<compile_context>
chip_gen: v7x
topology: tpu7x:2x2x1
jax: 0.10.0
libtpu: 0.0.40
codegen_flags: <defaults>
</compile_context>

<pallas_src>
import numpy as np
import jax
import jax.numpy as jnp
from jax.experimental import pallas as pl
from jax.experimental.pallas import tpu as pltpu

# ----------------------------- static config ------------------------------- #
B = 2           # batch size
M = 8           # encoder(m=...)
CH = 8          # encoder(ch=...)  -> conv3 out channels = 2*ch
H0 = W0 = 32    # input spatial size; input is NCHW (B, 3, 32, 32)


def _conv_out(n, k, s):
    return (n - k) // s + 1


H1, W1 = _conv_out(H0, 5, 2), _conv_out(W0, 5, 2)   # 14 x 14
H2, W2 = _conv_out(H1, 3, 2), _conv_out(W1, 3, 2)   # 6 x 6
H3, W3 = _conv_out(H2, 3, 1), _conv_out(W2, 3, 1)   # 4 x 4

LAYERS = (
    dict(cin=3, cout=M,      k=5, s=2, hin=H0, win=W0, hout=H1, wout=W1),
    dict(cin=M, cout=M,      k=3, s=2, hin=H1, win=W1, hout=H2, wout=W2),
    dict(cin=M, cout=2 * CH, k=3, s=1, hin=H2, win=W2, hout=H3, wout=W3),
)


# ----------------------------- fused kernel -------------------------------- #

def encoder_kernel(x_ref,
                   w1, b1, g1, be1, G1,
                   w2, b2, g2, be2, G2,
                   w3, b3, g3, be3, G3,
                   o_ref, s0, s1, s2):
    ws = (w1, w2, w3)
    bs = (b1, b2, b3)
    gs = (g1, g2, g3)
    bes = (be1, be2, be3)
    Gs = (G1, G2, G3)
    srcs = (s0, s1, s2)
    dsts = (s1, s2, o_ref)

    # Stage the input into the zero-padded scratch (in-kernel padding).
    n0 = B * LAYERS[0]['hin'] * LAYERS[0]['win']
    s0[:, n0:] = jnp.zeros((s0.shape[0], s0.shape[1] - n0), jnp.float32)
    s0[:LAYERS[0]['cin'], :n0] = x_ref[...]

    for i, l in enumerate(LAYERS):
        src, dst = srcs[i], dsts[i]
        cin, cout, k, win = l['cin'], l['cout'], l['k'], l['win']
        nin, nout = l['hin'] * l['win'], l['hout'] * l['wout']
        width = B * nin

        # ---- convolution: one (Cout,Cin)@(Cin, B*H*W) MXU dot per tap ------
        acc = jnp.zeros((cout, width), jnp.float32) + bs[i][...]
        for dy in range(k):
            for dx in range(k):
                shift = dy * win + dx
                acc = acc + jnp.dot(ws[i][dy * k + dx],
                                    src[:cin, shift:shift + width],
                                    preferred_element_type=jnp.float32)
        # Park acc in VMEM so the per-batch compaction can slice it as a ref.
        # (Tap-shifted garbage at block boundaries lands only on columns that
        #  the 0/1 selection matmul below never selects.)
        src[:cout, :width] = acc

        # ---- stride / valid-window compaction: 0/1 selection matmul --------
        G = Gs[i][...]
        for b in range(B):
            dst[:cout, b * nout:(b + 1) * nout] = jnp.dot(
                src[:cout, b * nin:(b + 1) * nin], G,
                preferred_element_type=jnp.float32)
        wt = B * nout
        if dst.shape[1] > wt:   # zero the tap-shift padding of the next stage
            dst[:, wt:] = jnp.zeros((dst.shape[0], dst.shape[1] - wt),
                                    jnp.float32)

        # ---- BatchNorm2d (training-mode batch statistics) ------------------
        y = dst[:cout, :wt]
        mu = jnp.mean(y, axis=1, keepdims=True)
        var = jnp.mean((y - mu) ** 2, axis=1, keepdims=True)
        y = (y - mu) * jax.lax.rsqrt(var + 1e-5) * gs[i][...] + bes[i][...]

        if i < len(LAYERS) - 1:
            # ELU(alpha=1)
            y = jnp.where(y > 0, y, jnp.exp(jnp.minimum(y, 0.0)) - 1.0)
        else:
            # encoder.normalize: y = s / sqrt(sum(s**2) / batch)
            ssq = jnp.sum(jnp.sum(y * y, axis=1, keepdims=True),
                          axis=0, keepdims=True)
            y = y * jax.lax.rsqrt(ssq / float(B))
        dst[:cout, :wt] = y


# ----------------------------- host-side wrappers --------------------------- #

def _selection_matrix(l):
    """0/1 matrix compacting the strided valid conv outputs of one image."""
    q = np.arange(l['hout'] * l['wout'])
    p = l['s'] * (q // l['wout']) * l['win'] + l['s'] * (q % l['wout'])
    G = np.zeros((l['hin'] * l['win'], l['hout'] * l['wout']), np.float32)
    G[p, q] = 1.0
    return jnp.asarray(G)


def _prepare_kernel_consts(params):
    consts = []
    for i, l in enumerate(LAYERS):
        w = params[f'conv{i}_w']                              # (Cout,Cin,K,K)
        wk = jnp.transpose(w, (2, 3, 0, 1)).reshape(
            l['k'] * l['k'], l['cout'], l['cin'])             # tap-major
        consts += [wk,
                   params[f'conv{i}_b'].reshape(l['cout'], 1),
                   params[f'bn{i}_gamma'].reshape(l['cout'], 1),
                   params[f'bn{i}_beta'].reshape(l['cout'], 1),
                   _selection_matrix(l)]
    return consts


def encoder_forward(x, params):
    """x: (B, 3, H0, W0) float32 NCHW.  Returns (B, 2, CH*H3*W3)."""
    consts = _prepare_kernel_consts(params)
    x_flat = jnp.transpose(x, (1, 0, 2, 3)).reshape(3, B * H0 * W0)

    vmem = pl.BlockSpec(memory_space=pltpu.MemorySpace.VMEM)
    scratch = [
        pltpu.VMEM((max(l['cin'], l['cout']),
                    B * l['hin'] * l['win'] + (l['k'] - 1) * (l['win'] + 1)),
                   jnp.float32)
        for l in LAYERS
    ]
    # Single grid-less invocation: everything fits one TensorCore at B=2.
    # TODO(synk): for large batches add a grid over batch tiles with
    # dimension_semantics=("parallel",) so v7x's second TensorCore is used.
    o = pl.pallas_call(
        encoder_kernel,
        out_shape=jax.ShapeDtypeStruct((2 * CH, B * H3 * W3), jnp.float32),
        in_specs=[vmem] * (1 + len(consts)),
        out_specs=vmem,
        scratch_shapes=scratch,
    )(x_flat, *consts)

    # kernel layout is (channel, batch*spatial); map back to torch's
    # reshape((B, 2, -1)) of the NCHW conv-stack output (already normalized).
    s = jnp.transpose(o.reshape(2 * CH, B, H3 * W3), (1, 0, 2)).reshape(B, 2, -1)
    return s


# ----------------------------- params & reference --------------------------- #

def init_params(key):
    keys = jax.random.split(key, 2 * len(LAYERS))

    def uinit(k, fan_in, shape):
        bound = float(fan_in) ** -0.5
        return jax.random.uniform(k, shape, jnp.float32, -bound, bound)

    params = {}
    for i, l in enumerate(LAYERS):
        fan_in = l['cin'] * l['k'] * l['k']
        params[f'conv{i}_w'] = uinit(keys[2 * i], fan_in,
                                     (l['cout'], l['cin'], l['k'], l['k']))
        params[f'conv{i}_b'] = uinit(keys[2 * i + 1], fan_in, (l['cout'],))
        params[f'bn{i}_gamma'] = jnp.ones((l['cout'],), jnp.float32)
        params[f'bn{i}_beta'] = jnp.zeros((l['cout'],), jnp.float32)
    return params


def encoder_reference(x, params):
    """Pure-JAX reference (PyTorch module semantics, train-mode BatchNorm)."""
    def conv(t, w, b, s):
        y = jax.lax.conv_general_dilated(
            t, w, window_strides=(s, s), padding='VALID',
            dimension_numbers=('NCHW', 'OIHW', 'NCHW'),
            precision=jax.lax.Precision.HIGHEST)
        return y + b.reshape(1, -1, 1, 1)

    def bn(t, g, be):
        mu = jnp.mean(t, axis=(0, 2, 3), keepdims=True)
        var = jnp.mean((t - mu) ** 2, axis=(0, 2, 3), keepdims=True)
        return ((t - mu) * jax.lax.rsqrt(var + 1e-5) * g.reshape(1, -1, 1, 1)
                + be.reshape(1, -1, 1, 1))

    def elu(t):
        return jnp.where(t > 0, t, jnp.exp(jnp.minimum(t, 0.0)) - 1.0)

    s = x
    for i, l in enumerate(LAYERS):
        s = bn(conv(s, params[f'conv{i}_w'], params[f'conv{i}_b'], l['s']),
               params[f'bn{i}_gamma'], params[f'bn{i}_beta'])
        if i < len(LAYERS) - 1:
            s = elu(s)
    s = s.reshape(x.shape[0], 2, -1)
    return s / jnp.sqrt(jnp.sum(s * s) / x.shape[0])


# ----------------------------- main ----------------------------------------- #

if __name__ == "__main__":
    key = jax.random.PRNGKey(0)
    kx, kp = jax.random.split(key)

    x = jax.random.normal(kx, (B, 3, H0, W0), jnp.float32)
    params = init_params(kp)

    fwd = jax.jit(lambda inp: encoder_forward(inp, params))
    out = fwd(x)
    jax.block_until_ready(out)

    assert out.shape == (B, 2, CH * H3 * W3), out.shape
    assert out.dtype == jnp.float32

    ref = encoder_reference(x, params)
    err = float(jnp.max(jnp.abs(out - ref)))
    assert err < 3e-2, f"mismatch vs pure-JAX reference: {err}"

    print("KERNEL_OK")
</pallas_src>

<mosaic_0001>
module attributes {stable_mosaic.version = 11 : i64} {
  func.func @encoder_kernel(%arg0: memref<3x2048xf32, #tpu.memory_space<vmem>>, %arg1: memref<25x8x3xf32, #tpu.memory_space<vmem>>, %arg2: memref<8x1xf32, #tpu.memory_space<vmem>>, %arg3: memref<8x1xf32, #tpu.memory_space<vmem>>, %arg4: memref<8x1xf32, #tpu.memory_space<vmem>>, %arg5: memref<1024x196xf32, #tpu.memory_space<vmem>>, %arg6: memref<9x8x8xf32, #tpu.memory_space<vmem>>, %arg7: memref<8x1xf32, #tpu.memory_space<vmem>>, %arg8: memref<8x1xf32, #tpu.memory_space<vmem>>, %arg9: memref<8x1xf32, #tpu.memory_space<vmem>>, %arg10: memref<196x36xf32, #tpu.memory_space<vmem>>, %arg11: memref<9x16x8xf32, #tpu.memory_space<vmem>>, %arg12: memref<16x1xf32, #tpu.memory_space<vmem>>, %arg13: memref<16x1xf32, #tpu.memory_space<vmem>>, %arg14: memref<16x1xf32, #tpu.memory_space<vmem>>, %arg15: memref<36x16xf32, #tpu.memory_space<vmem>>, %arg16: memref<16x32xf32, #tpu.memory_space<vmem>>, %arg17: memref<8x2180xf32, #tpu.memory_space<vmem>>, %arg18: memref<8x422xf32, #tpu.memory_space<vmem>>, %arg19: memref<16x86xf32, #tpu.memory_space<vmem>>) attributes {dimension_semantics = [], scalar_prefetch = 0 : i64, scratch_operands = 3 : i64, tpu.core_type = #tpu.core_type<tc>} {
    %cst = arith.constant 0.000000e+00 : f32
    %0 = vector.broadcast %cst : f32 to vector<8x132xf32>
    %c0 = arith.constant 0 : index
    %c2048 = arith.constant 2048 : index
    %1 = vector.load %arg17[%c0, %c2048] : memref<8x2180xf32, #tpu.memory_space<vmem>>, vector<8x132xf32>
    tpu.vector_store %arg17[%c0, %c2048], %0 {strides = array<i32>} : memref<8x2180xf32, #tpu.memory_space<vmem>>, vector<8x132xf32>,
    %c0_0 = arith.constant 0 : index
    %c0_1 = arith.constant 0 : index
    %2 = vector.load %arg0[%c0_0, %c0_1] : memref<3x2048xf32, #tpu.memory_space<vmem>>, vector<3x2048xf32>
    %c0_2 = arith.constant 0 : index
    %c0_3 = arith.constant 0 : index
    %3 = vector.load %arg17[%c0_2, %c0_3] : memref<8x2180xf32, #tpu.memory_space<vmem>>, vector<3x2048xf32>
    tpu.vector_store %arg17[%c0_2, %c0_3], %2 {strides = array<i32>} : memref<8x2180xf32, #tpu.memory_space<vmem>>, vector<3x2048xf32>,
    %cst_4 = arith.constant 0.000000e+00 : f32
    %4 = vector.broadcast %cst_4 : f32 to vector<8x2048xf32>
    %c0_5 = arith.constant 0 : index
    %c0_6 = arith.constant 0 : index
    %5 = vector.load %arg2[%c0_5, %c0_6] : memref<8x1xf32, #tpu.memory_space<vmem>>, vector<8x1xf32>
    %6 = vector.broadcast %5 : vector<8x1xf32> to vector<8x2048xf32>
    %7 = arith.addf %4, %6 : vector<8x2048xf32>
    %c0_7 = arith.constant 0 : index
    %c0_8 = arith.constant 0 : index
    %c0_9 = arith.constant 0 : index
    %8 = vector.load %arg1[%c0_7, %c0_8, %c0_9] : memref<25x8x3xf32, #tpu.memory_space<vmem>>, vector<1x8x3xf32>
    %9 = vector.shape_cast %8 : vector<1x8x3xf32> to vector<8x3xf32>
    %c0_10 = arith.constant 0 : index
    %c0_11 = arith.constant 0 : index
    %10 = vector.load %arg17[%c0_10, %c0_11] : memref<8x2180xf32, #tpu.memory_space<vmem>>, vector<3x2048xf32>
    %cst_12 = arith.constant dense<0.000000e+00> : vector<8x2048xf32>
    %11 = tpu.matmul %9, %10, %cst_12 {dimension_numbers = #tpu.dot_dimension_numbers<[1], [0], [0], [1], [0, 0, 1, 1], [], []>} : vector<8x3xf32>, vector<3x2048xf32>, vector<8x2048xf32> -> vector<8x2048xf32>
    %12 = arith.addf %7, %11 : vector<8x2048xf32>
    %c1 = arith.constant 1 : index
    %c0_13 = arith.constant 0 : index
    %c0_14 = arith.constant 0 : index
    %13 = vector.load %arg1[%c1, %c0_13, %c0_14] : memref<25x8x3xf32, #tpu.memory_space<vmem>>, vector<1x8x3xf32>
    %14 = vector.shape_cast %13 : vector<1x8x3xf32> to vector<8x3xf32>
    %c0_15 = arith.constant 0 : index
    %c1_16 = arith.constant 1 : index
    %15 = vector.load %arg17[%c0_15, %c1_16] : memref<8x2180xf32, #tpu.memory_space<vmem>>, vector<3x2048xf32>
    %cst_17 = arith.constant dense<0.000000e+00> : vector<8x2048xf32>
    %16 = tpu.matmul %14, %15, %cst_17 {dimension_numbers = #tpu.dot_dimension_numbers<[1], [0], [0], [1], [0, 0, 1, 1], [], []>} : vector<8x3xf32>, vector<3x2048xf32>, vector<8x2048xf32> -> vector<8x2048xf32>
    %17 = arith.addf %12, %16 : vector<8x2048xf32>
    %c2 = arith.constant 2 : index
    %c0_18 = arith.constant 0 : index
    %c0_19 = arith.constant 0 : index
    %18 = vector.load %arg1[%c2, %c0_18, %c0_19] : memref<25x8x3xf32, #tpu.memory_space<vmem>>, vector<1x8x3xf32>
    %19 = vector.shape_cast %18 : vector<1x8x3xf32> to vector<8x3xf32>
    %c0_20 = arith.constant 0 : index
    %c2_21 = arith.constant 2 : index
    %20 = vector.load %arg17[%c0_20, %c2_21] : memref<8x2180xf32, #tpu.memory_space<vmem>>, vector<3x2048xf32>
    %cst_22 = arith.constant dense<0.000000e+00> : vector<8x2048xf32>
    %21 = tpu.matmul %19, %20, %cst_22 {dimension_numbers = #tpu.dot_dimension_numbers<[1], [0], [0], [1], [0, 0, 1, 1], [], []>} : vector<8x3xf32>, vector<3x2048xf32>, vector<8x2048xf32> -> vector<8x2048xf32>
    %22 = arith.addf %17, %21 : vector<8x2048xf32>
    %c3 = arith.constant 3 : index
    %c0_23 = arith.constant 0 : index
    %c0_24 = arith.constant 0 : index
    %23 = vector.load %arg1[%c3, %c0_23, %c0_24] : memref<25x8x3xf32, #tpu.memory_space<vmem>>, vector<1x8x3xf32>
    %24 = vector.shape_cast %23 : vector<1x8x3xf32> to vector<8x3xf32>
    %c0_25 = arith.constant 0 : index
    %c3_26 = arith.constant 3 : index
    %25 = vector.load %arg17[%c0_25, %c3_26] : memref<8x2180xf32, #tpu.memory_space<vmem>>, vector<3x2048xf32>
    %cst_27 = arith.constant dense<0.000000e+00> : vector<8x2048xf32>
    %26 = tpu.matmul %24, %25, %cst_27 {dimension_numbers = #tpu.dot_dimension_numbers<[1], [0], [0], [1], [0, 0, 1, 1], [], []>} : vector<8x3xf32>, vector<3x2048xf32>, vector<8x2048xf32> -> vector<8x2048xf32>
    %27 = arith.addf %22, %26 : vector<8x2048xf32>
    %c4 = arith.constant 4 : index
    %c0_28 = arith.constant 0 : index
    %c0_29 = arith.constant 0 : index
    %28 = vector.load %arg1[%c4, %c0_28, %c0_29] : memref<25x8x3xf32, #tpu.memory_space<vmem>>, vector<1x8x3xf32>
    %29 = vector.shape_cast %28 : vector<1x8x3xf32> to vector<8x3xf32>
    %c0_30 = arith.constant 0 : index
    %c4_31 = arith.constant 4 : index
    %30 = vector.load %arg17[%c0_30, %c4_31] : memref<8x2180xf32, #tpu.memory_space<vmem>>, vector<3x2048xf32>
    %cst_32 = arith.constant dense<0.000000e+00> : vector<8x2048xf32>
    %31 = tpu.matmul %29, %30, %cst_32 {dimension_numbers = #tpu.dot_dimension_numbers<[1], [0], [0], [1], [0, 0, 1, 1], [], []>} : vector<8x3xf32>, vector<3x2048xf32>, vector<8x2048xf32> -> vector<8x2048xf32>
    %32 = arith.addf %27, %31 : vector<8x2048xf32>
    %c5 = arith.constant 5 : index
    %c0_33 = arith.constant 0 : index
    %c0_34 = arith.constant 0 : index
    %33 = vector.load %arg1[%c5, %c0_33, %c0_34] : memref<25x8x3xf32, #tpu.memory_space<vmem>>, vector<1x8x3xf32>
    %34 = vector.shape_cast %33 : vector<1x8x3xf32> to vector<8x3xf32>
    %c0_35 = arith.constant 0 : index
    %c32 = arith.constant 32 : index
    %35 = vector.load %arg17[%c0_35, %c32] : memref<8x2180xf32, #tpu.memory_space<vmem>>, vector<3x2048xf32>
    %cst_36 = arith.constant dense<0.000000e+00> : vector<8x2048xf32>
    %36 = tpu.matmul %34, %35, %cst_36 {dimension_numbers = #tpu.dot_dimension_numbers<[1], [0], [0], [1], [0, 0, 1, 1], [], []>} : vector<8x3xf32>, vector<3x2048xf32>, vector<8x2048xf32> -> vector<8x2048xf32>
    %37 = arith.addf %32, %36 : vector<8x2048xf32>
    %c6 = arith.constant 6 : index
    %c0_37 = arith.constant 0 : index
    %c0_38 = arith.constant 0 : index
    %38 = vector.load %arg1[%c6, %c0_37, %c0_38] : memref<25x8x3xf32, #tpu.memory_space<vmem>>, vector<1x8x3xf32>
    %39 = vector.shape_cast %38 : vector<1x8x3xf32> to vector<8x3xf32>
    %c0_39 = arith.constant 0 : index
    %c33 = arith.constant 33 : index
    %40 = vector.load %arg17[%c0_39, %c33] : memref<8x2180xf32, #tpu.memory_space<vmem>>, vector<3x2048xf32>
    %cst_40 = arith.constant dense<0.000000e+00> : vector<8x2048xf32>
    %41 = tpu.matmul %39, %40, %cst_40 {dimension_numbers = #tpu.dot_dimension_numbers<[1], [0], [0], [1], [0, 0, 1, 1], [], []>} : vector<8x3xf32>, vector<3x2048xf32>, vector<8x2048xf32> -> vector<8x2048xf32>
    %42 = arith.addf %37, %41 : vector<8x2048xf32>
    %c7 = arith.constant 7 : index
    %c0_41 = arith.constant 0 : index
    %c0_42 = arith.constant 0 : index
    %43 = vector.load %arg1[%c7, %c0_41, %c0_42] : memref<25x8x3xf32, #tpu.memory_space<vmem>>, vector<1x8x3xf32>
    %44 = vector.shape_cast %43 : vector<1x8x3xf32> to vector<8x3xf32>
    %c0_43 = arith.constant 0 : index
    %c34 = arith.constant 34 : index
    %45 = vector.load %arg17[%c0_43, %c34] : memref<8x2180xf32, #tpu.memory_space<vmem>>, vector<3x2048xf32>
    %cst_44 = arith.constant dense<0.000000e+00> : vector<8x2048xf32>
    %46 = tpu.matmul %44, %45, %cst_44 {dimension_numbers = #tpu.dot_dimension_numbers<[1], [0], [0], [1], [0, 0, 1, 1], [], []>} : vector<8x3xf32>, vector<3x2048xf32>, vector<8x2048xf32> -> vector<8x2048xf32>
    %47 = arith.addf %42, %46 : vector<8x2048xf32>
    %c8 = arith.constant 8 : index
    %c0_45 = arith.constant 0 : index
    %c0_46 = arith.constant 0 : index
    %48 = vector.load %arg1[%c8, %c0_45, %c0_46] : memref<25x8x3xf32, #tpu.memory_space<vmem>>, vector<1x8x3xf32>
    %49 = vector.shape_cast %48 : vector<1x8x3xf32> to vector<8x3xf32>
    %c0_47 = arith.constant 0 : index
    %c35 = arith.constant 35 : index
    %50 = vector.load %arg17[%c0_47, %c35] : memref<8x2180xf32, #tpu.memory_space<vmem>>, vector<3x2048xf32>
    %cst_48 = arith.constant dense<0.000000e+00> : vector<8x2048xf32>
    %51 = tpu.matmul %49, %50, %cst_48 {dimension_numbers = #tpu.dot_dimension_numbers<[1], [0], [0], [1], [0, 0, 1, 1], [], []>} : vector<8x3xf32>, vector<3x2048xf32>, vector<8x2048xf32> -> vector<8x2048xf32>
    %52 = arith.addf %47, %51 : vector<8x2048xf32>
    %c9 = arith.constant 9 : index
    %c0_49 = arith.constant 0 : index
    %c0_50 = arith.constant 0 : index
    %53 = vector.load %arg1[%c9, %c0_49, %c0_50] : memref<25x8x3xf32, #tpu.memory_space<vmem>>, vector<1x8x3xf32>
    %54 = vector.shape_cast %53 : vector<1x8x3xf32> to vector<8x3xf32>
    %c0_51 = arith.constant 0 : index
    %c36 = arith.constant 36 : index
    %55 = vector.load %arg17[%c0_51, %c36] : memref<8x2180xf32, #tpu.memory_space<vmem>>, vector<3x2048xf32>
    %cst_52 = arith.constant dense<0.000000e+00> : vector<8x2048xf32>
    %56 = tpu.matmul %54, %55, %cst_52 {dimension_numbers = #tpu.dot_dimension_numbers<[1], [0], [0], [1], [0, 0, 1, 1], [], []>} : vector<8x3xf32>, vector<3x2048xf32>, vector<8x2048xf32> -> vector<8x2048xf32>
    %57 = arith.addf %52, %56 : vector<8x2048xf32>
    %c10 = arith.constant 10 : index
    %c0_53 = arith.constant 0 : index
    %c0_54 = arith.constant 0 : index
    %58 = vector.load %arg1[%c10, %c0_53, %c0_54] : memref<25x8x3xf32, #tpu.memory_space<vmem>>, vector<1x8x3xf32>
    %59 = vector.shape_cast %58 : vector<1x8x3xf32> to vector<8x3xf32>
    %c0_55 = arith.constant 0 : index
    %c64 = arith.constant 64 : index
    %60 = vector.load %arg17[%c0_55, %c64] : memref<8x2180xf32, #tpu.memory_space<vmem>>, vector<3x2048xf32>
    %cst_56 = arith.constant dense<0.000000e+00> : vector<8x2048xf32>
    %61 = tpu.matmul %59, %60, %cst_56 {dimension_numbers = #tpu.dot_dimension_numbers<[1], [0], [0], [1], [0, 0, 1, 1], [], []>} : vector<8x3xf32>, vector<3x2048xf32>, vector<8x2048xf32> -> vector<8x2048xf32>
    %62 = arith.addf %57, %61 : vector<8x2048xf32>
    %c11 = arith.constant 11 : index
    %c0_57 = arith.constant 0 : index
    %c0_58 = arith.constant 0 : index
    %63 = vector.load %arg1[%c11, %c0_57, %c0_58] : memref<25x8x3xf32, #tpu.memory_space<vmem>>, vector<1x8x3xf32>
    %64 = vector.shape_cast %63 : vector<1x8x3xf32> to vector<8x3xf32>
    %c0_59 = arith.constant 0 : index
    %c65 = arith.constant 65 : index
    %65 = vector.load %arg17[%c0_59, %c65] : memref<8x2180xf32, #tpu.memory_space<vmem>>, vector<3x2048xf32>
    %cst_60 = arith.constant dense<0.000000e+00> : vector<8x2048xf32>
    %66 = tpu.matmul %64, %65, %cst_60 {dimension_numbers = #tpu.dot_dimension_numbers<[1], [0], [0], [1], [0, 0, 1, 1], [], []>} : vector<8x3xf32>, vector<3x2048xf32>, vector<8x2048xf32> -> vector<8x2048xf32>
    %67 = arith.addf %62, %66 : vector<8x2048xf32>
    %c12 = arith.constant 12 : index
    %c0_61 = arith.constant 0 : index
    %c0_62 = arith.constant 0 : index
    %68 = vector.load %arg1[%c12, %c0_61, %c0_62] : memref<25x8x3xf32, #tpu.memory_space<vmem>>, vector<1x8x3xf32>
    %69 = vector.shape_cast %68 : vector<1x8x3xf32> to vector<8x3xf32>
    %c0_63 = arith.constant 0 : index
    %c66 = arith.constant 66 : index
    %70 = vector.load %arg17[%c0_63, %c66] : memref<8x2180xf32, #tpu.memory_space<vmem>>, vector<3x2048xf32>
    %cst_64 = arith.constant dense<0.000000e+00> : vector<8x2048xf32>
    %71 = tpu.matmul %69, %70, %cst_64 {dimension_numbers = #tpu.dot_dimension_numbers<[1], [0], [0], [1], [0, 0, 1, 1], [], []>} : vector<8x3xf32>, vector<3x2048xf32>, vector<8x2048xf32> -> vector<8x2048xf32>
    %72 = arith.addf %67, %71 : vector<8x2048xf32>
    %c13 = arith.constant 13 : index
    %c0_65 = arith.constant 0 : index
    %c0_66 = arith.constant 0 : index
    %73 = vector.load %arg1[%c13, %c0_65, %c0_66] : memref<25x8x3xf32, #tpu.memory_space<vmem>>, vector<1x8x3xf32>
    %74 = vector.shape_cast %73 : vector<1x8x3xf32> to vector<8x3xf32>
    %c0_67 = arith.constant 0 : index
    %c67 = arith.constant 67 : index
    %75 = vector.load %arg17[%c0_67, %c67] : memref<8x2180xf32, #tpu.memory_space<vmem>>, vector<3x2048xf32>
    %cst_68 = arith.constant dense<0.000000e+00> : vector<8x2048xf32>
    %76 = tpu.matmul %74, %75, %cst_68 {dimension_numbers = #tpu.dot_dimension_numbers<[1], [0], [0], [1], [0, 0, 1, 1], [], []>} : vector<8x3xf32>, vector<3x2048xf32>, vector<8x2048xf32> -> vector<8x2048xf32>
    %77 = arith.addf %72, %76 : vector<8x2048xf32>
    %c14 = arith.constant 14 : index
    %c0_69 = arith.constant 0 : index
    %c0_70 = arith.constant 0 : index
    %78 = vector.load %arg1[%c14, %c0_69, %c0_70] : memref<25x8x3xf32, #tpu.memory_space<vmem>>, vector<1x8x3xf32>
    %79 = vector.shape_cast %78 : vector<1x8x3xf32> to vector<8x3xf32>
    %c0_71 = arith.constant 0 : index
    %c68 = arith.constant 68 : index
    %80 = vector.load %arg17[%c0_71, %c68] : memref<8x2180xf32, #tpu.memory_space<vmem>>, vector<3x2048xf32>
    %cst_72 = arith.constant dense<0.000000e+00> : vector<8x2048xf32>
    %81 = tpu.matmul %79, %80, %cst_72 {dimension_numbers = #tpu.dot_dimension_numbers<[1], [0], [0], [1], [0, 0, 1, 1], [], []>} : vector<8x3xf32>, vector<3x2048xf32>, vector<8x2048xf32> -> vector<8x2048xf32>
    %82 = arith.addf %77, %81 : vector<8x2048xf32>
    %c15 = arith.constant 15 : index
    %c0_73 = arith.constant 0 : index
    %c0_74 = arith.constant 0 : index
    %83 = vector.load %arg1[%c15, %c0_73, %c0_74] : memref<25x8x3xf32, #tpu.memory_space<vmem>>, vector<1x8x3xf32>
    %84 = vector.shape_cast %83 : vector<1x8x3xf32> to vector<8x3xf32>
    %c0_75 = arith.constant 0 : index
    %c96 = arith.constant 96 : index
    %85 = vector.load %arg17[%c0_75, %c96] : memref<8x2180xf32, #tpu.memory_space<vmem>>, vector<3x2048xf32>
    %cst_76 = arith.constant dense<0.000000e+00> : vector<8x2048xf32>
    %86 = tpu.matmul %84, %85, %cst_76 {dimension_numbers = #tpu.dot_dimension_numbers<[1], [0], [0], [1], [0, 0, 1, 1], [], []>} : vector<8x3xf32>, vector<3x2048xf32>, vector<8x2048xf32> -> vector<8x2048xf32>
    %87 = arith.addf %82, %86 : vector<8x2048xf32>
    %c16 = arith.constant 16 : index
    %c0_77 = arith.constant 0 : index
    %c0_78 = arith.constant 0 : index
    %88 = vector.load %arg1[%c16, %c0_77, %c0_78] : memref<25x8x3xf32, #tpu.memory_space<vmem>>, vector<1x8x3xf32>
    %89 = vector.shape_cast %88 : vector<1x8x3xf32> to vector<8x3xf32>
    %c0_79 = arith.constant 0 : index
    %c97 = arith.constant 97 : index
    %90 = vector.load %arg17[%c0_79, %c97] : memref<8x2180xf32, #tpu.memory_space<vmem>>, vector<3x2048xf32>
    %cst_80 = arith.constant dense<0.000000e+00> : vector<8x2048xf32>
    %91 = tpu.matmul %89, %90, %cst_80 {dimension_numbers = #tpu.dot_dimension_numbers<[1], [0], [0], [1], [0, 0, 1, 1], [], []>} : vector<8x3xf32>, vector<3x2048xf32>, vector<8x2048xf32> -> vector<8x2048xf32>
    %92 = arith.addf %87, %91 : vector<8x2048xf32>
    %c17 = arith.constant 17 : index
    %c0_81 = arith.constant 0 : index
    %c0_82 = arith.constant 0 : index
    %93 = vector.load %arg1[%c17, %c0_81, %c0_82] : memref<25x8x3xf32, #tpu.memory_space<vmem>>, vector<1x8x3xf32>
    %94 = vector.shape_cast %93 : vector<1x8x3xf32> to vector<8x3xf32>
    %c0_83 = arith.constant 0 : index
    %c98 = arith.constant 98 : index
    %95 = vector.load %arg17[%c0_83, %c98] : memref<8x2180xf32, #tpu.memory_space<vmem>>, vector<3x2048xf32>
    %cst_84 = arith.constant dense<0.000000e+00> : vector<8x2048xf32>
    %96 = tpu.matmul %94, %95, %cst_84 {dimension_numbers = #tpu.dot_dimension_numbers<[1], [0], [0], [1], [0, 0, 1, 1], [], []>} : vector<8x3xf32>, vector<3x2048xf32>, vector<8x2048xf32> -> vector<8x2048xf32>
    %97 = arith.addf %92, %96 : vector<8x2048xf32>
    %c18 = arith.constant 18 : index
    %c0_85 = arith.constant 0 : index
    %c0_86 = arith.constant 0 : index
    %98 = vector.load %arg1[%c18, %c0_85, %c0_86] : memref<25x8x3xf32, #tpu.memory_space<vmem>>, vector<1x8x3xf32>
    %99 = vector.shape_cast %98 : vector<1x8x3xf32> to vector<8x3xf32>
    %c0_87 = arith.constant 0 : index
    %c99 = arith.constant 99 : index
    %100 = vector.load %arg17[%c0_87, %c99] : memref<8x2180xf32, #tpu.memory_space<vmem>>, vector<3x2048xf32>
    %cst_88 = arith.constant dense<0.000000e+00> : vector<8x2048xf32>
    %101 = tpu.matmul %99, %100, %cst_88 {dimension_numbers = #tpu.dot_dimension_numbers<[1], [0], [0], [1], [0, 0, 1, 1], [], []>} : vector<8x3xf32>, vector<3x2048xf32>, vector<8x2048xf32> -> vector<8x2048xf32>
    %102 = arith.addf %97, %101 : vector<8x2048xf32>
    %c19 = arith.constant 19 : index
    %c0_89 = arith.constant 0 : index
    %c0_90 = arith.constant 0 : index
    %103 = vector.load %arg1[%c19, %c0_89, %c0_90] : memref<25x8x3xf32, #tpu.memory_space<vmem>>, vector<1x8x3xf32>
    %104 = vector.shape_cast %103 : vector<1x8x3xf32> to vector<8x3xf32>
    %c0_91 = arith.constant 0 : index
    %c100 = arith.constant 100 : index
    %105 = vector.load %arg17[%c0_91, %c100] : memref<8x2180xf32, #tpu.memory_space<vmem>>, vector<3x2048xf32>
    %cst_92 = arith.constant dense<0.000000e+00> : vector<8x2048xf32>
    %106 = tpu.matmul %104, %105, %cst_92 {dimension_numbers = #tpu.dot_dimension_numbers<[1], [0], [0], [1], [0, 0, 1, 1], [], []>} : vector<8x3xf32>, vector<3x2048xf32>, vector<8x2048xf32> -> vector<8x2048xf32>
    %107 = arith.addf %102, %106 : vector<8x2048xf32>
    %c20 = arith.constant 20 : index
    %c0_93 = arith.constant 0 : index
    %c0_94 = arith.constant 0 : index
    %108 = vector.load %arg1[%c20, %c0_93, %c0_94] : memref<25x8x3xf32, #tpu.memory_space<vmem>>, vector<1x8x3xf32>
    %109 = vector.shape_cast %108 : vector<1x8x3xf32> to vector<8x3xf32>
    %c0_95 = arith.constant 0 : index
    %c128 = arith.constant 128 : index
    %110 = vector.load %arg17[%c0_95, %c128] : memref<8x2180xf32, #tpu.memory_space<vmem>>, vector<3x2048xf32>
    %cst_96 = arith.constant dense<0.000000e+00> : vector<8x2048xf32>
    %111 = tpu.matmul %109, %110, %cst_96 {dimension_numbers = #tpu.dot_dimension_numbers<[1], [0], [0], [1], [0, 0, 1, 1], [], []>} : vector<8x3xf32>, vector<3x2048xf32>, vector<8x2048xf32> -> vector<8x2048xf32>
    %112 = arith.addf %107, %111 : vector<8x2048xf32>
    %c21 = arith.constant 21 : index
    %c0_97 = arith.constant 0 : index
    %c0_98 = arith.constant 0 : index
    %113 = vector.load %arg1[%c21, %c0_97, %c0_98] : memref<25x8x3xf32, #tpu.memory_space<vmem>>, vector<1x8x3xf32>
    %114 = vector.shape_cast %113 : vector<1x8x3xf32> to vector<8x3xf32>
    %c0_99 = arith.constant 0 : index
    %c129 = arith.constant 129 : index
    %115 = vector.load %arg17[%c0_99, %c129] : memref<8x2180xf32, #tpu.memory_space<vmem>>, vector<3x2048xf32>
    %cst_100 = arith.constant dense<0.000000e+00> : vector<8x2048xf32>
    %116 = tpu.matmul %114, %115, %cst_100 {dimension_numbers = #tpu.dot_dimension_numbers<[1], [0], [0], [1], [0, 0, 1, 1], [], []>} : vector<8x3xf32>, vector<3x2048xf32>, vector<8x2048xf32> -> vector<8x2048xf32>
    %117 = arith.addf %112, %116 : vector<8x2048xf32>
    %c22 = arith.constant 22 : index
    %c0_101 = arith.constant 0 : index
    %c0_102 = arith.constant 0 : index
    %118 = vector.load %arg1[%c22, %c0_101, %c0_102] : memref<25x8x3xf32, #tpu.memory_space<vmem>>, vector<1x8x3xf32>
    %119 = vector.shape_cast %118 : vector<1x8x3xf32> to vector<8x3xf32>
    %c0_103 = arith.constant 0 : index
    %c130 = arith.constant 130 : index
    %120 = vector.load %arg17[%c0_103, %c130] : memref<8x2180xf32, #tpu.memory_space<vmem>>, vector<3x2048xf32>
    %cst_104 = arith.constant dense<0.000000e+00> : vector<8x2048xf32>
    %121 = tpu.matmul %119, %120, %cst_104 {dimension_numbers = #tpu.dot_dimension_numbers<[1], [0], [0], [1], [0, 0, 1, 1], [], []>} : vector<8x3xf32>, vector<3x2048xf32>, vector<8x2048xf32> -> vector<8x2048xf32>
    %122 = arith.addf %117, %121 : vector<8x2048xf32>
    %c23 = arith.constant 23 : index
    %c0_105 = arith.constant 0 : index
    %c0_106 = arith.constant 0 : index
    %123 = vector.load %arg1[%c23, %c0_105, %c0_106] : memref<25x8x3xf32, #tpu.memory_space<vmem>>, vector<1x8x3xf32>
    %124 = vector.shape_cast %123 : vector<1x8x3xf32> to vector<8x3xf32>
    %c0_107 = arith.constant 0 : index
    %c131 = arith.constant 131 : index
    %125 = vector.load %arg17[%c0_107, %c131] : memref<8x2180xf32, #tpu.memory_space<vmem>>, vector<3x2048xf32>
    %cst_108 = arith.constant dense<0.000000e+00> : vector<8x2048xf32>
    %126 = tpu.matmul %124, %125, %cst_108 {dimension_numbers = #tpu.dot_dimension_numbers<[1], [0], [0], [1], [0, 0, 1, 1], [], []>} : vector<8x3xf32>, vector<3x2048xf32>, vector<8x2048xf32> -> vector<8x2048xf32>
    %127 = arith.addf %122, %126 : vector<8x2048xf32>
    %c24 = arith.constant 24 : index
    %c0_109 = arith.constant 0 : index
    %c0_110 = arith.constant 0 : index
    %128 = vector.load %arg1[%c24, %c0_109, %c0_110] : memref<25x8x3xf32, #tpu.memory_space<vmem>>, vector<1x8x3xf32>
    %129 = vector.shape_cast %128 : vector<1x8x3xf32> to vector<8x3xf32>
    %c0_111 = arith.constant 0 : index
    %c132 = arith.constant 132 : index
    %130 = vector.load %arg17[%c0_111, %c132] : memref<8x2180xf32, #tpu.memory_space<vmem>>, vector<3x2048xf32>
    %cst_112 = arith.constant dense<0.000000e+00> : vector<8x2048xf32>
    %131 = tpu.matmul %129, %130, %cst_112 {dimension_numbers = #tpu.dot_dimension_numbers<[1], [0], [0], [1], [0, 0, 1, 1], [], []>} : vector<8x3xf32>, vector<3x2048xf32>, vector<8x2048xf32> -> vector<8x2048xf32>
    %132 = arith.addf %127, %131 : vector<8x2048xf32>
    %c0_113 = arith.constant 0 : index
    %c0_114 = arith.constant 0 : index
    %133 = vector.load %arg17[%c0_113, %c0_114] : memref<8x2180xf32, #tpu.memory_space<vmem>>, vector<8x2048xf32>
    tpu.vector_store %arg17[%c0_113, %c0_114], %132 {strides = array<i32>} : memref<8x2180xf32, #tpu.memory_space<vmem>>, vector<8x2048xf32>,
    %c0_115 = arith.constant 0 : index
    %c0_116 = arith.constant 0 : index
    %134 = vector.load %arg5[%c0_115, %c0_116] : memref<1024x196xf32, #tpu.memory_space<vmem>>, vector<1024x196xf32>
    %c0_117 = arith.constant 0 : index
    %c0_118 = arith.constant 0 : index
    %135 = vector.load %arg17[%c0_117, %c0_118] : memref<8x2180xf32, #tpu.memory_space<vmem>>, vector<8x1024xf32>
    %cst_119 = arith.constant dense<0.000000e+00> : vector<8x196xf32>
    %136 = tpu.matmul %135, %134, %cst_119 {dimension_numbers = #tpu.dot_dimension_numbers<[1], [0], [0], [1], [0, 0, 1, 1], [], []>} : vector<8x1024xf32>, vector<1024x196xf32>, vector<8x196xf32> -> vector<8x196xf32>
    %c0_120 = arith.constant 0 : index
    %c0_121 = arith.constant 0 : index
    %137 = vector.load %arg18[%c0_120, %c0_121] : memref<8x422xf32, #tpu.memory_space<vmem>>, vector<8x196xf32>
    tpu.vector_store %arg18[%c0_120, %c0_121], %136 {strides = array<i32>} : memref<8x422xf32, #tpu.memory_space<vmem>>, vector<8x196xf32>,
    %c0_122 = arith.constant 0 : index
    %c1024 = arith.constant 1024 : index
    %138 = vector.load %arg17[%c0_122, %c1024] : memref<8x2180xf32, #tpu.memory_space<vmem>>, vector<8x1024xf32>
    %cst_123 = arith.constant dense<0.000000e+00> : vector<8x196xf32>
    %139 = tpu.matmul %138, %134, %cst_123 {dimension_numbers = #tpu.dot_dimension_numbers<[1], [0], [0], [1], [0, 0, 1, 1], [], []>} : vector<8x1024xf32>, vector<1024x196xf32>, vector<8x196xf32> -> vector<8x196xf32>
    %c0_124 = arith.constant 0 : index
    %c196 = arith.constant 196 : index
    %140 = vector.load %arg18[%c0_124, %c196] : memref<8x422xf32, #tpu.memory_space<vmem>>, vector<8x196xf32>
    tpu.vector_store %arg18[%c0_124, %c196], %139 {strides = array<i32>} : memref<8x422xf32, #tpu.memory_space<vmem>>, vector<8x196xf32>,
    %cst_125 = arith.constant 0.000000e+00 : f32
    %141 = vector.broadcast %cst_125 : f32 to vector<8x30xf32>
    %c0_126 = arith.constant 0 : index
    %c392 = arith.constant 392 : index
    %142 = vector.load %arg18[%c0_126, %c392] : memref<8x422xf32, #tpu.memory_space<vmem>>, vector<8x30xf32>
    tpu.vector_store %arg18[%c0_126, %c392], %141 {strides = array<i32>} : memref<8x422xf32, #tpu.memory_space<vmem>>, vector<8x30xf32>,
    %c0_127 = arith.constant 0 : index
    %c0_128 = arith.constant 0 : index
    %143 = vector.load %arg18[%c0_127, %c0_128] : memref<8x422xf32, #tpu.memory_space<vmem>>, vector<8x392xf32>
    %cst_129 = arith.constant dense<0.000000e+00> : vector<8xf32>
    %144 = vector.multi_reduction <add>, %143, %cst_129 [1] : vector<8x392xf32> to vector<8xf32>
    %145 = vector.shape_cast %144 : vector<8xf32> to vector<8x1xf32>
    %cst_130 = arith.constant 3.920000e+02 : f32
    %146 = vector.broadcast %cst_130 : f32 to vector<8x1xf32>
    %147 = arith.divf %145, %146 : vector<8x1xf32>
    %148 = vector.broadcast %147 : vector<8x1xf32> to vector<8x392xf32>
    %149 = arith.subf %143, %148 : vector<8x392xf32>
    %150 = arith.mulf %149, %149 : vector<8x392xf32>
    %cst_131 = arith.constant dense<0.000000e+00> : vector<8xf32>
    %151 = vector.multi_reduction <add>, %150, %cst_131 [1] : vector<8x392xf32> to vector<8xf32>
    %152 = vector.shape_cast %151 : vector<8xf32> to vector<8x1xf32>
    %cst_132 = arith.constant 3.920000e+02 : f32
    %153 = vector.broadcast %cst_132 : f32 to vector<8x1xf32>
    %154 = arith.divf %152, %153 : vector<8x1xf32>
    %155 = vector.broadcast %147 : vector<8x1xf32> to vector<8x392xf32>
    %156 = arith.subf %143, %155 : vector<8x392xf32>
    %cst_133 = arith.constant 9.99999974E-6 : f32
    %157 = vector.broadcast %cst_133 : f32 to vector<8x1xf32>
    %158 = arith.addf %154, %157 : vector<8x1xf32>
    %159 = math.rsqrt %158 : vector<8x1xf32>
    %160 = vector.broadcast %159 : vector<8x1xf32> to vector<8x392xf32>
    %161 = arith.mulf %156, %160 : vector<8x392xf32>
    %c0_134 = arith.constant 0 : index
    %c0_135 = arith.constant 0 : index
    %162 = vector.load %arg3[%c0_134, %c0_135] : memref<8x1xf32, #tpu.memory_space<vmem>>, vector<8x1xf32>
    %163 = vector.broadcast %162 : vector<8x1xf32> to vector<8x392xf32>
    %164 = arith.mulf %161, %163 : vector<8x392xf32>
    %c0_136 = arith.constant 0 : index
    %c0_137 = arith.constant 0 : index
    %165 = vector.load %arg4[%c0_136, %c0_137] : memref<8x1xf32, #tpu.memory_space<vmem>>, vector<8x1xf32>
    %166 = vector.broadcast %165 : vector<8x1xf32> to vector<8x392xf32>
    %167 = arith.addf %164, %166 : vector<8x392xf32>
    %cst_138 = arith.constant 0.000000e+00 : f32
    %168 = vector.broadcast %cst_138 : f32 to vector<8x392xf32>
    %169 = arith.cmpf ogt, %167, %168 : vector<8x392xf32>
    %cst_139 = arith.constant 0.000000e+00 : f32
    %170 = vector.broadcast %cst_139 : f32 to vector<8x392xf32>
    %171 = arith.minimumf %167, %170 : vector<8x392xf32>
    %172 = math.exp %171 : vector<8x392xf32>
    %cst_140 = arith.constant 1.000000e+00 : f32
    %173 = vector.broadcast %cst_140 : f32 to vector<8x392xf32>
    %174 = arith.subf %172, %173 : vector<8x392xf32>
    %175 = arith.select %169, %167, %174 : vector<8x392xi1>, vector<8x392xf32>
    %c0_141 = arith.constant 0 : index
    %c0_142 = arith.constant 0 : index
    %176 = vector.load %arg18[%c0_141, %c0_142] : memref<8x422xf32, #tpu.memory_space<vmem>>, vector<8x392xf32>
    tpu.vector_store %arg18[%c0_141, %c0_142], %175 {strides = array<i32>} : memref<8x422xf32, #tpu.memory_space<vmem>>, vector<8x392xf32>,
    %cst_143 = arith.constant 0.000000e+00 : f32
    %177 = vector.broadcast %cst_143 : f32 to vector<8x392xf32>
    %c0_144 = arith.constant 0 : index
    %c0_145 = arith.constant 0 : index
    %178 = vector.load %arg7[%c0_144, %c0_145] : memref<8x1xf32, #tpu.memory_space<vmem>>, vector<8x1xf32>
    %179 = vector.broadcast %178 : vector<8x1xf32> to vector<8x392xf32>
    %180 = arith.addf %177, %179 : vector<8x392xf32>
    %c0_146 = arith.constant 0 : index
    %c0_147 = arith.constant 0 : index
    %c0_148 = arith.constant 0 : index
    %181 = vector.load %arg6[%c0_146, %c0_147, %c0_148] : memref<9x8x8xf32, #tpu.memory_space<vmem>>, vector<1x8x8xf32>
    %182 = vector.shape_cast %181 : vector<1x8x8xf32> to vector<8x8xf32>
    %c0_149 = arith.constant 0 : index
    %c0_150 = arith.constant 0 : index
    %183 = vector.load %arg18[%c0_149, %c0_150] : memref<8x422xf32, #tpu.memory_space<vmem>>, vector<8x392xf32>
    %cst_151 = arith.constant dense<0.000000e+00> : vector<8x392xf32>
    %184 = tpu.matmul %182, %183, %cst_151 {dimension_numbers = #tpu.dot_dimension_numbers<[1], [0], [0], [1], [0, 0, 1, 1], [], []>} : vector<8x8xf32>, vector<8x392xf32>, vector<8x392xf32> -> vector<8x392xf32>
    %185 = arith.addf %180, %184 : vector<8x392xf32>
    %c1_152 = arith.constant 1 : index
    %c0_153 = arith.constant 0 : index
    %c0_154 = arith.constant 0 : index
    %186 = vector.load %arg6[%c1_152, %c0_153, %c0_154] : memref<9x8x8xf32, #tpu.memory_space<vmem>>, vector<1x8x8xf32>
    %187 = vector.shape_cast %186 : vector<1x8x8xf32> to vector<8x8xf32>
    %c0_155 = arith.constant 0 : index
    %c1_156 = arith.constant 1 : index
    %188 = vector.load %arg18[%c0_155, %c1_156] : memref<8x422xf32, #tpu.memory_space<vmem>>, vector<8x392xf32>
    %cst_157 = arith.constant dense<0.000000e+00> : vector<8x392xf32>
    %189 = tpu.matmul %187, %188, %cst_157 {dimension_numbers = #tpu.dot_dimension_numbers<[1], [0], [0], [1], [0, 0, 1, 1], [], []>} : vector<8x8xf32>, vector<8x392xf32>, vector<8x392xf32> -> vector<8x392xf32>
    %190 = arith.addf %185, %189 : vector<8x392xf32>
    %c2_158 = arith.constant 2 : index
    %c0_159 = arith.constant 0 : index
    %c0_160 = arith.constant 0 : index
    %191 = vector.load %arg6[%c2_158, %c0_159, %c0_160] : memref<9x8x8xf32, #tpu.memory_space<vmem>>, vector<1x8x8xf32>
    %192 = vector.shape_cast %191 : vector<1x8x8xf32> to vector<8x8xf32>
    %c0_161 = arith.constant 0 : index
    %c2_162 = arith.constant 2 : index
    %193 = vector.load %arg18[%c0_161, %c2_162] : memref<8x422xf32, #tpu.memory_space<vmem>>, vector<8x392xf32>
    %cst_163 = arith.constant dense<0.000000e+00> : vector<8x392xf32>
    %194 = tpu.matmul %192, %193, %cst_163 {dimension_numbers = #tpu.dot_dimension_numbers<[1], [0], [0], [1], [0, 0, 1, 1], [], []>} : vector<8x8xf32>, vector<8x392xf32>, vector<8x392xf32> -> vector<8x392xf32>
    %195 = arith.addf %190, %194 : vector<8x392xf32>
    %c3_164 = arith.constant 3 : index
    %c0_165 = arith.constant 0 : index
    %c0_166 = arith.constant 0 : index
    %196 = vector.load %arg6[%c3_164, %c0_165, %c0_166] : memref<9x8x8xf32, #tpu.memory_space<vmem>>, vector<1x8x8xf32>
    %197 = vector.shape_cast %196 : vector<1x8x8xf32> to vector<8x8xf32>
    %c0_167 = arith.constant 0 : index
    %c14_168 = arith.constant 14 : index
    %198 = vector.load %arg18[%c0_167, %c14_168] : memref<8x422xf32, #tpu.memory_space<vmem>>, vector<8x392xf32>
    %cst_169 = arith.constant dense<0.000000e+00> : vector<8x392xf32>
    %199 = tpu.matmul %197, %198, %cst_169 {dimension_numbers = #tpu.dot_dimension_numbers<[1], [0], [0], [1], [0, 0, 1, 1], [], []>} : vector<8x8xf32>, vector<8x392xf32>, vector<8x392xf32> -> vector<8x392xf32>
    %200 = arith.addf %195, %199 : vector<8x392xf32>
    %c4_170 = arith.constant 4 : index
    %c0_171 = arith.constant 0 : index
    %c0_172 = arith.constant 0 : index
    %201 = vector.load %arg6[%c4_170, %c0_171, %c0_172] : memref<9x8x8xf32, #tpu.memory_space<vmem>>, vector<1x8x8xf32>
    %202 = vector.shape_cast %201 : vector<1x8x8xf32> to vector<8x8xf32>
    %c0_173 = arith.constant 0 : index
    %c15_174 = arith.constant 15 : index
    %203 = vector.load %arg18[%c0_173, %c15_174] : memref<8x422xf32, #tpu.memory_space<vmem>>, vector<8x392xf32>
    %cst_175 = arith.constant dense<0.000000e+00> : vector<8x392xf32>
    %204 = tpu.matmul %202, %203, %cst_175 {dimension_numbers = #tpu.dot_dimension_numbers<[1], [0], [0], [1], [0, 0, 1, 1], [], []>} : vector<8x8xf32>, vector<8x392xf32>, vector<8x392xf32> -> vector<8x392xf32>
    %205 = arith.addf %200, %204 : vector<8x392xf32>
    %c5_176 = arith.constant 5 : index
    %c0_177 = arith.constant 0 : index
    %c0_178 = arith.constant 0 : index
    %206 = vector.load %arg6[%c5_176, %c0_177, %c0_178] : memref<9x8x8xf32, #tpu.memory_space<vmem>>, vector<1x8x8xf32>
    %207 = vector.shape_cast %206 : vector<1x8x8xf32> to vector<8x8xf32>
    %c0_179 = arith.constant 0 : index
    %c16_180 = arith.constant 16 : index
    %208 = vector.load %arg18[%c0_179, %c16_180] : memref<8x422xf32, #tpu.memory_space<vmem>>, vector<8x392xf32>
    %cst_181 = arith.constant dense<0.000000e+00> : vector<8x392xf32>
    %209 = tpu.matmul %207, %208, %cst_181 {dimension_numbers = #tpu.dot_dimension_numbers<[1], [0], [0], [1], [0, 0, 1, 1], [], []>} : vector<8x8xf32>, vector<8x392xf32>, vector<8x392xf32> -> vector<8x392xf32>
    %210 = arith.addf %205, %209 : vector<8x392xf32>
    %c6_182 = arith.constant 6 : index
    %c0_183 = arith.constant 0 : index
    %c0_184 = arith.constant 0 : index
    %211 = vector.load %arg6[%c6_182, %c0_183, %c0_184] : memref<9x8x8xf32, #tpu.memory_space<vmem>>, vector<1x8x8xf32>
    %212 = vector.shape_cast %211 : vector<1x8x8xf32> to vector<8x8xf32>
    %c0_185 = arith.constant 0 : index
    %c28 = arith.constant 28 : index
    %213 = vector.load %arg18[%c0_185, %c28] : memref<8x422xf32, #tpu.memory_space<vmem>>, vector<8x392xf32>
    %cst_186 = arith.constant dense<0.000000e+00> : vector<8x392xf32>
    %214 = tpu.matmul %212, %213, %cst_186 {dimension_numbers = #tpu.dot_dimension_numbers<[1], [0], [0], [1], [0, 0, 1, 1], [], []>} : vector<8x8xf32>, vector<8x392xf32>, vector<8x392xf32> -> vector<8x392xf32>
    %215 = arith.addf %210, %214 : vector<8x392xf32>
    %c7_187 = arith.constant 7 : index
    %c0_188 = arith.constant 0 : index
    %c0_189 = arith.constant 0 : index
    %216 = vector.load %arg6[%c7_187, %c0_188, %c0_189] : memref<9x8x8xf32, #tpu.memory_space<vmem>>, vector<1x8x8xf32>
    %217 = vector.shape_cast %216 : vector<1x8x8xf32> to vector<8x8xf32>
    %c0_190 = arith.constant 0 : index
    %c29 = arith.constant 29 : index
    %218 = vector.load %arg18[%c0_190, %c29] : memref<8x422xf32, #tpu.memory_space<vmem>>, vector<8x392xf32>
    %cst_191 = arith.constant dense<0.000000e+00> : vector<8x392xf32>
    %219 = tpu.matmul %217, %218, %cst_191 {dimension_numbers = #tpu.dot_dimension_numbers<[1], [0], [0], [1], [0, 0, 1, 1], [], []>} : vector<8x8xf32>, vector<8x392xf32>, vector<8x392xf32> -> vector<8x392xf32>
    %220 = arith.addf %215, %219 : vector<8x392xf32>
    %c8_192 = arith.constant 8 : index
    %c0_193 = arith.constant 0 : index
    %c0_194 = arith.constant 0 : index
    %221 = vector.load %arg6[%c8_192, %c0_193, %c0_194] : memref<9x8x8xf32, #tpu.memory_space<vmem>>, vector<1x8x8xf32>
    %222 = vector.shape_cast %221 : vector<1x8x8xf32> to vector<8x8xf32>
    %c0_195 = arith.constant 0 : index
    %c30 = arith.constant 30 : index
    %223 = vector.load %arg18[%c0_195, %c30] : memref<8x422xf32, #tpu.memory_space<vmem>>, vector<8x392xf32>
    %cst_196 = arith.constant dense<0.000000e+00> : vector<8x392xf32>
    %224 = tpu.matmul %222, %223, %cst_196 {dimension_numbers = #tpu.dot_dimension_numbers<[1], [0], [0], [1], [0, 0, 1, 1], [], []>} : vector<8x8xf32>, vector<8x392xf32>, vector<8x392xf32> -> vector<8x392xf32>
    %225 = arith.addf %220, %224 : vector<8x392xf32>
    %c0_197 = arith.constant 0 : index
    %c0_198 = arith.constant 0 : index
    %226 = vector.load %arg18[%c0_197, %c0_198] : memref<8x422xf32, #tpu.memory_space<vmem>>, vector<8x392xf32>
    tpu.vector_store %arg18[%c0_197, %c0_198], %225 {strides = array<i32>} : memref<8x422xf32, #tpu.memory_space<vmem>>, vector<8x392xf32>,
    %c0_199 = arith.constant 0 : index
    %c0_200 = arith.constant 0 : index
    %227 = vector.load %arg10[%c0_199, %c0_200] : memref<196x36xf32, #tpu.memory_space<vmem>>, vector<196x36xf32>
    %c0_201 = arith.constant 0 : index
    %c0_202 = arith.constant 0 : index
    %228 = vector.load %arg18[%c0_201, %c0_202] : memref<8x422xf32, #tpu.memory_space<vmem>>, vector<8x196xf32>
    %cst_203 = arith.constant dense<0.000000e+00> : vector<8x36xf32>
    %229 = tpu.matmul %228, %227, %cst_203 {dimension_numbers = #tpu.dot_dimension_numbers<[1], [0], [0], [1], [0, 0, 1, 1], [], []>} : vector<8x196xf32>, vector<196x36xf32>, vector<8x36xf32> -> vector<8x36xf32>
    %c0_204 = arith.constant 0 : index
    %c0_205 = arith.constant 0 : index
    %230 = vector.load %arg19[%c0_204, %c0_205] : memref<16x86xf32, #tpu.memory_space<vmem>>, vector<8x36xf32>
    tpu.vector_store %arg19[%c0_204, %c0_205], %229 {strides = array<i32>} : memref<16x86xf32, #tpu.memory_space<vmem>>, vector<8x36xf32>,
    %c0_206 = arith.constant 0 : index
    %c196_207 = arith.constant 196 : index
    %231 = vector.load %arg18[%c0_206, %c196_207] : memref<8x422xf32, #tpu.memory_space<vmem>>, vector<8x196xf32>
    %cst_208 = arith.constant dense<0.000000e+00> : vector<8x36xf32>
    %232 = tpu.matmul %231, %227, %cst_208 {dimension_numbers = #tpu.dot_dimension_numbers<[1], [0], [0], [1], [0, 0, 1, 1], [], []>} : vector<8x196xf32>, vector<196x36xf32>, vector<8x36xf32> -> vector<8x36xf32>
    %c0_209 = arith.constant 0 : index
    %c36_210 = arith.constant 36 : index
    %233 = vector.load %arg19[%c0_209, %c36_210] : memref<16x86xf32, #tpu.memory_space<vmem>>, vector<8x36xf32>
    tpu.vector_store %arg19[%c0_209, %c36_210], %232 {strides = array<i32>} : memref<16x86xf32, #tpu.memory_space<vmem>>, vector<8x36xf32>,
    %cst_211 = arith.constant 0.000000e+00 : f32
    %234 = vector.broadcast %cst_211 : f32 to vector<16x14xf32>
    %c0_212 = arith.constant 0 : index
    %c72 = arith.constant 72 : index
    %235 = vector.load %arg19[%c0_212, %c72] : memref<16x86xf32, #tpu.memory_space<vmem>>, vector<16x14xf32>
    tpu.vector_store %arg19[%c0_212, %c72], %234 {strides = array<i32>} : memref<16x86xf32, #tpu.memory_space<vmem>>, vector<16x14xf32>,
    %c0_213 = arith.constant 0 : index
    %c0_214 = arith.constant 0 : index
    %236 = vector.load %arg19[%c0_213, %c0_214] : memref<16x86xf32, #tpu.memory_space<vmem>>, vector<8x72xf32>
    %cst_215 = arith.constant dense<0.000000e+00> : vector<8xf32>
    %237 = vector.multi_reduction <add>, %236, %cst_215 [1] : vector<8x72xf32> to vector<8xf32>
    %238 = vector.shape_cast %237 : vector<8xf32> to vector<8x1xf32>
    %cst_216 = arith.constant 7.200000e+01 : f32
    %239 = vector.broadcast %cst_216 : f32 to vector<8x1xf32>
    %240 = arith.divf %238, %239 : vector<8x1xf32>
    %241 = vector.broadcast %240 : vector<8x1xf32> to vector<8x72xf32>
    %242 = arith.subf %236, %241 : vector<8x72xf32>
    %243 = arith.mulf %242, %242 : vector<8x72xf32>
    %cst_217 = arith.constant dense<0.000000e+00> : vector<8xf32>
    %244 = vector.multi_reduction <add>, %243, %cst_217 [1] : vector<8x72xf32> to vector<8xf32>
    %245 = vector.shape_cast %244 : vector<8xf32> to vector<8x1xf32>
    %cst_218 = arith.constant 7.200000e+01 : f32
    %246 = vector.broadcast %cst_218 : f32 to vector<8x1xf32>
    %247 = arith.divf %245, %246 : vector<8x1xf32>
    %248 = vector.broadcast %240 : vector<8x1xf32> to vector<8x72xf32>
    %249 = arith.subf %236, %248 : vector<8x72xf32>
    %cst_219 = arith.constant 9.99999974E-6 : f32
    %250 = vector.broadcast %cst_219 : f32 to vector<8x1xf32>
    %251 = arith.addf %247, %250 : vector<8x1xf32>
    %252 = math.rsqrt %251 : vector<8x1xf32>
    %253 = vector.broadcast %252 : vector<8x1xf32> to vector<8x72xf32>
    %254 = arith.mulf %249, %253 : vector<8x72xf32>
    %c0_220 = arith.constant 0 : index
    %c0_221 = arith.constant 0 : index
    %255 = vector.load %arg8[%c0_220, %c0_221] : memref<8x1xf32, #tpu.memory_space<vmem>>, vector<8x1xf32>
    %256 = vector.broadcast %255 : vector<8x1xf32> to vector<8x72xf32>
    %257 = arith.mulf %254, %256 : vector<8x72xf32>
    %c0_222 = arith.constant 0 : index
    %c0_223 = arith.constant 0 : index
    %258 = vector.load %arg9[%c0_222, %c0_223] : memref<8x1xf32, #tpu.memory_space<vmem>>, vector<8x1xf32>
    %259 = vector.broadcast %258 : vector<8x1xf32> to vector<8x72xf32>
    %260 = arith.addf %257, %259 : vector<8x72xf32>
    %cst_224 = arith.constant 0.000000e+00 : f32
    %261 = vector.broadcast %cst_224 : f32 to vector<8x72xf32>
    %262 = arith.cmpf ogt, %260, %261 : vector<8x72xf32>
    %cst_225 = arith.constant 0.000000e+00 : f32
    %263 = vector.broadcast %cst_225 : f32 to vector<8x72xf32>
    %264 = arith.minimumf %260, %263 : vector<8x72xf32>
    %265 = math.exp %264 : vector<8x72xf32>
    %cst_226 = arith.constant 1.000000e+00 : f32
    %266 = vector.broadcast %cst_226 : f32 to vector<8x72xf32>
    %267 = arith.subf %265, %266 : vector<8x72xf32>
    %268 = arith.select %262, %260, %267 : vector<8x72xi1>, vector<8x72xf32>
    %c0_227 = arith.constant 0 : index
    %c0_228 = arith.constant 0 : index
    %269 = vector.load %arg19[%c0_227, %c0_228] : memref<16x86xf32, #tpu.memory_space<vmem>>, vector<8x72xf32>
    tpu.vector_store %arg19[%c0_227, %c0_228], %268 {strides = array<i32>} : memref<16x86xf32, #tpu.memory_space<vmem>>, vector<8x72xf32>,
    %cst_229 = arith.constant 0.000000e+00 : f32
    %270 = vector.broadcast %cst_229 : f32 to vector<16x72xf32>
    %c0_230 = arith.constant 0 : index
    %c0_231 = arith.constant 0 : index
    %271 = vector.load %arg12[%c0_230, %c0_231] : memref<16x1xf32, #tpu.memory_space<vmem>>, vector<16x1xf32>
    %272 = vector.broadcast %271 : vector<16x1xf32> to vector<16x72xf32>
    %273 = arith.addf %270, %272 : vector<16x72xf32>
    %c0_232 = arith.constant 0 : index
    %c0_233 = arith.constant 0 : index
    %c0_234 = arith.constant 0 : index
    %274 = vector.load %arg11[%c0_232, %c0_233, %c0_234] : memref<9x16x8xf32, #tpu.memory_space<vmem>>, vector<1x16x8xf32>
    %275 = vector.shape_cast %274 : vector<1x16x8xf32> to vector<16x8xf32>
    %c0_235 = arith.constant 0 : index
    %c0_236 = arith.constant 0 : index
    %276 = vector.load %arg19[%c0_235, %c0_236] : memref<16x86xf32, #tpu.memory_space<vmem>>, vector<8x72xf32>
    %cst_237 = arith.constant dense<0.000000e+00> : vector<16x72xf32>
    %277 = tpu.matmul %275, %276, %cst_237 {dimension_numbers = #tpu.dot_dimension_numbers<[1], [0], [0], [1], [0, 0, 1, 1], [], []>} : vector<16x8xf32>, vector<8x72xf32>, vector<16x72xf32> -> vector<16x72xf32>
    %278 = arith.addf %273, %277 : vector<16x72xf32>
    %c1_238 = arith.constant 1 : index
    %c0_239 = arith.constant 0 : index
    %c0_240 = arith.constant 0 : index
    %279 = vector.load %arg11[%c1_238, %c0_239, %c0_240] : memref<9x16x8xf32, #tpu.memory_space<vmem>>, vector<1x16x8xf32>
    %280 = vector.shape_cast %279 : vector<1x16x8xf32> to vector<16x8xf32>
    %c0_241 = arith.constant 0 : index
    %c1_242 = arith.constant 1 : index
    %281 = vector.load %arg19[%c0_241, %c1_242] : memref<16x86xf32, #tpu.memory_space<vmem>>, vector<8x72xf32>
    %cst_243 = arith.constant dense<0.000000e+00> : vector<16x72xf32>
    %282 = tpu.matmul %280, %281, %cst_243 {dimension_numbers = #tpu.dot_dimension_numbers<[1], [0], [0], [1], [0, 0, 1, 1], [], []>} : vector<16x8xf32>, vector<8x72xf32>, vector<16x72xf32> -> vector<16x72xf32>
    %283 = arith.addf %278, %282 : vector<16x72xf32>
    %c2_244 = arith.constant 2 : index
    %c0_245 = arith.constant 0 : index
    %c0_246 = arith.constant 0 : index
    %284 = vector.load %arg11[%c2_244, %c0_245, %c0_246] : memref<9x16x8xf32, #tpu.memory_space<vmem>>, vector<1x16x8xf32>
    %285 = vector.shape_cast %284 : vector<1x16x8xf32> to vector<16x8xf32>
    %c0_247 = arith.constant 0 : index
    %c2_248 = arith.constant 2 : index
    %286 = vector.load %arg19[%c0_247, %c2_248] : memref<16x86xf32, #tpu.memory_space<vmem>>, vector<8x72xf32>
    %cst_249 = arith.constant dense<0.000000e+00> : vector<16x72xf32>
    %287 = tpu.matmul %285, %286, %cst_249 {dimension_numbers = #tpu.dot_dimension_numbers<[1], [0], [0], [1], [0, 0, 1, 1], [], []>} : vector<16x8xf32>, vector<8x72xf32>, vector<16x72xf32> -> vector<16x72xf32>
    %288 = arith.addf %283, %287 : vector<16x72xf32>
    %c3_250 = arith.constant 3 : index
    %c0_251 = arith.constant 0 : index
    %c0_252 = arith.constant 0 : index
    %289 = vector.load %arg11[%c3_250, %c0_251, %c0_252] : memref<9x16x8xf32, #tpu.memory_space<vmem>>, vector<1x16x8xf32>
    %290 = vector.shape_cast %289 : vector<1x16x8xf32> to vector<16x8xf32>
    %c0_253 = arith.constant 0 : index
    %c6_254 = arith.constant 6 : index
    %291 = vector.load %arg19[%c0_253, %c6_254] : memref<16x86xf32, #tpu.memory_space<vmem>>, vector<8x72xf32>
    %cst_255 = arith.constant dense<0.000000e+00> : vector<16x72xf32>
    %292 = tpu.matmul %290, %291, %cst_255 {dimension_numbers = #tpu.dot_dimension_numbers<[1], [0], [0], [1], [0, 0, 1, 1], [], []>} : vector<16x8xf32>, vector<8x72xf32>, vector<16x72xf32> -> vector<16x72xf32>
    %293 = arith.addf %288, %292 : vector<16x72xf32>
    %c4_256 = arith.constant 4 : index
    %c0_257 = arith.constant 0 : index
    %c0_258 = arith.constant 0 : index
    %294 = vector.load %arg11[%c4_256, %c0_257, %c0_258] : memref<9x16x8xf32, #tpu.memory_space<vmem>>, vector<1x16x8xf32>
    %295 = vector.shape_cast %294 : vector<1x16x8xf32> to vector<16x8xf32>
    %c0_259 = arith.constant 0 : index
    %c7_260 = arith.constant 7 : index
    %296 = vector.load %arg19[%c0_259, %c7_260] : memref<16x86xf32, #tpu.memory_space<vmem>>, vector<8x72xf32>
    %cst_261 = arith.constant dense<0.000000e+00> : vector<16x72xf32>
    %297 = tpu.matmul %295, %296, %cst_261 {dimension_numbers = #tpu.dot_dimension_numbers<[1], [0], [0], [1], [0, 0, 1, 1], [], []>} : vector<16x8xf32>, vector<8x72xf32>, vector<16x72xf32> -> vector<16x72xf32>
    %298 = arith.addf %293, %297 : vector<16x72xf32>
    %c5_262 = arith.constant 5 : index
    %c0_263 = arith.constant 0 : index
    %c0_264 = arith.constant 0 : index
    %299 = vector.load %arg11[%c5_262, %c0_263, %c0_264] : memref<9x16x8xf32, #tpu.memory_space<vmem>>, vector<1x16x8xf32>
    %300 = vector.shape_cast %299 : vector<1x16x8xf32> to vector<16x8xf32>
    %c0_265 = arith.constant 0 : index
    %c8_266 = arith.constant 8 : index
    %301 = vector.load %arg19[%c0_265, %c8_266] : memref<16x86xf32, #tpu.memory_space<vmem>>, vector<8x72xf32>
    %cst_267 = arith.constant dense<0.000000e+00> : vector<16x72xf32>
    %302 = tpu.matmul %300, %301, %cst_267 {dimension_numbers = #tpu.dot_dimension_numbers<[1], [0], [0], [1], [0, 0, 1, 1], [], []>} : vector<16x8xf32>, vector<8x72xf32>, vector<16x72xf32> -> vector<16x72xf32>
    %303 = arith.addf %298, %302 : vector<16x72xf32>
    %c6_268 = arith.constant 6 : index
    %c0_269 = arith.constant 0 : index
    %c0_270 = arith.constant 0 : index
    %304 = vector.load %arg11[%c6_268, %c0_269, %c0_270] : memref<9x16x8xf32, #tpu.memory_space<vmem>>, vector<1x16x8xf32>
    %305 = vector.shape_cast %304 : vector<1x16x8xf32> to vector<16x8xf32>
    %c0_271 = arith.constant 0 : index
    %c12_272 = arith.constant 12 : index
    %306 = vector.load %arg19[%c0_271, %c12_272] : memref<16x86xf32, #tpu.memory_space<vmem>>, vector<8x72xf32>
    %cst_273 = arith.constant dense<0.000000e+00> : vector<16x72xf32>
    %307 = tpu.matmul %305, %306, %cst_273 {dimension_numbers = #tpu.dot_dimension_numbers<[1], [0], [0], [1], [0, 0, 1, 1], [], []>} : vector<16x8xf32>, vector<8x72xf32>, vector<16x72xf32> -> vector<16x72xf32>
    %308 = arith.addf %303, %307 : vector<16x72xf32>
    %c7_274 = arith.constant 7 : index
    %c0_275 = arith.constant 0 : index
    %c0_276 = arith.constant 0 : index
    %309 = vector.load %arg11[%c7_274, %c0_275, %c0_276] : memref<9x16x8xf32, #tpu.memory_space<vmem>>, vector<1x16x8xf32>
    %310 = vector.shape_cast %309 : vector<1x16x8xf32> to vector<16x8xf32>
    %c0_277 = arith.constant 0 : index
    %c13_278 = arith.constant 13 : index
    %311 = vector.load %arg19[%c0_277, %c13_278] : memref<16x86xf32, #tpu.memory_space<vmem>>, vector<8x72xf32>
    %cst_279 = arith.constant dense<0.000000e+00> : vector<16x72xf32>
    %312 = tpu.matmul %310, %311, %cst_279 {dimension_numbers = #tpu.dot_dimension_numbers<[1], [0], [0], [1], [0, 0, 1, 1], [], []>} : vector<16x8xf32>, vector<8x72xf32>, vector<16x72xf32> -> vector<16x72xf32>
    %313 = arith.addf %308, %312 : vector<16x72xf32>
    %c8_280 = arith.constant 8 : index
    %c0_281 = arith.constant 0 : index
    %c0_282 = arith.constant 0 : index
    %314 = vector.load %arg11[%c8_280, %c0_281, %c0_282] : memref<9x16x8xf32, #tpu.memory_space<vmem>>, vector<1x16x8xf32>
    %315 = vector.shape_cast %314 : vector<1x16x8xf32> to vector<16x8xf32>
    %c0_283 = arith.constant 0 : index
    %c14_284 = arith.constant 14 : index
    %316 = vector.load %arg19[%c0_283, %c14_284] : memref<16x86xf32, #tpu.memory_space<vmem>>, vector<8x72xf32>
    %cst_285 = arith.constant dense<0.000000e+00> : vector<16x72xf32>
    %317 = tpu.matmul %315, %316, %cst_285 {dimension_numbers = #tpu.dot_dimension_numbers<[1], [0], [0], [1], [0, 0, 1, 1], [], []>} : vector<16x8xf32>, vector<8x72xf32>, vector<16x72xf32> -> vector<16x72xf32>
    %318 = arith.addf %313, %317 : vector<16x72xf32>
    %c0_286 = arith.constant 0 : index
    %c0_287 = arith.constant 0 : index
    %319 = vector.load %arg19[%c0_286, %c0_287] : memref<16x86xf32, #tpu.memory_space<vmem>>, vector<16x72xf32>
    tpu.vector_store %arg19[%c0_286, %c0_287], %318 {strides = array<i32>} : memref<16x86xf32, #tpu.memory_space<vmem>>, vector<16x72xf32>,
    %c0_288 = arith.constant 0 : index
    %c0_289 = arith.constant 0 : index
    %320 = vector.load %arg15[%c0_288, %c0_289] : memref<36x16xf32, #tpu.memory_space<vmem>>, vector<36x16xf32>
    %c0_290 = arith.constant 0 : index
    %c0_291 = arith.constant 0 : index
    %321 = vector.load %arg19[%c0_290, %c0_291] : memref<16x86xf32, #tpu.memory_space<vmem>>, vector<16x36xf32>
    %cst_292 = arith.constant dense<0.000000e+00> : vector<16x16xf32>
    %322 = tpu.matmul %321, %320, %cst_292 {dimension_numbers = #tpu.dot_dimension_numbers<[1], [0], [0], [1], [0, 0, 1, 1], [], []>} : vector<16x36xf32>, vector<36x16xf32>, vector<16x16xf32> -> vector<16x16xf32>
    %c0_293 = arith.constant 0 : index
    %c0_294 = arith.constant 0 : index
    %323 = vector.load %arg16[%c0_293, %c0_294] : memref<16x32xf32, #tpu.memory_space<vmem>>, vector<16x16xf32>
    tpu.vector_store %arg16[%c0_293, %c0_294], %322 {strides = array<i32>} : memref<16x32xf32, #tpu.memory_space<vmem>>, vector<16x16xf32>,
    %c0_295 = arith.constant 0 : index
    %c36_296 = arith.constant 36 : index
    %324 = vector.load %arg19[%c0_295, %c36_296] : memref<16x86xf32, #tpu.memory_space<vmem>>, vector<16x36xf32>
    %cst_297 = arith.constant dense<0.000000e+00> : vector<16x16xf32>
    %325 = tpu.matmul %324, %320, %cst_297 {dimension_numbers = #tpu.dot_dimension_numbers<[1], [0], [0], [1], [0, 0, 1, 1], [], []>} : vector<16x36xf32>, vector<36x16xf32>, vector<16x16xf32> -> vector<16x16xf32>
    %c0_298 = arith.constant 0 : index
    %c16_299 = arith.constant 16 : index
    %326 = vector.load %arg16[%c0_298, %c16_299] : memref<16x32xf32, #tpu.memory_space<vmem>>, vector<16x16xf32>
    tpu.vector_store %arg16[%c0_298, %c16_299], %325 {strides = array<i32>} : memref<16x32xf32, #tpu.memory_space<vmem>>, vector<16x16xf32>,
    %c0_300 = arith.constant 0 : index
    %c0_301 = arith.constant 0 : index
    %327 = vector.load %arg16[%c0_300, %c0_301] : memref<16x32xf32, #tpu.memory_space<vmem>>, vector<16x32xf32>
    %cst_302 = arith.constant dense<0.000000e+00> : vector<16xf32>
    %328 = vector.multi_reduction <add>, %327, %cst_302 [1] : vector<16x32xf32> to vector<16xf32>
    %329 = vector.shape_cast %328 : vector<16xf32> to vector<16x1xf32>
    %cst_303 = arith.constant 3.200000e+01 : f32
    %330 = vector.broadcast %cst_303 : f32 to vector<16x1xf32>
    %331 = arith.divf %329, %330 : vector<16x1xf32>
    %332 = vector.broadcast %331 : vector<16x1xf32> to vector<16x32xf32>
    %333 = arith.subf %327, %332 : vector<16x32xf32>
    %334 = arith.mulf %333, %333 : vector<16x32xf32>
    %cst_304 = arith.constant dense<0.000000e+00> : vector<16xf32>
    %335 = vector.multi_reduction <add>, %334, %cst_304 [1] : vector<16x32xf32> to vector<16xf32>
    %336 = vector.shape_cast %335 : vector<16xf32> to vector<16x1xf32>
    %cst_305 = arith.constant 3.200000e+01 : f32
    %337 = vector.broadcast %cst_305 : f32 to vector<16x1xf32>
    %338 = arith.divf %336, %337 : vector<16x1xf32>
    %339 = vector.broadcast %331 : vector<16x1xf32> to vector<16x32xf32>
    %340 = arith.subf %327, %339 : vector<16x32xf32>
    %cst_306 = arith.constant 9.99999974E-6 : f32
    %341 = vector.broadcast %cst_306 : f32 to vector<16x1xf32>
    %342 = arith.addf %338, %341 : vector<16x1xf32>
    %343 = math.rsqrt %342 : vector<16x1xf32>
    %344 = vector.broadcast %343 : vector<16x1xf32> to vector<16x32xf32>
    %345 = arith.mulf %340, %344 : vector<16x32xf32>
    %c0_307 = arith.constant 0 : index
    %c0_308 = arith.constant 0 : index
    %346 = vector.load %arg13[%c0_307, %c0_308] : memref<16x1xf32, #tpu.memory_space<vmem>>, vector<16x1xf32>
    %347 = vector.broadcast %346 : vector<16x1xf32> to vector<16x32xf32>
    %348 = arith.mulf %345, %347 : vector<16x32xf32>
    %c0_309 = arith.constant 0 : index
    %c0_310 = arith.constant 0 : index
    %349 = vector.load %arg14[%c0_309, %c0_310] : memref<16x1xf32, #tpu.memory_space<vmem>>, vector<16x1xf32>
    %350 = vector.broadcast %349 : vector<16x1xf32> to vector<16x32xf32>
    %351 = arith.addf %348, %350 : vector<16x32xf32>
    %352 = arith.mulf %351, %351 : vector<16x32xf32>
    %cst_311 = arith.constant dense<0.000000e+00> : vector<16xf32>
    %353 = vector.multi_reduction <add>, %352, %cst_311 [1] : vector<16x32xf32> to vector<16xf32>
    %354 = vector.shape_cast %353 : vector<16xf32> to vector<16x1xf32>
    %cst_312 = arith.constant dense<0.000000e+00> : vector<1xf32>
    %355 = vector.multi_reduction <add>, %354, %cst_312 [0] : vector<16x1xf32> to vector<1xf32>
    %356 = vector.shape_cast %355 : vector<1xf32> to vector<1x1xf32>
    %cst_313 = arith.constant 2.000000e+00 : f32
    %357 = vector.broadcast %cst_313 : f32 to vector<1x1xf32>
    %358 = arith.divf %356, %357 : vector<1x1xf32>
    %359 = math.rsqrt %358 : vector<1x1xf32>
    %360 = vector.broadcast %359 : vector<1x1xf32> to vector<16x32xf32>
    %361 = arith.mulf %351, %360 : vector<16x32xf32>
    %c0_314 = arith.constant 0 : index
    %c0_315 = arith.constant 0 : index
    %362 = vector.load %arg16[%c0_314, %c0_315] : memref<16x32xf32, #tpu.memory_space<vmem>>, vector<16x32xf32>
    tpu.vector_store %arg16[%c0_314, %c0_315], %361 {strides = array<i32>} : memref<16x32xf32, #tpu.memory_space<vmem>>, vector<16x32xf32>,
    return
  }
}

</mosaic_0001>

<bundles_post_ra>
// kernel: _lambda_.1
= control target key start
LH: loop header
LB: loop body
LE: loop exit
PB: predicated region body
PF: predicated region fallthrough
CT: control target
= control target key end

     0   :  { %s26447_s0 = inlined_call_operand.vmem [shape: f32[3,2048], index: 0, kind: input, shape index: {}]   ;;  %s26448_s1 = inlined_call_operand.vmem [shape: f32[25,8,3], index: 1, kind: input, shape index: {}]   ;;  %s26449_s2 = inlined_call_operand.vmem [shape: f32[8,1], index: 2, kind: input, shape index: {}]   ;;  %s26450_s3 = inlined_call_operand.vmem [shape: f32[8,1], index: 3, kind: input, shape index: {}, may-alias: {3,8}]   ;;  %s26451_s4 = inlined_call_operand.vmem [shape: f32[8,1], index: 4, kind: input, shape index: {}, may-alias: {4,9}]   ;;  %s26452_s5 = inlined_call_operand.hbm [shape: f32[1024,196], index: 5, kind: input, shape index: {}]   ;;  %s26453_s6 = inlined_call_operand.vmem [shape: f32[9,8,8], index: 6, kind: input, shape index: {}]   ;;  %s26454_s7 = inlined_call_operand.vmem [shape: f32[8,1], index: 7, kind: input, shape index: {}]   ;;  %s26455_s8 = inlined_call_operand.vmem [shape: f32[8,1], index: 8, kind: input, shape index: {}, may-alias: {3,8}]   ;;  %s26456_s9 = inlined_call_operand.vmem [shape: f32[8,1], index: 9, kind: input, shape index: {}, may-alias: {4,9}]   ;;  %s26457_s10 = inlined_call_operand.vmem [shape: f32[196,36], index: 10, kind: input, shape index: {}]   ;;  %s26458_s11 = inlined_call_operand.vmem [shape: f32[9,16,8], index: 11, kind: input, shape index: {}]   ;;  %s26459_s12 = inlined_call_operand.vmem [shape: f32[16,1], index: 12, kind: input, shape index: {}]   ;;  %s26460_s13 = inlined_call_operand.vmem [shape: f32[16,1], index: 13, kind: input, shape index: {}]   ;;  %s26461_s14 = inlined_call_operand.vmem [shape: f32[16,1], index: 14, kind: input, shape index: {}]   ;;  %s26462_s15 = inlined_call_operand.vmem [shape: f32[36,16], index: 15, kind: input, shape index: {}]   ;;  %s26463_s16 = inlined_call_operand.vmem [shape: f32[16,32], index: 16, kind: output, shape index: {}]  }
   0x1   :  { %26465 = sst [smem:[#allocation12_spill]] %s26447_s0 }
   0x2   :  { %21 = vsyncpa [#allocation6], 0  ;;  %s22727_s21 = smov [#allocation5]   ;;  %s22703_s25 = scalar_lea.hbm %s26452_s5, 32768 }
   0x3   :  { %s37_s22 = sshll.u32 %s22727_s21, 4  ;;  %p22704_p0 = scmp.ne.s32.totalorder %s26452_s5, %s22703_s25  ;;  %s38_s22 = int_to_ptr.vmem [resolvable:$true] %s37_s22 }
   0x4   :  { %p22707_p1 = scmp.lt.u32.totalorder %s22703_s25, %s26452_s5 }
   0x6   :  { %p22709_p2 = pnand %p22707_p1, %p22704_p0 }
   0x8   :  { %22712 = shalt.err (!%p22709_p2)
}
   0x9   :  { %s22713_s30 = scalar_lea.vmem %s38_s22, 32768  ;;  %p22718_p4 = scmp.lt.s32.totalorder %s38_s22, %s38_s22 }
   0xa   :  { %p22714_p3 = scmp.ne.s32.totalorder %s38_s22, %s22713_s30  ;;  %p22719_p5 = scmp.lt.s32.totalorder %s22713_s30, %s22713_s30 }
   0xc   :  { %p22720_p6 = por %p22719_p5, %p22718_p4 }
   0xe   :  { %p22721_p7 = pnand %p22720_p6, %p22714_p3 }
  0x10   :  { %22724 = shalt.err (!%p22721_p7)
}
  0x11   :  { %s22728_s0 = smov 256   ;;  %s22729_s17 = smov 16  }
  0x12   :  { %43 = dma.hbm_to_vmem [thread:$0]  %s26452_s5, 32768, %s38_s22, [#allocation6], %s22728_s0, %s22728_s0, %s22729_s17  }
  0x13   :  { %22725 = dma.done.wait [#allocation6], 32768  }
  0x14   :  { %22726 = vsyncadd [#allocation6], 4294934528  ;;  %v22730_v0 = vmov 0.0   ;;  %s26466_s23 = sld [smem:[#allocation12_spill]]  ;;  %s22731_s24 = smov 127   ;;  %vm146_vm0 = vcmask 1042432  }
  0x15   :  { %67 = vst [vmem:[#allocation2 + $0x80] sm:$0xff] %v22730_v0  ;;  %543 = vmatprep.mubr.f32.mxu0 %v22730_v0  ;;  %259 = vmatprep.mubr.f32.mxu1 %v22730_v0  ;;  %v22909_v23 = vld [vmem:[%s26448_s1] sm:$0xff]  ;;  %vm142_vm1 = vcmask 23552   ;;  %s22732_s26 = smov 126   ;;  %s22733_s27 = smov 125   ;;  %vm849_vm2 = vcmask 1039360  }
  0x16   :  { %s22734_s5 = smov 124   ;;  %s22735_s22 = smov 96   ;;  %v23113_v61 = vld [vmem:[%s26448_s1 + $0x8] sm:$0xff]  ;;  %vm1521_vm3 = vcmask 1031168   ;;  %vm2193_vm4 = vcmask 1022976   ;;  %vm2865_vm5 = vcmask 1014784  }
  0x17   :  { %s22736_s30 = smov 95   ;;  %s22737_s19 = smov 94   ;;  %vm3537_vm6 = vcmask 785408   ;;  %vm4209_vm7 = vcmask 777216   ;;  %vm4881_vm8 = vcmask 769024   ;;  %vm5553_vm9 = vcmask 760832  }
  0x18   :  { %s22738_s28 = smov 93   ;;  %s22739_s18 = smov 92   ;;  %vm6225_vm10 = vcmask 752640   ;;  %vm6897_vm11 = vcmask 523264   ;;  %vm7569_vm12 = vcmask 515072   ;;  %vm8241_vm13 = vcmask 506880  }
  0x19   :  { %s22744_s29 = smov 60   ;;  %vm8913_vm14 = vcmask 498688   ;;  %vm9585_vm15 = vcmask 490496   ;;  %s22749_s0 = smov 28  }
  0x1a   :  { %v71_v1 = vld [vmem:[%s26466_s23 + $0x8] sm:$0x77]  ;;  %v70_v2 = vld [vmem:[%s26466_s23] sm:$0x77]  ;;  %v73_v3 = vld [vmem:[%s26466_s23 + $0x18] sm:$0x77] }
  0x1b   :  { %104 = vst [vmem:[#allocation2 + $0x10] sm:$0x7] %v71_v1  ;;  %102 = vst [vmem:[#allocation2] sm:$0x7] %v70_v2  ;;  %v86_v4 = vcombine.high %v70_v2, %v70_v2  ;;  %v72_v5 = vld [vmem:[%s26466_s23 + $0x10] sm:$0x77]  ;;  %v87_v8 = vcombine.high %v71_v1, %v71_v1  ;;  %v89_v9 = vcombine.high %v73_v3, %v73_v3 }
  0x1c   :  { %108 = vst [vmem:[#allocation2 + $0x30] sm:$0x7] %v73_v3  ;;  %v74_v6 = vld [vmem:[%s26466_s23 + $0x20] sm:$0x77]  ;;  %v75_v7 = vld [vmem:[%s26466_s23 + $0x28] sm:$0x77]  ;;  %v88_v10 = vcombine.high %v72_v5, %v72_v5 }
  0x1d   :  { %106 = vst [vmem:[#allocation2 + $0x20] sm:$0x7] %v72_v5  ;;  %110 = vst [vmem:[#allocation2 + $0x40] sm:$0x7] %v74_v6  ;;  %v76_v11 = vld [vmem:[%s26466_s23 + $0x30] sm:$0x77]  ;;  %v90_v12 = vcombine.high %v74_v6, %v74_v6  ;;  %v91_v14 = vcombine.high %v75_v7, %v75_v7 }
  0x1e   :  { %112 = vst [vmem:[#allocation2 + $0x50] sm:$0x7] %v75_v7  ;;  %v77_v13 = vld [vmem:[%s26466_s23 + $0x38] sm:$0x77]  ;;  %103 = vst [vmem:[#allocation2 + $0x8] sm:$0x7] %v86_v4  ;;  %v92_v15 = vcombine.high %v76_v11, %v76_v11 }
  0x1f   :  { %114 = vst [vmem:[#allocation2 + $0x60] sm:$0x7] %v76_v11  ;;  %116 = vst [vmem:[#allocation2 + $0x70] sm:$0x7] %v77_v13  ;;  %v93_v16 = vcombine.high %v77_v13, %v77_v13  ;;  %v23089_v52 = vld [vmem:[#allocation2 + $0x80] sm:$0x7] }
  0x20   :  { %105 = vst [vmem:[#allocation2 + $0x18] sm:$0x7] %v87_v8  ;;  %109 = vst [vmem:[#allocation2 + $0x38] sm:$0x7] %v89_v9  ;;  %s22755_s23 = smov 100  }
  0x21   :  { %107 = vst [vmem:[#allocation2 + $0x28] sm:$0x7] %v88_v10  ;;  %111 = vst [vmem:[#allocation2 + $0x48] sm:$0x7] %v90_v12 }
  0x22   :  { %113 = vst [vmem:[#allocation2 + $0x58] sm:$0x7] %v91_v14  ;;  %115 = vst [vmem:[#allocation2 + $0x68] sm:$0x7] %v92_v15  ;;  %v22890_v17 = vld [vmem:[#allocation2 + $0x10] sm:$0x7] }
  0x23   :  { %117 = vst [vmem:[#allocation2 + $0x78] sm:$0x7] %v93_v16  ;;  %v22892_v18 = vld [vmem:[#allocation2] sm:$0x7]  ;;  %819 = vrot.lane.b32.xlu0 %v22890_v17, %s22731_s24  ;;  %v22898_v19 = vld [vmem:[#allocation2 + $0x30] sm:$0x7] }
  0x24   :  { %815 = vrot.lane.b32.xlu1 %v22892_v18, %s22731_s24  ;;  %v22900_v20 = vld [vmem:[#allocation2 + $0x20] sm:$0x7]  ;;  %v128_v37 = vld [vmem:[#allocation2 + $0x10] sm:$0x7] }
  0x25   :  { %v134_v22 = vld [vmem:[#allocation2 + $0x40] sm:$0x7]  ;;  %v22913_v25 = vld [vmem:[#allocation2 + $0x50] sm:$0x7]  ;;  %v22926_v29 = vld [vmem:[#allocation2 + $0x8] sm:$0x7] }
  0x26   :  { %v22911_v24 = vld [vmem:[#allocation2 + $0x40] sm:$0x7]  ;;  %v22947_v33 = vld [vmem:[#allocation2 + $0x70] sm:$0x7]  ;;  %v127_v34 = vld [vmem:[#allocation2 + $0x8] sm:$0x7] }
  0x27   :  { %827 = vrot.lane.b32.xlu0 %v22898_v19, %s22731_s24  ;;  %v138_v27 = vld [vmem:[#allocation2 + $0x60] sm:$0x7]  ;;  %20710 = vmatprep.subr.msk.mxu1 %vm146_vm0, %v127_v34  ;;  %v129_v36 = vld [vmem:[#allocation2 + $0x18] sm:$0x7]  ;;  %v132_v41 = vld [vmem:[#allocation2 + $0x30] sm:$0x7] }
  0x28   :  { %823 = vrot.lane.b32.xlu1 %v22900_v20, %s22731_s24  ;;  %v135_v21 = vld [vmem:[#allocation2 + $0x48] sm:$0x7]  ;;  %v22945_v32 = vld [vmem:[#allocation2 + $0x60] sm:$0x7]  ;;  %v133_v40 = vld [vmem:[#allocation2 + $0x38] sm:$0x7] }
  0x29   :  { %20722 = vmatprep.subr.msk.mxu0 %vm146_vm0, %v135_v21  ;;  %v139_v26 = vld [vmem:[#allocation2 + $0x68] sm:$0x7]  ;;  %v126_v35 = vld [vmem:[#allocation2] sm:$0x7]  ;;  %v137_v42 = vld [vmem:[#allocation2 + $0x58] sm:$0x7] }
  0x2a   :  { %20723 = vmatpush1.msk.msra.mxu0 %vm146_vm0, %v134_v22  ;;  %v22924_v28 = vld [vmem:[#allocation2 + $0x28] sm:$0x7]  ;;  %20711 = vmatpush1.msk.msra.mxu1 %vm146_vm0, %v126_v35  ;;  %v130_v39 = vld [vmem:[#allocation2 + $0x20] sm:$0x7]  ;;  %v136_v43 = vld [vmem:[#allocation2 + $0x50] sm:$0x7] }
  0x2b   :  { %20724 = vmatmul.mubr.msk.f32.vlgmr.msra.gmra.mrb[0].mxu0 %vm142_vm1, %v22909_v23  ;;  %20728 = vmatprep.subr.msk.mxu0 %vm146_vm0, %v139_v26  ;;  %v22936_v30 = vld [vmem:[#allocation2 + $0x68] sm:$0x7]  ;;  %v141_v44 = vld [vmem:[#allocation2 + $0x78] sm:$0x7]  ;;  %v140_v45 = vld [vmem:[#allocation2 + $0x70] sm:$0x7] }
  0x2c   :  { %831 = vrot.lane.b32.xlu0 %v22911_v24, %s22731_s24  ;;  %835 = vrot.lane.b32.xlu1 %v22913_v25, %s22731_s24  ;;  %v22938_v31 = vld [vmem:[#allocation2 + $0x48] sm:$0x7]  ;;  %v23055_v46 = vld [vmem:[#allocation2 + $0x18] sm:$0x7]  ;;  %v23176_v15 = vld [vmem:[%s26448_s1 + $0x10] sm:$0xff] }
  0x2d   :  { %20729 = vmatpush1.msk.msra.mxu0 %vm146_vm0, %v138_v27  ;;  %685 = vmatprep.mubr.f32.mxu0 %v22730_v0  ;;  %v131_v38 = vld [vmem:[#allocation2 + $0x28] sm:$0x7]  ;;  %v23065_v47 = vld [vmem:[#allocation2 + $0x38] sm:$0x7] }
  0x2e   :  { %20712 = vmatmul.mubr.msk.f32.vlgmr.msra.gmra.mrb[0].mxu1 %vm142_vm1, %v22909_v23  ;;  %20713 = vmatprep.subr.msk.mxu1 %vm146_vm0, %v129_v36  ;;  %v23075_v48 = vld [vmem:[#allocation2 + $0x58] sm:$0x7] }
  0x2f   :  { %20730 = vmatmul.mubr.msk.f32.vlgmr.msra.gmra.mrb[2].mxu0 %vm142_vm1, %v22909_v23  ;;  %330 = vmatprep.mubr.f32.mxu1 %v22730_v0  ;;  %v23087_v51 = vld [vmem:[#allocation2 + $0x78] sm:$0x7] }
  0x30   :  { %825 = vrot.lane.b32.xlu1 %v22924_v28, %s22731_s24  ;;  %817 = vrot.lane.b32.xlu0 %v22926_v29, %s22731_s24 }
  0x31   :  { %965 = vmatprep.mubr.f32.mxu0 %v22730_v0  ;;  %20714 = vmatpush1.msk.msra.mxu1 %vm146_vm0, %v128_v37 }
  0x32   :  { %20715 = vmatmul.mubr.msk.f32.vlgmr.msra.gmra.mrb[2].mxu1 %vm142_vm1, %v22909_v23  ;;  %20716 = vmatprep.subr.msk.mxu1 %vm146_vm0, %v131_v38 }
  0x33   :  { %20717 = vmatpush1.msk.msra.mxu1 %vm146_vm0, %v130_v39  ;;  %401 = vmatprep.mubr.f32.mxu1 %v22730_v0 }
  0x34   :  { %841 = vrot.lane.b32.xlu1 %v22936_v30, %s22731_s24  ;;  %833 = vrot.lane.b32.xlu0 %v22938_v31, %s22731_s24 }
  0x35   :  { %20719 = vmatprep.subr.msk.mxu1 %vm146_vm0, %v133_v40 }
  0x36   :  { %20718 = vmatmul.mubr.msk.f32.vlgmr.msra.gmra.mrb[4].mxu1 %vm142_vm1, %v22909_v23 }
  0x37   :  { %472 = vmatprep.mubr.f32.mxu1 %v22730_v0  ;;  %20720 = vmatpush1.msk.msra.mxu1 %vm146_vm0, %v132_v41 }
  0x38   :  { %839 = vrot.lane.b32.xlu1 %v22945_v32, %s22731_s24  ;;  %843 = vrot.lane.b32.xlu0 %v22947_v33, %s22731_s24 }
  0x39   :  { %20725 = vmatprep.subr.msk.mxu1 %vm146_vm0, %v137_v42 }
  0x3a   :  { %20721 = vmatmul.mubr.msk.f32.vlgmr.msra.gmra.mrb[6].mxu1 %vm142_vm1, %v22909_v23 }
  0x3b   :  { %614 = vmatprep.mubr.f32.mxu1 %v22730_v0  ;;  %20726 = vmatpush1.msk.msra.mxu1 %vm146_vm0, %v136_v43 }
  0x3c   :  { %1491 = vrot.lane.b32.xlu1 %v22890_v17, %s22732_s26  ;;  %1489 = vrot.lane.b32.xlu0 %v22926_v29, %s22732_s26 }
  0x3d   :  { %20731 = vmatprep.subr.msk.mxu1 %vm146_vm0, %v141_v44 }
  0x3e   :  { %20727 = vmatmul.mubr.msk.f32.vlgmr.msra.gmra.mrb[8].mxu1 %vm142_vm1, %v22909_v23 }
  0x3f   :  { %20732 = vmatpush1.msk.msra.mxu1 %vm146_vm0, %v140_v45  ;;  %756 = vmatprep.mubr.f32.mxu1 %v22730_v0 }
  0x40   :  { %1497 = vrot.lane.b32.xlu1 %v22924_v28, %s22732_s26  ;;  %1487 = vrot.lane.b32.xlu0 %v22892_v18, %s22732_s26 }
  0x42   :  { %20733 = vmatmul.mubr.msk.f32.vlgmr.msra.gmra.mrb[10].mxu1 %vm142_vm1, %v22909_v23 }
  0x43   :  { %1036 = vmatprep.mubr.f32.mxu1 %v22730_v0 }
  0x44   :  { %1495 = vrot.lane.b32.xlu1 %v22900_v20, %s22732_s26  ;;  %1499 = vrot.lane.b32.xlu0 %v22898_v19, %s22732_s26 }
  0x48   :  { %1507 = vrot.lane.b32.xlu1 %v22913_v25, %s22732_s26  ;;  %1505 = vrot.lane.b32.xlu0 %v22938_v31, %s22732_s26 }
  0x4c   :  { %1513 = vrot.lane.b32.xlu1 %v22936_v30, %s22732_s26  ;;  %1503 = vrot.lane.b32.xlu0 %v22911_v24, %s22732_s26 }
  0x50   :  { %1511 = vrot.lane.b32.xlu1 %v22945_v32, %s22732_s26  ;;  %1515 = vrot.lane.b32.xlu0 %v22947_v33, %s22732_s26 }
  0x54   :  { %2163 = vrot.lane.b32.xlu1 %v22890_v17, %s22733_s27  ;;  %2161 = vrot.lane.b32.xlu0 %v22926_v29, %s22733_s27 }
  0x58   :  { %2169 = vrot.lane.b32.xlu1 %v22924_v28, %s22733_s27  ;;  %2159 = vrot.lane.b32.xlu0 %v22892_v18, %s22733_s27 }
  0x5c   :  { %2167 = vrot.lane.b32.xlu1 %v22900_v20, %s22733_s27  ;;  %2171 = vrot.lane.b32.xlu0 %v22898_v19, %s22733_s27 }
  0x60   :  { %2179 = vrot.lane.b32.xlu1 %v22913_v25, %s22733_s27  ;;  %2177 = vrot.lane.b32.xlu0 %v22938_v31, %s22733_s27 }
  0x64   :  { %2185 = vrot.lane.b32.xlu1 %v22936_v30, %s22733_s27  ;;  %2175 = vrot.lane.b32.xlu0 %v22911_v24, %s22733_s27 }
  0x68   :  { %2183 = vrot.lane.b32.xlu1 %v22945_v32, %s22733_s27  ;;  %2187 = vrot.lane.b32.xlu0 %v22947_v33, %s22733_s27 }
  0x6c   :  { %2835 = vrot.lane.b32.xlu1 %v22890_v17, %s22734_s5  ;;  %2833 = vrot.lane.b32.xlu0 %v22926_v29, %s22734_s5 }
  0x70   :  { %2841 = vrot.lane.b32.xlu1 %v22924_v28, %s22734_s5  ;;  %2831 = vrot.lane.b32.xlu0 %v22892_v18, %s22734_s5 }
  0x74   :  { %2839 = vrot.lane.b32.xlu1 %v22900_v20, %s22734_s5  ;;  %2843 = vrot.lane.b32.xlu0 %v22898_v19, %s22734_s5 }
  0x78   :  { %2851 = vrot.lane.b32.xlu1 %v22913_v25, %s22734_s5  ;;  %2849 = vrot.lane.b32.xlu0 %v22938_v31, %s22734_s5 }
  0x7c   :  { %2857 = vrot.lane.b32.xlu1 %v22936_v30, %s22734_s5  ;;  %2847 = vrot.lane.b32.xlu0 %v22911_v24, %s22734_s5 }
  0x80   :  { %2855 = vrot.lane.b32.xlu1 %v22945_v32, %s22734_s5  ;;  %2859 = vrot.lane.b32.xlu0 %v22947_v33, %s22734_s5 }
  0x84   :  { %3505 = vrot.lane.b32.xlu1 %v22926_v29, %s22735_s22  ;;  %821 = vrot.lane.b32.xlu0 %v23055_v46, %s22731_s24 }
  0x88   :  { %3503 = vrot.lane.b32.xlu1 %v22892_v18, %s22735_s22  ;;  %3507 = vrot.lane.b32.xlu0 %v22890_v17, %s22735_s22 }
  0x8c   :  { %3513 = vrot.lane.b32.xlu1 %v22924_v28, %s22735_s22  ;;  %829 = vrot.lane.b32.xlu0 %v23065_v47, %s22731_s24 }
  0x90   :  { %3511 = vrot.lane.b32.xlu1 %v22900_v20, %s22735_s22  ;;  %3515 = vrot.lane.b32.xlu0 %v22898_v19, %s22735_s22 }
  0x94   :  { %3521 = vrot.lane.b32.xlu1 %v22938_v31, %s22735_s22  ;;  %837 = vrot.lane.b32.xlu0 %v23075_v48, %s22731_s24 }
  0x95   :  { %v23081_v49 = vpop.permute.xlu0 %819 }
  0x96   :  { %v816_v50 = vpop.permute.xlu1 %815 }
  0x98   :  { %3519 = vrot.lane.b32.xlu1 %v22911_v24, %s22735_s22  ;;  %3523 = vrot.lane.b32.xlu0 %v22913_v25, %s22735_s22 }
  0x99   :  { %v23091_v53 = vpop.permute.xlu0 %827 }
  0x9a   :  { %v23093_v54 = vpop.permute.xlu1 %823 }
  0x9c   :  { %845 = vrot.lane.b32.xlu0 %v23087_v51, %s22731_s24  ;;  %847 = vrot.lane.b32.xlu1 %v23089_v52, %s22731_s24 }
  0x9e   :  { %v23099_v55 = vpop.permute.xlu0 %831  ;;  %v23101_v56 = vpop.permute.xlu1 %835 }
  0xa0   :  { %3529 = vrot.lane.b32.xlu0 %v22936_v30, %s22735_s22  ;;  %3531 = vrot.lane.b32.xlu1 %v22947_v33, %s22735_s22 }
  0xa2   :  { %v826_v57 = vpop.permute.xlu1 %825  ;;  %v818_v58 = vpop.permute.xlu0 %817 }
  0xa3   :  { %v850_v59 = vsel %vm849_vm2, %v816_v50, %v818_v58  ;;  %v851_v60 = vsel %vm849_vm2, %v818_v58, %v23081_v49  ;;  %v855_v62 = vsel %vm849_vm2, %v826_v57, %v23091_v53  ;;  %v854_v63 = vsel %vm849_vm2, %v23093_v54, %v826_v57  ;;  %v23253_v57 = vld [vmem:[%s26448_s1 + $0x18] sm:$0xff] }
  0xa4   :  { %3527 = vrot.lane.b32.xlu0 %v22945_v32, %s22735_s22  ;;  %20735 = vmatprep.subr.msk.mxu0 %vm146_vm0, %v851_v60 }
  0xa5   :  { %1493 = vrot.lane.b32.xlu1 %v23055_v46, %s22732_s26  ;;  %20736 = vmatpush1.msk.msra.mxu0 %vm146_vm0, %v850_v59 }
  0xa6   :  { %v842_v1 = vpop.permute.xlu1 %841  ;;  %20737 = vmatmul.mubr.msk.f32.vlgmr.msra.gmra.mrb[4].mxu0 %vm142_vm1, %v23113_v61  ;;  %20741 = vmatprep.subr.msk.mxu0 %vm146_vm0, %v855_v62  ;;  %v834_v2 = vpop.permute.xlu0 %833 }
  0xa7   :  { %20742 = vmatpush1.msk.msra.mxu0 %vm146_vm0, %v854_v63  ;;  %v859_v3 = vsel %vm849_vm2, %v834_v2, %v23101_v56  ;;  %1107 = vmatprep.mubr.f32.mxu0 %v22730_v0  ;;  %v858_v4 = vsel %vm849_vm2, %v23099_v55, %v834_v2 }
  0xa8   :  { %4177 = vrot.lane.b32.xlu0 %v22926_v29, %s22736_s30  ;;  %20747 = vmatprep.subr.msk.mxu0 %vm146_vm0, %v859_v3 }
  0xa9   :  { %4179 = vrot.lane.b32.xlu1 %v22890_v17, %s22736_s30 }
  0xaa   :  { %v23139_v5 = vpop.permute.xlu1 %839  ;;  %20743 = vmatmul.mubr.msk.f32.vlgmr.msra.gmra.mrb[6].mxu0 %vm142_vm1, %v23113_v61  ;;  %v23143_v6 = vpop.permute.xlu0 %843 }
  0xab   :  { %20748 = vmatpush1.msk.msra.mxu0 %vm146_vm0, %v858_v4  ;;  %v863_v7 = vsel %vm849_vm2, %v842_v1, %v23143_v6  ;;  %1249 = vmatprep.mubr.f32.mxu0 %v22730_v0  ;;  %v862_v8 = vsel %vm849_vm2, %v23139_v5, %v842_v1 }
  0xac   :  { %4175 = vrot.lane.b32.xlu0 %v22892_v18, %s22736_s30  ;;  %20753 = vmatprep.subr.msk.mxu0 %vm146_vm0, %v863_v7 }
  0xad   :  { %1501 = vrot.lane.b32.xlu1 %v23065_v47, %s22732_s26 }
  0xae   :  { %v23156_v9 = vpop.permute.xlu1 %1491  ;;  %20749 = vmatmul.mubr.msk.f32.vlgmr.msra.gmra.mrb[0].mxu0 %vm142_vm1, %v23113_v61  ;;  %v1490_v10 = vpop.permute.xlu0 %1489 }
  0xaf   :  { %20754 = vmatpush1.msk.msra.mxu0 %vm146_vm0, %v862_v8  ;;  %v1523_v11 = vsel %vm1521_vm3, %v1490_v10, %v23156_v9  ;;  %1391 = vmatprep.mubr.f32.mxu0 %v22730_v0 }
  0xb0   :  { %4185 = vrot.lane.b32.xlu0 %v22924_v28, %s22736_s30  ;;  %20760 = vmatprep.subr.msk.mxu0 %vm146_vm0, %v1523_v11 }
  0xb1   :  { %4187 = vrot.lane.b32.xlu1 %v22898_v19, %s22736_s30 }
  0xb2   :  { %v1498_v12 = vpop.permute.xlu1 %1497  ;;  %v1488_v13 = vpop.permute.xlu0 %1487  ;;  %20755 = vmatmul.mubr.msk.f32.vlgmr.msra.gmra.mrb[2].mxu0 %vm142_vm1, %v23113_v61 }
  0xb3   :  { %v1522_v14 = vsel %vm1521_vm3, %v1488_v13, %v1490_v10  ;;  %1637 = vmatprep.mubr.f32.mxu0 %v22730_v0 }
  0xb4   :  { %4183 = vrot.lane.b32.xlu0 %v22900_v20, %s22736_s30  ;;  %20761 = vmatpush1.msk.msra.mxu0 %vm146_vm0, %v1522_v14 }
  0xb5   :  { %1509 = vrot.lane.b32.xlu1 %v23075_v48, %s22732_s26 }
  0xb6   :  { %v23183_v16 = vpop.permute.xlu1 %1495  ;;  %v23185_v21 = vpop.permute.xlu0 %1499  ;;  %20762 = vmatmul.mubr.msk.f32.vlgmr.msra.gmra.mrb[4].mxu0 %vm142_vm1, %v23176_v15 }
  0xb7   :  { %v1526_v22 = vsel %vm1521_vm3, %v23183_v16, %v1498_v12  ;;  %v1527_v23 = vsel %vm1521_vm3, %v1498_v12, %v23185_v21  ;;  %1779 = vmatprep.mubr.f32.mxu0 %v22730_v0 }
  0xb8   :  { %4193 = vrot.lane.b32.xlu0 %v22938_v31, %s22736_s30  ;;  %20766 = vmatprep.subr.msk.mxu0 %vm146_vm0, %v1527_v23 }
  0xb9   :  { %4195 = vrot.lane.b32.xlu1 %v22913_v25, %s22736_s30  ;;  %20767 = vmatpush1.msk.msra.mxu0 %vm146_vm0, %v1526_v22 }
  0xba   :  { %v23200_v26 = vpop.permute.xlu1 %1507  ;;  %v1506_v27 = vpop.permute.xlu0 %1505  ;;  %20768 = vmatmul.mubr.msk.f32.vlgmr.msra.gmra.mrb[6].mxu0 %vm142_vm1, %v23176_v15 }
  0xbb   :  { %v1531_v34 = vsel %vm1521_vm3, %v1506_v27, %v23200_v26  ;;  %1921 = vmatprep.mubr.f32.mxu0 %v22730_v0 }
  0xbc   :  { %4191 = vrot.lane.b32.xlu0 %v22911_v24, %s22736_s30  ;;  %20772 = vmatprep.subr.msk.mxu0 %vm146_vm0, %v1531_v34 }
  0xbd   :  { %1517 = vrot.lane.b32.xlu1 %v23087_v51, %s22732_s26 }
  0xbe   :  { %v1514_v35 = vpop.permute.xlu1 %1513  ;;  %v23212_v36 = vpop.permute.xlu0 %1503 }
  0xbf   :  { %v1530_v37 = vsel %vm1521_vm3, %v23212_v36, %v1506_v27 }
  0xc0   :  { %20773 = vmatpush1.msk.msra.mxu0 %vm146_vm0, %v1530_v37  ;;  %1519 = vrot.lane.b32.xlu0 %v23089_v52, %s22732_s26 }
  0xc1   :  { %4201 = vrot.lane.b32.xlu1 %v22936_v30, %s22736_s30  ;;  %20774 = vmatmul.mubr.msk.f32.vlgmr.msra.gmra.mrb[0].mxu0 %vm142_vm1, %v23176_v15 }
  0xc2   :  { %v23223_v38 = vpop.permute.xlu1 %1511  ;;  %v23225_v39 = vpop.permute.xlu0 %1515  ;;  %2063 = vmatprep.mubr.f32.mxu0 %v22730_v0 }
  0xc3   :  { %v1534_v40 = vsel %vm1521_vm3, %v23223_v38, %v1514_v35  ;;  %v1535_v41 = vsel %vm1521_vm3, %v1514_v35, %v23225_v39  ;;  %v23331_v35 = vld [vmem:[%s26448_s1 + $0x20] sm:$0xff] }
  0xc4   :  { %20778 = vmatprep.subr.msk.mxu0 %vm146_vm0, %v1535_v41  ;;  %4203 = vrot.lane.b32.xlu0 %v22947_v33, %s22736_s30 }
  0xc5   :  { %4199 = vrot.lane.b32.xlu1 %v22945_v32, %s22736_s30  ;;  %20779 = vmatpush1.msk.msra.mxu0 %vm146_vm0, %v1534_v40 }
  0xc6   :  { %v23238_v42 = vpop.permute.xlu1 %2163  ;;  %v2162_v43 = vpop.permute.xlu0 %2161  ;;  %20780 = vmatmul.mubr.msk.f32.vlgmr.msra.gmra.mrb[2].mxu0 %vm142_vm1, %v23176_v15 }
  0xc7   :  { %v2195_v44 = vsel %vm2193_vm4, %v2162_v43, %v23238_v42  ;;  %2309 = vmatprep.mubr.f32.mxu0 %v22730_v0 }
  0xc8   :  { %20785 = vmatprep.subr.msk.mxu0 %vm146_vm0, %v2195_v44  ;;  %2165 = vrot.lane.b32.xlu0 %v23055_v46, %s22733_s27 }
  0xc9   :  { %4849 = vrot.lane.b32.xlu1 %v22926_v29, %s22737_s19 }
  0xca   :  { %v2170_v45 = vpop.permute.xlu1 %2169  ;;  %v2160_v50 = vpop.permute.xlu0 %2159 }
  0xcb   :  { %v2194_v58 = vsel %vm2193_vm4, %v2160_v50, %v2162_v43 }
  0xcc   :  { %20786 = vmatpush1.msk.msra.mxu0 %vm146_vm0, %v2194_v58  ;;  %4851 = vrot.lane.b32.xlu0 %v22890_v17, %s22737_s19 }
  0xcd   :  { %4847 = vrot.lane.b32.xlu1 %v22892_v18, %s22737_s19  ;;  %20787 = vmatmul.mubr.msk.f32.vlgmr.msra.gmra.mrb[4].mxu0 %vm142_vm1, %v23253_v57 }
  0xce   :  { %v23263_v59 = vpop.permute.xlu1 %2167  ;;  %v23265_v60 = vpop.permute.xlu0 %2171  ;;  %2451 = vmatprep.mubr.f32.mxu0 %v22730_v0 }
  0xcf   :  { %v2198_v62 = vsel %vm2193_vm4, %v23263_v59, %v2170_v45  ;;  %v2199_v63 = vsel %vm2193_vm4, %v2170_v45, %v23265_v60 }
  0xd0   :  { %20791 = vmatprep.subr.msk.mxu0 %vm146_vm0, %v2199_v63  ;;  %2173 = vrot.lane.b32.xlu0 %v23065_v47, %s22733_s27 }
  0xd1   :  { %4857 = vrot.lane.b32.xlu1 %v22924_v28, %s22737_s19  ;;  %20792 = vmatpush1.msk.msra.mxu0 %vm146_vm0, %v2198_v62 }
  0xd2   :  { %v23278_v1 = vpop.permute.xlu1 %2179  ;;  %v2178_v2 = vpop.permute.xlu0 %2177  ;;  %20793 = vmatmul.mubr.msk.f32.vlgmr.msra.gmra.mrb[6].mxu0 %vm142_vm1, %v23253_v57 }
  0xd3   :  { %v2203_v3 = vsel %vm2193_vm4, %v2178_v2, %v23278_v1  ;;  %2593 = vmatprep.mubr.f32.mxu0 %v22730_v0 }
  0xd4   :  { %20797 = vmatprep.subr.msk.mxu0 %vm146_vm0, %v2203_v3  ;;  %4859 = vrot.lane.b32.xlu0 %v22898_v19, %s22737_s19 }
  0xd5   :  { %4855 = vrot.lane.b32.xlu1 %v22900_v20, %s22737_s19 }
  0xd6   :  { %v2186_v4 = vpop.permute.xlu1 %2185  ;;  %v23290_v7 = vpop.permute.xlu0 %2175 }
  0xd7   :  { %v2202_v8 = vsel %vm2193_vm4, %v23290_v7, %v2178_v2 }
  0xd8   :  { %20798 = vmatpush1.msk.msra.mxu0 %vm146_vm0, %v2202_v8  ;;  %2181 = vrot.lane.b32.xlu0 %v23075_v48, %s22733_s27 }
  0xd9   :  { %4865 = vrot.lane.b32.xlu1 %v22938_v31, %s22737_s19  ;;  %20799 = vmatmul.mubr.msk.f32.vlgmr.msra.gmra.mrb[0].mxu0 %vm142_vm1, %v23253_v57 }
  0xda   :  { %v23301_v10 = vpop.permute.xlu1 %2183  ;;  %v23303_v11 = vpop.permute.xlu0 %2187  ;;  %2735 = vmatprep.mubr.f32.mxu0 %v22730_v0 }
  0xdb   :  { %v2206_v12 = vsel %vm2193_vm4, %v23301_v10, %v2186_v4  ;;  %v2207_v13 = vsel %vm2193_vm4, %v2186_v4, %v23303_v11 }
  0xdc   :  { %20803 = vmatprep.subr.msk.mxu0 %vm146_vm0, %v2207_v13  ;;  %4867 = vrot.lane.b32.xlu0 %v22913_v25, %s22737_s19 }
  0xdd   :  { %4863 = vrot.lane.b32.xlu1 %v22911_v24, %s22737_s19  ;;  %20804 = vmatpush1.msk.msra.mxu0 %vm146_vm0, %v2206_v12 }
  0xde   :  { %v23316_v14 = vpop.permute.xlu1 %2835  ;;  %v2834_v22 = vpop.permute.xlu0 %2833  ;;  %20805 = vmatmul.mubr.msk.f32.vlgmr.msra.gmra.mrb[2].mxu0 %vm142_vm1, %v23253_v57 }
  0xdf   :  { %v2867_v23 = vsel %vm2865_vm5, %v2834_v22, %v23316_v14  ;;  %2981 = vmatprep.mubr.f32.mxu0 %v22730_v0 }
  0xe0   :  { %20810 = vmatprep.subr.msk.mxu0 %vm146_vm0, %v2867_v23  ;;  %2189 = vrot.lane.b32.xlu0 %v23087_v51, %s22733_s27 }
  0xe1   :  { %2191 = vrot.lane.b32.xlu1 %v23089_v52, %s22733_s27 }
  0xe2   :  { %v2842_v27 = vpop.permute.xlu1 %2841  ;;  %v2832_v34 = vpop.permute.xlu0 %2831 }
  0xe3   :  { %v2866_v37 = vsel %vm2865_vm5, %v2832_v34, %v2834_v22 }
  0xe4   :  { %20811 = vmatpush1.msk.msra.mxu0 %vm146_vm0, %v2866_v37  ;;  %4873 = vrot.lane.b32.xlu0 %v22936_v30, %s22737_s19 }
  0xe5   :  { %4875 = vrot.lane.b32.xlu1 %v22947_v33, %s22737_s19  ;;  %20812 = vmatmul.mubr.msk.f32.vlgmr.msra.gmra.mrb[4].mxu0 %vm142_vm1, %v23331_v35 }
  0xe6   :  { %v23341_v40 = vpop.permute.xlu1 %2839  ;;  %v23343_v41 = vpop.permute.xlu0 %2843  ;;  %3123 = vmatprep.mubr.f32.mxu0 %v22730_v0 }
  0xe7   :  { %v2870_v43 = vsel %vm2865_vm5, %v23341_v40, %v2842_v27  ;;  %v2871_v44 = vsel %vm2865_vm5, %v2842_v27, %v23343_v41 }
  0xe8   :  { %20816 = vmatprep.subr.msk.mxu0 %vm146_vm0, %v2871_v44  ;;  %4871 = vrot.lane.b32.xlu0 %v22945_v32, %s22737_s19 }
  0xe9   :  { %2837 = vrot.lane.b32.xlu1 %v23055_v46, %s22734_s5  ;;  %20817 = vmatpush1.msk.msra.mxu0 %vm146_vm0, %v2870_v43  ;;  %v23417_v43 = vld [vmem:[%s26448_s1 + $0x28] sm:$0xff] }
  0xea   :  { %v23356_v45 = vpop.permute.xlu1 %2851  ;;  %v2850_v50 = vpop.permute.xlu0 %2849  ;;  %20818 = vmatmul.mubr.msk.f32.vlgmr.msra.gmra.mrb[6].mxu0 %vm142_vm1, %v23331_v35 }
  0xeb   :  { %v2875_v58 = vsel %vm2865_vm5, %v2850_v50, %v23356_v45  ;;  %3265 = vmatprep.mubr.f32.mxu0 %v22730_v0 }
  0xec   :  { %20822 = vmatprep.subr.msk.mxu0 %vm146_vm0, %v2875_v58  ;;  %5521 = vrot.lane.b32.xlu0 %v22926_v29, %s22738_s28 }
  0xed   :  { %5523 = vrot.lane.b32.xlu1 %v22890_v17, %s22738_s28 }
  0xee   :  { %v2858_v62 = vpop.permute.xlu1 %2857  ;;  %v23368_v63 = vpop.permute.xlu0 %2847 }
  0xef   :  { %v2874_v2 = vsel %vm2865_vm5, %v23368_v63, %v2850_v50 }
  0xf0   :  { %20823 = vmatpush1.msk.msra.mxu0 %vm146_vm0, %v2874_v2  ;;  %5519 = vrot.lane.b32.xlu0 %v22892_v18, %s22738_s28 }
  0xf1   :  { %2845 = vrot.lane.b32.xlu1 %v23065_v47, %s22734_s5  ;;  %20824 = vmatmul.mubr.msk.f32.vlgmr.msra.gmra.mrb[0].mxu0 %vm142_vm1, %v23331_v35 }
  0xf2   :  { %v23379_v3 = vpop.permute.xlu1 %2855  ;;  %v23381_v4 = vpop.permute.xlu0 %2859  ;;  %3407 = vmatprep.mubr.f32.mxu0 %v22730_v0 }
  0xf3   :  { %v2878_v8 = vsel %vm2865_vm5, %v23379_v3, %v2858_v62  ;;  %v2879_v12 = vsel %vm2865_vm5, %v2858_v62, %v23381_v4 }
  0xf4   :  { %20828 = vmatprep.subr.msk.mxu0 %vm146_vm0, %v2879_v12  ;;  %5529 = vrot.lane.b32.xlu0 %v22924_v28, %s22738_s28 }
  0xf5   :  { %5531 = vrot.lane.b32.xlu1 %v22898_v19, %s22738_s28  ;;  %20829 = vmatpush1.msk.msra.mxu0 %vm146_vm0, %v2878_v8 }
  0xf6   :  { %v3506_v13 = vpop.permute.xlu1 %3505  ;;  %v822_v22 = vpop.permute.xlu0 %821  ;;  %20830 = vmatmul.mubr.msk.f32.vlgmr.msra.gmra.mrb[2].mxu0 %vm142_vm1, %v23331_v35 }
  0xf7   :  { %v852_v23 = vsel %vm849_vm2, %v23081_v49, %v822_v22  ;;  %v853_v27 = vsel %vm849_vm2, %v822_v22, %v23093_v54  ;;  %3653 = vmatprep.mubr.f32.mxu0 %v22730_v0 }
  0xf8   :  { %20738 = vmatprep.subr.msk.mxu1 %vm146_vm0, %v853_v27  ;;  %5527 = vrot.lane.b32.xlu0 %v22900_v20, %s22738_s28 }
  0xf9   :  { %2853 = vrot.lane.b32.xlu1 %v23075_v48, %s22734_s5  ;;  %20739 = vmatpush1.msk.msra.mxu1 %vm146_vm0, %v852_v23 }
  0xfa   :  { %v3504_v34 = vpop.permute.xlu1 %3503  ;;  %v23407_v37 = vpop.permute.xlu0 %3507  ;;  %20740 = vmatmul.mubr.msk.f32.vlgmr.msra.gmra.mrb[2].mxu1 %vm142_vm1, %v23113_v61 }
  0xfb   :  { %v3538_v49 = vsel %vm3537_vm6, %v3504_v34, %v3506_v13  ;;  %v3539_v54 = vsel %vm3537_vm6, %v3506_v13, %v23407_v37  ;;  %1178 = vmatprep.mubr.f32.mxu1 %v22730_v0 }
  0xfc   :  { %20835 = vmatprep.subr.msk.mxu0 %vm146_vm0, %v3539_v54  ;;  %5537 = vrot.lane.b32.xlu0 %v22938_v31, %s22738_s28 }
  0xfd   :  { %5539 = vrot.lane.b32.xlu1 %v22913_v25, %s22738_s28  ;;  %20836 = vmatpush1.msk.msra.mxu0 %vm146_vm0, %v3538_v49 }
  0xfe   :  { %v3514_v44 = vpop.permute.xlu1 %3513  ;;  %v830_v50 = vpop.permute.xlu0 %829  ;;  %20837 = vmatmul.mubr.msk.f32.vlgmr.msra.gmra.mrb[4].mxu0 %vm142_vm1, %v23417_v43 }
  0xff   :  { %v856_v58 = vsel %vm849_vm2, %v23091_v53, %v830_v50  ;;  %v857_v62 = vsel %vm849_vm2, %v830_v50, %v23099_v55  ;;  %3795 = vmatprep.mubr.f32.mxu0 %v22730_v0 }
 0x100   :  { %20744 = vmatprep.subr.msk.mxu1 %vm146_vm0, %v857_v62  ;;  %5535 = vrot.lane.b32.xlu0 %v22911_v24, %s22738_s28 }
 0x101   :  { %2861 = vrot.lane.b32.xlu1 %v23087_v51, %s22734_s5  ;;  %20745 = vmatpush1.msk.msra.mxu1 %vm146_vm0, %v856_v58 }
 0x102   :  { %v23439_v2 = vpop.permute.xlu1 %3511  ;;  %v23441_v8 = vpop.permute.xlu0 %3515  ;;  %20746 = vmatmul.mubr.msk.f32.vlgmr.msra.gmra.mrb[6].mxu1 %vm142_vm1, %v23113_v61 }
 0x103   :  { %v3542_v53 = vsel %vm3537_vm6, %v23439_v2, %v3514_v44  ;;  %v3543_v55 = vsel %vm3537_vm6, %v3514_v44, %v23441_v8  ;;  %1320 = vmatprep.mubr.f32.mxu1 %v22730_v0 }
 0x104   :  { %20841 = vmatprep.subr.msk.mxu0 %vm146_vm0, %v3543_v55  ;;  %2863 = vrot.lane.b32.xlu0 %v23089_v52, %s22734_s5 }
 0x105   :  { %5545 = vrot.lane.b32.xlu1 %v22936_v30, %s22738_s28  ;;  %20842 = vmatpush1.msk.msra.mxu0 %vm146_vm0, %v3542_v53 }
 0x106   :  { %v3522_v12 = vpop.permute.xlu1 %3521  ;;  %v838_v13 = vpop.permute.xlu0 %837  ;;  %20843 = vmatmul.mubr.msk.f32.vlgmr.msra.gmra.mrb[6].mxu0 %vm142_vm1, %v23417_v43 }
 0x107   :  { %v860_v22 = vsel %vm849_vm2, %v23101_v56, %v838_v13  ;;  %v861_v23 = vsel %vm849_vm2, %v838_v13, %v23139_v5  ;;  %3937 = vmatprep.mubr.f32.mxu0 %v22730_v0 }
 0x108   :  { %20750 = vmatprep.subr.msk.mxu1 %vm146_vm0, %v861_v23  ;;  %5547 = vrot.lane.b32.xlu0 %v22947_v33, %s22738_s28 }
 0x109   :  { %5543 = vrot.lane.b32.xlu1 %v22945_v32, %s22738_s28  ;;  %20751 = vmatpush1.msk.msra.mxu1 %vm146_vm0, %v860_v22 }
 0x10a   :  { %v23469_v27 = vpop.permute.xlu1 %3519  ;;  %v23471_v34 = vpop.permute.xlu0 %3523  ;;  %20752 = vmatmul.mubr.msk.f32.vlgmr.msra.gmra.mrb[8].mxu1 %vm142_vm1, %v23113_v61 }
 0x10b   :  { %v3546_v56 = vsel %vm3537_vm6, %v23469_v27, %v3522_v12  ;;  %v3547_v5 = vsel %vm3537_vm6, %v3522_v12, %v23471_v34  ;;  %1462 = vmatprep.mubr.f32.mxu1 %v22730_v0 }
 0x10c   :  { %20847 = vmatprep.subr.msk.mxu0 %vm146_vm0, %v3547_v5  ;;  %3509 = vrot.lane.b32.xlu0 %v23055_v46, %s22735_s22 }
 0x10d   :  { %6193 = vrot.lane.b32.xlu1 %v22926_v29, %s22739_s18  ;;  %20848 = vmatpush1.msk.msra.mxu0 %vm146_vm0, %v3546_v56 }
 0x10e   :  { %v846_v49 = vpop.permute.xlu0 %845  ;;  %v848_v54 = vpop.permute.xlu1 %847  ;;  %20849 = vmatmul.mubr.msk.f32.vlgmr.msra.gmra.mrb[0].mxu0 %vm142_vm1, %v23417_v43 }
 0x10f   :  { %v864_v44 = vsel %vm849_vm2, %v23143_v6, %v846_v49  ;;  %v865_v50 = vsel %vm849_vm2, %v846_v49, %v848_v54  ;;  %4079 = vmatprep.mubr.f32.mxu0 %v22730_v0  ;;  %v23544_v49 = vld [vmem:[%s26448_s1 + $0x30] sm:$0xff] }
 0x110   :  { %6195 = vrot.lane.b32.xlu0 %v22890_v17, %s22739_s18  ;;  %20756 = vmatprep.subr.msk.mxu1 %vm146_vm0, %v865_v50 }
 0x111   :  { %6191 = vrot.lane.b32.xlu1 %v22892_v18, %s22739_s18  ;;  %20757 = vmatpush1.msk.msra.mxu1 %vm146_vm0, %v864_v44 }
 0x112   :  { %v3530_v58 = vpop.permute.xlu0 %3529  ;;  %v23498_v62 = vpop.permute.xlu1 %3531  ;;  %20758 = vmatmul.mubr.msk.f32.vlgmr.msra.gmra.mrb[10].mxu1 %vm142_vm1, %v23113_v61 }
 0x113   :  { %v3551_v6 = vsel %vm3537_vm6, %v3530_v58, %v23498_v62  ;;  %1708 = vmatprep.mubr.f32.mxu1 %v22730_v0 }
 0x114   :  { %3517 = vrot.lane.b32.xlu0 %v23065_v47, %s22735_s22  ;;  %20853 = vmatprep.subr.msk.mxu0 %vm146_vm0, %v3551_v6 }
 0x115   :  { %6201 = vrot.lane.b32.xlu1 %v22924_v28, %s22739_s18 }
 0x116   :  { %v23510_v53 = vpop.permute.xlu0 %3527 }
 0x117   :  { %v3550_v55 = vsel %vm3537_vm6, %v23510_v53, %v3530_v58  ;;  %v1494_v12 = vpop.permute.xlu1 %1493 }
 0x118   :  { %v1524_v61 = vsel %vm1521_vm3, %v23156_v9, %v1494_v12  ;;  %6203 = vrot.lane.b32.xlu0 %v22898_v19, %s22739_s18  ;;  %v1525_v13 = vsel %vm1521_vm3, %v1494_v12, %v23183_v16  ;;  %20854 = vmatpush1.msk.msra.mxu0 %vm146_vm0, %v3550_v55 }
 0x119   :  { %6199 = vrot.lane.b32.xlu1 %v22900_v20, %s22739_s18  ;;  %20763 = vmatprep.subr.msk.mxu1 %vm146_vm0, %v1525_v13 }
 0x11a   :  { %20764 = vmatpush1.msk.msra.mxu1 %vm146_vm0, %v1524_v61  ;;  %v4178_v22 = vpop.permute.xlu0 %4177  ;;  %20855 = vmatmul.mubr.msk.f32.vlgmr.msra.gmra.mrb[2].mxu0 %vm142_vm1, %v23417_v43 }
 0x11b   :  { %v23527_v9 = vpop.permute.xlu1 %4179  ;;  %20765 = vmatmul.mubr.msk.f32.vlgmr.msra.gmra.mrb[2].mxu1 %vm142_vm1, %v23176_v15  ;;  %4325 = vmatprep.mubr.f32.mxu0 %v22730_v0 }
 0x11c   :  { %3525 = vrot.lane.b32.xlu0 %v23075_v48, %s22735_s22  ;;  %v4211_v16 = vsel %vm4209_vm7, %v4178_v22, %v23527_v9  ;;  %1850 = vmatprep.mubr.f32.mxu1 %v22730_v0 }
 0x11d   :  { %6209 = vrot.lane.b32.xlu1 %v22938_v31, %s22739_s18  ;;  %20860 = vmatprep.subr.msk.mxu0 %vm146_vm0, %v4211_v16 }
 0x11e   :  { %v4176_v23 = vpop.permute.xlu0 %4175 }
 0x11f   :  { %v4210_v56 = vsel %vm4209_vm7, %v4176_v23, %v4178_v22  ;;  %v1502_v5 = vpop.permute.xlu1 %1501 }
 0x120   :  { %v1528_v54 = vsel %vm1521_vm3, %v23185_v21, %v1502_v5  ;;  %6211 = vrot.lane.b32.xlu0 %v22913_v25, %s22739_s18  ;;  %v1529_v44 = vsel %vm1521_vm3, %v1502_v5, %v23212_v36  ;;  %20861 = vmatpush1.msk.msra.mxu0 %vm146_vm0, %v4210_v56 }
 0x121   :  { %6207 = vrot.lane.b32.xlu1 %v22911_v24, %s22739_s18  ;;  %20769 = vmatprep.subr.msk.mxu1 %vm146_vm0, %v1529_v44 }
 0x122   :  { %20770 = vmatpush1.msk.msra.mxu1 %vm146_vm0, %v1528_v54  ;;  %v4186_v50 = vpop.permute.xlu0 %4185  ;;  %20862 = vmatmul.mubr.msk.f32.vlgmr.msra.gmra.mrb[4].mxu0 %vm142_vm1, %v23544_v49 }
 0x123   :  { %v23559_v21 = vpop.permute.xlu1 %4187  ;;  %20771 = vmatmul.mubr.msk.f32.vlgmr.msra.gmra.mrb[6].mxu1 %vm142_vm1, %v23176_v15  ;;  %4467 = vmatprep.mubr.f32.mxu0 %v22730_v0 }
 0x124   :  { %3533 = vrot.lane.b32.xlu0 %v23087_v51, %s22735_s22  ;;  %v4215_v24 = vsel %vm4209_vm7, %v4186_v50, %v23559_v21  ;;  %1992 = vmatprep.mubr.f32.mxu1 %v22730_v0 }
 0x125   :  { %3535 = vrot.lane.b32.xlu1 %v23089_v52, %s22735_s22  ;;  %20866 = vmatprep.subr.msk.mxu0 %vm146_vm0, %v4215_v24  ;;  %s22740_s22 = smov 64  }
 0x126   :  { %v23572_v36 = vpop.permute.xlu0 %4183 }
 0x127   :  { %v4214_v58 = vsel %vm4209_vm7, %v23572_v36, %v4186_v50  ;;  %v1510_v6 = vpop.permute.xlu1 %1509 }
 0x128   :  { %v1532_v55 = vsel %vm1521_vm3, %v23200_v26, %v1510_v6  ;;  %6217 = vrot.lane.b32.xlu0 %v22936_v30, %s22739_s18  ;;  %v1533_v12 = vsel %vm1521_vm3, %v1510_v6, %v23223_v38  ;;  %20867 = vmatpush1.msk.msra.mxu0 %vm146_vm0, %v4214_v58 }
 0x129   :  { %6219 = vrot.lane.b32.xlu1 %v22947_v33, %s22739_s18  ;;  %20775 = vmatprep.subr.msk.mxu1 %vm146_vm0, %v1533_v12 }
 0x12a   :  { %20776 = vmatpush1.msk.msra.mxu1 %vm146_vm0, %v1532_v55  ;;  %v4194_v61 = vpop.permute.xlu0 %4193  ;;  %20868 = vmatmul.mubr.msk.f32.vlgmr.msra.gmra.mrb[6].mxu0 %vm142_vm1, %v23544_v49 }
 0x12b   :  { %v23589_v26 = vpop.permute.xlu1 %4195  ;;  %20777 = vmatmul.mubr.msk.f32.vlgmr.msra.gmra.mrb[8].mxu1 %vm142_vm1, %v23176_v15  ;;  %4609 = vmatprep.mubr.f32.mxu0 %v22730_v0 }
 0x12c   :  { %6215 = vrot.lane.b32.xlu0 %v22945_v32, %s22739_s18  ;;  %v4219_v33 = vsel %vm4209_vm7, %v4194_v61, %v23589_v26  ;;  %2134 = vmatprep.mubr.f32.mxu1 %v22730_v0  ;;  %v23613_v32 = vld [vmem:[#allocation2 + $0x80] sm:$0xff] }
 0x12d   :  { %4181 = vrot.lane.b32.xlu1 %v23055_v46, %s22736_s30  ;;  %20872 = vmatprep.subr.msk.mxu0 %vm146_vm0, %v4219_v33 }
 0x12e   :  { %v23602_v38 = vpop.permute.xlu0 %4191 }
 0x12f   :  { %v4218_v13 = vsel %vm4209_vm7, %v23602_v38, %v4194_v61  ;;  %v1518_v22 = vpop.permute.xlu1 %1517 }
 0x130   :  { %6865 = vrot.lane.b32.xlu0 %v22926_v29, %s22740_s22  ;;  %20873 = vmatpush1.msk.msra.mxu0 %vm146_vm0, %v4218_v13  ;;  %v1536_v56 = vsel %vm1521_vm3, %v23225_v39, %v1518_v22 }
 0x131   :  { %6867 = vrot.lane.b32.xlu1 %v22890_v17, %s22740_s22  ;;  %20874 = vmatmul.mubr.msk.f32.vlgmr.msra.gmra.mrb[0].mxu0 %vm142_vm1, %v23544_v49 }
 0x132   :  { %v1520_v0 = vpop.permute.xlu0 %1519  ;;  %4751 = vmatprep.mubr.f32.mxu0 %v23613_v32 }
 0x133   :  { %v1537_v16 = vsel %vm1521_vm3, %v1518_v22, %v1520_v0  ;;  %v4202_v23 = vpop.permute.xlu1 %4201  ;;  %v23713_v22 = vld [vmem:[#allocation2 + $0x70] sm:$0x7] }
 0x134   :  { %6863 = vrot.lane.b32.xlu0 %v22892_v18, %s22740_s22  ;;  %20781 = vmatprep.subr.msk.mxu1 %vm146_vm0, %v1537_v16 }
 0x135   :  { %4189 = vrot.lane.b32.xlu1 %v23065_v47, %s22736_s30  ;;  %20782 = vmatpush1.msk.msra.mxu1 %vm146_vm0, %v1536_v56 }
 0x136   :  { %v23625_v17 = vpop.permute.xlu0 %4203  ;;  %20783 = vmatmul.mubr.msk.f32.vlgmr.msra.gmra.mrb[10].mxu1 %vm142_vm1, %v23176_v15 }
 0x137   :  { %v23629_v29 = vpop.permute.xlu1 %4199  ;;  %v4223_v39 = vsel %vm4209_vm7, %v4202_v23, %v23625_v17  ;;  %2380 = vmatprep.mubr.f32.mxu1 %v23613_v32 }
 0x138   :  { %v4222_v18 = vsel %vm4209_vm7, %v23629_v29, %v4202_v23  ;;  %6873 = vrot.lane.b32.xlu0 %v22924_v28, %s22740_s22  ;;  %20878 = vmatprep.subr.msk.mxu0 %vm146_vm0, %v4223_v39  ;;  %v23737_v23 = vld [vmem:[#allocation2 + $0x8] sm:$0x7] }
 0x139   :  { %6875 = vrot.lane.b32.xlu1 %v22898_v19, %s22740_s22  ;;  %20879 = vmatpush1.msk.msra.mxu0 %vm146_vm0, %v4222_v18 }
 0x13a   :  { %v2166_v15 = vpop.permute.xlu0 %2165  ;;  %20880 = vmatmul.mubr.msk.f32.vlgmr.msra.gmra.mrb[2].mxu0 %vm142_vm1, %v23544_v49 }
 0x13b   :  { %v2196_v5 = vsel %vm2193_vm4, %v23238_v42, %v2166_v15  ;;  %v4850_v54 = vpop.permute.xlu1 %4849  ;;  %v2197_v44 = vsel %vm2193_vm4, %v2166_v15, %v23263_v59  ;;  %4997 = vmatprep.mubr.f32.mxu0 %v23613_v32  ;;  %v23748_v15 = vld [vmem:[#allocation2 + $0x10] sm:$0x7] }
 0x13c   :  { %6871 = vrot.lane.b32.xlu0 %v22900_v20, %s22740_s22  ;;  %20788 = vmatprep.subr.msk.mxu1 %vm146_vm0, %v2197_v44  ;;  %v23664_v20 = vld [vmem:[%s26448_s1 + $0x38] sm:$0xff] }
 0x13d   :  { %4197 = vrot.lane.b32.xlu1 %v23075_v48, %s22736_s30  ;;  %20789 = vmatpush1.msk.msra.mxu1 %vm146_vm0, %v2196_v5  ;;  %v23752_v5 = vld [vmem:[#allocation2] sm:$0x7] }
 0x13e   :  { %v23655_v19 = vpop.permute.xlu0 %4851  ;;  %20790 = vmatmul.mubr.msk.f32.vlgmr.msra.gmra.mrb[2].mxu1 %vm142_vm1, %v23253_v57 }
 0x13f   :  { %v4848_v28 = vpop.permute.xlu1 %4847  ;;  %v4883_v42 = vsel %vm4881_vm8, %v4850_v54, %v23655_v19  ;;  %2522 = vmatprep.mubr.f32.mxu1 %v23613_v32 }
 0x140   :  { %v4882_v59 = vsel %vm4881_vm8, %v4848_v28, %v4850_v54  ;;  %6881 = vrot.lane.b32.xlu0 %v22938_v31, %s22740_s22  ;;  %20885 = vmatprep.subr.msk.mxu0 %vm146_vm0, %v4883_v42  ;;  %v23681_v31 = vld [vmem:[#allocation2 + $0x40] sm:$0x7]  ;;  %v23767_v28 = vld [vmem:[#allocation2 + $0x28] sm:$0x7] }
 0x141   :  { %6883 = vrot.lane.b32.xlu1 %v22913_v25, %s22740_s22  ;;  %20886 = vmatpush1.msk.msra.mxu0 %vm146_vm0, %v4882_v59 }
 0x142   :  { %v2174_v50 = vpop.permute.xlu0 %2173  ;;  %20887 = vmatmul.mubr.msk.f32.vlgmr.msra.gmra.mrb[4].mxu0 %vm142_vm1, %v23664_v20 }
 0x143   :  { %v2200_v24 = vsel %vm2193_vm4, %v23265_v60, %v2174_v50  ;;  %v4858_v58 = vpop.permute.xlu1 %4857  ;;  %v2201_v6 = vsel %vm2193_vm4, %v2174_v50, %v23290_v7  ;;  %5139 = vmatprep.mubr.f32.mxu0 %v23613_v32  ;;  %v23778_v50 = vld [vmem:[#allocation2 + $0x30] sm:$0x7] }
 0x144   :  { %6879 = vrot.lane.b32.xlu0 %v23681_v31, %s22740_s22  ;;  %20794 = vmatprep.subr.msk.mxu1 %vm146_vm0, %v2201_v6 }
 0x145   :  { %4205 = vrot.lane.b32.xlu1 %v23087_v51, %s22736_s30  ;;  %20795 = vmatpush1.msk.msra.mxu1 %vm146_vm0, %v2200_v24 }
 0x146   :  { %v23689_v25 = vpop.permute.xlu0 %4859  ;;  %20796 = vmatmul.mubr.msk.f32.vlgmr.msra.gmra.mrb[6].mxu1 %vm142_vm1, %v23253_v57 }
 0x147   :  { %v23693_v60 = vpop.permute.xlu1 %4855  ;;  %v4887_v7 = vsel %vm4881_vm8, %v4858_v58, %v23689_v25  ;;  %2664 = vmatprep.mubr.f32.mxu1 %v23613_v32 }
 0x148   :  { %v4886_v55 = vsel %vm4881_vm8, %v23693_v60, %v4858_v58  ;;  %4207 = vrot.lane.b32.xlu0 %v23089_v52, %s22736_s30  ;;  %20891 = vmatprep.subr.msk.mxu0 %vm146_vm0, %v4887_v7  ;;  %s22741_s30 = smov 63   ;;  %v23785_v58 = vld [vmem:[#allocation2 + $0x20] sm:$0x7]  ;;  %v23803_v7 = vld [vmem:[#allocation2 + $0x48] sm:$0x7] }
 0x149   :  { %6889 = vrot.lane.b32.xlu1 %v22936_v30, %s22740_s22  ;;  %20892 = vmatpush1.msk.msra.mxu0 %vm146_vm0, %v4886_v55  ;;  %v23718_v30 = vld [vmem:[#allocation2 + $0x60] sm:$0x7] }
 0x14a   :  { %v2182_v12 = vpop.permute.xlu0 %2181  ;;  %20893 = vmatmul.mubr.msk.f32.vlgmr.msra.gmra.mrb[6].mxu0 %vm142_vm1, %v23664_v20 }
 0x14b   :  { %v2204_v61 = vsel %vm2193_vm4, %v23278_v1, %v2182_v12  ;;  %v4866_v33 = vpop.permute.xlu1 %4865  ;;  %v2205_v13 = vsel %vm2193_vm4, %v2182_v12, %v23301_v10  ;;  %5281 = vmatprep.mubr.f32.mxu0 %v23613_v32 }
 0x14c   :  { %6891 = vrot.lane.b32.xlu0 %v23713_v22, %s22740_s22  ;;  %20800 = vmatprep.subr.msk.mxu1 %vm146_vm0, %v2205_v13  ;;  %v23816_v13 = vld [vmem:[#allocation2 + $0x50] sm:$0x7] }
 0x14d   :  { %6887 = vrot.lane.b32.xlu1 %v23718_v30, %s22740_s22  ;;  %20801 = vmatpush1.msk.msra.mxu1 %vm146_vm0, %v2204_v61 }
 0x14e   :  { %v23723_v1 = vpop.permute.xlu0 %4867  ;;  %20802 = vmatmul.mubr.msk.f32.vlgmr.msra.gmra.mrb[8].mxu1 %vm142_vm1, %v23253_v57 }
 0x14f   :  { %v23727_v10 = vpop.permute.xlu1 %4863  ;;  %v4891_v0 = vsel %vm4881_vm8, %v4866_v33, %v23723_v1  ;;  %2806 = vmatprep.mubr.f32.mxu1 %v23613_v32 }
 0x150   :  { %v4890_v16 = vsel %vm4881_vm8, %v23727_v10, %v4866_v33  ;;  %4853 = vrot.lane.b32.xlu0 %v23055_v46, %s22737_s19  ;;  %20897 = vmatprep.subr.msk.mxu0 %vm146_vm0, %v4891_v0 }
 0x151   :  { %7537 = vrot.lane.b32.xlu1 %v23737_v23, %s22741_s30  ;;  %20898 = vmatpush1.msk.msra.mxu0 %vm146_vm0, %v4890_v16 }
 0x152   :  { %v2190_v56 = vpop.permute.xlu0 %2189  ;;  %20899 = vmatmul.mubr.msk.f32.vlgmr.msra.gmra.mrb[0].mxu0 %vm142_vm1, %v23664_v20 }
 0x153   :  { %v2208_v39 = vsel %vm2193_vm4, %v23303_v11, %v2190_v56  ;;  %v2192_v18 = vpop.permute.xlu1 %2191  ;;  %5423 = vmatprep.mubr.f32.mxu0 %v23613_v32 }
 0x154   :  { %v2209_v46 = vsel %vm2193_vm4, %v2190_v56, %v2192_v18  ;;  %7539 = vrot.lane.b32.xlu0 %v23748_v15, %s22741_s30 }
 0x155   :  { %7535 = vrot.lane.b32.xlu1 %v23752_v5, %s22741_s30  ;;  %20806 = vmatprep.subr.msk.mxu1 %vm146_vm0, %v2209_v46 }
 0x156   :  { %20807 = vmatpush1.msk.msra.mxu1 %vm146_vm0, %v2208_v39  ;;  %v4874_v11 = vpop.permute.xlu0 %4873 }
 0x157   :  { %v23758_v54 = vpop.permute.xlu1 %4875  ;;  %20808 = vmatmul.mubr.msk.f32.vlgmr.msra.gmra.mrb[10].mxu1 %vm142_vm1, %v23253_v57 }
 0x158   :  { %4861 = vrot.lane.b32.xlu0 %v23065_v47, %s22737_s19  ;;  %v4895_v44 = vsel %vm4881_vm8, %v4874_v11, %v23758_v54  ;;  %3052 = vmatprep.mubr.f32.mxu1 %v23613_v32 }
 0x159   :  { %7545 = vrot.lane.b32.xlu1 %v23767_v28, %s22741_s30  ;;  %20903 = vmatprep.subr.msk.mxu0 %vm146_vm0, %v4895_v44  ;;  %v23871_v44 = vld [vmem:[#allocation2 + $0x18] sm:$0x7] }
 0x15a   :  { %v23772_v42 = vpop.permute.xlu0 %4871 }
 0x15b   :  { %v4894_v57 = vsel %vm4881_vm8, %v23772_v42, %v4874_v11  ;;  %v2838_v59 = vpop.permute.xlu1 %2837 }
 0x15c   :  { %v2868_v47 = vsel %vm2865_vm5, %v23316_v14, %v2838_v59  ;;  %7547 = vrot.lane.b32.xlu0 %v23778_v50, %s22741_s30  ;;  %v2869_v24 = vsel %vm2865_vm5, %v2838_v59, %v23341_v40  ;;  %20904 = vmatpush1.msk.msra.mxu0 %vm146_vm0, %v4894_v57 }
 0x15d   :  { %7543 = vrot.lane.b32.xlu1 %v23785_v58, %s22741_s30  ;;  %20813 = vmatprep.subr.msk.mxu1 %vm146_vm0, %v2869_v24 }
 0x15e   :  { %20814 = vmatpush1.msk.msra.mxu1 %vm146_vm0, %v2868_v47  ;;  %v5522_v14 = vpop.permute.xlu0 %5521  ;;  %20905 = vmatmul.mubr.msk.f32.vlgmr.msra.gmra.mrb[2].mxu0 %vm142_vm1, %v23664_v20 }
 0x15f   :  { %v23793_v6 = vpop.permute.xlu1 %5523  ;;  %20815 = vmatmul.mubr.msk.f32.vlgmr.msra.gmra.mrb[2].mxu1 %vm142_vm1, %v23331_v35  ;;  %5669 = vmatprep.mubr.f32.mxu0 %v23613_v32 }
 0x160   :  { %4869 = vrot.lane.b32.xlu0 %v23075_v48, %s22737_s19  ;;  %v5555_v40 = vsel %vm5553_vm9, %v5522_v14, %v23793_v6  ;;  %3194 = vmatprep.mubr.f32.mxu1 %v23613_v32  ;;  %v23812_v48 = vld [vmem:[%s26448_s1 + $0x40] sm:$0xff] }
 0x161   :  { %7553 = vrot.lane.b32.xlu1 %v23803_v7, %s22741_s30  ;;  %20910 = vmatprep.subr.msk.mxu0 %vm146_vm0, %v5555_v40 }
 0x162   :  { %v5520_v55 = vpop.permute.xlu0 %5519 }
 0x163   :  { %v5554_v12 = vsel %vm5553_vm9, %v5520_v55, %v5522_v14  ;;  %v2846_v61 = vpop.permute.xlu1 %2845 }
 0x164   :  { %v2872_v33 = vsel %vm2865_vm5, %v23343_v41, %v2846_v61  ;;  %7555 = vrot.lane.b32.xlu0 %v23816_v13, %s22741_s30  ;;  %v2873_v0 = vsel %vm2865_vm5, %v2846_v61, %v23368_v63  ;;  %20911 = vmatpush1.msk.msra.mxu0 %vm146_vm0, %v5554_v12  ;;  %v23894_v12 = vld [vmem:[#allocation2 + $0x38] sm:$0x7] }
 0x165   :  { %7551 = vrot.lane.b32.xlu1 %v23681_v31, %s22741_s30  ;;  %20819 = vmatprep.subr.msk.mxu1 %vm146_vm0, %v2873_v0 }
 0x166   :  { %20820 = vmatpush1.msk.msra.mxu1 %vm146_vm0, %v2872_v33  ;;  %v5530_v16 = vpop.permute.xlu0 %5529  ;;  %20912 = vmatmul.mubr.msk.f32.vlgmr.msra.gmra.mrb[4].mxu0 %vm142_vm1, %v23812_v48 }
 0x167   :  { %v23829_v41 = vpop.permute.xlu1 %5531  ;;  %20821 = vmatmul.mubr.msk.f32.vlgmr.msra.gmra.mrb[6].mxu1 %vm142_vm1, %v23331_v35  ;;  %5811 = vmatprep.mubr.f32.mxu0 %v23613_v32 }
 0x168   :  { %4877 = vrot.lane.b32.xlu0 %v23087_v51, %s22737_s19  ;;  %v5559_v63 = vsel %vm5553_vm9, %v5530_v16, %v23829_v41  ;;  %3336 = vmatprep.mubr.f32.mxu1 %v23613_v32  ;;  %v23848_v51 = vld [vmem:[#allocation2 + $0x68] sm:$0x7] }
 0x169   :  { %4879 = vrot.lane.b32.xlu1 %v23089_v52, %s22737_s19  ;;  %20916 = vmatprep.subr.msk.mxu0 %vm146_vm0, %v5559_v63  ;;  %s22742_s19 = smov 62  }
 0x16a   :  { %v23842_v56 = vpop.permute.xlu0 %5527 }
 0x16b   :  { %v5558_v39 = vsel %vm5553_vm9, %v23842_v56, %v5530_v16  ;;  %v2854_v18 = vpop.permute.xlu1 %2853 }
 0x16c   :  { %v2876_v46 = vsel %vm2865_vm5, %v23356_v45, %v2854_v18  ;;  %7561 = vrot.lane.b32.xlu0 %v23848_v51, %s22741_s30  ;;  %v2877_v11 = vsel %vm2865_vm5, %v2854_v18, %v23379_v3  ;;  %20917 = vmatpush1.msk.msra.mxu0 %vm146_vm0, %v5558_v39  ;;  %v23926_v18 = vld [vmem:[#allocation2 + $0x58] sm:$0x7] }
 0x16d   :  { %7563 = vrot.lane.b32.xlu1 %v23713_v22, %s22741_s30  ;;  %20825 = vmatprep.subr.msk.mxu1 %vm146_vm0, %v2877_v11  ;;  %v23940_v11 = vld [vmem:[%s26448_s1 + $0x48] sm:$0xff] }
 0x16e   :  { %20826 = vmatpush1.msk.msra.mxu1 %vm146_vm0, %v2876_v46  ;;  %v5538_v52 = vpop.permute.xlu0 %5537  ;;  %20918 = vmatmul.mubr.msk.f32.vlgmr.msra.gmra.mrb[6].mxu0 %vm142_vm1, %v23812_v48 }
 0x16f   :  { %v23861_v45 = vpop.permute.xlu1 %5539  ;;  %20827 = vmatmul.mubr.msk.f32.vlgmr.msra.gmra.mrb[8].mxu1 %vm142_vm1, %v23331_v35  ;;  %5953 = vmatprep.mubr.f32.mxu0 %v23613_v32 }
 0x170   :  { %7559 = vrot.lane.b32.xlu0 %v23718_v30, %s22741_s30  ;;  %v5563_v3 = vsel %vm5553_vm9, %v5538_v52, %v23861_v45  ;;  %3478 = vmatprep.mubr.f32.mxu1 %v23613_v32 }
 0x171   :  { %5525 = vrot.lane.b32.xlu1 %v23871_v44, %s22738_s28  ;;  %20922 = vmatprep.subr.msk.mxu0 %vm146_vm0, %v5563_v3 }
 0x172   :  { %v23876_v57 = vpop.permute.xlu0 %5535 }
 0x173   :  { %v5562_v59 = vsel %vm5553_vm9, %v23876_v57, %v5538_v52  ;;  %v2862_v47 = vpop.permute.xlu1 %2861 }
 0x174   :  { %8209 = vrot.lane.b32.xlu0 %v23737_v23, %s22742_s19  ;;  %20923 = vmatpush1.msk.msra.mxu0 %vm146_vm0, %v5562_v59  ;;  %v2880_v55 = vsel %vm2865_vm5, %v23381_v4, %v2862_v47 }
 0x175   :  { %8211 = vrot.lane.b32.xlu1 %v23748_v15, %s22742_s19  ;;  %20924 = vmatmul.mubr.msk.f32.vlgmr.msra.gmra.mrb[0].mxu0 %vm142_vm1, %v23812_v48 }
 0x176   :  { %v2864_v24 = vpop.permute.xlu0 %2863  ;;  %6095 = vmatprep.mubr.f32.mxu0 %v23613_v32 }
 0x177   :  { %v2881_v14 = vsel %vm2865_vm5, %v2862_v47, %v2864_v24  ;;  %v5546_v40 = vpop.permute.xlu1 %5545 }
 0x178   :  { %8207 = vrot.lane.b32.xlu0 %v23752_v5, %s22742_s19  ;;  %20831 = vmatprep.subr.msk.mxu1 %vm146_vm0, %v2881_v14  ;;  %v23960_v14 = vld [vmem:[#allocation2 + $0x78] sm:$0x7] }
 0x179   :  { %5533 = vrot.lane.b32.xlu1 %v23894_v12, %s22738_s28  ;;  %20832 = vmatpush1.msk.msra.mxu1 %vm146_vm0, %v2880_v55 }
 0x17a   :  { %v23899_v61 = vpop.permute.xlu0 %5547  ;;  %20833 = vmatmul.mubr.msk.f32.vlgmr.msra.gmra.mrb[10].mxu1 %vm142_vm1, %v23331_v35 }
 0x17b   :  { %v23903_v33 = vpop.permute.xlu1 %5543  ;;  %v5567_v4 = vsel %vm5553_vm9, %v5546_v40, %v23899_v61  ;;  %3724 = vmatprep.mubr.f32.mxu1 %v23613_v32 }
 0x17c   :  { %v5566_v0 = vsel %vm5553_vm9, %v23903_v33, %v5546_v40  ;;  %8217 = vrot.lane.b32.xlu0 %v23767_v28, %s22742_s19  ;;  %20928 = vmatprep.subr.msk.mxu0 %vm146_vm0, %v5567_v4  ;;  %v23976_v4 = vld [vmem:[#allocation2 + $0x80] sm:$0x7] }
 0x17d   :  { %8219 = vrot.lane.b32.xlu1 %v23778_v50, %s22742_s19  ;;  %20929 = vmatpush1.msk.msra.mxu0 %vm146_vm0, %v5566_v0 }
 0x17e   :  { %v3510_v35 = vpop.permute.xlu0 %3509  ;;  %20930 = vmatmul.mubr.msk.f32.vlgmr.msra.gmra.mrb[2].mxu0 %vm142_vm1, %v23812_v48 }
 0x17f   :  { %v3540_v16 = vsel %vm3537_vm6, %v23407_v37, %v3510_v35  ;;  %v6194_v63 = vpop.permute.xlu1 %6193  ;;  %v3541_v39 = vsel %vm3537_vm6, %v3510_v35, %v23439_v2  ;;  %6341 = vmatprep.mubr.f32.mxu0 %v23613_v32 }
 0x180   :  { %8215 = vrot.lane.b32.xlu0 %v23785_v58, %s22742_s19  ;;  %20838 = vmatprep.subr.msk.mxu1 %vm146_vm0, %v3541_v39 }
 0x181   :  { %5541 = vrot.lane.b32.xlu1 %v23926_v18, %s22738_s28  ;;  %20839 = vmatpush1.msk.msra.mxu1 %vm146_vm0, %v3540_v16 }
 0x182   :  { %v23931_v37 = vpop.permute.xlu0 %6195  ;;  %20840 = vmatmul.mubr.msk.f32.vlgmr.msra.gmra.mrb[2].mxu1 %vm142_vm1, %v23417_v43 }
 0x183   :  { %v6192_v2 = vpop.permute.xlu1 %6191  ;;  %v6227_v46 = vsel %vm6225_vm10, %v6194_v63, %v23931_v37  ;;  %3866 = vmatprep.mubr.f32.mxu1 %v23613_v32 }
 0x184   :  { %v6226_v52 = vsel %vm6225_vm10, %v6192_v2, %v6194_v63  ;;  %8225 = vrot.lane.b32.xlu0 %v23803_v7, %s22742_s19  ;;  %20935 = vmatprep.subr.msk.mxu0 %vm146_vm0, %v6227_v46 }
 0x185   :  { %8227 = vrot.lane.b32.xlu1 %v23816_v13, %s22742_s19  ;;  %20936 = vmatpush1.msk.msra.mxu0 %vm146_vm0, %v6226_v52 }
 0x186   :  { %v3518_v3 = vpop.permute.xlu0 %3517  ;;  %20937 = vmatmul.mubr.msk.f32.vlgmr.msra.gmra.mrb[4].mxu0 %vm142_vm1, %v23940_v11 }
 0x187   :  { %v3544_v59 = vsel %vm3537_vm6, %v23441_v8, %v3518_v3  ;;  %v6202_v47 = vpop.permute.xlu1 %6201  ;;  %v3545_v24 = vsel %vm3537_vm6, %v3518_v3, %v23469_v27  ;;  %6483 = vmatprep.mubr.f32.mxu0 %v23613_v32 }
 0x188   :  { %8223 = vrot.lane.b32.xlu0 %v23681_v31, %s22742_s19  ;;  %20844 = vmatprep.subr.msk.mxu1 %vm146_vm0, %v3545_v24 }
 0x189   :  { %5549 = vrot.lane.b32.xlu1 %v23960_v14, %s22738_s28  ;;  %20845 = vmatpush1.msk.msra.mxu1 %vm146_vm0, %v3544_v59 }
 0x18a   :  { %v23965_v40 = vpop.permute.xlu0 %6203  ;;  %20846 = vmatmul.mubr.msk.f32.vlgmr.msra.gmra.mrb[6].mxu1 %vm142_vm1, %v23417_v43 }
 0x18b   :  { %v23969_v8 = vpop.permute.xlu1 %6199  ;;  %v6231_v27 = vsel %vm6225_vm10, %v6202_v47, %v23965_v40  ;;  %4008 = vmatprep.mubr.f32.mxu1 %v23613_v32 }
 0x18c   :  { %v6230_v55 = vsel %vm6225_vm10, %v23969_v8, %v6202_v47  ;;  %5551 = vrot.lane.b32.xlu0 %v23976_v4, %s22738_s28  ;;  %20941 = vmatprep.subr.msk.mxu0 %vm146_vm0, %v6231_v27  ;;  %s22743_s28 = smov 61  }
 0x18d   :  { %8233 = vrot.lane.b32.xlu1 %v23848_v51, %s22742_s19  ;;  %20942 = vmatpush1.msk.msra.mxu0 %vm146_vm0, %v6230_v55 }
 0x18e   :  { %v3526_v0 = vpop.permute.xlu0 %3525  ;;  %20943 = vmatmul.mubr.msk.f32.vlgmr.msra.gmra.mrb[6].mxu0 %vm142_vm1, %v23940_v11 }
 0x18f   :  { %v3548_v35 = vsel %vm3537_vm6, %v23471_v34, %v3526_v0  ;;  %v6210_v16 = vpop.permute.xlu1 %6209  ;;  %v3549_v63 = vsel %vm3537_vm6, %v3526_v0, %v23510_v53  ;;  %6625 = vmatprep.mubr.f32.mxu0 %v23613_v32 }
 0x190   :  { %8235 = vrot.lane.b32.xlu0 %v23713_v22, %s22742_s19  ;;  %20850 = vmatprep.subr.msk.mxu1 %vm146_vm0, %v3549_v63 }
 0x191   :  { %8231 = vrot.lane.b32.xlu1 %v23718_v30, %s22742_s19  ;;  %20851 = vmatpush1.msk.msra.mxu1 %vm146_vm0, %v3548_v35 }
 0x192   :  { %v23997_v39 = vpop.permute.xlu0 %6211  ;;  %20852 = vmatmul.mubr.msk.f32.vlgmr.msra.gmra.mrb[8].mxu1 %vm142_vm1, %v23417_v43 }
 0x193   :  { %v24001_v34 = vpop.permute.xlu1 %6207  ;;  %v6235_v53 = vsel %vm6225_vm10, %v6210_v16, %v23997_v39  ;;  %4150 = vmatprep.mubr.f32.mxu1 %v23613_v32 }
 0x194   :  { %v6234_v2 = vsel %vm6225_vm10, %v24001_v34, %v6210_v16  ;;  %6197 = vrot.lane.b32.xlu0 %v23871_v44, %s22739_s18  ;;  %20947 = vmatprep.subr.msk.mxu0 %vm146_vm0, %v6235_v53 }
 0x195   :  { %8881 = vrot.lane.b32.xlu1 %v23737_v23, %s22743_s28  ;;  %20948 = vmatpush1.msk.msra.mxu0 %vm146_vm0, %v6234_v2 }
 0x196   :  { %v3534_v46 = vpop.permute.xlu0 %3533  ;;  %20949 = vmatmul.mubr.msk.f32.vlgmr.msra.gmra.mrb[0].mxu0 %vm142_vm1, %v23940_v11 }
 0x197   :  { %v3552_v52 = vsel %vm3537_vm6, %v23498_v62, %v3534_v46  ;;  %v3536_v3 = vpop.permute.xlu1 %3535  ;;  %6767 = vmatprep.mubr.f32.mxu0 %v23613_v32 }
 0x198   :  { %v3553_v59 = vsel %vm3537_vm6, %v3534_v46, %v3536_v3  ;;  %8883 = vrot.lane.b32.xlu0 %v23748_v15, %s22743_s28  ;;  %v24072_v46 = vld [vmem:[%s26448_s1 + $0x50] sm:$0xff]  ;;  %vm10257_vm6 = vcmask 261120  }
 0x199   :  { %8879 = vrot.lane.b32.xlu1 %v23752_v5, %s22743_s28  ;;  %20856 = vmatprep.subr.msk.mxu1 %vm146_vm0, %v3553_v59 }
 0x19a   :  { %20857 = vmatpush1.msk.msra.mxu1 %vm146_vm0, %v3552_v52  ;;  %v6218_v47 = vpop.permute.xlu0 %6217 }
 0x19b   :  { %v24026_v24 = vpop.permute.xlu1 %6219  ;;  %20858 = vmatmul.mubr.msk.f32.vlgmr.msra.gmra.mrb[10].mxu1 %vm142_vm1, %v23417_v43 }
 0x19c   :  { %6205 = vrot.lane.b32.xlu0 %v23894_v12, %s22739_s18  ;;  %v6239_v62 = vsel %vm6225_vm10, %v6218_v47, %v24026_v24  ;;  %4396 = vmatprep.mubr.f32.mxu1 %v23613_v32 }
 0x19d   :  { %8889 = vrot.lane.b32.xlu1 %v23767_v28, %s22743_s28  ;;  %20953 = vmatprep.subr.msk.mxu0 %vm146_vm0, %v6239_v62 }
 0x19e   :  { %v24038_v27 = vpop.permute.xlu0 %6215 }
 0x19f   :  { %v6238_v55 = vsel %vm6225_vm10, %v24038_v27, %v6218_v47  ;;  %v4182_v0 = vpop.permute.xlu1 %4181 }
 0x1a0   :  { %v4212_v43 = vsel %vm4209_vm7, %v23527_v9, %v4182_v0  ;;  %8891 = vrot.lane.b32.xlu0 %v23778_v50, %s22743_s28  ;;  %v4213_v35 = vsel %vm4209_vm7, %v4182_v0, %v23572_v36  ;;  %20954 = vmatpush1.msk.msra.mxu0 %vm146_vm0, %v6238_v55 }
 0x1a1   :  { %8887 = vrot.lane.b32.xlu1 %v23785_v58, %s22743_s28  ;;  %20863 = vmatprep.subr.msk.mxu1 %vm146_vm0, %v4213_v35 }
 0x1a2   :  { %20864 = vmatpush1.msk.msra.mxu1 %vm146_vm0, %v4212_v43  ;;  %v6866_v16 = vpop.permute.xlu0 %6865  ;;  %20955 = vmatmul.mubr.msk.f32.vlgmr.msra.gmra.mrb[2].mxu0 %vm142_vm1, %v23940_v11 }
 0x1a3   :  { %v24055_v9 = vpop.permute.xlu1 %6867  ;;  %20865 = vmatmul.mubr.msk.f32.vlgmr.msra.gmra.mrb[2].mxu1 %vm142_vm1, %v23544_v49  ;;  %7013 = vmatprep.mubr.f32.mxu0 %v23613_v32 }
 0x1a4   :  { %6213 = vrot.lane.b32.xlu0 %v23926_v18, %s22739_s18  ;;  %v6899_v36 = vsel %vm6897_vm11, %v6866_v16, %v24055_v9  ;;  %4538 = vmatprep.mubr.f32.mxu1 %v23613_v32 }
 0x1a5   :  { %8897 = vrot.lane.b32.xlu1 %v23803_v7, %s22743_s28  ;;  %20960 = vmatprep.subr.msk.mxu0 %vm146_vm0, %v6899_v36 }
 0x1a6   :  { %v6864_v63 = vpop.permute.xlu0 %6863 }
 0x1a7   :  { %v6898_v53 = vsel %vm6897_vm11, %v6864_v63, %v6866_v16  ;;  %v4190_v2 = vpop.permute.xlu1 %4189 }
 0x1a8   :  { %v4216_v52 = vsel %vm4209_vm7, %v23559_v21, %v4190_v2  ;;  %8899 = vrot.lane.b32.xlu0 %v23816_v13, %s22743_s28  ;;  %v4217_v3 = vsel %vm4209_vm7, %v4190_v2, %v23602_v38  ;;  %20961 = vmatpush1.msk.msra.mxu0 %vm146_vm0, %v6898_v53 }
 0x1a9   :  { %8895 = vrot.lane.b32.xlu1 %v23681_v31, %s22743_s28  ;;  %20869 = vmatprep.subr.msk.mxu1 %vm146_vm0, %v4217_v3 }
 0x1aa   :  { %20870 = vmatpush1.msk.msra.mxu1 %vm146_vm0, %v4216_v52  ;;  %v6874_v59 = vpop.permute.xlu0 %6873  ;;  %20962 = vmatmul.mubr.msk.f32.vlgmr.msra.gmra.mrb[4].mxu0 %vm142_vm1, %v24072_v46 }
 0x1ab   :  { %v24087_v21 = vpop.permute.xlu1 %6875  ;;  %20871 = vmatmul.mubr.msk.f32.vlgmr.msra.gmra.mrb[6].mxu1 %vm142_vm1, %v23544_v49  ;;  %7155 = vmatprep.mubr.f32.mxu0 %v23613_v32 }
 0x1ac   :  { %6221 = vrot.lane.b32.xlu0 %v23960_v14, %s22739_s18  ;;  %v6903_v38 = vsel %vm6897_vm11, %v6874_v59, %v24087_v21  ;;  %4680 = vmatprep.mubr.f32.mxu1 %v23613_v32 }
 0x1ad   :  { %6223 = vrot.lane.b32.xlu1 %v23976_v4, %s22739_s18  ;;  %20966 = vmatprep.subr.msk.mxu0 %vm146_vm0, %v6903_v38 }
 0x1ae   :  { %v24100_v47 = vpop.permute.xlu0 %6871 }
 0x1af   :  { %v6902_v62 = vsel %vm6897_vm11, %v24100_v47, %v6874_v59  ;;  %v4198_v55 = vpop.permute.xlu1 %4197 }
 0x1b0   :  { %v4220_v0 = vsel %vm4209_vm7, %v23589_v26, %v4198_v55  ;;  %8905 = vrot.lane.b32.xlu0 %v23848_v51, %s22743_s28  ;;  %v4221_v43 = vsel %vm4209_vm7, %v4198_v55, %v23629_v29  ;;  %20967 = vmatpush1.msk.msra.mxu0 %vm146_vm0, %v6902_v62 }
 0x1b1   :  { %8907 = vrot.lane.b32.xlu1 %v23713_v22, %s22743_s28  ;;  %20875 = vmatprep.subr.msk.mxu1 %vm146_vm0, %v4221_v43 }
 0x1b2   :  { %20876 = vmatpush1.msk.msra.mxu1 %vm146_vm0, %v4220_v0  ;;  %v6882_v35 = vpop.permute.xlu0 %6881  ;;  %20968 = vmatmul.mubr.msk.f32.vlgmr.msra.gmra.mrb[6].mxu0 %vm142_vm1, %v24072_v46 }
 0x1b3   :  { %v24117_v26 = vpop.permute.xlu1 %6883  ;;  %20877 = vmatmul.mubr.msk.f32.vlgmr.msra.gmra.mrb[8].mxu1 %vm142_vm1, %v23544_v49  ;;  %7297 = vmatprep.mubr.f32.mxu0 %v23613_v32 }
 0x1b4   :  { %8903 = vrot.lane.b32.xlu0 %v23718_v30, %s22743_s28  ;;  %v6907_v29 = vsel %vm6897_vm11, %v6882_v35, %v24117_v26  ;;  %4822 = vmatprep.mubr.f32.mxu1 %v23613_v32 }
 0x1b5   :  { %6869 = vrot.lane.b32.xlu1 %v23871_v44, %s22740_s22  ;;  %20972 = vmatprep.subr.msk.mxu0 %vm146_vm0, %v6907_v29  ;;  %v24190_v29 = vld [vmem:[%s26448_s1 + $0x58] sm:$0xff] }
 0x1b6   :  { %v24130_v16 = vpop.permute.xlu0 %6879 }
 0x1b7   :  { %v6906_v36 = vsel %vm6897_vm11, %v24130_v16, %v6882_v35  ;;  %v4206_v63 = vpop.permute.xlu1 %4205 }
 0x1b8   :  { %9553 = vrot.lane.b32.xlu0 %v23737_v23, %s22744_s29  ;;  %20973 = vmatpush1.msk.msra.mxu0 %vm146_vm0, %v6906_v36  ;;  %v4224_v3 = vsel %vm4209_vm7, %v23625_v17, %v4206_v63 }
 0x1b9   :  { %9555 = vrot.lane.b32.xlu1 %v23748_v15, %s22744_s29  ;;  %20974 = vmatmul.mubr.msk.f32.vlgmr.msra.gmra.mrb[0].mxu0 %vm142_vm1, %v24072_v46 }
 0x1ba   :  { %v4208_v53 = vpop.permute.xlu0 %4207  ;;  %7439 = vmatprep.mubr.f32.mxu0 %v23613_v32 }
 0x1bb   :  { %v4225_v2 = vsel %vm4209_vm7, %v4206_v63, %v4208_v53  ;;  %v6890_v52 = vpop.permute.xlu1 %6889  ;;  %vm10929_vm7 = vcmask 252928  }
 0x1bc   :  { %9551 = vrot.lane.b32.xlu0 %v23752_v5, %s22744_s29  ;;  %20881 = vmatprep.subr.msk.mxu1 %vm146_vm0, %v4225_v2 }
 0x1bd   :  { %6877 = vrot.lane.b32.xlu1 %v23894_v12, %s22740_s22  ;;  %20882 = vmatpush1.msk.msra.mxu1 %vm146_vm0, %v4224_v3 }
 0x1be   :  { %v24151_v59 = vpop.permute.xlu0 %6891  ;;  %20883 = vmatmul.mubr.msk.f32.vlgmr.msra.gmra.mrb[10].mxu1 %vm142_vm1, %v23544_v49 }
 0x1bf   :  { %v24155_v38 = vpop.permute.xlu1 %6887  ;;  %v6911_v17 = vsel %vm6897_vm11, %v6890_v52, %v24151_v59  ;;  %5068 = vmatprep.mubr.f32.mxu1 %v23613_v32 }
 0x1c0   :  { %v6910_v62 = vsel %vm6897_vm11, %v24155_v38, %v6890_v52  ;;  %9561 = vrot.lane.b32.xlu0 %v23767_v28, %s22744_s29  ;;  %20978 = vmatprep.subr.msk.mxu0 %vm146_vm0, %v6911_v17 }
 0x1c1   :  { %9563 = vrot.lane.b32.xlu1 %v23778_v50, %s22744_s29  ;;  %20979 = vmatpush1.msk.msra.mxu0 %vm146_vm0, %v6910_v62 }
 0x1c2   :  { %v4854_v49 = vpop.permute.xlu0 %4853  ;;  %20980 = vmatmul.mubr.msk.f32.vlgmr.msra.gmra.mrb[2].mxu0 %vm142_vm1, %v24072_v46 }
 0x1c3   :  { %v4884_v55 = vsel %vm4881_vm8, %v23655_v19, %v4854_v49  ;;  %v7538_v0 = vpop.permute.xlu1 %7537  ;;  %v4885_v43 = vsel %vm4881_vm8, %v4854_v49, %v23693_v60  ;;  %7685 = vmatprep.mubr.f32.mxu0 %v23613_v32 }
 0x1c4   :  { %9559 = vrot.lane.b32.xlu0 %v23785_v58, %s22744_s29  ;;  %20888 = vmatprep.subr.msk.mxu1 %vm146_vm0, %v4885_v43 }
 0x1c5   :  { %6885 = vrot.lane.b32.xlu1 %v23926_v18, %s22740_s22  ;;  %20889 = vmatpush1.msk.msra.mxu1 %vm146_vm0, %v4884_v55 }
 0x1c6   :  { %v24181_v35 = vpop.permute.xlu0 %7539  ;;  %20890 = vmatmul.mubr.msk.f32.vlgmr.msra.gmra.mrb[2].mxu1 %vm142_vm1, %v23664_v20 }
 0x1c7   :  { %v7536_v19 = vpop.permute.xlu1 %7535  ;;  %v7571_v60 = vsel %vm7569_vm12, %v7538_v0, %v24181_v35  ;;  %5210 = vmatprep.mubr.f32.mxu1 %v23613_v32 }
 0x1c8   :  { %v7570_v36 = vsel %vm7569_vm12, %v7536_v19, %v7538_v0  ;;  %9569 = vrot.lane.b32.xlu0 %v23803_v7, %s22744_s29  ;;  %20985 = vmatprep.subr.msk.mxu0 %vm146_vm0, %v7571_v60 }
 0x1c9   :  { %9571 = vrot.lane.b32.xlu1 %v23816_v13, %s22744_s29  ;;  %20986 = vmatpush1.msk.msra.mxu0 %vm146_vm0, %v7570_v36 }
 0x1ca   :  { %v4862_v63 = vpop.permute.xlu0 %4861  ;;  %20987 = vmatmul.mubr.msk.f32.vlgmr.msra.gmra.mrb[4].mxu0 %vm142_vm1, %v24190_v29 }
 0x1cb   :  { %v4888_v53 = vsel %vm4881_vm8, %v23689_v25, %v4862_v63  ;;  %v7546_v2 = vpop.permute.xlu1 %7545  ;;  %v4889_v52 = vsel %vm4881_vm8, %v4862_v63, %v23727_v10  ;;  %7827 = vmatprep.mubr.f32.mxu0 %v23613_v32 }
 0x1cc   :  { %9567 = vrot.lane.b32.xlu0 %v23681_v31, %s22744_s29  ;;  %20894 = vmatprep.subr.msk.mxu1 %vm146_vm0, %v4889_v52 }
 0x1cd   :  { %6893 = vrot.lane.b32.xlu1 %v23960_v14, %s22740_s22  ;;  %20895 = vmatpush1.msk.msra.mxu1 %vm146_vm0, %v4888_v53 }
 0x1ce   :  { %v24213_v3 = vpop.permute.xlu0 %7547  ;;  %20896 = vmatmul.mubr.msk.f32.vlgmr.msra.gmra.mrb[6].mxu1 %vm142_vm1, %v23664_v20 }
 0x1cf   :  { %v24217_v25 = vpop.permute.xlu1 %7543  ;;  %v7575_v10 = vsel %vm7569_vm12, %v7546_v2, %v24213_v3  ;;  %5352 = vmatprep.mubr.f32.mxu1 %v23613_v32 }
 0x1d0   :  { %v7574_v17 = vsel %vm7569_vm12, %v24217_v25, %v7546_v2  ;;  %6895 = vrot.lane.b32.xlu0 %v23976_v4, %s22740_s22  ;;  %20991 = vmatprep.subr.msk.mxu0 %vm146_vm0, %v7575_v10  ;;  %s22745_s22 = smov 32  }
 0x1d1   :  { %9577 = vrot.lane.b32.xlu1 %v23848_v51, %s22744_s29  ;;  %20992 = vmatpush1.msk.msra.mxu0 %vm146_vm0, %v7574_v17 }
 0x1d2   :  { %v4870_v62 = vpop.permute.xlu0 %4869  ;;  %20993 = vmatmul.mubr.msk.f32.vlgmr.msra.gmra.mrb[6].mxu0 %vm142_vm1, %v24190_v29 }
 0x1d3   :  { %v4892_v49 = vsel %vm4881_vm8, %v23723_v1, %v4870_v62  ;;  %v7554_v55 = vpop.permute.xlu1 %7553  ;;  %v4893_v0 = vsel %vm4881_vm8, %v4870_v62, %v23772_v42  ;;  %7969 = vmatprep.mubr.f32.mxu0 %v23613_v32 }
 0x1d4   :  { %9579 = vrot.lane.b32.xlu0 %v23713_v22, %s22744_s29  ;;  %20900 = vmatprep.subr.msk.mxu1 %vm146_vm0, %v4893_v0 }
 0x1d5   :  { %9575 = vrot.lane.b32.xlu1 %v23718_v30, %s22744_s29  ;;  %20901 = vmatpush1.msk.msra.mxu1 %vm146_vm0, %v4892_v49 }
 0x1d6   :  { %v24243_v43 = vpop.permute.xlu0 %7555  ;;  %20902 = vmatmul.mubr.msk.f32.vlgmr.msra.gmra.mrb[8].mxu1 %vm142_vm1, %v23664_v20 }
 0x1d7   :  { %v24247_v1 = vpop.permute.xlu1 %7551  ;;  %v7579_v42 = vsel %vm7569_vm12, %v7554_v55, %v24243_v43  ;;  %5494 = vmatprep.mubr.f32.mxu1 %v23613_v32 }
 0x1d8   :  { %v7578_v19 = vsel %vm7569_vm12, %v24247_v1, %v7554_v55  ;;  %7541 = vrot.lane.b32.xlu0 %v23871_v44, %s22741_s30  ;;  %20997 = vmatprep.subr.msk.mxu0 %vm146_vm0, %v7579_v42 }
 0x1d9   :  { %10225 = vrot.lane.b32.xlu1 %v23737_v23, %s22745_s22  ;;  %20998 = vmatpush1.msk.msra.mxu0 %vm146_vm0, %v7578_v19 }
 0x1da   :  { %v4878_v60 = vpop.permute.xlu0 %4877  ;;  %20999 = vmatmul.mubr.msk.f32.vlgmr.msra.gmra.mrb[0].mxu0 %vm142_vm1, %v24190_v29 }
 0x1db   :  { %v4896_v36 = vsel %vm4881_vm8, %v23758_v54, %v4878_v60  ;;  %v4880_v63 = vpop.permute.xlu1 %4879  ;;  %8111 = vmatprep.mubr.f32.mxu0 %v23613_v32 }
 0x1dc   :  { %v4897_v53 = vsel %vm4881_vm8, %v4878_v60, %v4880_v63  ;;  %10227 = vrot.lane.b32.xlu0 %v23748_v15, %s22745_s22  ;;  %v24318_v60 = vld [vmem:[%s26448_s1 + $0x60] sm:$0xff]  ;;  %vm68_vm8 = vcmask 31744  }
 0x1dd   :  { %10223 = vrot.lane.b32.xlu1 %v23752_v5, %s22745_s22  ;;  %20906 = vmatprep.subr.msk.mxu1 %vm146_vm0, %v4897_v53 }
 0x1de   :  { %20907 = vmatpush1.msk.msra.mxu1 %vm146_vm0, %v4896_v36  ;;  %v7562_v2 = vpop.permute.xlu0 %7561 }
 0x1df   :  { %v24272_v52 = vpop.permute.xlu1 %7563  ;;  %20908 = vmatmul.mubr.msk.f32.vlgmr.msra.gmra.mrb[10].mxu1 %vm142_vm1, %v23664_v20 }
 0x1e0   :  { %7549 = vrot.lane.b32.xlu0 %v23894_v12, %s22741_s30  ;;  %v7583_v54 = vsel %vm7569_vm12, %v7562_v2, %v24272_v52  ;;  %5740 = vmatprep.mubr.f32.mxu1 %v23613_v32 }
 0x1e1   :  { %10233 = vrot.lane.b32.xlu1 %v23767_v28, %s22745_s22  ;;  %21003 = vmatprep.subr.msk.mxu0 %vm146_vm0, %v7583_v54 }
 0x1e2   :  { %v24284_v10 = vpop.permute.xlu0 %7559 }
 0x1e3   :  { %v7582_v17 = vsel %vm7569_vm12, %v24284_v10, %v7562_v2  ;;  %v5526_v62 = vpop.permute.xlu1 %5525 }
 0x1e4   :  { %v5556_v20 = vsel %vm5553_vm9, %v23793_v6, %v5526_v62  ;;  %10235 = vrot.lane.b32.xlu0 %v23778_v50, %s22745_s22  ;;  %v5557_v49 = vsel %vm5553_vm9, %v5526_v62, %v23842_v56  ;;  %21004 = vmatpush1.msk.msra.mxu0 %vm146_vm0, %v7582_v17 }
 0x1e5   :  { %10231 = vrot.lane.b32.xlu1 %v23785_v58, %s22745_s22  ;;  %20913 = vmatprep.subr.msk.mxu1 %vm146_vm0, %v5557_v49 }
 0x1e6   :  { %20914 = vmatpush1.msk.msra.mxu1 %vm146_vm0, %v5556_v20  ;;  %v8210_v55 = vpop.permute.xlu0 %8209  ;;  %21005 = vmatmul.mubr.msk.f32.vlgmr.msra.gmra.mrb[2].mxu0 %vm142_vm1, %v24190_v29 }
 0x1e7   :  { %v24301_v6 = vpop.permute.xlu1 %8211  ;;  %20915 = vmatmul.mubr.msk.f32.vlgmr.msra.gmra.mrb[2].mxu1 %vm142_vm1, %v23812_v48  ;;  %8357 = vmatprep.mubr.f32.mxu0 %v23613_v32 }
 0x1e8   :  { %7557 = vrot.lane.b32.xlu0 %v23926_v18, %s22741_s30  ;;  %v8243_v56 = vsel %vm8241_vm13, %v8210_v55, %v24301_v6  ;;  %5882 = vmatprep.mubr.f32.mxu1 %v23613_v32 }
 0x1e9   :  { %10241 = vrot.lane.b32.xlu1 %v23803_v7, %s22745_s22  ;;  %21010 = vmatprep.subr.msk.mxu0 %vm146_vm0, %v8243_v56 }
 0x1ea   :  { %v8208_v0 = vpop.permute.xlu0 %8207 }
 0x1eb   :  { %v8242_v42 = vsel %vm8241_vm13, %v8208_v0, %v8210_v55  ;;  %v5534_v19 = vpop.permute.xlu1 %5533 }
 0x1ec   :  { %v5560_v36 = vsel %vm5553_vm9, %v23829_v41, %v5534_v19  ;;  %10243 = vrot.lane.b32.xlu0 %v23816_v13, %s22745_s22  ;;  %v5561_v63 = vsel %vm5553_vm9, %v5534_v19, %v23876_v57  ;;  %21011 = vmatpush1.msk.msra.mxu0 %vm146_vm0, %v8242_v42 }
 0x1ed   :  { %10239 = vrot.lane.b32.xlu1 %v23681_v31, %s22745_s22  ;;  %20919 = vmatprep.subr.msk.mxu1 %vm146_vm0, %v5561_v63 }
 0x1ee   :  { %20920 = vmatpush1.msk.msra.mxu1 %vm146_vm0, %v5560_v36  ;;  %v8218_v53 = vpop.permute.xlu0 %8217  ;;  %21012 = vmatmul.mubr.msk.f32.vlgmr.msra.gmra.mrb[4].mxu0 %vm142_vm1, %v24318_v60 }
 0x1ef   :  { %v24333_v41 = vpop.permute.xlu1 %8219  ;;  %20921 = vmatmul.mubr.msk.f32.vlgmr.msra.gmra.mrb[6].mxu1 %vm142_vm1, %v23812_v48  ;;  %8499 = vmatprep.mubr.f32.mxu0 %v23613_v32 }
 0x1f0   :  { %7565 = vrot.lane.b32.xlu0 %v23960_v14, %s22741_s30  ;;  %v8247_v57 = vsel %vm8241_vm13, %v8218_v53, %v24333_v41  ;;  %6024 = vmatprep.mubr.f32.mxu1 %v23613_v32 }
 0x1f1   :  { %7567 = vrot.lane.b32.xlu1 %v23976_v4, %s22741_s30  ;;  %21016 = vmatprep.subr.msk.mxu0 %vm146_vm0, %v8247_v57  ;;  %s22746_s30 = smov 31   ;;  %v24405_v57 = vld [vmem:[#allocation2 + $0x80] sm:$0xff] }
 0x1f2   :  { %v24346_v2 = vpop.permute.xlu0 %8215  ;;  %69 = vst.msk [vmem:[#allocation2 + $0x88] sm:$0xff] %vm68_vm8, %v24405_v57  ;;  %vm18718_vm8 = vcmask 916480  }
 0x1f3   :  { %v8246_v54 = vsel %vm8241_vm13, %v24346_v2, %v8218_v53  ;;  %v5542_v17 = vpop.permute.xlu1 %5541 }
 0x1f4   :  { %v5564_v62 = vsel %vm5553_vm9, %v23861_v45, %v5542_v17  ;;  %10249 = vrot.lane.b32.xlu0 %v23848_v51, %s22745_s22  ;;  %v5565_v20 = vsel %vm5553_vm9, %v5542_v17, %v23903_v33  ;;  %21017 = vmatpush1.msk.msra.mxu0 %vm146_vm0, %v8246_v54 }
 0x1f5   :  { %10251 = vrot.lane.b32.xlu1 %v23713_v22, %s22745_s22  ;;  %20925 = vmatprep.subr.msk.mxu1 %vm146_vm0, %v5565_v20 }
 0x1f6   :  { %20926 = vmatpush1.msk.msra.mxu1 %vm146_vm0, %v5564_v62  ;;  %v8226_v49 = vpop.permute.xlu0 %8225  ;;  %21018 = vmatmul.mubr.msk.f32.vlgmr.msra.gmra.mrb[6].mxu0 %vm142_vm1, %v24318_v60 }
 0x1f7   :  { %v24363_v45 = vpop.permute.xlu1 %8227  ;;  %20927 = vmatmul.mubr.msk.f32.vlgmr.msra.gmra.mrb[8].mxu1 %vm142_vm1, %v23812_v48  ;;  %8641 = vmatprep.mubr.f32.mxu0 %v23613_v32 }
 0x1f8   :  { %10247 = vrot.lane.b32.xlu0 %v23718_v30, %s22745_s22  ;;  %v8251_v33 = vsel %vm8241_vm13, %v8226_v49, %v24363_v45  ;;  %6166 = vmatprep.mubr.f32.mxu1 %v23613_v32 }
 0x1f9   :  { %8213 = vrot.lane.b32.xlu1 %v23871_v44, %s22742_s19  ;;  %21022 = vmatprep.subr.msk.mxu0 %vm146_vm0, %v8251_v33  ;;  %v24438_v33 = vld [vmem:[%s26448_s1 + $0x68] sm:$0xff] }
 0x1fa   :  { %v24376_v55 = vpop.permute.xlu0 %8223 }
 0x1fb   :  { %v8250_v56 = vsel %vm8241_vm13, %v24376_v55, %v8226_v49  ;;  %v5550_v0 = vpop.permute.xlu1 %5549 }
 0x1fc   :  { %10897 = vrot.lane.b32.xlu0 %v23737_v23, %s22746_s30  ;;  %21023 = vmatpush1.msk.msra.mxu0 %vm146_vm0, %v8250_v56  ;;  %v5568_v63 = vsel %vm5553_vm9, %v23899_v61, %v5550_v0 }
 0x1fd   :  { %10899 = vrot.lane.b32.xlu1 %v23748_v15, %s22746_s30  ;;  %21024 = vmatmul.mubr.msk.f32.vlgmr.msra.gmra.mrb[0].mxu0 %vm142_vm1, %v24318_v60 }
 0x1fe   :  { %v5552_v42 = vpop.permute.xlu0 %5551  ;;  %8783 = vmatprep.mubr.f32.mxu0 %v23613_v32 }
 0x1ff   :  { %v5569_v19 = vsel %vm5553_vm9, %v5550_v0, %v5552_v42  ;;  %v8234_v36 = vpop.permute.xlu1 %8233  ;;  %vm11601_vm9 = vcmask 244736  }
 0x200   :  { %10895 = vrot.lane.b32.xlu0 %v23752_v5, %s22746_s30  ;;  %20931 = vmatprep.subr.msk.mxu1 %vm146_vm0, %v5569_v19 }
 0x201   :  { %8221 = vrot.lane.b32.xlu1 %v23894_v12, %s22742_s19  ;;  %20932 = vmatpush1.msk.msra.mxu1 %vm146_vm0, %v5568_v63 }
 0x202   :  { %v24397_v53 = vpop.permute.xlu0 %8235  ;;  %20933 = vmatmul.mubr.msk.f32.vlgmr.msra.gmra.mrb[10].mxu1 %vm142_vm1, %v23812_v48 }
 0x203   :  { %v24401_v32 = vpop.permute.xlu1 %8231  ;;  %v8255_v61 = vsel %vm8241_vm13, %v8234_v36, %v24397_v53  ;;  %6412 = vmatprep.mubr.f32.mxu1 %v24405_v57 }
 0x204   :  { %v8254_v54 = vsel %vm8241_vm13, %v24401_v32, %v8234_v36  ;;  %10905 = vrot.lane.b32.xlu0 %v23767_v28, %s22746_s30  ;;  %21028 = vmatprep.subr.msk.mxu0 %vm146_vm0, %v8255_v61 }
 0x205   :  { %10907 = vrot.lane.b32.xlu1 %v23778_v50, %s22746_s30  ;;  %21029 = vmatpush1.msk.msra.mxu0 %vm146_vm0, %v8254_v54 }
 0x206   :  { %v6198_v48 = vpop.permute.xlu0 %6197  ;;  %21030 = vmatmul.mubr.msk.f32.vlgmr.msra.gmra.mrb[2].mxu0 %vm142_vm1, %v24318_v60 }
 0x207   :  { %v6228_v17 = vsel %vm6225_vm10, %v23931_v37, %v6198_v48  ;;  %v8882_v62 = vpop.permute.xlu1 %8881  ;;  %v6229_v20 = vsel %vm6225_vm10, %v6198_v48, %v23969_v8  ;;  %9029 = vmatprep.mubr.f32.mxu0 %v24405_v57 }
 0x208   :  { %10903 = vrot.lane.b32.xlu0 %v23785_v58, %s22746_s30  ;;  %20938 = vmatprep.subr.msk.mxu1 %vm146_vm0, %v6229_v20 }
 0x209   :  { %8229 = vrot.lane.b32.xlu1 %v23926_v18, %s22742_s19  ;;  %20939 = vmatpush1.msk.msra.mxu1 %vm146_vm0, %v6228_v17 }
 0x20a   :  { %v24429_v49 = vpop.permute.xlu0 %8883  ;;  %20940 = vmatmul.mubr.msk.f32.vlgmr.msra.gmra.mrb[2].mxu1 %vm142_vm1, %v23940_v11 }
 0x20b   :  { %v8880_v37 = vpop.permute.xlu1 %8879  ;;  %v8915_v8 = vsel %vm8913_vm14, %v8882_v62, %v24429_v49  ;;  %6554 = vmatprep.mubr.f32.mxu1 %v24405_v57 }
 0x20c   :  { %v8914_v56 = vsel %vm8913_vm14, %v8880_v37, %v8882_v62  ;;  %10913 = vrot.lane.b32.xlu0 %v23803_v7, %s22746_s30  ;;  %21035 = vmatprep.subr.msk.mxu0 %vm146_vm0, %v8915_v8 }
 0x20d   :  { %10915 = vrot.lane.b32.xlu1 %v23816_v13, %s22746_s30  ;;  %21036 = vmatpush1.msk.msra.mxu0 %vm146_vm0, %v8914_v56 }
 0x20e   :  { %v6206_v0 = vpop.permute.xlu0 %6205  ;;  %21037 = vmatmul.mubr.msk.f32.vlgmr.msra.gmra.mrb[4].mxu0 %vm142_vm1, %v24438_v33 }
 0x20f   :  { %v6232_v42 = vsel %vm6225_vm10, %v23965_v40, %v6206_v0  ;;  %v8890_v19 = vpop.permute.xlu1 %8889  ;;  %v6233_v36 = vsel %vm6225_vm10, %v6206_v0, %v24001_v34  ;;  %9171 = vmatprep.mubr.f32.mxu0 %v24405_v57 }
 0x210   :  { %10911 = vrot.lane.b32.xlu0 %v23681_v31, %s22746_s30  ;;  %20944 = vmatprep.subr.msk.mxu1 %vm146_vm0, %v6233_v36  ;;  %v24566_v36 = vld [vmem:[%s26448_s1 + $0x70] sm:$0xff] }
 0x211   :  { %8237 = vrot.lane.b32.xlu1 %v23960_v14, %s22742_s19  ;;  %20945 = vmatpush1.msk.msra.mxu1 %vm146_vm0, %v6232_v42 }
 0x212   :  { %v24461_v63 = vpop.permute.xlu0 %8891  ;;  %20946 = vmatmul.mubr.msk.f32.vlgmr.msra.gmra.mrb[6].mxu1 %vm142_vm1, %v23940_v11 }
 0x213   :  { %v24465_v40 = vpop.permute.xlu1 %8887  ;;  %v8919_v34 = vsel %vm8913_vm14, %v8890_v19, %v24461_v63  ;;  %6696 = vmatprep.mubr.f32.mxu1 %v24405_v57 }
 0x214   :  { %v8918_v31 = vsel %vm8913_vm14, %v24465_v40, %v8890_v19  ;;  %8239 = vrot.lane.b32.xlu0 %v23976_v4, %s22742_s19  ;;  %21041 = vmatprep.subr.msk.mxu0 %vm146_vm0, %v8919_v34  ;;  %s22747_s19 = smov 30  }
 0x215   :  { %10921 = vrot.lane.b32.xlu1 %v23848_v51, %s22746_s30  ;;  %21042 = vmatpush1.msk.msra.mxu0 %vm146_vm0, %v8918_v31  ;;  %v24575_v31 = vld [vmem:[#allocation2 + $0x40] sm:$0x7] }
 0x216   :  { %v6214_v61 = vpop.permute.xlu0 %6213  ;;  %21043 = vmatmul.mubr.msk.f32.vlgmr.msra.gmra.mrb[6].mxu0 %vm142_vm1, %v24438_v33 }
 0x217   :  { %v6236_v54 = vsel %vm6225_vm10, %v23997_v39, %v6214_v61  ;;  %v8898_v48 = vpop.permute.xlu1 %8897  ;;  %v6237_v17 = vsel %vm6225_vm10, %v6214_v61, %v24038_v27  ;;  %9313 = vmatprep.mubr.f32.mxu0 %v24405_v57 }
 0x218   :  { %10923 = vrot.lane.b32.xlu0 %v23713_v22, %s22746_s30  ;;  %20950 = vmatprep.subr.msk.mxu1 %vm146_vm0, %v6237_v17 }
 0x219   :  { %10919 = vrot.lane.b32.xlu1 %v23718_v30, %s22746_s30  ;;  %20951 = vmatpush1.msk.msra.mxu1 %vm146_vm0, %v6236_v54 }
 0x21a   :  { %v24491_v62 = vpop.permute.xlu0 %8899  ;;  %20952 = vmatmul.mubr.msk.f32.vlgmr.msra.gmra.mrb[8].mxu1 %vm142_vm1, %v23940_v11 }
 0x21b   :  { %v24495_v39 = vpop.permute.xlu1 %8895  ;;  %v8923_v27 = vsel %vm8913_vm14, %v8898_v48, %v24491_v62  ;;  %6838 = vmatprep.mubr.f32.mxu1 %v24405_v57 }
 0x21c   :  { %v8922_v22 = vsel %vm8913_vm14, %v24495_v39, %v8898_v48  ;;  %8885 = vrot.lane.b32.xlu0 %v23871_v44, %s22743_s28  ;;  %21047 = vmatprep.subr.msk.mxu0 %vm146_vm0, %v8923_v27 }
 0x21d   :  { %11569 = vrot.lane.b32.xlu1 %v23737_v23, %s22747_s19  ;;  %21048 = vmatpush1.msk.msra.mxu0 %vm146_vm0, %v8922_v22  ;;  %v24607_v22 = vld [vmem:[#allocation2 + $0x70] sm:$0x7] }
 0x21e   :  { %v6222_v30 = vpop.permute.xlu0 %6221  ;;  %21049 = vmatmul.mubr.msk.f32.vlgmr.msra.gmra.mrb[0].mxu0 %vm142_vm1, %v24438_v33 }
 0x21f   :  { %v6240_v20 = vsel %vm6225_vm10, %v24026_v24, %v6222_v30  ;;  %v6224_v37 = vpop.permute.xlu1 %6223  ;;  %9455 = vmatprep.mubr.f32.mxu0 %v24405_v57 }
 0x220   :  { %v6241_v8 = vsel %vm6225_vm10, %v6222_v30, %v6224_v37  ;;  %11571 = vrot.lane.b32.xlu0 %v23748_v15, %s22747_s19  ;;  %vm12273_vm10 = vcmask 236544  }
 0x221   :  { %11567 = vrot.lane.b32.xlu1 %v23752_v5, %s22747_s19  ;;  %20956 = vmatprep.subr.msk.mxu1 %vm146_vm0, %v6241_v8 }
 0x222   :  { %20957 = vmatpush1.msk.msra.mxu1 %vm146_vm0, %v6240_v20  ;;  %v8906_v23 = vpop.permute.xlu0 %8905 }
 0x223   :  { %v24520_v56 = vpop.permute.xlu1 %8907  ;;  %20958 = vmatmul.mubr.msk.f32.vlgmr.msra.gmra.mrb[10].mxu1 %vm142_vm1, %v23940_v11 }
 0x224   :  { %8893 = vrot.lane.b32.xlu0 %v23894_v12, %s22743_s28  ;;  %v8927_v24 = vsel %vm8913_vm14, %v8906_v23, %v24520_v56  ;;  %7084 = vmatprep.mubr.f32.mxu1 %v24405_v57 }
 0x225   :  { %11577 = vrot.lane.b32.xlu1 %v23767_v28, %s22747_s19  ;;  %21053 = vmatprep.subr.msk.mxu0 %vm146_vm0, %v8927_v24  ;;  %v24639_v24 = vld [vmem:[#allocation2 + $0x10] sm:$0x7] }
 0x226   :  { %v24532_v15 = vpop.permute.xlu0 %8903 }
 0x227   :  { %v8926_v5 = vsel %vm8913_vm14, %v24532_v15, %v8906_v23  ;;  %v6870_v0 = vpop.permute.xlu1 %6869  ;;  %v24634_v23 = vld [vmem:[#allocation2 + $0x8] sm:$0x7] }
 0x228   :  { %v6900_v11 = vsel %vm6897_vm11, %v24055_v9, %v6870_v0  ;;  %11579 = vrot.lane.b32.xlu0 %v23778_v50, %s22747_s19  ;;  %v6901_v42 = vsel %vm6897_vm11, %v6870_v0, %v24100_v47  ;;  %21054 = vmatpush1.msk.msra.mxu0 %vm146_vm0, %v8926_v5 }
 0x229   :  { %11575 = vrot.lane.b32.xlu1 %v23785_v58, %s22747_s19  ;;  %20963 = vmatprep.subr.msk.mxu1 %vm146_vm0, %v6901_v42  ;;  %v24649_v42 = vld [vmem:[#allocation2] sm:$0x7] }
 0x22a   :  { %20964 = vmatpush1.msk.msra.mxu1 %vm146_vm0, %v6900_v11  ;;  %v9554_v28 = vpop.permute.xlu0 %9553  ;;  %21055 = vmatmul.mubr.msk.f32.vlgmr.msra.gmra.mrb[2].mxu0 %vm142_vm1, %v24438_v33 }
 0x22b   :  { %v24549_v9 = vpop.permute.xlu1 %9555  ;;  %20965 = vmatmul.mubr.msk.f32.vlgmr.msra.gmra.mrb[2].mxu1 %vm142_vm1, %v24072_v46  ;;  %9701 = vmatprep.mubr.f32.mxu0 %v24405_v57 }
 0x22c   :  { %8901 = vrot.lane.b32.xlu0 %v23926_v18, %s22743_s28  ;;  %v9587_v50 = vsel %vm9585_vm15, %v9554_v28, %v24549_v9  ;;  %7226 = vmatprep.mubr.f32.mxu1 %v24405_v57 }
 0x22d   :  { %11585 = vrot.lane.b32.xlu1 %v23803_v7, %s22747_s19  ;;  %21060 = vmatprep.subr.msk.mxu0 %vm146_vm0, %v9587_v50 }
 0x22e   :  { %v9552_v58 = vpop.permute.xlu0 %9551 }
 0x22f   :  { %v9586_v47 = vsel %vm9585_vm15, %v9552_v58, %v9554_v28  ;;  %v6878_v19 = vpop.permute.xlu1 %6877 }
 0x230   :  { %v6904_v34 = vsel %vm6897_vm11, %v24087_v21, %v6878_v19  ;;  %11587 = vrot.lane.b32.xlu0 %v23816_v13, %s22747_s19  ;;  %v6905_v7 = vsel %vm6897_vm11, %v6878_v19, %v24130_v16  ;;  %21061 = vmatpush1.msk.msra.mxu0 %vm146_vm0, %v9586_v47  ;;  %v24668_v47 = vld [vmem:[#allocation2 + $0x28] sm:$0x7] }
 0x231   :  { %11583 = vrot.lane.b32.xlu1 %v24575_v31, %s22747_s19  ;;  %20969 = vmatprep.subr.msk.mxu1 %vm146_vm0, %v6905_v7 }
 0x232   :  { %20970 = vmatpush1.msk.msra.mxu1 %vm146_vm0, %v6904_v34  ;;  %v9562_v61 = vpop.permute.xlu0 %9561  ;;  %21062 = vmatmul.mubr.msk.f32.vlgmr.msra.gmra.mrb[4].mxu0 %vm142_vm1, %v24566_v36 }
 0x233   :  { %v24583_v21 = vpop.permute.xlu1 %9563  ;;  %20971 = vmatmul.mubr.msk.f32.vlgmr.msra.gmra.mrb[6].mxu1 %vm142_vm1, %v24072_v46  ;;  %9843 = vmatprep.mubr.f32.mxu0 %v24405_v57 }
 0x234   :  { %8909 = vrot.lane.b32.xlu0 %v23960_v14, %s22743_s28  ;;  %v9591_v13 = vsel %vm9585_vm15, %v9562_v61, %v24583_v21  ;;  %7368 = vmatprep.mubr.f32.mxu1 %v24405_v57 }
 0x235   :  { %8911 = vrot.lane.b32.xlu1 %v23976_v4, %s22743_s28  ;;  %21066 = vmatprep.subr.msk.mxu0 %vm146_vm0, %v9591_v13  ;;  %s22748_s28 = smov 29  }
 0x236   :  { %v24596_v16 = vpop.permute.xlu0 %9559 }
 0x237   :  { %v9590_v54 = vsel %vm9585_vm15, %v24596_v16, %v9562_v61  ;;  %v6886_v48 = vpop.permute.xlu1 %6885  ;;  %v24685_v61 = vld [vmem:[#allocation2 + $0x20] sm:$0x7] }
 0x238   :  { %v6908_v17 = vsel %vm6897_vm11, %v24117_v26, %v6886_v48  ;;  %11593 = vrot.lane.b32.xlu0 %v23848_v51, %s22747_s19  ;;  %v6909_v27 = vsel %vm6897_vm11, %v6886_v48, %v24155_v38  ;;  %21067 = vmatpush1.msk.msra.mxu0 %vm146_vm0, %v9590_v54  ;;  %v24620_v51 = vld [vmem:[#allocation2 + $0x60] sm:$0x7]  ;;  %v24702_v54 = vld [vmem:[%s26448_s1 + $0x78] sm:$0xff]  ;;  %v24706_v48 = vld [vmem:[#allocation2 + $0x48] sm:$0x7] }
 0x239   :  { %11595 = vrot.lane.b32.xlu1 %v24607_v22, %s22747_s19  ;;  %20975 = vmatprep.subr.msk.mxu1 %vm146_vm0, %v6909_v27 }
 0x23a   :  { %20976 = vmatpush1.msk.msra.mxu1 %vm146_vm0, %v6908_v17  ;;  %v9570_v30 = vpop.permute.xlu0 %9569  ;;  %21068 = vmatmul.mubr.msk.f32.vlgmr.msra.gmra.mrb[6].mxu0 %vm142_vm1, %v24566_v36  ;;  %v24711_v17 = vld [vmem:[#allocation2 + $0x50] sm:$0x7] }
 0x23b   :  { %v24615_v26 = vpop.permute.xlu1 %9571  ;;  %20977 = vmatmul.mubr.msk.f32.vlgmr.msra.gmra.mrb[8].mxu1 %vm142_vm1, %v24072_v46  ;;  %9985 = vmatprep.mubr.f32.mxu0 %v24405_v57 }
 0x23c   :  { %11591 = vrot.lane.b32.xlu0 %v24620_v51, %s22747_s19  ;;  %v9595_v38 = vsel %vm9585_vm15, %v9570_v30, %v24615_v26  ;;  %7510 = vmatprep.mubr.f32.mxu1 %v24405_v57 }
 0x23d   :  { %9557 = vrot.lane.b32.xlu1 %v23871_v44, %s22744_s29  ;;  %21072 = vmatprep.subr.msk.mxu0 %vm146_vm0, %v9595_v38 }
 0x23e   :  { %v24630_v20 = vpop.permute.xlu0 %9567 }
 0x23f   :  { %v9594_v37 = vsel %vm9585_vm15, %v24630_v20, %v9570_v30  ;;  %v6894_v8 = vpop.permute.xlu1 %6893 }
 0x240   :  { %12241 = vrot.lane.b32.xlu0 %v24634_v23, %s22748_s28  ;;  %21073 = vmatpush1.msk.msra.mxu0 %vm146_vm0, %v9594_v37  ;;  %v6912_v11 = vsel %vm6897_vm11, %v24151_v59, %v6894_v8 }
 0x241   :  { %12243 = vrot.lane.b32.xlu1 %v24639_v24, %s22748_s28  ;;  %21074 = vmatmul.mubr.msk.f32.vlgmr.msra.gmra.mrb[0].mxu0 %vm142_vm1, %v24566_v36 }
 0x242   :  { %v6896_v44 = vpop.permute.xlu0 %6895  ;;  %10127 = vmatprep.mubr.f32.mxu0 %v24405_v57 }
 0x243   :  { %v6913_v5 = vsel %vm6897_vm11, %v6894_v8, %v6896_v44  ;;  %v9578_v0 = vpop.permute.xlu1 %9577  ;;  %vm12945_vm11 = vcmask 228352  }
 0x244   :  { %12239 = vrot.lane.b32.xlu0 %v24649_v42, %s22748_s28  ;;  %20981 = vmatprep.subr.msk.mxu1 %vm146_vm0, %v6913_v5 }
 0x245   :  { %9565 = vrot.lane.b32.xlu1 %v23894_v12, %s22744_s29  ;;  %20982 = vmatpush1.msk.msra.mxu1 %vm146_vm0, %v6912_v11  ;;  %v24673_v12 = vld [vmem:[#allocation2 + $0x30] sm:$0x7] }
 0x246   :  { %v24657_v28 = vpop.permute.xlu0 %9579  ;;  %20983 = vmatmul.mubr.msk.f32.vlgmr.msra.gmra.mrb[10].mxu1 %vm142_vm1, %v24072_v46 }
 0x247   :  { %v24661_v50 = vpop.permute.xlu1 %9575  ;;  %v9599_v59 = vsel %vm9585_vm15, %v9578_v0, %v24657_v28  ;;  %7756 = vmatprep.mubr.f32.mxu1 %v24405_v57 }
 0x248   :  { %v9598_v58 = vsel %vm9585_vm15, %v24661_v50, %v9578_v0  ;;  %12249 = vrot.lane.b32.xlu0 %v24668_v47, %s22748_s28  ;;  %21078 = vmatprep.subr.msk.mxu0 %vm146_vm0, %v9599_v59 }
 0x249   :  { %12251 = vrot.lane.b32.xlu1 %v24673_v12, %s22748_s28  ;;  %21079 = vmatpush1.msk.msra.mxu0 %vm146_vm0, %v9598_v58 }
 0x24a   :  { %v7542_v46 = vpop.permute.xlu0 %7541  ;;  %21080 = vmatmul.mubr.msk.f32.vlgmr.msra.gmra.mrb[2].mxu0 %vm142_vm1, %v24566_v36 }
 0x24b   :  { %v7572_v19 = vsel %vm7569_vm12, %v24181_v35, %v7542_v46  ;;  %v10226_v34 = vpop.permute.xlu1 %10225  ;;  %v7573_v7 = vsel %vm7569_vm12, %v7542_v46, %v24217_v25  ;;  %10373 = vmatprep.mubr.f32.mxu0 %v24405_v57  ;;  %v24772_v46 = vld [vmem:[#allocation2 + $0x18] sm:$0x7] }
 0x24c   :  { %12247 = vrot.lane.b32.xlu0 %v24685_v61, %s22748_s28  ;;  %20988 = vmatprep.subr.msk.mxu1 %vm146_vm0, %v7573_v7 }
 0x24d   :  { %9573 = vrot.lane.b32.xlu1 %v23926_v18, %s22744_s29  ;;  %20989 = vmatpush1.msk.msra.mxu1 %vm146_vm0, %v7572_v19 }
 0x24e   :  { %v24693_v35 = vpop.permute.xlu0 %10227  ;;  %20990 = vmatmul.mubr.msk.f32.vlgmr.msra.gmra.mrb[2].mxu1 %vm142_vm1, %v24190_v29 }
 0x24f   :  { %v10224_v25 = vpop.permute.xlu1 %10223  ;;  %v10259_v13 = vsel %vm10257_vm6, %v10226_v34, %v24693_v35  ;;  %7898 = vmatprep.mubr.f32.mxu1 %v24405_v57 }
 0x250   :  { %v10258_v18 = vsel %vm10257_vm6, %v10224_v25, %v10226_v34  ;;  %12257 = vrot.lane.b32.xlu0 %v24706_v48, %s22748_s28  ;;  %21085 = vmatprep.subr.msk.mxu0 %vm146_vm0, %v10259_v13 }
 0x251   :  { %12259 = vrot.lane.b32.xlu1 %v24711_v17, %s22748_s28  ;;  %21086 = vmatpush1.msk.msra.mxu0 %vm146_vm0, %v10258_v18 }
 0x252   :  { %v7550_v27 = vpop.permute.xlu0 %7549  ;;  %21087 = vmatmul.mubr.msk.f32.vlgmr.msra.gmra.mrb[4].mxu0 %vm142_vm1, %v24702_v54 }
 0x253   :  { %v7576_v30 = vsel %vm7569_vm12, %v24213_v3, %v7550_v27  ;;  %v10234_v38 = vpop.permute.xlu1 %10233  ;;  %v7577_v37 = vsel %vm7569_vm12, %v7550_v27, %v24247_v1  ;;  %10515 = vmatprep.mubr.f32.mxu0 %v24405_v57 }
 0x254   :  { %12255 = vrot.lane.b32.xlu0 %v24575_v31, %s22748_s28  ;;  %20994 = vmatprep.subr.msk.mxu1 %vm146_vm0, %v7577_v37 }
 0x255   :  { %9581 = vrot.lane.b32.xlu1 %v23960_v14, %s22744_s29  ;;  %20995 = vmatpush1.msk.msra.mxu1 %vm146_vm0, %v7576_v30  ;;  %v24743_v14 = vld [vmem:[#allocation2 + $0x68] sm:$0x7] }
 0x256   :  { %v24729_v8 = vpop.permute.xlu0 %10235  ;;  %20996 = vmatmul.mubr.msk.f32.vlgmr.msra.gmra.mrb[6].mxu1 %vm142_vm1, %v24190_v29 }
 0x257   :  { %v24733_v3 = vpop.permute.xlu1 %10231  ;;  %v10263_v1 = vsel %vm10257_vm6, %v10234_v38, %v24729_v8  ;;  %8040 = vmatprep.mubr.f32.mxu1 %v24405_v57 }
 0x258   :  { %v10262_v44 = vsel %vm10257_vm6, %v24733_v3, %v10234_v38  ;;  %9583 = vrot.lane.b32.xlu0 %v23976_v4, %s22744_s29  ;;  %21091 = vmatprep.subr.msk.mxu0 %vm146_vm0, %v10263_v1 }
 0x259   :  { %12265 = vrot.lane.b32.xlu1 %v24743_v14, %s22748_s28  ;;  %21092 = vmatpush1.msk.msra.mxu0 %vm146_vm0, %v10262_v44 }
 0x25a   :  { %v7558_v5 = vpop.permute.xlu0 %7557  ;;  %21093 = vmatmul.mubr.msk.f32.vlgmr.msra.gmra.mrb[6].mxu0 %vm142_vm1, %v24702_v54 }
 0x25b   :  { %v7580_v0 = vsel %vm7569_vm12, %v24243_v43, %v7558_v5  ;;  %v10242_v11 = vpop.permute.xlu1 %10241  ;;  %v7581_v4 = vsel %vm7569_vm12, %v7558_v5, %v24284_v10  ;;  %10657 = vmatprep.mubr.f32.mxu0 %v24405_v57 }
 0x25c   :  { %12267 = vrot.lane.b32.xlu0 %v24607_v22, %s22748_s28  ;;  %21000 = vmatprep.subr.msk.mxu1 %vm146_vm0, %v7581_v4 }
 0x25d   :  { %12263 = vrot.lane.b32.xlu1 %v24620_v51, %s22748_s28  ;;  %21001 = vmatpush1.msk.msra.mxu1 %vm146_vm0, %v7580_v0 }
 0x25e   :  { %v24761_v59 = vpop.permute.xlu0 %10243  ;;  %21002 = vmatmul.mubr.msk.f32.vlgmr.msra.gmra.mrb[8].mxu1 %vm142_vm1, %v24190_v29 }
 0x25f   :  { %v24765_v43 = vpop.permute.xlu1 %10239  ;;  %v10267_v10 = vsel %vm10257_vm6, %v10242_v11, %v24761_v59  ;;  %8182 = vmatprep.mubr.f32.mxu1 %v24405_v57 }
 0x260   :  { %v10266_v58 = vsel %vm10257_vm6, %v24765_v43, %v10242_v11  ;;  %10229 = vrot.lane.b32.xlu0 %v24772_v46, %s22745_s22  ;;  %21097 = vmatprep.subr.msk.mxu0 %vm146_vm0, %v10267_v10  ;;  %v24842_v11 = vld [vmem:[%s26448_s1 + $0x80] sm:$0xff] }
 0x261   :  { %12913 = vrot.lane.b32.xlu1 %v24634_v23, %s22749_s0  ;;  %21098 = vmatpush1.msk.msra.mxu0 %vm146_vm0, %v10266_v58 }
 0x262   :  { %v7566_v19 = vpop.permute.xlu0 %7565  ;;  %21099 = vmatmul.mubr.msk.f32.vlgmr.msra.gmra.mrb[0].mxu0 %vm142_vm1, %v24702_v54 }
 0x263   :  { %v7584_v34 = vsel %vm7569_vm12, %v24272_v52, %v7566_v19  ;;  %v7568_v7 = vpop.permute.xlu1 %7567  ;;  %10799 = vmatprep.mubr.f32.mxu0 %v24405_v57  ;;  %v24796_v52 = vld [vmem:[#allocation2 + $0x38] sm:$0x7] }
 0x264   :  { %v7585_v25 = vsel %vm7569_vm12, %v7566_v19, %v7568_v7  ;;  %12915 = vrot.lane.b32.xlu0 %v24639_v24, %s22749_s0  ;;  %v24869_v19 = vpop.f32.mrb[0].mxu1 }
 0x265   :  { %12911 = vrot.lane.b32.xlu1 %v24649_v42, %s22749_s0  ;;  %21006 = vmatprep.subr.msk.mxu1 %vm146_vm0, %v7585_v25  ;;  %26467 = vst [vmem:[#allocation8_spill] sm:$0xff] %v24869_v19  ;;  %v24878_v25 = vpop.f32.mrb[1].mxu1 }
 0x266   :  { %21007 = vmatpush1.msk.msra.mxu1 %vm146_vm0, %v7584_v34  ;;  %v10250_v13 = vpop.permute.xlu0 %10249  ;;  %v24871_v34 = vld [vmem:[#allocation2 + $0x80] sm:$0x7]  ;;  %26468 = vst [vmem:[#allocation9_spill] sm:$0xff] %v24878_v25 }
 0x267   :  { %v24792_v18 = vpop.permute.xlu1 %10251  ;;  %21008 = vmatmul.mubr.msk.f32.vlgmr.msra.gmra.mrb[10].mxu1 %vm142_vm1, %v24190_v29 }
 0x268   :  { %10237 = vrot.lane.b32.xlu0 %v24796_v52, %s22745_s22  ;;  %v10271_v27 = vsel %vm10257_vm6, %v10250_v13, %v24792_v18  ;;  %8428 = vmatprep.mubr.f32.mxu1 %v24405_v57 }
 0x269   :  { %12921 = vrot.lane.b32.xlu1 %v24668_v47, %s22749_s0  ;;  %21103 = vmatprep.subr.msk.mxu0 %vm146_vm0, %v10271_v27 }
 0x26a   :  { %v24806_v42 = vpop.permute.xlu0 %10247 }
 0x26b   :  { %v10270_v29 = vsel %vm10257_vm6, %v24806_v42, %v10250_v13  ;;  %v8214_v30 = vpop.permute.xlu1 %8213 }
 0x26c   :  { %v8244_v38 = vsel %vm8241_vm13, %v24301_v6, %v8214_v30  ;;  %12923 = vrot.lane.b32.xlu0 %v24673_v12, %s22749_s0  ;;  %v8245_v37 = vsel %vm8241_vm13, %v8214_v30, %v24346_v2  ;;  %21104 = vmatpush1.msk.msra.mxu0 %vm146_vm0, %v10270_v29  ;;  %v24828_v2 = vld [vmem:[#allocation2 + $0x58] sm:$0x7] }
 0x26d   :  { %12919 = vrot.lane.b32.xlu1 %v24685_v61, %s22749_s0  ;;  %21013 = vmatprep.subr.msk.mxu1 %vm146_vm0, %v8245_v37  ;;  %v24910_v37 = vpop.f32.mrb[4].mxu1 }
 0x26e   :  { %21014 = vmatpush1.msk.msra.mxu1 %vm146_vm0, %v8244_v38  ;;  %v10898_v1 = vpop.permute.xlu0 %10897  ;;  %21105 = vmatmul.mubr.msk.f32.vlgmr.msra.gmra.mrb[2].mxu0 %vm142_vm1, %v24702_v54  ;;  %26469 = vst [vmem:[#allocation10_spill] sm:$0xff] %v24910_v37 }
 0x26f   :  { %v24823_v6 = vpop.permute.xlu1 %10899  ;;  %21015 = vmatmul.mubr.msk.f32.vlgmr.msra.gmra.mrb[2].mxu1 %vm142_vm1, %v24318_v60  ;;  %11045 = vmatprep.mubr.f32.mxu0 %v24405_v57 }
 0x270   :  { %10245 = vrot.lane.b32.xlu0 %v24828_v2, %s22745_s22  ;;  %v10931_v61 = vsel %vm10929_vm7, %v10898_v1, %v24823_v6  ;;  %8570 = vmatprep.mubr.f32.mxu1 %v24405_v57 }
 0x271   :  { %12929 = vrot.lane.b32.xlu1 %v24706_v48, %s22749_s0  ;;  %21110 = vmatprep.subr.msk.mxu0 %vm146_vm0, %v10931_v61 }
 0x272   :  { %v10896_v44 = vpop.permute.xlu0 %10895 }
 0x273   :  { %v10930_v5 = vsel %vm10929_vm7, %v10896_v44, %v10898_v1  ;;  %v8222_v0 = vpop.permute.xlu1 %8221 }
 0x274   :  { %v8248_v4 = vsel %vm8241_vm13, %v24333_v41, %v8222_v0  ;;  %12931 = vrot.lane.b32.xlu0 %v24711_v17, %s22749_s0  ;;  %v8249_v10 = vsel %vm8241_vm13, %v8222_v0, %v24376_v55  ;;  %21111 = vmatpush1.msk.msra.mxu0 %vm146_vm0, %v10930_v5  ;;  %v24862_v55 = vld [vmem:[#allocation2 + $0x78] sm:$0x7] }
 0x275   :  { %12927 = vrot.lane.b32.xlu1 %v24575_v31, %s22749_s0  ;;  %21019 = vmatprep.subr.msk.mxu1 %vm146_vm0, %v8249_v10 }
 0x276   :  { %21020 = vmatpush1.msk.msra.mxu1 %vm146_vm0, %v8248_v4  ;;  %v10906_v58 = vpop.permute.xlu0 %10905  ;;  %21112 = vmatmul.mubr.msk.f32.vlgmr.msra.gmra.mrb[4].mxu0 %vm142_vm1, %v24842_v11 }
 0x277   :  { %v24857_v41 = vpop.permute.xlu1 %10907  ;;  %21021 = vmatmul.mubr.msk.f32.vlgmr.msra.gmra.mrb[6].mxu1 %vm142_vm1, %v24318_v60  ;;  %11187 = vmatprep.mubr.f32.mxu0 %v24405_v57 }
 0x278   :  { %10253 = vrot.lane.b32.xlu0 %v24862_v55, %s22745_s22  ;;  %v10935_v31 = vsel %vm10929_vm7, %v10906_v58, %v24857_v41  ;;  %8712 = vmatprep.mubr.f32.mxu1 %v24405_v57 }
 0x279   :  { %10255 = vrot.lane.b32.xlu1 %v24871_v34, %s22745_s22  ;;  %21116 = vmatprep.subr.msk.mxu0 %vm146_vm0, %v10935_v31 }
 0x27a   :  { %v24876_v7 = vpop.permute.xlu0 %10903 }
 0x27b   :  { %v10934_v13 = vsel %vm10929_vm7, %v24876_v7, %v10906_v58  ;;  %v8230_v27 = vpop.permute.xlu1 %8229  ;;  %v24935_v58 = vld [vmem:[#allocation2 + $0x10] sm:$0x7] }
 0x27c   :  { %v8252_v29 = vsel %vm8241_vm13, %v24363_v45, %v8230_v27  ;;  %12937 = vrot.lane.b32.xlu0 %v24743_v14, %s22749_s0  ;;  %v8253_v30 = vsel %vm8241_vm13, %v8230_v27, %v24401_v32  ;;  %21117 = vmatpush1.msk.msra.mxu0 %vm146_vm0, %v10934_v13 }
 0x27d   :  { %12939 = vrot.lane.b32.xlu1 %v24607_v22, %s22749_s0  ;;  %21025 = vmatprep.subr.msk.mxu1 %vm146_vm0, %v8253_v30 }
 0x27e   :  { %21026 = vmatpush1.msk.msra.mxu1 %vm146_vm0, %v8252_v29  ;;  %v10914_v38 = vpop.permute.xlu0 %10913  ;;  %21118 = vmatmul.mubr.msk.f32.vlgmr.msra.gmra.mrb[6].mxu0 %vm142_vm1, %v24842_v11  ;;  %v24955_v29 = vld [vmem:[#allocation2 + $0x8] sm:$0x7] }
 0x27f   :  { %v24895_v45 = vpop.permute.xlu1 %10915  ;;  %21027 = vmatmul.mubr.msk.f32.vlgmr.msra.gmra.mrb[8].mxu1 %vm142_vm1, %v24318_v60  ;;  %11329 = vmatprep.mubr.f32.mxu0 %v24405_v57 }
 0x280   :  { %12935 = vrot.lane.b32.xlu0 %v24620_v51, %s22749_s0  ;;  %v10939_v32 = vsel %vm10929_vm7, %v10914_v38, %v24895_v45  ;;  %8854 = vmatprep.mubr.f32.mxu1 %v24405_v57  ;;  %v24921_v51 = vpop.f32.mrb[5].mxu1 }
 0x281   :  { %10901 = vrot.lane.b32.xlu1 %v24772_v46, %s22746_s30  ;;  %21122 = vmatprep.subr.msk.mxu0 %vm146_vm0, %v10939_v32  ;;  %26470 = vst [vmem:[#allocation11_spill] sm:$0xff] %v24921_v51 }
 0x282   :  { %v24908_v22 = vpop.permute.xlu0 %10911 }
 0x283   :  { %v10938_v1 = vsel %vm10929_vm7, %v24908_v22, %v10914_v38  ;;  %v8238_v61 = vpop.permute.xlu1 %8237 }
 0x284   :  { %10909 = vrot.lane.b32.xlu0 %v24796_v52, %s22746_s30  ;;  %21123 = vmatpush1.msk.msra.mxu0 %vm146_vm0, %v10938_v1  ;;  %v8256_v4 = vsel %vm8241_vm13, %v24397_v53, %v8238_v61 }
 0x285   :  { %10917 = vrot.lane.b32.xlu1 %v24828_v2, %s22746_s30  ;;  %21124 = vmatmul.mubr.msk.f32.vlgmr.msra.gmra.mrb[0].mxu0 %vm142_vm1, %v24842_v11 }
 0x286   :  { %v8240_v44 = vpop.permute.xlu0 %8239  ;;  %11471 = vmatprep.mubr.f32.mxu0 %v24405_v57 }
 0x287   :  { %v8257_v5 = vsel %vm8241_vm13, %v8238_v61, %v8240_v44  ;;  %v10922_v0 = vpop.permute.xlu1 %10921  ;;  %v24981_v44 = vld [vmem:[%s26448_s1 + $0x88] sm:$0xff] }
 0x288   :  { %10925 = vrot.lane.b32.xlu0 %v24862_v55, %s22746_s30  ;;  %21031 = vmatprep.subr.msk.mxu1 %vm146_vm0, %v8257_v5 }
 0x289   :  { %10927 = vrot.lane.b32.xlu1 %v24871_v34, %s22746_s30  ;;  %21032 = vmatpush1.msk.msra.mxu1 %vm146_vm0, %v8256_v4  ;;  %s22752_s30 = smov 114  }
 0x28a   :  { %v24933_v10 = vpop.permute.xlu0 %10923  ;;  %21033 = vmatmul.mubr.msk.f32.vlgmr.msra.gmra.mrb[10].mxu1 %vm142_vm1, %v24318_v60  ;;  %v24953_v60 = vld [vmem:[#allocation2 + $0x18] sm:$0x7] }
 0x28b   :  { %v24940_v53 = vpop.permute.xlu1 %10919  ;;  %v10943_v31 = vsel %vm10929_vm7, %v10922_v0, %v24933_v10  ;;  %9100 = vmatprep.mubr.f32.mxu1 %v24405_v57 }
 0x28c   :  { %v10942_v13 = vsel %vm10929_vm7, %v24940_v53, %v10922_v0  ;;  %11573 = vrot.lane.b32.xlu0 %v24772_v46, %s22747_s19  ;;  %21128 = vmatprep.subr.msk.mxu0 %vm146_vm0, %v10943_v31  ;;  %v24991_v0 = vld [vmem:[#allocation2 + $0x38] sm:$0x7]  ;;  %v24993_v31 = vld [vmem:[#allocation2 + $0x28] sm:$0x7] }
 0x28d   :  { %14240 = vrot.lane.b32.xlu1 %v24935_v58, %s22731_s24  ;;  %21129 = vmatpush1.msk.msra.mxu0 %vm146_vm0, %v10942_v13 }
 0x28e   :  { %v8886_v27 = vpop.permute.xlu0 %8885  ;;  %21130 = vmatmul.mubr.msk.f32.vlgmr.msra.gmra.mrb[2].mxu0 %vm142_vm1, %v24842_v11 }
 0x28f   :  { %v8916_v30 = vsel %vm8913_vm14, %v24429_v49, %v8886_v27  ;;  %v11570_v38 = vpop.permute.xlu1 %11569  ;;  %v8917_v32 = vsel %vm8913_vm14, %v8886_v27, %v24465_v40  ;;  %11717 = vmatprep.mubr.f32.mxu0 %v24405_v57  ;;  %v24972_v49 = vld [vmem:[#allocation2 + $0x30] sm:$0x7] }
 0x290   :  { %14242 = vrot.lane.b32.xlu0 %v24953_v60, %s22731_s24  ;;  %21038 = vmatprep.subr.msk.mxu1 %vm146_vm0, %v8917_v32  ;;  %v25010_v32 = vld [vmem:[#allocation2 + $0x50] sm:$0x7] }
 0x291   :  { %14238 = vrot.lane.b32.xlu1 %v24955_v29, %s22731_s24  ;;  %21039 = vmatpush1.msk.msra.mxu1 %vm146_vm0, %v8916_v30 }
 0x292   :  { %v24970_v1 = vpop.permute.xlu0 %11571  ;;  %21040 = vmatmul.mubr.msk.f32.vlgmr.msra.gmra.mrb[2].mxu1 %vm142_vm1, %v24438_v33 }
 0x293   :  { %v11568_v40 = vpop.permute.xlu1 %11567  ;;  %v11603_v61 = vsel %vm11601_vm9, %v11570_v38, %v24970_v1  ;;  %9242 = vmatprep.mubr.f32.mxu1 %v24405_v57 }
 0x294   :  { %v11602_v5 = vsel %vm11601_vm9, %v11568_v40, %v11570_v38  ;;  %11581 = vrot.lane.b32.xlu0 %v24796_v52, %s22747_s19  ;;  %21135 = vmatprep.subr.msk.mxu0 %vm146_vm0, %v11603_v61  ;;  %v25027_v61 = vld [vmem:[#allocation2 + $0x58] sm:$0x7] }
 0x295   :  { %14248 = vrot.lane.b32.xlu1 %v24972_v49, %s22731_s24  ;;  %21136 = vmatpush1.msk.msra.mxu0 %vm146_vm0, %v11602_v5 }
 0x296   :  { %v8894_v4 = vpop.permute.xlu0 %8893  ;;  %21137 = vmatmul.mubr.msk.f32.vlgmr.msra.gmra.mrb[4].mxu0 %vm142_vm1, %v24981_v44 }
 0x297   :  { %v8920_v13 = vsel %vm8913_vm14, %v24461_v63, %v8894_v4  ;;  %v11578_v27 = vpop.permute.xlu1 %11577  ;;  %v8921_v30 = vsel %vm8913_vm14, %v8894_v4, %v24495_v39  ;;  %11859 = vmatprep.mubr.f32.mxu0 %v24405_v57  ;;  %v25029_v4 = vld [vmem:[#allocation2 + $0x48] sm:$0x7] }
 0x298   :  { %14250 = vrot.lane.b32.xlu0 %v24991_v0, %s22731_s24  ;;  %21044 = vmatprep.subr.msk.mxu1 %vm146_vm0, %v8921_v30 }
 0x299   :  { %14246 = vrot.lane.b32.xlu1 %v24993_v31, %s22731_s24  ;;  %21045 = vmatpush1.msk.msra.mxu1 %vm146_vm0, %v8920_v13 }
 0x29a   :  { %v25008_v38 = vpop.permute.xlu0 %11579  ;;  %21046 = vmatmul.mubr.msk.f32.vlgmr.msra.gmra.mrb[6].mxu1 %vm142_vm1, %v24438_v33 }
 0x29b   :  { %v25014_v63 = vpop.permute.xlu1 %11575  ;;  %v11607_v39 = vsel %vm11601_vm9, %v11578_v27, %v25008_v38  ;;  %9384 = vmatprep.mubr.f32.mxu1 %v24405_v57 }
 0x29c   :  { %v11606_v40 = vsel %vm11601_vm9, %v25014_v63, %v11578_v27  ;;  %11589 = vrot.lane.b32.xlu0 %v24828_v2, %s22747_s19  ;;  %21141 = vmatprep.subr.msk.mxu0 %vm146_vm0, %v11607_v39 }
 0x29d   :  { %14256 = vrot.lane.b32.xlu1 %v25010_v32, %s22731_s24  ;;  %21142 = vmatpush1.msk.msra.mxu0 %vm146_vm0, %v11606_v40 }
 0x29e   :  { %v8902_v5 = vpop.permute.xlu0 %8901  ;;  %21143 = vmatmul.mubr.msk.f32.vlgmr.msra.gmra.mrb[6].mxu0 %vm142_vm1, %v24981_v44 }
 0x29f   :  { %v8924_v13 = vsel %vm8913_vm14, %v24491_v62, %v8902_v5  ;;  %v11586_v27 = vpop.permute.xlu1 %11585  ;;  %v8925_v30 = vsel %vm8913_vm14, %v8902_v5, %v24532_v15  ;;  %12001 = vmatprep.mubr.f32.mxu0 %v24405_v57  ;;  %v25061_v5 = vld [vmem:[#allocation2 + $0x70] sm:$0x7] }
 0x2a0   :  { %14258 = vrot.lane.b32.xlu0 %v25027_v61, %s22731_s24  ;;  %21050 = vmatprep.subr.msk.mxu1 %vm146_vm0, %v8925_v30  ;;  %v25063_v30 = vld [vmem:[#allocation2 + $0x78] sm:$0x7] }
 0x2a1   :  { %14254 = vrot.lane.b32.xlu1 %v25029_v4, %s22731_s24  ;;  %21051 = vmatpush1.msk.msra.mxu1 %vm146_vm0, %v8924_v13 }
 0x2a2   :  { %v25044_v39 = vpop.permute.xlu0 %11587  ;;  %21052 = vmatmul.mubr.msk.f32.vlgmr.msra.gmra.mrb[8].mxu1 %vm142_vm1, %v24438_v33 }
 0x2a3   :  { %v25048_v62 = vpop.permute.xlu1 %11583  ;;  %v11611_v15 = vsel %vm11601_vm9, %v11586_v27, %v25044_v39  ;;  %9526 = vmatprep.mubr.f32.mxu1 %v24405_v57 }
 0x2a4   :  { %v11610_v40 = vsel %vm11601_vm9, %v25048_v62, %v11586_v27  ;;  %11597 = vrot.lane.b32.xlu0 %v24862_v55, %s22747_s19  ;;  %21147 = vmatprep.subr.msk.mxu0 %vm146_vm0, %v11611_v15 }
 0x2a5   :  { %11599 = vrot.lane.b32.xlu1 %v24871_v34, %s22747_s19  ;;  %21148 = vmatpush1.msk.msra.mxu0 %vm146_vm0, %v11610_v40  ;;  %v25076_v40 = vld [vmem:[#allocation2 + $0x68] sm:$0x7]  ;;  %s22753_s19 = smov 113  }
 0x2a6   :  { %v8910_v13 = vpop.permute.xlu0 %8909  ;;  %21149 = vmatmul.mubr.msk.f32.vlgmr.msra.gmra.mrb[0].mxu0 %vm142_vm1, %v24981_v44 }
 0x2a7   :  { %v8928_v27 = vsel %vm8913_vm14, %v24520_v56, %v8910_v13  ;;  %v8912_v51 = vpop.permute.xlu1 %8911  ;;  %12143 = vmatprep.mubr.f32.mxu0 %v24405_v57 }
 0x2a8   :  { %v8929_v15 = vsel %vm8913_vm14, %v8910_v13, %v8912_v51  ;;  %14264 = vrot.lane.b32.xlu0 %v25061_v5, %s22731_s24 }
 0x2a9   :  { %14266 = vrot.lane.b32.xlu1 %v25063_v30, %s22731_s24  ;;  %21056 = vmatprep.subr.msk.mxu1 %vm146_vm0, %v8929_v15 }
 0x2aa   :  { %21057 = vmatpush1.msk.msra.mxu1 %vm146_vm0, %v8928_v27  ;;  %v11594_v37 = vpop.permute.xlu0 %11593 }
 0x2ab   :  { %v25079_v25 = vpop.permute.xlu1 %11595  ;;  %21058 = vmatmul.mubr.msk.f32.vlgmr.msra.gmra.mrb[10].mxu1 %vm142_vm1, %v24438_v33 }
 0x2ac   :  { %14262 = vrot.lane.b32.xlu0 %v25076_v40, %s22731_s24  ;;  %v11615_v56 = vsel %vm11601_vm9, %v11594_v37, %v25079_v25  ;;  %9772 = vmatprep.mubr.f32.mxu1 %v24405_v57 }
 0x2ad   :  { %12245 = vrot.lane.b32.xlu1 %v24772_v46, %s22748_s28  ;;  %21153 = vmatprep.subr.msk.mxu0 %vm146_vm0, %v11615_v56 }
 0x2ae   :  { %v25091_v51 = vpop.permute.xlu0 %11591 }
 0x2af   :  { %v11614_v13 = vsel %vm11601_vm9, %v25091_v51, %v11594_v37  ;;  %v9558_v27 = vpop.permute.xlu1 %9557 }
 0x2b0   :  { %v9588_v33 = vsel %vm9585_vm15, %v24549_v9, %v9558_v27  ;;  %14911 = vrot.lane.b32.xlu0 %v24935_v58, %s22732_s26  ;;  %v9589_v15 = vsel %vm9585_vm15, %v9558_v27, %v24596_v16  ;;  %21154 = vmatpush1.msk.msra.mxu0 %vm146_vm0, %v11614_v13  ;;  %v22750_v13 = vmov 0  }
 0x2b1   :  { %14913 = vrot.lane.b32.xlu1 %v24953_v60, %s22732_s26  ;;  %21063 = vmatprep.subr.msk.mxu1 %vm146_vm0, %v9589_v15  ;;  %v25125_v15 = vld [vmem:[%s26448_s1 + $0x90] sm:$0xff] }
 0x2b2   :  { %21064 = vmatpush1.msk.msra.mxu1 %vm146_vm0, %v9588_v33  ;;  %v12242_v37 = vpop.permute.xlu0 %12241  ;;  %21155 = vmatmul.mubr.msk.f32.vlgmr.msra.gmra.mrb[2].mxu0 %vm142_vm1, %v24981_v44 }
 0x2b3   :  { %v25108_v9 = vpop.permute.xlu1 %12243  ;;  %21065 = vmatmul.mubr.msk.f32.vlgmr.msra.gmra.mrb[2].mxu1 %vm142_vm1, %v24566_v36  ;;  %12389 = vmatprep.mubr.f32.mxu0 %v24405_v57 }
 0x2b4   :  { %14909 = vrot.lane.b32.xlu0 %v24955_v29, %s22732_s26  ;;  %v12275_v16 = vsel %vm12273_vm10, %v12242_v37, %v25108_v9  ;;  %9914 = vmatprep.mubr.f32.mxu1 %v24405_v57 }
 0x2b5   :  { %12253 = vrot.lane.b32.xlu1 %v24796_v52, %s22748_s28  ;;  %21160 = vmatprep.subr.msk.mxu0 %vm146_vm0, %v12275_v16 }
 0x2b6   :  { %v12240_v56 = vpop.permute.xlu0 %12239  ;;  %22625 = vset.pattern.permute.xlu1 %v22750_v13  ;;  %22626 = vset.pattern.permute.xlu0 %v22750_v13 }
 0x2b7   :  { %v12274_v27 = vsel %vm12273_vm10, %v12240_v56, %v12242_v37  ;;  %v9566_v33 = vpop.permute.xlu1 %9565 }
 0x2b8   :  { %v9592_v19 = vsel %vm9585_vm15, %v24583_v21, %v9566_v33  ;;  %14919 = vrot.lane.b32.xlu0 %v24972_v49, %s22732_s26  ;;  %v9593_v16 = vsel %vm9585_vm15, %v9566_v33, %v24630_v20  ;;  %21161 = vmatpush1.msk.msra.mxu0 %vm146_vm0, %v12274_v27 }
 0x2b9   :  { %14921 = vrot.lane.b32.xlu1 %v24991_v0, %s22732_s26  ;;  %21069 = vmatprep.subr.msk.mxu1 %vm146_vm0, %v9593_v16 }
 0x2ba   :  { %21070 = vmatpush1.msk.msra.mxu1 %vm146_vm0, %v9592_v19  ;;  %v12250_v37 = vpop.permute.xlu0 %12249  ;;  %21162 = vmatmul.mubr.msk.f32.vlgmr.msra.gmra.mrb[4].mxu0 %vm142_vm1, %v25125_v15 }
 0x2bb   :  { %v25140_v21 = vpop.permute.xlu1 %12251  ;;  %21071 = vmatmul.mubr.msk.f32.vlgmr.msra.gmra.mrb[6].mxu1 %vm142_vm1, %v24566_v36  ;;  %12531 = vmatprep.mubr.f32.mxu0 %v24405_v57 }
 0x2bc   :  { %14917 = vrot.lane.b32.xlu0 %v24993_v31, %s22732_s26  ;;  %v12279_v20 = vsel %vm12273_vm10, %v12250_v37, %v25140_v21  ;;  %10056 = vmatprep.mubr.f32.mxu1 %v24405_v57 }
 0x2bd   :  { %12261 = vrot.lane.b32.xlu1 %v24828_v2, %s22748_s28  ;;  %21166 = vmatprep.subr.msk.mxu0 %vm146_vm0, %v12279_v20 }
 0x2be   :  { %v25153_v19 = vpop.permute.xlu0 %12247 }
 0x2bf   :  { %v12278_v56 = vsel %vm12273_vm10, %v25153_v19, %v12250_v37  ;;  %v9574_v13 = vpop.permute.xlu1 %9573 }
 0x2c0   :  { %v9596_v27 = vsel %vm9585_vm15, %v24615_v26, %v9574_v13  ;;  %14927 = vrot.lane.b32.xlu0 %v25010_v32, %s22732_s26  ;;  %v9597_v33 = vsel %vm9585_vm15, %v9574_v13, %v24661_v50  ;;  %21167 = vmatpush1.msk.msra.mxu0 %vm146_vm0, %v12278_v56  ;;  %v25194_v13 = vld [vmem:[#allocation2 + $0x80] sm:$0xff] }
 0x2c1   :  { %14929 = vrot.lane.b32.xlu1 %v25027_v61, %s22732_s26  ;;  %21075 = vmatprep.subr.msk.mxu1 %vm146_vm0, %v9597_v33 }
 0x2c2   :  { %21076 = vmatpush1.msk.msra.mxu1 %vm146_vm0, %v9596_v27  ;;  %v12258_v16 = vpop.permute.xlu0 %12257  ;;  %21168 = vmatmul.mubr.msk.f32.vlgmr.msra.gmra.mrb[6].mxu0 %vm142_vm1, %v25125_v15 }
 0x2c3   :  { %v25170_v26 = vpop.permute.xlu1 %12259  ;;  %21077 = vmatmul.mubr.msk.f32.vlgmr.msra.gmra.mrb[8].mxu1 %vm142_vm1, %v24566_v36  ;;  %12673 = vmatprep.mubr.f32.mxu0 %v24405_v57 }
 0x2c4   :  { %14925 = vrot.lane.b32.xlu0 %v25029_v4, %s22732_s26  ;;  %v12283_v50 = vsel %vm12273_vm10, %v12258_v16, %v25170_v26  ;;  %10198 = vmatprep.mubr.f32.mxu1 %v24405_v57 }
 0x2c5   :  { %12269 = vrot.lane.b32.xlu1 %v24862_v55, %s22748_s28  ;;  %21172 = vmatprep.subr.msk.mxu0 %vm146_vm0, %v12283_v50 }
 0x2c6   :  { %v25183_v37 = vpop.permute.xlu0 %12255 }
 0x2c7   :  { %v12282_v20 = vsel %vm12273_vm10, %v25183_v37, %v12258_v16  ;;  %v9582_v56 = vpop.permute.xlu1 %9581 }
 0x2c8   :  { %12271 = vrot.lane.b32.xlu0 %v24871_v34, %s22748_s28  ;;  %21173 = vmatpush1.msk.msra.mxu0 %vm146_vm0, %v12282_v20  ;;  %v9600_v16 = vsel %vm9585_vm15, %v24657_v28, %v9582_v56 }
 0x2c9   :  { %14935 = vrot.lane.b32.xlu1 %v25061_v5, %s22732_s26  ;;  %21174 = vmatmul.mubr.msk.f32.vlgmr.msra.gmra.mrb[0].mxu0 %vm142_vm1, %v25125_v15 }
 0x2ca   :  { %v9584_v57 = vpop.permute.xlu0 %9583  ;;  %12815 = vmatprep.mubr.f32.mxu0 %v25194_v13 }
 0x2cb   :  { %v9601_v27 = vsel %vm9585_vm15, %v9582_v56, %v9584_v57  ;;  %v12266_v33 = vpop.permute.xlu1 %12265 }
 0x2cc   :  { %14937 = vrot.lane.b32.xlu0 %v25063_v30, %s22732_s26  ;;  %21081 = vmatprep.subr.msk.mxu1 %vm146_vm0, %v9601_v27 }
 0x2cd   :  { %14933 = vrot.lane.b32.xlu1 %v25076_v40, %s22732_s26  ;;  %21082 = vmatpush1.msk.msra.mxu1 %vm146_vm0, %v9600_v16  ;;  %v25245_v16 = vld [vmem:[%s26448_s1 + $0x98] sm:$0xff] }
 0x2ce   :  { %v25206_v50 = vpop.permute.xlu0 %12267  ;;  %21083 = vmatmul.mubr.msk.f32.vlgmr.msra.gmra.mrb[10].mxu1 %vm142_vm1, %v24566_v36 }
 0x2cf   :  { %v25210_v20 = vpop.permute.xlu1 %12263  ;;  %v12287_v28 = vsel %vm12273_vm10, %v12266_v33, %v25206_v50  ;;  %10444 = vmatprep.mubr.f32.mxu1 %v25194_v13 }
 0x2d0   :  { %v12286_v56 = vsel %vm12273_vm10, %v25210_v20, %v12266_v33  ;;  %12917 = vrot.lane.b32.xlu0 %v24772_v46, %s22749_s0  ;;  %21178 = vmatprep.subr.msk.mxu0 %vm146_vm0, %v12287_v28 }
 0x2d1   :  { %15582 = vrot.lane.b32.xlu1 %v24935_v58, %s22733_s27  ;;  %21179 = vmatpush1.msk.msra.mxu0 %vm146_vm0, %v12286_v56 }
 0x2d2   :  { %v10230_v36 = vpop.permute.xlu0 %10229  ;;  %21180 = vmatmul.mubr.msk.f32.vlgmr.msra.gmra.mrb[2].mxu0 %vm142_vm1, %v25125_v15 }
 0x2d3   :  { %v10260_v57 = vsel %vm10257_vm6, %v24693_v35, %v10230_v36  ;;  %v12914_v27 = vpop.permute.xlu1 %12913  ;;  %v10261_v33 = vsel %vm10257_vm6, %v10230_v36, %v24733_v3  ;;  %13061 = vmatprep.mubr.f32.mxu0 %v25194_v13 }
 0x2d4   :  { %15584 = vrot.lane.b32.xlu0 %v24953_v60, %s22733_s27  ;;  %21088 = vmatprep.subr.msk.mxu1 %vm146_vm0, %v10261_v33 }
 0x2d5   :  { %15580 = vrot.lane.b32.xlu1 %v24955_v29, %s22733_s27  ;;  %21089 = vmatpush1.msk.msra.mxu1 %vm146_vm0, %v10260_v57 }
 0x2d6   :  { %v25236_v46 = vpop.permute.xlu0 %12915  ;;  %21090 = vmatmul.mubr.msk.f32.vlgmr.msra.gmra.mrb[2].mxu1 %vm142_vm1, %v24702_v54 }
 0x2d7   :  { %v12912_v35 = vpop.permute.xlu1 %12911  ;;  %v12947_v3 = vsel %vm12945_vm11, %v12914_v27, %v25236_v46  ;;  %10586 = vmatprep.mubr.f32.mxu1 %v25194_v13 }
 0x2d8   :  { %v12946_v28 = vsel %vm12945_vm11, %v12912_v35, %v12914_v27  ;;  %12925 = vrot.lane.b32.xlu0 %v24796_v52, %s22749_s0  ;;  %21185 = vmatprep.subr.msk.mxu0 %vm146_vm0, %v12947_v3 }
 0x2d9   :  { %15590 = vrot.lane.b32.xlu1 %v24972_v49, %s22733_s27  ;;  %21186 = vmatpush1.msk.msra.mxu0 %vm146_vm0, %v12946_v28 }
 0x2da   :  { %v10238_v56 = vpop.permute.xlu0 %10237  ;;  %21187 = vmatmul.mubr.msk.f32.vlgmr.msra.gmra.mrb[4].mxu0 %vm142_vm1, %v25245_v16 }
 0x2db   :  { %v10264_v36 = vsel %vm10257_vm6, %v24729_v8, %v10238_v56  ;;  %v12922_v57 = vpop.permute.xlu1 %12921  ;;  %v10265_v27 = vsel %vm10257_vm6, %v10238_v56, %v24765_v43  ;;  %13203 = vmatprep.mubr.f32.mxu0 %v25194_v13 }
 0x2dc   :  { %15592 = vrot.lane.b32.xlu0 %v24991_v0, %s22733_s27  ;;  %21094 = vmatprep.subr.msk.mxu1 %vm146_vm0, %v10265_v27 }
 0x2dd   :  { %15588 = vrot.lane.b32.xlu1 %v24993_v31, %s22733_s27  ;;  %21095 = vmatpush1.msk.msra.mxu1 %vm146_vm0, %v10264_v36 }
 0x2de   :  { %v25268_v52 = vpop.permute.xlu0 %12923  ;;  %21096 = vmatmul.mubr.msk.f32.vlgmr.msra.gmra.mrb[6].mxu1 %vm142_vm1, %v24702_v54 }
 0x2df   :  { %v25272_v8 = vpop.permute.xlu1 %12919  ;;  %v12951_v43 = vsel %vm12945_vm11, %v12922_v57, %v25268_v52  ;;  %10728 = vmatprep.mubr.f32.mxu1 %v25194_v13 }
 0x2e0   :  { %v12950_v33 = vsel %vm12945_vm11, %v25272_v8, %v12922_v57  ;;  %12933 = vrot.lane.b32.xlu0 %v24828_v2, %s22749_s0  ;;  %21191 = vmatprep.subr.msk.mxu0 %vm146_vm0, %v12951_v43 }
 0x2e1   :  { %15598 = vrot.lane.b32.xlu1 %v25010_v32, %s22733_s27  ;;  %21192 = vmatpush1.msk.msra.mxu0 %vm146_vm0, %v12950_v33 }
 0x2e2   :  { %v10246_v35 = vpop.permute.xlu0 %10245  ;;  %21193 = vmatmul.mubr.msk.f32.vlgmr.msra.gmra.mrb[6].mxu0 %vm142_vm1, %v25245_v16 }
 0x2e3   :  { %v10268_v3 = vsel %vm10257_vm6, %v24761_v59, %v10246_v35  ;;  %v12930_v28 = vpop.permute.xlu1 %12929  ;;  %v10269_v56 = vsel %vm10257_vm6, %v10246_v35, %v24806_v42  ;;  %13345 = vmatprep.mubr.f32.mxu0 %v25194_v13 }
 0x2e4   :  { %15600 = vrot.lane.b32.xlu0 %v25027_v61, %s22733_s27  ;;  %21100 = vmatprep.subr.msk.mxu1 %vm146_vm0, %v10269_v56 }
 0x2e5   :  { %15596 = vrot.lane.b32.xlu1 %v25029_v4, %s22733_s27  ;;  %21101 = vmatpush1.msk.msra.mxu1 %vm146_vm0, %v10268_v3 }
 0x2e6   :  { %v25298_v2 = vpop.permute.xlu0 %12931  ;;  %21102 = vmatmul.mubr.msk.f32.vlgmr.msra.gmra.mrb[8].mxu1 %vm142_vm1, %v24702_v54 }
 0x2e7   :  { %v25302_v59 = vpop.permute.xlu1 %12927  ;;  %v12955_v42 = vsel %vm12945_vm11, %v12930_v28, %v25298_v2  ;;  %10870 = vmatprep.mubr.f32.mxu1 %v25194_v13 }
 0x2e8   :  { %v12954_v36 = vsel %vm12945_vm11, %v25302_v59, %v12930_v28  ;;  %12941 = vrot.lane.b32.xlu0 %v24862_v55, %s22749_s0  ;;  %21197 = vmatprep.subr.msk.mxu0 %vm146_vm0, %v12955_v42 }
 0x2e9   :  { %12943 = vrot.lane.b32.xlu1 %v24871_v34, %s22749_s0  ;;  %21198 = vmatpush1.msk.msra.mxu0 %vm146_vm0, %v12954_v36  ;;  %v25452_v36 = vld [vmem:[#allocation2 + $0x80] sm:$0x7] }
 0x2ea   :  { %v10254_v57 = vpop.permute.xlu0 %10253  ;;  %21199 = vmatmul.mubr.msk.f32.vlgmr.msra.gmra.mrb[0].mxu0 %vm142_vm1, %v25245_v16 }
 0x2eb   :  { %v10272_v27 = vsel %vm10257_vm6, %v24792_v18, %v10254_v57  ;;  %v10256_v43 = vpop.permute.xlu1 %10255  ;;  %13487 = vmatprep.mubr.f32.mxu0 %v25194_v13 }
 0x2ec   :  { %v10273_v33 = vsel %vm10257_vm6, %v10254_v57, %v10256_v43  ;;  %15606 = vrot.lane.b32.xlu0 %v25061_v5, %s22733_s27  ;;  %v25470_v43 = vld [vmem:[%s26448_s1 + $0xa8] sm:$0xff] }
 0x2ed   :  { %15608 = vrot.lane.b32.xlu1 %v25063_v30, %s22733_s27  ;;  %21106 = vmatprep.subr.msk.mxu1 %vm146_vm0, %v10273_v33  ;;  %v25478_v33 = vld [vmem:[#allocation2 + $0x88] sm:$0x7] }
 0x2ee   :  { %21107 = vmatpush1.msk.msra.mxu1 %vm146_vm0, %v10272_v27  ;;  %v12938_v55 = vpop.permute.xlu0 %12937 }
 0x2ef   :  { %v25327_v34 = vpop.permute.xlu1 %12939  ;;  %21108 = vmatmul.mubr.msk.f32.vlgmr.msra.gmra.mrb[10].mxu1 %vm142_vm1, %v24702_v54 }
 0x2f0   :  { %15604 = vrot.lane.b32.xlu0 %v25076_v40, %s22733_s27  ;;  %v12959_v18 = vsel %vm12945_vm11, %v12938_v55, %v25327_v34  ;;  %11116 = vmatprep.mubr.f32.mxu1 %v25194_v13 }
 0x2f1   :  { %16253 = vrot.lane.b32.xlu1 %v24935_v58, %s22734_s5  ;;  %21203 = vmatprep.subr.msk.mxu0 %vm146_vm0, %v12959_v18 }
 0x2f2   :  { %v25339_v35 = vpop.permute.xlu0 %12935 }
 0x2f3   :  { %v12958_v3 = vsel %vm12945_vm11, %v25339_v35, %v12938_v55  ;;  %v10902_v28 = vpop.permute.xlu1 %10901 }
 0x2f4   :  { %v10932_v54 = vsel %vm10929_vm7, %v24823_v6, %v10902_v28  ;;  %16255 = vrot.lane.b32.xlu0 %v24953_v60, %s22734_s5  ;;  %v10933_v56 = vsel %vm10929_vm7, %v10902_v28, %v24876_v7  ;;  %21204 = vmatpush1.msk.msra.mxu0 %vm146_vm0, %v12958_v3 }
 0x2f5   :  { %16251 = vrot.lane.b32.xlu1 %v24955_v29, %s22734_s5  ;;  %21113 = vmatprep.subr.msk.mxu1 %vm146_vm0, %v10933_v56  ;;  %v25370_v29 = vld [vmem:[%s26448_s1 + $0xa0] sm:$0xff] }
 0x2f6   :  { %21114 = vmatpush1.msk.msra.mxu1 %vm146_vm0, %v10932_v54  ;;  %21205 = vmatmul.mubr.msk.f32.vlgmr.msra.gmra.mrb[2].mxu0 %vm142_vm1, %v25245_v16  ;;  %v10910_v58 = vpop.permute.xlu0 %10909 }
 0x2f7   :  { %v10936_v6 = vsel %vm10929_vm7, %v24857_v41, %v10910_v58  ;;  %21115 = vmatmul.mubr.msk.f32.vlgmr.msra.gmra.mrb[2].mxu1 %vm142_vm1, %v24842_v11  ;;  %v10918_v7 = vpop.permute.xlu1 %10917  ;;  %21210 = vmatprep.subr.msk.mxu0 %vm146_vm0, %v24639_v24  ;;  %v10937_v60 = vsel %vm10929_vm7, %v10910_v58, %v24908_v22 }
 0x2f8   :  { %16261 = vrot.lane.b32.xlu0 %v24972_v49, %s22734_s5  ;;  %21119 = vmatprep.subr.msk.mxu1 %vm146_vm0, %v10937_v60  ;;  %v10941_v41 = vsel %vm10929_vm7, %v10918_v7, %v24940_v53  ;;  %v10940_v49 = vsel %vm10929_vm7, %v24895_v45, %v10918_v7 }
 0x2f9   :  { %16263 = vrot.lane.b32.xlu1 %v24991_v0, %s22734_s5  ;;  %21211 = vmatpush1.msk.msra.mxu0 %vm146_vm0, %v24634_v23 }
 0x2fa   :  { %13682 = vmatprep.mubr.f32.mxu0 %v25194_v13  ;;  %21120 = vmatpush1.msk.msra.mxu1 %vm146_vm0, %v10936_v6  ;;  %v10926_v24 = vpop.permute.xlu0 %10925 }
 0x2fb   :  { %11258 = vmatprep.mubr.f32.mxu1 %v25194_v13  ;;  %21212 = vmatmul.mubr.msk.f32.vlgmr.msra.gmra.mrb[4].mxu0 %vm142_vm1, %v25370_v29  ;;  %v10928_v22 = vpop.permute.xlu1 %10927 }
 0x2fc   :  { %21121 = vmatmul.mubr.msk.f32.vlgmr.msra.gmra.mrb[6].mxu1 %vm142_vm1, %v24842_v11  ;;  %21125 = vmatprep.subr.msk.mxu1 %vm146_vm0, %v10941_v41  ;;  %v10945_v23 = vsel %vm10929_vm7, %v10926_v24, %v10928_v22 }
 0x2fd   :  { %21126 = vmatpush1.msk.msra.mxu1 %vm146_vm0, %v10940_v49  ;;  %21216 = vmatprep.subr.msk.mxu0 %vm146_vm0, %v24673_v12  ;;  %v10944_v12 = vsel %vm10929_vm7, %v24933_v10, %v10926_v24 }
 0x2fe   :  { %16259 = vrot.lane.b32.xlu0 %v24993_v31, %s22734_s5  ;;  %16269 = vrot.lane.b32.xlu1 %v25010_v32, %s22734_s5  ;;  %v11574_v53 = vpop.permute.xlu0 %11573  ;;  %v25423_v31 = vld [vmem:[#allocation2 + $0x20] sm:$0x7] }
 0x2ff   :  { %21131 = vmatprep.subr.msk.mxu1 %vm146_vm0, %v10945_v23  ;;  %21217 = vmatpush1.msk.msra.mxu0 %vm146_vm0, %v24668_v47  ;;  %v14241_v45 = vpop.permute.xlu1 %14240  ;;  %v11605_v0 = vsel %vm11601_vm9, %v11574_v53, %v25014_v63  ;;  %v25431_v32 = vld [vmem:[#allocation2 + $0x40] sm:$0x7] }
 0x300   :  { %13824 = vmatprep.mubr.f32.mxu0 %v25194_v13  ;;  %11400 = vmatprep.mubr.f32.mxu1 %v25194_v13 }
 0x301   :  { %21218 = vmatmul.mubr.msk.f32.vlgmr.msra.gmra.mrb[6].mxu0 %vm142_vm1, %v25370_v29  ;;  %21127 = vmatmul.mubr.msk.f32.vlgmr.msra.gmra.mrb[8].mxu1 %vm142_vm1, %v24842_v11 }
 0x302   :  { %21132 = vmatpush1.msk.msra.mxu1 %vm146_vm0, %v10944_v12  ;;  %21222 = vmatprep.subr.msk.mxu0 %vm146_vm0, %v24711_v17  ;;  %v25412_v47 = vpop.permute.xlu0 %14242  ;;  %v11604_v17 = vsel %vm11601_vm9, %v24970_v1, %v11574_v53 }
 0x303   :  { %16271 = vrot.lane.b32.xlu0 %v25027_v61, %s22734_s5  ;;  %16267 = vrot.lane.b32.xlu1 %v25029_v4, %s22734_s5  ;;  %v14239_v10 = vpop.permute.xlu1 %14238  ;;  %v14273_v61 = vsel %vm849_vm2, %v14241_v45, %v25412_v47 }
 0x304   :  { %21138 = vmatprep.subr.msk.mxu1 %vm146_vm0, %v11605_v0  ;;  %21223 = vmatpush1.msk.msra.mxu0 %vm146_vm0, %v24706_v48  ;;  %v22692_v48 = vld [vmem:[#allocation2 + $0x70] sm:$0x7]  ;;  %v14272_v1 = vsel %vm849_vm2, %v14239_v10, %v14241_v45 }
 0x305   :  { %13966 = vmatprep.mubr.f32.mxu0 %v25194_v13  ;;  %11542 = vmatprep.mubr.f32.mxu1 %v25194_v13 }
 0x306   :  { %21224 = vmatmul.mubr.msk.f32.vlgmr.msra.gmra.mrb[0].mxu0 %vm142_vm1, %v25370_v29  ;;  %21133 = vmatmul.mubr.msk.f32.vlgmr.msra.gmra.mrb[10].mxu1 %vm142_vm1, %v24842_v11  ;;  %v11582_v63 = vpop.permute.xlu0 %11581  ;;  %v25445_v11 = vld [vmem:[#allocation2 + $0x60] sm:$0x7] }
 0x307   :  { %21139 = vmatpush1.msk.msra.mxu1 %vm146_vm0, %v11604_v17  ;;  %21228 = vmatprep.subr.msk.mxu0 %vm146_vm0, %v22692_v48  ;;  %v14249_v4 = vpop.permute.xlu1 %14248  ;;  %v11609_v42 = vsel %vm11601_vm9, %v11582_v63, %v25048_v62  ;;  %v11608_v57 = vsel %vm11601_vm9, %v25008_v38, %v11582_v63  ;;  %v25579_v17 = vld [vmem:[%s26448_s1 + $0xb0] sm:$0xff] }
 0x308   :  { %21229 = vmatpush1.msk.msra.mxu0 %vm146_vm0, %v24743_v14  ;;  %14244 = vrot.lane.b32.xlu0 %v25423_v31, %s22731_s24 }
 0x309   :  { %14252 = vrot.lane.b32.xlu1 %v25431_v32, %s22731_s24  ;;  %14108 = vmatprep.mubr.f32.mxu0 %v25194_v13 }
 0x30a   :  { %21235 = vmatprep.subr.msk.mxu0 %vm146_vm0, %v14273_v61  ;;  %21230 = vmatmul.mubr.msk.f32.vlgmr.msra.gmra.mrb[2].mxu0 %vm142_vm1, %v25370_v29  ;;  %v25454_v14 = vpop.permute.xlu0 %14250 }
 0x30b   :  { %21236 = vmatpush1.msk.msra.mxu0 %vm146_vm0, %v14272_v1  ;;  %11788 = vmatprep.mubr.f32.mxu1 %v25194_v13  ;;  %v25460_v27 = vpop.permute.xlu1 %14246  ;;  %v14277_v62 = vsel %vm849_vm2, %v14249_v4, %v25454_v14 }
 0x30c   :  { %14260 = vrot.lane.b32.xlu0 %v25445_v11, %s22731_s24  ;;  %21144 = vmatprep.subr.msk.mxu1 %vm146_vm0, %v11609_v42  ;;  %v14276_v38 = vsel %vm849_vm2, %v25460_v27, %v14249_v4 }
 0x30d   :  { %14268 = vrot.lane.b32.xlu1 %v25452_v36, %s22731_s24  ;;  %21140 = vmatmul.mubr.msk.f32.vlgmr.msra.gmra.mrb[2].mxu1 %vm142_vm1, %v24981_v44 }
 0x30e   :  { %21145 = vmatpush1.msk.msra.mxu1 %vm146_vm0, %v11608_v57  ;;  %14387 = vmatprep.mubr.f32.mxu0 %v25194_v13  ;;  %v11590_v55 = vpop.permute.xlu0 %11589 }
 0x30f   :  { %21241 = vmatprep.subr.msk.mxu0 %vm146_vm0, %v14277_v62  ;;  %21237 = vmatmul.mubr.msk.f32.vlgmr.msra.gmra.mrb[4].mxu0 %vm142_vm1, %v25470_v43  ;;  %v14257_v18 = vpop.permute.xlu1 %14256  ;;  %v11613_v3 = vsel %vm11601_vm9, %v11590_v55, %v25091_v51  ;;  %v11612_v28 = vsel %vm11601_vm9, %v25044_v39, %v11590_v55 }
 0x310   :  { %14270 = vrot.lane.b32.xlu0 %v25478_v33, %s22731_s24  ;;  %21242 = vmatpush1.msk.msra.mxu0 %vm146_vm0, %v14276_v38 }
 0x311   :  { %14915 = vrot.lane.b32.xlu1 %v25423_v31, %s22732_s26  ;;  %11930 = vmatprep.mubr.f32.mxu1 %v25194_v13 }
 0x312   :  { %21150 = vmatprep.subr.msk.mxu1 %vm146_vm0, %v11613_v3  ;;  %21146 = vmatmul.mubr.msk.f32.vlgmr.msra.gmra.mrb[6].mxu1 %vm142_vm1, %v24981_v44  ;;  %v25498_v54 = vpop.permute.xlu0 %14258 }
 0x313   :  { %21151 = vmatpush1.msk.msra.mxu1 %vm146_vm0, %v11612_v28  ;;  %v25501_v51 = vpop.permute.xlu1 %14254  ;;  %14529 = vmatprep.mubr.f32.mxu0 %v25194_v13  ;;  %v14281_v39 = vsel %vm849_vm2, %v14257_v18, %v25498_v54 }
 0x314   :  { %14923 = vrot.lane.b32.xlu0 %v25431_v32, %s22732_s26  ;;  %v14280_v56 = vsel %vm849_vm2, %v25501_v51, %v14257_v18  ;;  %21247 = vmatprep.subr.msk.mxu0 %vm146_vm0, %v14281_v39 }
 0x315   :  { %14931 = vrot.lane.b32.xlu1 %v25445_v11, %s22732_s26  ;;  %21243 = vmatmul.mubr.msk.f32.vlgmr.msra.gmra.mrb[6].mxu0 %vm142_vm1, %v25470_v43 }
 0x316   :  { %21248 = vmatpush1.msk.msra.mxu0 %vm146_vm0, %v14280_v56  ;;  %v11598_v58 = vpop.permute.xlu0 %11597  ;;  %12072 = vmatprep.mubr.f32.mxu1 %v25194_v13 }
 0x317   :  { %v11616_v6 = vsel %vm11601_vm9, %v25079_v25, %v11598_v58  ;;  %v11600_v7 = vpop.permute.xlu1 %11599  ;;  %21152 = vmatmul.mubr.msk.f32.vlgmr.msra.gmra.mrb[8].mxu1 %vm142_vm1, %v24981_v44  ;;  %14671 = vmatprep.mubr.f32.mxu0 %v25194_v13 }
 0x318   :  { %14939 = vrot.lane.b32.xlu0 %v25452_v36, %s22732_s26  ;;  %v11617_v60 = vsel %vm11601_vm9, %v11598_v58, %v11600_v7  ;;  %12214 = vmatprep.mubr.f32.mxu1 %v25194_v13  ;;  %vm18885_vm9 = vcmask 818176  }
 0x319   :  { %14941 = vrot.lane.b32.xlu1 %v25478_v33, %s22732_s26  ;;  %21156 = vmatprep.subr.msk.mxu1 %vm146_vm0, %v11617_v60 }
 0x31a   :  { %21157 = vmatpush1.msk.msra.mxu1 %vm146_vm0, %v11616_v6  ;;  %v14265_v25 = vpop.permute.xlu0 %14264  ;;  %21249 = vmatmul.mubr.msk.f32.vlgmr.msra.gmra.mrb[0].mxu0 %vm142_vm1, %v25470_v43 }
 0x31b   :  { %v25532_v24 = vpop.permute.xlu1 %14266  ;;  %21158 = vmatmul.mubr.msk.f32.vlgmr.msra.gmra.mrb[10].mxu1 %vm142_vm1, %v24981_v44  ;;  %14813 = vmatprep.mubr.f32.mxu0 %v25194_v13 }
 0x31c   :  { %15586 = vrot.lane.b32.xlu0 %v25423_v31, %s22733_s27  ;;  %v14285_v41 = vsel %vm849_vm2, %v14265_v25, %v25532_v24  ;;  %12460 = vmatprep.mubr.f32.mxu1 %v25194_v13 }
 0x31d   :  { %15594 = vrot.lane.b32.xlu1 %v25431_v32, %s22733_s27  ;;  %21253 = vmatprep.subr.msk.mxu0 %vm146_vm0, %v14285_v41 }
 0x31e   :  { %v25545_v22 = vpop.permute.xlu0 %14262 }
 0x31f   :  { %v14284_v44 = vsel %vm849_vm2, %v25545_v22, %v14265_v25  ;;  %v12246_v49 = vpop.permute.xlu1 %12245 }
 0x320   :  { %15602 = vrot.lane.b32.xlu0 %v25445_v11, %s22733_s27  ;;  %v12276_v23 = vsel %vm12273_vm10, %v25108_v9, %v12246_v49  ;;  %v12277_v53 = vsel %vm12273_vm10, %v12246_v49, %v25153_v19  ;;  %21254 = vmatpush1.msk.msra.mxu0 %vm146_vm0, %v14284_v44 }
 0x321   :  { %15610 = vrot.lane.b32.xlu1 %v25452_v36, %s22733_s27  ;;  %21163 = vmatprep.subr.msk.mxu1 %vm146_vm0, %v12277_v53 }
 0x322   :  { %21164 = vmatpush1.msk.msra.mxu1 %vm146_vm0, %v12276_v23  ;;  %v14912_v45 = vpop.permute.xlu0 %14911  ;;  %21255 = vmatmul.mubr.msk.f32.vlgmr.msra.gmra.mrb[2].mxu0 %vm142_vm1, %v25470_v43 }
 0x323   :  { %v25562_v12 = vpop.permute.xlu1 %14913  ;;  %21165 = vmatmul.mubr.msk.f32.vlgmr.msra.gmra.mrb[2].mxu1 %vm142_vm1, %v25125_v15  ;;  %15058 = vmatprep.mubr.f32.mxu0 %v25194_v13 }
 0x324   :  { %15612 = vrot.lane.b32.xlu0 %v25478_v33, %s22733_s27  ;;  %v14944_v9 = vsel %vm1521_vm3, %v14912_v45, %v25562_v12  ;;  %12602 = vmatprep.mubr.f32.mxu1 %v25194_v13  ;;  %s22754_s27 = smov 112  }
 0x325   :  { %16257 = vrot.lane.b32.xlu1 %v25423_v31, %s22734_s5  ;;  %21260 = vmatprep.subr.msk.mxu0 %vm146_vm0, %v14944_v9 }
 0x326   :  { %v14910_v19 = vpop.permute.xlu0 %14909 }
 0x327   :  { %v14943_v0 = vsel %vm1521_vm3, %v14910_v19, %v14912_v45  ;;  %v12254_v10 = vpop.permute.xlu1 %12253 }
 0x328   :  { %16265 = vrot.lane.b32.xlu0 %v25431_v32, %s22734_s5  ;;  %v12280_v63 = vsel %vm12273_vm10, %v25140_v21, %v12254_v10  ;;  %v12281_v31 = vsel %vm12273_vm10, %v12254_v10, %v25183_v37  ;;  %21261 = vmatpush1.msk.msra.mxu0 %vm146_vm0, %v14943_v0 }
 0x329   :  { %16273 = vrot.lane.b32.xlu1 %v25445_v11, %s22734_s5  ;;  %21169 = vmatprep.subr.msk.mxu1 %vm146_vm0, %v12281_v31 }
 0x32a   :  { %21170 = vmatpush1.msk.msra.mxu1 %vm146_vm0, %v12280_v63  ;;  %v14920_v48 = vpop.permute.xlu0 %14919  ;;  %21262 = vmatmul.mubr.msk.f32.vlgmr.msra.gmra.mrb[4].mxu0 %vm142_vm1, %v25579_v17 }
 0x32b   :  { %v25594_v32 = vpop.permute.xlu1 %14921  ;;  %21171 = vmatmul.mubr.msk.f32.vlgmr.msra.gmra.mrb[6].mxu1 %vm142_vm1, %v25125_v15  ;;  %15200 = vmatprep.mubr.f32.mxu0 %v25194_v13 }
 0x32c   :  { %16275 = vrot.lane.b32.xlu0 %v25076_v40, %s22734_s5  ;;  %v14948_v21 = vsel %vm1521_vm3, %v14920_v48, %v25594_v32  ;;  %12744 = vmatprep.mubr.f32.mxu1 %v25194_v13 }
 0x32d   :  { %16277 = vrot.lane.b32.xlu1 %v25061_v5, %s22734_s5  ;;  %21266 = vmatprep.subr.msk.mxu0 %vm146_vm0, %v14948_v21  ;;  %v118_v5 = vld [vmem:[%s26449_s2] sm:$0xff]  ;;  %s22756_s2 = smov 99  }
 0x32e   :  { %v25607_v37 = vpop.permute.xlu0 %14917 }
 0x32f   :  { %v14947_v61 = vsel %vm1521_vm3, %v25607_v37, %v14920_v48  ;;  %v12262_v4 = vpop.permute.xlu1 %12261 }
 0x330   :  { %16279 = vrot.lane.b32.xlu0 %v25063_v30, %s22734_s5  ;;  %v12284_v40 = vsel %vm12273_vm10, %v25170_v26, %v12262_v4  ;;  %v12285_v1 = vsel %vm12273_vm10, %v12262_v4, %v25210_v20  ;;  %21267 = vmatpush1.msk.msra.mxu0 %vm146_vm0, %v14947_v61 }
 0x331   :  { %16281 = vrot.lane.b32.xlu1 %v25452_v36, %s22734_s5  ;;  %21175 = vmatprep.subr.msk.mxu1 %vm146_vm0, %v12285_v1  ;;  %v22694_v1 = vld [vmem:[#allocation2 + $0x18] sm:$0x7] }
 0x332   :  { %21176 = vmatpush1.msk.msra.mxu1 %vm146_vm0, %v12284_v40  ;;  %v14928_v30 = vpop.permute.xlu0 %14927  ;;  %21268 = vmatmul.mubr.msk.f32.vlgmr.msra.gmra.mrb[6].mxu0 %vm142_vm1, %v25579_v17  ;;  %v22693_v40 = vld [vmem:[#allocation2 + $0x20] sm:$0x7] }
 0x333   :  { %v25627_v26 = vpop.permute.xlu1 %14929  ;;  %21177 = vmatmul.mubr.msk.f32.vlgmr.msra.gmra.mrb[8].mxu1 %vm142_vm1, %v25125_v15  ;;  %15342 = vmatprep.mubr.f32.mxu0 %v25194_v13 }
 0x334   :  { %v14952_v20 = vsel %vm1521_vm3, %v14928_v30, %v25627_v26  ;;  %16283 = vrot.lane.b32.xlu0 %v25478_v33, %s22734_s5  ;;  %12886 = vmatprep.mubr.f32.mxu1 %v25194_v13  ;;  %s22757_s5 = smov 98  }
 0x335   :  { %121 = vperm.xlu1 %22625, %v118_v5   ;;  %21272 = vmatprep.subr.msk.mxu0 %vm146_vm0, %v14952_v20  ;;  %v22695_v5 = vld [vmem:[#allocation2 + $0x40] sm:$0x7] }
 0x336   :  { %v25638_v11 = vpop.permute.xlu0 %14925 }
 0x337   :  { %v14951_v42 = vsel %vm1521_vm3, %v25638_v11, %v14928_v30  ;;  %v12270_v36 = vpop.permute.xlu1 %12269 }
 0x338   :  { %21273 = vmatpush1.msk.msra.mxu0 %vm146_vm0, %v14951_v42  ;;  %v12288_v33 = vsel %vm12273_vm10, %v25206_v50, %v12270_v36  ;;  %v22696_v42 = vld [vmem:[#allocation2 + $0x38] sm:$0x7] }
 0x339   :  { %21274 = vmatmul.mubr.msk.f32.vlgmr.msra.gmra.mrb[0].mxu0 %vm142_vm1, %v25579_v17 }
 0x33a   :  { %v12272_v57 = vpop.permute.xlu0 %12271  ;;  %15484 = vmatprep.mubr.f32.mxu0 %v25194_v13 }
 0x33b   :  { %v12289_v62 = vsel %vm12273_vm10, %v12270_v36, %v12272_v57  ;;  %v14936_v38 = vpop.permute.xlu1 %14935  ;;  %v22697_v57 = vld [vmem:[#allocation2 + $0x60] sm:$0x7]  ;;  %vm19052_vm10 = vcmask 809984  }
 0x33c   :  { %21181 = vmatprep.subr.msk.mxu1 %vm146_vm0, %v12289_v62 }
 0x33d   :  { %21182 = vmatpush1.msk.msra.mxu1 %vm146_vm0, %v12288_v33  ;;  %v25771_v33 = vld [vmem:[%s26448_s1 + $0xc0] sm:$0xff] }
 0x33e   :  { %v25651_v55 = vpop.permute.xlu0 %14937  ;;  %21183 = vmatmul.mubr.msk.f32.vlgmr.msra.gmra.mrb[10].mxu1 %vm142_vm1, %v25125_v15 }
 0x33f   :  { %v25655_v18 = vpop.permute.xlu1 %14933  ;;  %v14956_v3 = vsel %vm1521_vm3, %v14936_v38, %v25651_v55  ;;  %13132 = vmatprep.mubr.f32.mxu1 %v25194_v13 }
 0x340   :  { %v14955_v28 = vsel %vm1521_vm3, %v25655_v18, %v14936_v38  ;;  %21278 = vmatprep.subr.msk.mxu0 %vm146_vm0, %v14956_v3 }
 0x341   :  { %21279 = vmatpush1.msk.msra.mxu0 %vm146_vm0, %v14955_v28  ;;  %v22698_v28 = vld [vmem:[#allocation2 + $0x58] sm:$0x7] }
 0x342   :  { %v12918_v50 = vpop.permute.xlu0 %12917  ;;  %21280 = vmatmul.mubr.msk.f32.vlgmr.msra.gmra.mrb[2].mxu0 %vm142_vm1, %v25579_v17 }
 0x343   :  { %v12948_v15 = vsel %vm12945_vm11, %v25236_v46, %v12918_v50  ;;  %v15583_v39 = vpop.permute.xlu1 %15582  ;;  %v12949_v56 = vsel %vm12945_vm11, %v12918_v50, %v25272_v8  ;;  %15729 = vmatprep.mubr.f32.mxu0 %v25194_v13  ;;  %v25682_v46 = vld [vmem:[%s26448_s1 + $0xb8] sm:$0xff]  ;;  %s22751_s1 = smov 68  }
 0x344   :  { %21188 = vmatprep.subr.msk.mxu1 %vm146_vm0, %v12949_v56 }
 0x345   :  { %21189 = vmatpush1.msk.msra.mxu1 %vm146_vm0, %v12948_v15  ;;  %v22699_v15 = vld [vmem:[#allocation2 + $0x80] sm:$0x7] }
 0x346   :  { %v25673_v58 = vpop.permute.xlu0 %15584  ;;  %21190 = vmatmul.mubr.msk.f32.vlgmr.msra.gmra.mrb[2].mxu1 %vm142_vm1, %v25245_v16 }
 0x347   :  { %v15581_v6 = vpop.permute.xlu1 %15580  ;;  %v15615_v7 = vsel %vm2193_vm4, %v15583_v39, %v25673_v58  ;;  %13274 = vmatprep.mubr.f32.mxu1 %v25194_v13 }
 0x348   :  { %v15614_v8 = vsel %vm2193_vm4, %v15581_v6, %v15583_v39  ;;  %21285 = vmatprep.subr.msk.mxu0 %vm146_vm0, %v15615_v7  ;;  %v22700_v6 = vld [vmem:[#allocation2 + $0x78] sm:$0x7] }
 0x349   :  { %21286 = vmatpush1.msk.msra.mxu0 %vm146_vm0, %v15614_v8 }
 0x34a   :  { %v12926_v60 = vpop.permute.xlu0 %12925  ;;  %21287 = vmatmul.mubr.msk.f32.vlgmr.msra.gmra.mrb[4].mxu0 %vm142_vm1, %v25682_v46 }
 0x34b   :  { %v12952_v25 = vsel %vm12945_vm11, %v25268_v52, %v12926_v60  ;;  %v15591_v41 = vpop.permute.xlu1 %15590  ;;  %v12953_v44 = vsel %vm12945_vm11, %v12926_v60, %v25302_v59  ;;  %15871 = vmatprep.mubr.f32.mxu0 %v25194_v13 }
 0x34c   :  { %21194 = vmatprep.subr.msk.mxu1 %vm146_vm0, %v12953_v44 }
 0x34d   :  { %21195 = vmatpush1.msk.msra.mxu1 %vm146_vm0, %v12952_v25 }
 0x34e   :  { %v25697_v49 = vpop.permute.xlu0 %15592  ;;  %21196 = vmatmul.mubr.msk.f32.vlgmr.msra.gmra.mrb[6].mxu1 %vm142_vm1, %v25245_v16 }
 0x34f   :  { %v25701_v23 = vpop.permute.xlu1 %15588  ;;  %v15619_v52 = vsel %vm2193_vm4, %v15591_v41, %v25697_v49  ;;  %13416 = vmatprep.mubr.f32.mxu1 %v25194_v13 }
 0x350   :  { %v15618_v59 = vsel %vm2193_vm4, %v25701_v23, %v15591_v41  ;;  %21291 = vmatprep.subr.msk.mxu0 %vm146_vm0, %v15619_v52 }
 0x351   :  { %21292 = vmatpush1.msk.msra.mxu0 %vm146_vm0, %v15618_v59 }
 0x352   :  { %v12934_v53 = vpop.permute.xlu0 %12933  ;;  %21293 = vmatmul.mubr.msk.f32.vlgmr.msra.gmra.mrb[6].mxu0 %vm142_vm1, %v25682_v46 }
 0x353   :  { %v12956_v45 = vsel %vm12945_vm11, %v25298_v2, %v12934_v53  ;;  %v15599_v9 = vpop.permute.xlu1 %15598  ;;  %v12957_v19 = vsel %vm12945_vm11, %v12934_v53, %v25339_v35  ;;  %16013 = vmatprep.mubr.f32.mxu0 %v25194_v13 }
 0x354   :  { %21200 = vmatprep.subr.msk.mxu1 %vm146_vm0, %v12957_v19 }
 0x355   :  { %21201 = vmatpush1.msk.msra.mxu1 %vm146_vm0, %v12956_v45 }
 0x356   :  { %v25719_v0 = vpop.permute.xlu0 %15600  ;;  %21202 = vmatmul.mubr.msk.f32.vlgmr.msra.gmra.mrb[8].mxu1 %vm142_vm1, %v25245_v16 }
 0x357   :  { %v25723_v10 = vpop.permute.xlu1 %15596  ;;  %v15623_v2 = vsel %vm2193_vm4, %v15599_v9, %v25719_v0  ;;  %13558 = vmatprep.mubr.f32.mxu1 %v25194_v13 }
 0x358   :  { %v15622_v35 = vsel %vm2193_vm4, %v25723_v10, %v15599_v9  ;;  %21297 = vmatprep.subr.msk.mxu0 %vm146_vm0, %v15623_v2 }
 0x359   :  { %21298 = vmatpush1.msk.msra.mxu0 %vm146_vm0, %v15622_v35 }
 0x35a   :  { %v12942_v63 = vpop.permute.xlu0 %12941  ;;  %21299 = vmatmul.mubr.msk.f32.vlgmr.msra.gmra.mrb[0].mxu0 %vm142_vm1, %v25682_v46 }
 0x35b   :  { %v12960_v31 = vsel %vm12945_vm11, %v25327_v34, %v12942_v63  ;;  %v12944_v48 = vpop.permute.xlu1 %12943  ;;  %16155 = vmatprep.mubr.f32.mxu0 %v25194_v13 }
 0x35c   :  { %v12961_v21 = vsel %vm12945_vm11, %v12942_v63, %v12944_v48  ;;  %vm19219_vm11 = vcmask 801792  }
 0x35d   :  { %21206 = vmatprep.subr.msk.mxu1 %vm146_vm0, %v12961_v21 }
 0x35e   :  { %21207 = vmatpush1.msk.msra.mxu1 %vm146_vm0, %v12960_v31  ;;  %v15607_v61 = vpop.permute.xlu0 %15606 }
 0x35f   :  { %v25740_v4 = vpop.permute.xlu1 %15608  ;;  %21208 = vmatmul.mubr.msk.f32.vlgmr.msra.gmra.mrb[10].mxu1 %vm142_vm1, %v25245_v16  ;;  %21213 = vmatprep.subr.msk.mxu1 %vm146_vm0, %v22693_v40 }
 0x360   :  { %v15627_v34 = vsel %vm2193_vm4, %v15607_v61, %v25740_v4  ;;  %21214 = vmatpush1.msk.msra.mxu1 %vm146_vm0, %v22694_v1  ;;  %13753 = vmatprep.mubr.f32.mxu1 %v25194_v13 }
 0x361   :  { %21303 = vmatprep.subr.msk.mxu0 %vm146_vm0, %v15627_v34  ;;  %21219 = vmatprep.subr.msk.mxu1 %vm146_vm0, %v22695_v5 }
 0x362   :  { %v25751_v30 = vpop.permute.xlu0 %15604 }
 0x363   :  { %v15626_v16 = vsel %vm2193_vm4, %v25751_v30, %v15607_v61  ;;  %v16254_v20 = vpop.permute.xlu1 %16253  ;;  %21215 = vmatmul.mubr.msk.f32.vlgmr.msra.gmra.mrb[2].mxu1 %vm142_vm1, %v25370_v29 }
 0x364   :  { %21304 = vmatpush1.msk.msra.mxu0 %vm146_vm0, %v15626_v16  ;;  %21220 = vmatpush1.msk.msra.mxu1 %vm146_vm0, %v22696_v42 }
 0x365   :  { %21305 = vmatmul.mubr.msk.f32.vlgmr.msra.gmra.mrb[2].mxu0 %vm142_vm1, %v25682_v46  ;;  %13895 = vmatprep.mubr.f32.mxu1 %v25194_v13 }
 0x366   :  { %v25762_v36 = vpop.permute.xlu0 %16255  ;;  %16400 = vmatprep.mubr.f32.mxu0 %v25194_v13  ;;  %21225 = vmatprep.subr.msk.mxu1 %vm146_vm0, %v22697_v57 }
 0x367   :  { %v16286_v62 = vsel %vm2865_vm5, %v16254_v20, %v25762_v36  ;;  %v16252_v38 = vpop.permute.xlu1 %16251  ;;  %21221 = vmatmul.mubr.msk.f32.vlgmr.msra.gmra.mrb[6].mxu1 %vm142_vm1, %v25370_v29 }
 0x368   :  { %v16285_v3 = vsel %vm2865_vm5, %v16252_v38, %v16254_v20  ;;  %21310 = vmatprep.subr.msk.mxu0 %vm146_vm0, %v16286_v62  ;;  %21226 = vmatpush1.msk.msra.mxu1 %vm146_vm0, %v22698_v28  ;;  %v16939_v28 = vld [vmem:[#allocation5 + $0x18] sm:$0xff] }
 0x369   :  { %21311 = vmatpush1.msk.msra.mxu0 %vm146_vm0, %v16285_v3  ;;  %14037 = vmatprep.mubr.f32.mxu1 %v25194_v13  ;;  %v16937_v3 = vld [vmem:[#allocation5 + $0x8] sm:$0xff] }
 0x36a   :  { %v16262_v50 = vpop.permute.xlu0 %16261  ;;  %21312 = vmatmul.mubr.msk.f32.vlgmr.msra.gmra.mrb[4].mxu0 %vm142_vm1, %v25771_v33  ;;  %21231 = vmatprep.subr.msk.mxu1 %vm146_vm0, %v22699_v15  ;;  %v16936_v15 = vld [vmem:[#allocation5] sm:$0xff] }
 0x36b   :  { %v25783_v39 = vpop.permute.xlu1 %16263  ;;  %16542 = vmatprep.mubr.f32.mxu0 %v25194_v13  ;;  %21227 = vmatmul.mubr.msk.f32.vlgmr.msra.gmra.mrb[8].mxu1 %vm142_vm1, %v25370_v29 }
 0x36c   :  { %v16290_v56 = vsel %vm2865_vm5, %v16262_v50, %v25783_v39  ;;  %21232 = vmatpush1.msk.msra.mxu1 %vm146_vm0, %v22700_v6  ;;  %14179 = vmatprep.mubr.f32.mxu1 %v25194_v13  ;;  %v25920_v6 = vld [vmem:[#allocation2 + $0x80] sm:$0xff] }
 0x36d   :  { %21316 = vmatprep.subr.msk.mxu0 %vm146_vm0, %v16290_v56  ;;  %v16938_v56 = vld [vmem:[#allocation5 + $0x10] sm:$0xff] }
 0x36f   :  { %21233 = vmatmul.mubr.msk.f32.vlgmr.msra.gmra.mrb[10].mxu1 %vm142_vm1, %v25370_v29 }
 0x370   :  { %v25795_v7 = vpop.permute.xlu0 %16259  ;;  %v16270_v8 = vpop.permute.xlu1 %16269  ;;  %14458 = vmatprep.mubr.f32.mxu1 %v25194_v13 }
 0x371   :  { %v16289_v60 = vsel %vm2865_vm5, %v25795_v7, %v16262_v50 }
 0x372   :  { %21317 = vmatpush1.msk.msra.mxu0 %vm146_vm0, %v16289_v60  ;;  %v25925_v60 = vpack.c.bf16 %v16939_v28, %v16937_v3  ;;  %v16969_v3 = vld [vmem:[#allocation5 + $0x108] sm:$0xff] }
 0x373   :  { %21318 = vmatmul.mubr.msk.f32.vlgmr.msra.gmra.mrb[6].mxu0 %vm142_vm1, %v25771_v33 }
 0x374   :  { %16684 = vmatprep.mubr.f32.mxu0 %v25194_v13 }
 0x375   :  { %v25804_v25 = vpop.permute.xlu0 %16271  ;;  %v25806_v41 = vpop.permute.xlu1 %16267 }
 0x376   :  { %v16294_v29 = vsel %vm2865_vm5, %v16270_v8, %v25804_v25  ;;  %v16293_v44 = vsel %vm2865_vm5, %v25806_v41, %v16270_v8  ;;  %v16941_v8 = vld [vmem:[#allocation5 + $0x28] sm:$0xff] }
 0x377   :  { %21322 = vmatprep.subr.msk.mxu0 %vm146_vm0, %v16294_v29  ;;  %v25928_v29 = vpack.c.bf16 %v16938_v56, %v16936_v15  ;;  %v16973_v15 = vld [vmem:[#allocation5 + $0x128] sm:$0xff]  ;;  %v16975_v56 = vld [vmem:[#allocation5 + $0x138] sm:$0xff] }
 0x378   :  { %21323 = vmatpush1.msk.msra.mxu0 %vm146_vm0, %v16293_v44 }
 0x379   :  { %21324 = vmatmul.mubr.msk.f32.vlgmr.msra.gmra.mrb[0].mxu0 %vm142_vm1, %v25771_v33 }
 0x37a   :  { %v14245_v52 = vpop.permute.xlu0 %14244  ;;  %16826 = vmatprep.mubr.f32.mxu0 %v25194_v13 }
 0x37b   :  { %v14274_v59 = vsel %vm849_vm2, %v25412_v47, %v14245_v52  ;;  %v14275_v53 = vsel %vm849_vm2, %v14245_v52, %v25460_v27  ;;  %v14253_v45 = vpop.permute.xlu1 %14252 }
 0x37c   :  { %21238 = vmatprep.subr.msk.mxu1 %vm146_vm0, %v14275_v53  ;;  %v14279_v9 = vsel %vm849_vm2, %v14253_v45, %v25501_v51  ;;  %v14278_v19 = vsel %vm849_vm2, %v25454_v14, %v14253_v45  ;;  %v16942_v53 = vld [vmem:[#allocation5 + $0x30] sm:$0xff] }
 0x37d   :  { %21239 = vmatpush1.msk.msra.mxu1 %vm146_vm0, %v14274_v59  ;;  %v16940_v59 = vld [vmem:[#allocation5 + $0x20] sm:$0xff] }
 0x37e   :  { %v14261_v2 = vpop.permute.xlu0 %14260  ;;  %21240 = vmatmul.mubr.msk.f32.vlgmr.msra.gmra.mrb[2].mxu1 %vm142_vm1, %v25470_v43  ;;  %21244 = vmatprep.subr.msk.mxu1 %vm146_vm0, %v14279_v9  ;;  %v16945_v9 = vld [vmem:[#allocation5 + $0x48] sm:$0xff] }
 0x37f   :  { %v14283_v47 = vsel %vm849_vm2, %v14261_v2, %v25545_v22  ;;  %v14269_v27 = vpop.permute.xlu1 %14268  ;;  %21245 = vmatpush1.msk.msra.mxu1 %vm146_vm0, %v14278_v19  ;;  %14600 = vmatprep.mubr.f32.mxu1 %v25194_v13  ;;  %v14282_v51 = vsel %vm849_vm2, %v25498_v54, %v14261_v2  ;;  %v16947_v19 = vld [vmem:[#allocation5 + $0x58] sm:$0xff] }
 0x380   :  { %21250 = vmatprep.subr.msk.mxu1 %vm146_vm0, %v14283_v47  ;;  %v14286_v22 = vsel %vm849_vm2, %v25532_v24, %v14269_v27  ;;  %v16944_v47 = vld [vmem:[#allocation5 + $0x40] sm:$0xff] }
 0x382   :  { %v14271_v14 = vpop.permute.xlu0 %14270  ;;  %21246 = vmatmul.mubr.msk.f32.vlgmr.msra.gmra.mrb[6].mxu1 %vm142_vm1, %v25470_v43 }
 0x383   :  { %v14287_v35 = vsel %vm849_vm2, %v14269_v27, %v14271_v14  ;;  %21251 = vmatpush1.msk.msra.mxu1 %vm146_vm0, %v14282_v51  ;;  %v14916_v63 = vpop.permute.xlu1 %14915  ;;  %14742 = vmatprep.mubr.f32.mxu1 %v25194_v13  ;;  %v16946_v27 = vld [vmem:[#allocation5 + $0x50] sm:$0xff]  ;;  %v16949_v14 = vld [vmem:[#allocation5 + $0x68] sm:$0xff] }
 0x384   :  { %21256 = vmatprep.subr.msk.mxu1 %vm146_vm0, %v14287_v35  ;;  %v14946_v54 = vsel %vm1521_vm3, %v14916_v63, %v25607_v37  ;;  %v14945_v21 = vsel %vm1521_vm3, %v25562_v12, %v14916_v63  ;;  %v16951_v35 = vld [vmem:[#allocation5 + $0x78] sm:$0xff] }
 0x386   :  { %v14924_v31 = vpop.permute.xlu0 %14923  ;;  %21252 = vmatmul.mubr.msk.f32.vlgmr.msra.gmra.mrb[8].mxu1 %vm142_vm1, %v25470_v43 }
 0x387   :  { %21257 = vmatpush1.msk.msra.mxu1 %vm146_vm0, %v14286_v22  ;;  %v14932_v48 = vpop.permute.xlu1 %14931  ;;  %14884 = vmatprep.mubr.f32.mxu1 %v25194_v13  ;;  %v14950_v24 = vsel %vm1521_vm3, %v14924_v31, %v25638_v11  ;;  %v14949_v40 = vsel %vm1521_vm3, %v25594_v32, %v14924_v31  ;;  %v25971_v22 = vpack.c.bf16 %v16951_v35, %v16949_v14  ;;  %v16948_v31 = vld [vmem:[#allocation5 + $0x60] sm:$0xff] }
 0x388   :  { %21263 = vmatprep.subr.msk.mxu1 %vm146_vm0, %v14946_v54  ;;  %v14953_v1 = vsel %vm1521_vm3, %v25627_v26, %v14932_v48  ;;  %v16950_v54 = vld [vmem:[#allocation5 + $0x70] sm:$0xff]  ;;  %v16984_v35 = vld [vmem:[#allocation5 + $0x180] sm:$0xff] }
 0x38a   :  { %v14940_v61 = vpop.permute.xlu0 %14939  ;;  %21258 = vmatmul.mubr.msk.f32.vlgmr.msra.gmra.mrb[10].mxu1 %vm142_vm1, %v25470_v43  ;;  %v14954_v43 = vsel %vm1521_vm3, %v14932_v48, %v25655_v18  ;;  %v16953_v48 = vld [vmem:[#allocation5 + $0x88] sm:$0xff] }
 0x38b   :  { %21264 = vmatpush1.msk.msra.mxu1 %vm146_vm0, %v14945_v21  ;;  %v14942_v37 = vpop.permute.xlu1 %14941  ;;  %15129 = vmatprep.mubr.f32.mxu1 %v25194_v13  ;;  %v14957_v18 = vsel %vm1521_vm3, %v25651_v55, %v14940_v61  ;;  %v16955_v21 = vld [vmem:[#allocation5 + $0x98] sm:$0xff] }
 0x38c   :  { %21269 = vmatprep.subr.msk.mxu1 %vm146_vm0, %v14950_v24  ;;  %v14958_v11 = vsel %vm1521_vm3, %v14940_v61, %v14942_v37  ;;  %v21535_v24 = vpack.c.bf16 %v16950_v54, %v16948_v31  ;;  %v16988_v31 = vld [vmem:[#allocation5 + $0x1a0] sm:$0xff]  ;;  %v16990_v54 = vld [vmem:[#allocation5 + $0x1b0] sm:$0xff] }
 0x38e   :  { %v15587_v34 = vpop.permute.xlu0 %15586  ;;  %21265 = vmatmul.mubr.msk.f32.vlgmr.msra.gmra.mrb[2].mxu1 %vm142_vm1, %v25579_v17 }
 0x38f   :  { %21270 = vmatpush1.msk.msra.mxu1 %vm146_vm0, %v14949_v40  ;;  %v15595_v12 = vpop.permute.xlu1 %15594  ;;  %15271 = vmatprep.mubr.f32.mxu1 %v25194_v13  ;;  %v15617_v26 = vsel %vm2193_vm4, %v15587_v34, %v25701_v23  ;;  %v15616_v42 = vsel %vm2193_vm4, %v25673_v58, %v15587_v34  ;;  %v21537_v40 = vpack.c.bf16 %v16955_v21, %v16953_v48  ;;  %v16952_v34 = vld [vmem:[#allocation5 + $0x80] sm:$0xff]  ;;  %v16993_v48 = vld [vmem:[#allocation5 + $0x1c8] sm:$0xff]  ;;  %v16995_v21 = vld [vmem:[#allocation5 + $0x1d8] sm:$0xff] }
 0x390   :  { %21275 = vmatprep.subr.msk.mxu1 %vm146_vm0, %v14954_v43  ;;  %v15621_v55 = vsel %vm2193_vm4, %v15595_v12, %v25723_v10  ;;  %v15620_v62 = vsel %vm2193_vm4, %v25697_v49, %v15595_v12  ;;  %v16954_v43 = vld [vmem:[#allocation5 + $0x90] sm:$0xff]  ;;  %v16957_v12 = vld [vmem:[#allocation5 + $0xa8] sm:$0xff] }
 0x392   :  { %v15603_v32 = vpop.permute.xlu0 %15602  ;;  %21271 = vmatmul.mubr.msk.f32.vlgmr.msra.gmra.mrb[6].mxu1 %vm142_vm1, %v25579_v17 }
 0x393   :  { %21276 = vmatpush1.msk.msra.mxu1 %vm146_vm0, %v14953_v1  ;;  %v15611_v5 = vpop.permute.xlu1 %15610  ;;  %15413 = vmatprep.mubr.f32.mxu1 %v25194_v13  ;;  %v15624_v49 = vsel %vm2193_vm4, %v25719_v0, %v15603_v32  ;;  %v16943_v0 = vld [vmem:[#allocation5 + $0x38] sm:$0xff] }
 0x394   :  { %21281 = vmatprep.subr.msk.mxu1 %vm146_vm0, %v14958_v11  ;;  %v15628_v44 = vsel %vm2193_vm4, %v25740_v4, %v15611_v5  ;;  %v25936_v52 = vpack.c.bf16 %v16943_v0, %v16941_v8  ;;  %v25945_v4 = vpack.c.bf16 %v16942_v53, %v16940_v59  ;;  %v16959_v11 = vld [vmem:[#allocation5 + $0xb8] sm:$0xff]  ;;  %v16972_v8 = vld [vmem:[#allocation5 + $0x120] sm:$0xff]  ;;  %v16974_v0 = vld [vmem:[#allocation5 + $0x130] sm:$0xff] }
 0x395   :  { %v16976_v59 = vld [vmem:[#allocation5 + $0x140] sm:$0xff]  ;;  %v16978_v53 = vld [vmem:[#allocation5 + $0x150] sm:$0xff] }
 0x396   :  { %v15613_v16 = vpop.permute.xlu0 %15612  ;;  %21277 = vmatmul.mubr.msk.f32.vlgmr.msra.gmra.mrb[8].mxu1 %vm142_vm1, %v25579_v17 }
 0x397   :  { %21282 = vmatpush1.msk.msra.mxu1 %vm146_vm0, %v14957_v18  ;;  %v16258_v20 = vpop.permute.xlu1 %16257  ;;  %15555 = vmatprep.mubr.f32.mxu1 %v25194_v13  ;;  %v15629_v38 = vsel %vm2193_vm4, %v15611_v5, %v15613_v16  ;;  %v16956_v5 = vld [vmem:[#allocation5 + $0xa0] sm:$0xff]  ;;  %v16958_v18 = vld [vmem:[#allocation5 + $0xb0] sm:$0xff]  ;;  %v16961_v16 = vld [vmem:[#allocation5 + $0xc8] sm:$0xff] }
 0x398   :  { %21288 = vmatprep.subr.msk.mxu1 %vm146_vm0, %v15617_v26  ;;  %v16288_v45 = vsel %vm2865_vm5, %v16258_v20, %v25795_v7  ;;  %v16287_v2 = vsel %vm2865_vm5, %v25762_v36, %v16258_v20  ;;  %v25952_v7 = vpack.c.bf16 %v16947_v19, %v16945_v9  ;;  %v25963_v36 = vpack.c.bf16 %v16946_v27, %v16944_v47  ;;  %v16963_v26 = vld [vmem:[#allocation5 + $0xd8] sm:$0xff]  ;;  %v16985_v47 = vld [vmem:[#allocation5 + $0x188] sm:$0xff] }
 0x399   :  { %v21543_v20 = vpack.c.bf16 %v16958_v18, %v16956_v5  ;;  %v16983_v9 = vld [vmem:[#allocation5 + $0x178] sm:$0xff]  ;;  %v21563_v19 = vpack.c.bf16 %v16978_v53, %v16976_v59 }
 0x39a   :  { %v25889_v57 = vpop.permute.xlu0 %16265  ;;  %21283 = vmatmul.mubr.msk.f32.vlgmr.msra.gmra.mrb[10].mxu1 %vm142_vm1, %v25579_v17  ;;  %v15625_v17 = vsel %vm2193_vm4, %v15603_v32, %v25751_v30  ;;  %v21541_v32 = vpack.c.bf16 %v16959_v11, %v16957_v12  ;;  %v16987_v27 = vld [vmem:[#allocation5 + $0x198] sm:$0xff]  ;;  %v16996_v11 = vld [vmem:[#allocation5 + $0x1e0] sm:$0xff]  ;;  %vm17792_vm4 = vcmask 64512  }
 0x39b   :  { %21289 = vmatpush1.msk.msra.mxu1 %vm146_vm0, %v15616_v42  ;;  %v25896_v23 = vpop.permute.xlu1 %16273  ;;  %15800 = vmatprep.mubr.f32.mxu1 %v25194_v13  ;;  %v16292_v51 = vsel %vm2865_vm5, %v25889_v57, %v25806_v41  ;;  %v16291_v63 = vsel %vm2865_vm5, %v25783_v39, %v25889_v57  ;;  %v21545_v42 = vpack.c.bf16 %v16963_v26, %v16961_v16  ;;  %v16960_v57 = vld [vmem:[#allocation5 + $0xc0] sm:$0xff]  ;;  %v26474_v59 = vld [vmem:[#allocation11_spill] sm:$0xff] }
 0x39c   :  { %21294 = vmatprep.subr.msk.mxu1 %vm146_vm0, %v15621_v55  ;;  %v16295_v37 = vsel %vm2865_vm5, %v25804_v25, %v25896_v23  ;;  %v21539_v25 = vpack.c.bf16 %v16954_v43, %v16952_v34  ;;  %v16962_v55 = vld [vmem:[#allocation5 + $0xd0] sm:$0xff]  ;;  %v21569_v14 = vpack.c.bf16 %v16987_v27, %v16985_v47  ;;  %v16999_v34 = vld [vmem:[#allocation5 + $0x1f8] sm:$0xff]  ;;  %v26471_v26 = vld [vmem:[#allocation8_spill] sm:$0xff] }
 0x39d   :  { %v17014_v47 = vld [vmem:[#allocation5 + $0x270] sm:$0xff]  ;;  %v17017_v27 = vld [vmem:[#allocation5 + $0x288] sm:$0xff] }
 0x39e   :  { %v16276_v58 = vpop.permute.xlu0 %16275  ;;  %21290 = vmatmul.mubr.msk.f32.vlgmr.msra.gmra.mrb[2].mxu1 %vm142_vm1, %v25682_v46 }
 0x39f   :  { %21295 = vmatpush1.msk.msra.mxu1 %vm146_vm0, %v15620_v62  ;;  %15942 = vmatprep.mubr.f32.mxu1 %v25194_v13  ;;  %v16278_v10 = vpop.permute.xlu1 %16277  ;;  %v16967_v62 = vld [vmem:[#allocation5 + $0xf8] sm:$0xff] }
 0x3a0   :  { %21300 = vmatprep.subr.msk.mxu1 %vm146_vm0, %v15625_v17  ;;  %v16297_v30 = vsel %vm2865_vm5, %v16276_v58, %v16278_v10 }
 0x3a2   :  { %v25912_v50 = vpop.permute.xlu0 %16279  ;;  %21296 = vmatmul.mubr.msk.f32.vlgmr.msra.gmra.mrb[6].mxu1 %vm142_vm1, %v25682_v46 }
 0x3a3   :  { %21301 = vmatpush1.msk.msra.mxu1 %vm146_vm0, %v15624_v49  ;;  %v16298_v13 = vsel %vm2865_vm5, %v16278_v10, %v25912_v50  ;;  %16084 = vmatprep.mubr.f32.mxu1 %v25920_v6  ;;  %v16282_v61 = vpop.permute.xlu1 %16281  ;;  %v16964_v10 = vld [vmem:[#allocation5 + $0xe0] sm:$0xff] }
 0x3a4   :  { %21328 = vmatprep.subr.msk.mxu0 %vm146_vm0, %v16298_v13  ;;  %21306 = vmatprep.subr.msk.mxu1 %vm146_vm0, %v15629_v38  ;;  %v16299_v1 = vsel %vm2865_vm5, %v25912_v50, %v16282_v61  ;;  %v16966_v38 = vld [vmem:[#allocation5 + $0xf0] sm:$0xff]  ;;  %v16968_v50 = vld [vmem:[#allocation5 + $0x100] sm:$0xff] }
 0x3a5   :  { %21329 = vmatpush1.msk.msra.mxu0 %vm146_vm0, %v16297_v30  ;;  %v21551_v28 = vpack.c.bf16 %v16966_v38, %v16964_v10  ;;  %v16970_v30 = vld [vmem:[#allocation5 + $0x110] sm:$0xff] }
 0x3a6   :  { %21302 = vmatmul.mubr.msk.f32.vlgmr.msra.gmra.mrb[8].mxu1 %vm142_vm1, %v25682_v46  ;;  %21330 = vmatmul.mubr.msk.f32.vlgmr.msra.gmra.mrb[2].mxu0 %vm142_vm1, %v25771_v33  ;;  %v16284_v41 = vpop.permute.xlu0 %16283  ;;  %v21555_v13 = vpack.c.bf16 %v16970_v30, %v16968_v50  ;;  %v17006_v50 = vld [vmem:[#allocation5 + $0x230] sm:$0xff]  ;;  %v17009_v30 = vld [vmem:[#allocation5 + $0x248] sm:$0xff] }
 0x3a7   :  { %21307 = vmatpush1.msk.msra.mxu1 %vm146_vm0, %v15628_v44  ;;  %16226 = vmatprep.mubr.f32.mxu1 %v25920_v6  ;;  %v16300_v39 = vsel %vm2865_vm5, %v16282_v61, %v16284_v41  ;;  %v21559_v44 = vpack.c.bf16 %v16974_v0, %v16972_v8  ;;  %v21575_v61 = vpack.c.bf16 %v16990_v54, %v16988_v31  ;;  %v17010_v8 = vld [vmem:[#allocation5 + $0x250] sm:$0xff]  ;;  %v17021_v31 = vld [vmem:[#allocation5 + $0x2a8] sm:$0xff]  ;;  %v17023_v54 = vld [vmem:[#allocation5 + $0x2b8] sm:$0xff] }
 0x3a8   :  { %21313 = vmatprep.subr.msk.mxu1 %vm146_vm0, %v16288_v45  ;;  %21522 = vmatprep.subr.bf16.mxu0 %v25925_v60  ;;  %v16981_v45 = vld [vmem:[#allocation5 + $0x168] sm:$0xff]  ;;  %v26473_v0 = vld [vmem:[#allocation10_spill] sm:$0xff] }
 0x3a9   :  { %21524 = vmatpush1.bf16.msra.mxu0 %v25928_v29 }
 0x3aa   :  { %21308 = vmatmul.mubr.msk.f32.vlgmr.msra.gmra.mrb[10].mxu1 %vm142_vm1, %v25682_v46  ;;  %21526 = vmatprep.subr.bf16.mxu0 %v25936_v52  ;;  %v16296_v46 = vsel %vm2865_vm5, %v25896_v23, %v16276_v58  ;;  %v16965_v23 = vld [vmem:[#allocation5 + $0xe8] sm:$0xff]  ;;  %v21547_v58 = vpack.c.bf16 %v16962_v55, %v16960_v57  ;;  %v17002_v57 = vld [vmem:[#allocation5 + $0x210] sm:$0xff]  ;;  %vm17794_vm5 = vcmask 310336  }
 0x3ab   :  { %21314 = vmatpush1.msk.msra.mxu1 %vm146_vm0, %v16287_v2  ;;  %16471 = vmatprep.mubr.f32.mxu1 %v25920_v6  ;;  %v21549_v17 = vpack.c.bf16 %v16967_v62, %v16965_v23  ;;  %v16980_v2 = vld [vmem:[#allocation5 + $0x160] sm:$0xff]  ;;  %v26472_v23 = vld [vmem:[#allocation9_spill] sm:$0xff] }
 0x3ac   :  { %21319 = vmatprep.subr.msk.mxu1 %vm146_vm0, %v16292_v51 }
 0x3ad   :  { %21528 = vmatpush1.bf16.msra.mxu0 %v25945_v4 }
 0x3ae   :  { %21315 = vmatmul.mubr.msk.f32.vlgmr.msra.gmra.mrb[2].mxu1 %vm142_vm1, %v25771_v33  ;;  %21530 = vmatprep.subr.bf16.mxu0 %v25952_v7 }
 0x3af   :  { %21320 = vmatpush1.msk.msra.mxu1 %vm146_vm0, %v16291_v63  ;;  %16613 = vmatprep.mubr.f32.mxu1 %v25920_v6  ;;  %v16991_v63 = vld [vmem:[#allocation5 + $0x1b8] sm:$0xff] }
 0x3b0   :  { %21325 = vmatprep.subr.msk.mxu1 %vm146_vm0, %v16296_v46  ;;  %v16986_v46 = vld [vmem:[#allocation5 + $0x190] sm:$0xff] }
 0x3b1   :  { %21532 = vmatpush1.bf16.msra.mxu0 %v25963_v36  ;;  %v21571_v41 = vpack.c.bf16 %v16986_v46, %v16984_v35 }
 0x3b2   :  { %21321 = vmatmul.mubr.msk.f32.vlgmr.msra.gmra.mrb[6].mxu1 %vm142_vm1, %v25771_v33  ;;  %21534 = vmatprep.subr.bf16.mxu0 %v25971_v22 }
 0x3b3   :  { %21326 = vmatpush1.msk.msra.mxu1 %vm146_vm0, %v16295_v37  ;;  %16755 = vmatprep.mubr.f32.mxu1 %v25920_v6  ;;  %v16994_v37 = vld [vmem:[#allocation5 + $0x1d0] sm:$0xff] }
 0x3b4   :  { %21331 = vmatprep.subr.msk.mxu1 %vm146_vm0, %v16300_v39  ;;  %v21577_v39 = vpack.c.bf16 %v16995_v21, %v16993_v48  ;;  %v26002_v16 = vpop.permute.xlu1 %121 }
 0x3b5   :  { %21536 = vmatpush1.bf16.msra.mxu0 %v21535_v24  ;;  %v764_v62 = vadd.f32 %v26472_v23, %v26002_v16  ;;  %v768_v53 = vadd.f32 %v26474_v59, %v26002_v16  ;;  %v17032_v23 = vld [vmem:[#allocation5 + $0x300] sm:$0xff] }
 0x3b6   :  { %21327 = vmatmul.mubr.msk.f32.vlgmr.msra.gmra.mrb[8].mxu1 %vm142_vm1, %v25771_v33  ;;  %21538 = vmatprep.subr.bf16.mxu0 %v21537_v40 }
 0x3b7   :  { %21332 = vmatpush1.msk.msra.mxu1 %vm146_vm0, %v16299_v1  ;;  %16897 = vmatprep.mubr.f32.mxu1 %v25920_v6  ;;  %v21557_v6 = vpack.c.bf16 %v16975_v56, %v16973_v15  ;;  %v16998_v1 = vld [vmem:[#allocation5 + $0x1f0] sm:$0xff]  ;;  %v17011_v15 = vld [vmem:[#allocation5 + $0x258] sm:$0xff]  ;;  %vm17485_vm0 = vcmask 556032  }
 0x3b8   :  { %21778 = vmatprep.subr.bf16.mxu1 %v25925_v60  ;;  %v16977_v60 = vld [vmem:[#allocation5 + $0x148] sm:$0xff]  ;;  %v21583_v5 = vpack.c.bf16 %v16998_v1, %v16996_v11  ;;  %v17026_v11 = vld [vmem:[#allocation5 + $0x2d0] sm:$0xff] }
 0x3b9   :  { %21540 = vmatpush1.bf16.msra.mxu0 %v21539_v25  ;;  %v17029_v1 = vld [vmem:[#allocation5 + $0x2e8] sm:$0xff] }
 0x3ba   :  { %21333 = vmatmul.mubr.msk.f32.vlgmr.msra.gmra.mrb[10].mxu1 %vm142_vm1, %v25771_v33  ;;  %21542 = vmatprep.subr.bf16.mxu0 %v21541_v32  ;;  %v16971_v33 = vld [vmem:[#allocation5 + $0x118] sm:$0xff]  ;;  %vm17789_vm1 = vcmask 1048096  }
 0x3bb   :  { %21780 = vmatpush1.bf16.msra.mxu1 %v25928_v29  ;;  %v21553_v49 = vpack.c.bf16 %v16971_v33, %v16969_v3  ;;  %v16979_v29 = vld [vmem:[#allocation5 + $0x158] sm:$0xff] }
 0x3bc   :  { %21782 = vmatprep.subr.bf16.mxu1 %v25936_v52  ;;  %v21561_v52 = vpack.c.bf16 %v16979_v29, %v16977_v60  ;;  %v767_v60 = vadd.f32 %v26473_v0, %v26002_v16  ;;  %v17013_v29 = vld [vmem:[#allocation5 + $0x268] sm:$0xff] }
 0x3bd   :  { %21544 = vmatpush1.bf16.msra.mxu0 %v21543_v20 }
 0x3be   :  { %21546 = vmatprep.subr.bf16.mxu0 %v21545_v42 }
 0x3bf   :  { %21784 = vmatpush1.bf16.msra.mxu1 %v25945_v4  ;;  %v21565_v4 = vpack.c.bf16 %v16983_v9, %v16981_v45 }
 0x3c0   :  { %21786 = vmatprep.subr.bf16.mxu1 %v25952_v7  ;;  %v16982_v7 = vld [vmem:[#allocation5 + $0x170] sm:$0xff] }
 0x3c1   :  { %21548 = vmatpush1.bf16.msra.mxu0 %v21547_v58  ;;  %v21567_v51 = vpack.c.bf16 %v16982_v7, %v16980_v2  ;;  %v17012_v7 = vld [vmem:[#allocation5 + $0x260] sm:$0xff] }
 0x3c2   :  { %21550 = vmatprep.subr.bf16.mxu0 %v21549_v17 }
 0x3c3   :  { %21788 = vmatpush1.bf16.msra.mxu1 %v25963_v36  ;;  %v16989_v36 = vld [vmem:[#allocation5 + $0x1a8] sm:$0xff] }
 0x3c4   :  { %21790 = vmatprep.subr.bf16.mxu1 %v25971_v22  ;;  %v21573_v22 = vpack.c.bf16 %v16991_v63, %v16989_v36  ;;  %v17016_v36 = vld [vmem:[#allocation5 + $0x280] sm:$0xff]  ;;  %v17018_v63 = vld [vmem:[#allocation5 + $0x290] sm:$0xff] }
 0x3c5   :  { %21552 = vmatpush1.bf16.msra.mxu0 %v21551_v28  ;;  %v21603_v21 = vpack.c.bf16 %v17018_v63, %v17016_v36 }
 0x3c6   :  { %21554 = vmatprep.subr.bf16.mxu0 %v21553_v49 }
 0x3c7   :  { %21792 = vmatpush1.bf16.msra.mxu1 %v21535_v24  ;;  %v16992_v24 = vld [vmem:[#allocation5 + $0x1c0] sm:$0xff] }
 0x3c8   :  { %21794 = vmatprep.subr.bf16.mxu1 %v21537_v40  ;;  %v16997_v40 = vld [vmem:[#allocation5 + $0x1e8] sm:$0xff]  ;;  %v21579_v43 = vpack.c.bf16 %v16994_v37, %v16992_v24  ;;  %v17022_v24 = vld [vmem:[#allocation5 + $0x2b0] sm:$0xff] }
 0x3c9   :  { %21556 = vmatpush1.bf16.msra.mxu0 %v21555_v13  ;;  %v21581_v12 = vpack.c.bf16 %v16999_v34, %v16997_v40  ;;  %v17025_v37 = vld [vmem:[#allocation5 + $0x2c8] sm:$0xff]  ;;  %v17027_v40 = vld [vmem:[#allocation5 + $0x2d8] sm:$0xff] }
 0x3ca   :  { %21558 = vmatprep.subr.bf16.mxu0 %v21557_v6 }
 0x3cb   :  { %21796 = vmatpush1.bf16.msra.mxu1 %v21539_v25  ;;  %v17001_v25 = vld [vmem:[#allocation5 + $0x208] sm:$0xff] }
 0x3cc   :  { %21798 = vmatprep.subr.bf16.mxu1 %v21541_v32  ;;  %v17003_v32 = vld [vmem:[#allocation5 + $0x218] sm:$0xff] }
 0x3cd   :  { %21560 = vmatpush1.bf16.msra.mxu0 %v21559_v44  ;;  %v21585_v18 = vpack.c.bf16 %v17003_v32, %v17001_v25  ;;  %v17031_v25 = vld [vmem:[#allocation5 + $0x2f8] sm:$0xff] }
 0x3ce   :  { %21562 = vmatprep.subr.bf16.mxu0 %v21561_v52 }
 0x3cf   :  { %21800 = vmatpush1.bf16.msra.mxu1 %v21543_v20  ;;  %v763_v20 = vadd.f32 %v26471_v26, %v26002_v16  ;;  %v17030_v26 = vld [vmem:[#allocation5 + $0x2f0] sm:$0xff] }
 0x3d0   :  { %21802 = vmatprep.subr.bf16.mxu1 %v21545_v42  ;;  %v17000_v42 = vld [vmem:[#allocation5 + $0x200] sm:$0xff] }
 0x3d1   :  { %21564 = vmatpush1.bf16.msra.mxu0 %v21563_v19  ;;  %v21587_v33 = vpack.c.bf16 %v17002_v57, %v17000_v42  ;;  %v17035_v42 = vld [vmem:[#allocation5 + $0x318] sm:$0xff] }
 0x3d2   :  { %21566 = vmatprep.subr.bf16.mxu0 %v21565_v4 }
 0x3d3   :  { %21804 = vmatpush1.bf16.msra.mxu1 %v21547_v58  ;;  %v17005_v58 = vld [vmem:[#allocation5 + $0x228] sm:$0xff] }
 0x3d4   :  { %21806 = vmatprep.subr.bf16.mxu1 %v21549_v17  ;;  %v17007_v17 = vld [vmem:[#allocation5 + $0x238] sm:$0xff] }
 0x3d5   :  { %21568 = vmatpush1.bf16.msra.mxu0 %v21567_v51 }
 0x3d6   :  { %21570 = vmatprep.subr.bf16.mxu0 %v21569_v14 }
 0x3d7   :  { %21808 = vmatpush1.bf16.msra.mxu1 %v21551_v28  ;;  %v21589_v28 = vpack.c.bf16 %v17007_v17, %v17005_v58  ;;  %v17037_v58 = vld [vmem:[#allocation5 + $0x328] sm:$0xff]  ;;  %v17039_v17 = vld [vmem:[#allocation5 + $0x338] sm:$0xff] }
 0x3d8   :  { %21810 = vmatprep.subr.bf16.mxu1 %v21553_v49  ;;  %v17004_v49 = vld [vmem:[#allocation5 + $0x220] sm:$0xff] }
 0x3d9   :  { %21572 = vmatpush1.bf16.msra.mxu0 %v21571_v41  ;;  %v21591_v56 = vpack.c.bf16 %v17006_v50, %v17004_v49  ;;  %v17043_v49 = vld [vmem:[#allocation5 + $0x358] sm:$0xff] }
 0x3da   :  { %21574 = vmatprep.subr.bf16.mxu0 %v21573_v22 }
 0x3db   :  { %21812 = vmatpush1.bf16.msra.mxu1 %v21555_v13  ;;  %v21593_v13 = vpack.c.bf16 %v17011_v15, %v17009_v30  ;;  %v17040_v15 = vld [vmem:[#allocation5 + $0x340] sm:$0xff] }
 0x3dc   :  { %21814 = vmatprep.subr.bf16.mxu1 %v21557_v6  ;;  %v17008_v6 = vld [vmem:[#allocation5 + $0x240] sm:$0xff] }
 0x3dd   :  { %21576 = vmatpush1.bf16.msra.mxu0 %v21575_v61 }
 0x3de   :  { %21578 = vmatprep.subr.bf16.mxu0 %v21577_v39 }
 0x3df   :  { %21816 = vmatpush1.bf16.msra.mxu1 %v21559_v44  ;;  %v17015_v44 = vld [vmem:[#allocation5 + $0x278] sm:$0xff] }
 0x3e0   :  { %21818 = vmatprep.subr.bf16.mxu1 %v21561_v52  ;;  %v21597_v2 = vpack.c.bf16 %v17015_v44, %v17013_v29  ;;  %v17046_v29 = vld [vmem:[#allocation5 + $0x370] sm:$0xff]  ;;  %v17049_v44 = vld [vmem:[#allocation5 + $0x388] sm:$0xff] }
 0x3e1   :  { %21580 = vmatpush1.bf16.msra.mxu0 %v21579_v43 }
 0x3e2   :  { %21582 = vmatprep.subr.bf16.mxu0 %v21581_v12 }
 0x3e3   :  { %21820 = vmatpush1.bf16.msra.mxu1 %v21563_v19  ;;  %v21595_v19 = vpack.c.bf16 %v17010_v8, %v17008_v6  ;;  %v17047_v6 = vld [vmem:[#allocation5 + $0x378] sm:$0xff] }
 0x3e4   :  { %21822 = vmatprep.subr.bf16.mxu1 %v21565_v4 }
 0x3e5   :  { %21584 = vmatpush1.bf16.msra.mxu0 %v21583_v5 }
 0x3e6   :  { %21586 = vmatprep.subr.bf16.mxu0 %v21585_v18 }
 0x3e7   :  { %21824 = vmatpush1.bf16.msra.mxu1 %v21567_v51  ;;  %v17019_v51 = vld [vmem:[#allocation5 + $0x298] sm:$0xff] }
 0x3e8   :  { %21826 = vmatprep.subr.bf16.mxu1 %v21569_v14  ;;  %v21599_v14 = vpack.c.bf16 %v17014_v47, %v17012_v7  ;;  %v21601_v46 = vpack.c.bf16 %v17019_v51, %v17017_v27  ;;  %v17055_v7 = vld [vmem:[#allocation5 + $0x3b8] sm:$0xff]  ;;  %v17052_v51 = vld [vmem:[#allocation5 + $0x3a0] sm:$0xff] }
 0x3eb   :  { %21828 = vmatpush1.bf16.msra.mxu1 %v21571_v41 }
 0x3ec   :  { %21830 = vmatprep.subr.bf16.mxu1 %v21573_v22 }
 0x3ef   :  { %21832 = vmatpush1.bf16.msra.mxu1 %v21575_v61  ;;  %v21605_v61 = vpack.c.bf16 %v17023_v54, %v17021_v31  ;;  %v17061_v31 = vld [vmem:[#allocation5 + $0x3e8] sm:$0xff]  ;;  %v17063_v54 = vld [vmem:[#allocation5 + $0x3f8] sm:$0xff] }
 0x3f0   :  { %21834 = vmatprep.subr.bf16.mxu1 %v21577_v39  ;;  %v17020_v39 = vld [vmem:[#allocation5 + $0x2a0] sm:$0xff] }
 0x3f1   :  { %v21607_v34 = vpack.c.bf16 %v17022_v24, %v17020_v39  ;;  %v17062_v39 = vld [vmem:[#allocation5 + $0x3f0] sm:$0xff] }
 0x3f3   :  { %21836 = vmatpush1.bf16.msra.mxu1 %v21579_v43  ;;  %v21609_v43 = vpack.c.bf16 %v17027_v40, %v17025_v37  ;;  %v17065_v37 = vld [vmem:[#allocation5 + $0x408] sm:$0xff]  ;;  %v17067_v40 = vld [vmem:[#allocation5 + $0x418] sm:$0xff] }
 0x3f4   :  { %21838 = vmatprep.subr.bf16.mxu1 %v21581_v12  ;;  %v17024_v12 = vld [vmem:[#allocation5 + $0x2c0] sm:$0xff] }
 0x3f5   :  { %v21611_v32 = vpack.c.bf16 %v17026_v11, %v17024_v12 }
 0x3f7   :  { %21840 = vmatpush1.bf16.msra.mxu1 %v21583_v5  ;;  %v21613_v5 = vpack.c.bf16 %v17031_v25, %v17029_v1  ;;  %v26032_v1 = vpack.c.bf16 %v17067_v40, %v17065_v37  ;;  %v17064_v25 = vld [vmem:[#allocation5 + $0x400] sm:$0xff] }
 0x3f8   :  { %21842 = vmatprep.subr.bf16.mxu1 %v21585_v18  ;;  %v17028_v18 = vld [vmem:[#allocation5 + $0x2e0] sm:$0xff] }
 0x3f9   :  { %v21615_v57 = vpack.c.bf16 %v17030_v26, %v17028_v18  ;;  %v17069_v18 = vld [vmem:[#allocation5 + $0x428] sm:$0xff]  ;;  %v17071_v26 = vld [vmem:[#allocation5 + $0x438] sm:$0xff] }
 0x43d   :  { %v16402_v55 = vpop.f32.mrb[4].mxu0 }
 0x43e   :  { %v22122_v10 = vadd.f32 %v16402_v55, %v763_v20  ;;  %v16404_v38 = vpop.f32.mrb[5].mxu0  ;;  %v17033_v20 = vld [vmem:[#allocation5 + $0x308] sm:$0xff] }
 0x43f   :  { %v22124_v3 = vadd.f32 %v16404_v38, %v764_v62  ;;  %v21617_v55 = vpack.c.bf16 %v17035_v42, %v17033_v20  ;;  %v17034_v62 = vld [vmem:[#allocation5 + $0x310] sm:$0xff]  ;;  %v21621_v38 = vpack.c.bf16 %v17039_v17, %v17037_v58 }
 0x440   :  { %16920 = vst [vmem:[#allocation2] sm:$0xff] %v22122_v10  ;;  %v17070_v58 = vld [vmem:[#allocation5 + $0x430] sm:$0xff] }
 0x441   :  { %16921 = vst [vmem:[#allocation2 + $0x8] sm:$0xff] %v22124_v3  ;;  %17264 = vmatprep.mubr.f32.mxu0 %v22124_v3  ;;  %v17036_v3 = vld [vmem:[#allocation5 + $0x320] sm:$0xff] }
 0x442   :  { %17265 = vmatmul.mubr.f32.vlgmr.msra.gmra.mrb[8].mxu0 %v22122_v10  ;;  %v21619_v10 = vpack.c.bf16 %v17034_v62, %v17032_v23  ;;  %v21653_v23 = vpack.c.bf16 %v17071_v26, %v17069_v18  ;;  %v17068_v62 = vld [vmem:[#allocation5 + $0x420] sm:$0xff]  ;;  %v17098_v18 = vld [vmem:[#allocation5 + $0x510] sm:$0xff]  ;;  %v17101_v26 = vld [vmem:[#allocation5 + $0x528] sm:$0xff] }
 0x443   :  { %21588 = vmatpush1.bf16.msra.mxu0 %v21587_v33 }
 0x444   :  { %21590 = vmatprep.subr.bf16.mxu0 %v21589_v28 }
 0x446   :  { %v16544_v52 = vpop.f32.mrb[6].mxu0 }
 0x447   :  { %v26012_v45 = vadd.f32 %v16544_v52, %v767_v60  ;;  %v16546_v9 = vpop.f32.mrb[7].mxu0  ;;  %21592 = vmatpush1.bf16.msra.mxu0 %v21591_v56  ;;  %v17044_v60 = vld [vmem:[#allocation5 + $0x360] sm:$0xff]  ;;  %v17051_v52 = vld [vmem:[#allocation5 + $0x398] sm:$0xff] }
 0x448   :  { %v26014_v4 = vadd.f32 %v16546_v9, %v768_v53  ;;  %21594 = vmatprep.subr.bf16.mxu0 %v21593_v13  ;;  %v21631_v59 = vpack.c.bf16 %v17046_v29, %v17044_v60  ;;  %v21633_v53 = vpack.c.bf16 %v17051_v52, %v17049_v44  ;;  %v17048_v9 = vld [vmem:[#allocation5 + $0x380] sm:$0xff]  ;;  %v17078_v52 = vld [vmem:[#allocation5 + $0x470] sm:$0xff] }
 0x449   :  { %16924 = vst [vmem:[#allocation2 + $0x20] sm:$0xff] %v26012_v45  ;;  %v17076_v44 = vld [vmem:[#allocation5 + $0x460] sm:$0xff] }
 0x44a   :  { %16925 = vst [vmem:[#allocation2 + $0x28] sm:$0xff] %v26014_v4 }
 0x44b   :  { %21596 = vmatpush1.bf16.msra.mxu0 %v21595_v19 }
 0x44c   :  { %v16686_v35 = vpop.f32.mrb[0].mxu0  ;;  %21598 = vmatprep.subr.bf16.mxu0 %v21597_v2 }
 0x44d   :  { %v22133_v41 = vadd.f32 %v16686_v35, %v26002_v16  ;;  %v16688_v22 = vpop.f32.mrb[1].mxu0  ;;  %v17057_v35 = vld [vmem:[#allocation5 + $0x3c8] sm:$0xff] }
 0x44e   :  { %v22134_v48 = vadd.f32 %v16688_v22, %v26002_v16  ;;  %v17058_v22 = vld [vmem:[#allocation5 + $0x3d0] sm:$0xff] }
 0x44f   :  { %16928 = vst [vmem:[#allocation2 + $0x40] sm:$0xff] %v22133_v41  ;;  %21600 = vmatpush1.bf16.msra.mxu0 %v21599_v14 }
 0x450   :  { %16929 = vst [vmem:[#allocation2 + $0x48] sm:$0xff] %v22134_v48  ;;  %17559 = vmatprep.mubr.f32.mxu1 %v22134_v48  ;;  %21602 = vmatprep.subr.bf16.mxu0 %v21601_v46 }
 0x451   :  { %17560 = vmatmul.mubr.f32.vlgmr.msra.gmra.mrb[12].mxu1 %v22133_v41  ;;  %v17056_v41 = vld [vmem:[#allocation5 + $0x3c0] sm:$0xff] }
 0x452   :  { %21844 = vmatpush1.bf16.msra.mxu1 %v21587_v33  ;;  %v17038_v33 = vld [vmem:[#allocation5 + $0x330] sm:$0xff]  ;;  %v21643_v48 = vpack.c.bf16 %v17058_v22, %v17056_v41  ;;  %v17089_v22 = vld [vmem:[#allocation5 + $0x4c8] sm:$0xff] }
 0x453   :  { %21846 = vmatprep.subr.bf16.mxu1 %v21589_v28  ;;  %21604 = vmatpush1.bf16.msra.mxu0 %v21603_v21  ;;  %v17041_v28 = vld [vmem:[#allocation5 + $0x348] sm:$0xff]  ;;  %v21623_v50 = vpack.c.bf16 %v17038_v33, %v17036_v3  ;;  %v17086_v41 = vld [vmem:[#allocation5 + $0x4b0] sm:$0xff] }
 0x454   :  { %21606 = vmatprep.subr.bf16.mxu0 %v21605_v61  ;;  %v21625_v30 = vpack.c.bf16 %v17043_v49, %v17041_v28  ;;  %v21655_v49 = vpack.c.bf16 %v17070_v58, %v17068_v62  ;;  %v17105_v62 = vld [vmem:[#allocation5 + $0x548] sm:$0xff]  ;;  %v17107_v58 = vld [vmem:[#allocation5 + $0x558] sm:$0xff] }
 0x456   :  { %21848 = vmatpush1.bf16.msra.mxu1 %v21591_v56  ;;  %v17042_v56 = vld [vmem:[#allocation5 + $0x350] sm:$0xff] }
 0x457   :  { %21850 = vmatprep.subr.bf16.mxu1 %v21593_v13  ;;  %21608 = vmatpush1.bf16.msra.mxu0 %v21607_v34  ;;  %v17045_v13 = vld [vmem:[#allocation5 + $0x368] sm:$0xff]  ;;  %v21627_v8 = vpack.c.bf16 %v17042_v56, %v17040_v15  ;;  %v17074_v15 = vld [vmem:[#allocation5 + $0x450] sm:$0xff] }
 0x458   :  { %21610 = vmatprep.subr.bf16.mxu0 %v21609_v43  ;;  %v21629_v0 = vpack.c.bf16 %v17047_v6, %v17045_v13  ;;  %v17077_v13 = vld [vmem:[#allocation5 + $0x468] sm:$0xff]  ;;  %v17079_v6 = vld [vmem:[#allocation5 + $0x478] sm:$0xff] }
 0x459   :  { %v21661_v29 = vpack.c.bf16 %v17079_v6, %v17077_v13  ;;  %v17110_v13 = vld [vmem:[#allocation5 + $0x570] sm:$0xff]  ;;  %v17113_v6 = vld [vmem:[#allocation5 + $0x588] sm:$0xff] }
 0x45a   :  { %21852 = vmatpush1.bf16.msra.mxu1 %v21595_v19  ;;  %v17050_v19 = vld [vmem:[#allocation5 + $0x390] sm:$0xff] }
 0x45b   :  { %21854 = vmatprep.subr.bf16.mxu1 %v21597_v2  ;;  %21612 = vmatpush1.bf16.msra.mxu0 %v21611_v32  ;;  %v17053_v2 = vld [vmem:[#allocation5 + $0x3a8] sm:$0xff]  ;;  %v21635_v47 = vpack.c.bf16 %v17050_v19, %v17048_v9  ;;  %v17083_v9 = vld [vmem:[#allocation5 + $0x498] sm:$0xff] }
 0x45c   :  { %21614 = vmatprep.subr.bf16.mxu0 %v21613_v5  ;;  %v21637_v27 = vpack.c.bf16 %v17055_v7, %v17053_v2 }
 0x45e   :  { %21856 = vmatpush1.bf16.msra.mxu1 %v21599_v14  ;;  %v17054_v14 = vld [vmem:[#allocation5 + $0x3b0] sm:$0xff] }
 0x45f   :  { %21858 = vmatprep.subr.bf16.mxu1 %v21601_v46  ;;  %21616 = vmatpush1.bf16.msra.mxu0 %v21615_v57  ;;  %v17059_v46 = vld [vmem:[#allocation5 + $0x3d8] sm:$0xff]  ;;  %v21639_v36 = vpack.c.bf16 %v17054_v14, %v17052_v51  ;;  %v17080_v51 = vld [vmem:[#allocation5 + $0x480] sm:$0xff]  ;;  %v17082_v14 = vld [vmem:[#allocation5 + $0x490] sm:$0xff] }
 0x460   :  { %21618 = vmatprep.subr.bf16.mxu0 %v21617_v55  ;;  %v21641_v63 = vpack.c.bf16 %v17059_v46, %v17057_v35  ;;  %v17085_v35 = vld [vmem:[#allocation5 + $0x4a8] sm:$0xff]  ;;  %v17087_v46 = vld [vmem:[#allocation5 + $0x4b8] sm:$0xff] }
 0x462   :  { %21860 = vmatpush1.bf16.msra.mxu1 %v21603_v21  ;;  %v26020_v21 = vpack.c.bf16 %v17063_v54, %v17061_v31  ;;  %v17091_v31 = vld [vmem:[#allocation5 + $0x4d8] sm:$0xff] }
 0x463   :  { %21862 = vmatprep.subr.bf16.mxu1 %v21605_v61  ;;  %21620 = vmatpush1.bf16.msra.mxu0 %v21619_v10  ;;  %v17060_v61 = vld [vmem:[#allocation5 + $0x3e0] sm:$0xff] }
 0x464   :  { %21622 = vmatprep.subr.bf16.mxu0 %v21621_v38  ;;  %v26028_v11 = vpack.c.bf16 %v17062_v39, %v17060_v61  ;;  %v17090_v61 = vld [vmem:[#allocation5 + $0x4d0] sm:$0xff]  ;;  %v17093_v39 = vld [vmem:[#allocation5 + $0x4e8] sm:$0xff] }
 0x466   :  { %21864 = vmatpush1.bf16.msra.mxu1 %v21607_v34 }
 0x467   :  { %21866 = vmatprep.subr.bf16.mxu1 %v21609_v43  ;;  %21624 = vmatpush1.bf16.msra.mxu0 %v21623_v50 }
 0x468   :  { %21626 = vmatprep.subr.bf16.mxu0 %v21625_v30 }
 0x46a   :  { %21868 = vmatpush1.bf16.msra.mxu1 %v21611_v32  ;;  %v17066_v32 = vld [vmem:[#allocation5 + $0x410] sm:$0xff] }
 0x46b   :  { %21870 = vmatprep.subr.bf16.mxu1 %v21613_v5  ;;  %21628 = vmatpush1.bf16.msra.mxu0 %v21627_v8 }
 0x46c   :  { %21630 = vmatprep.subr.bf16.mxu0 %v21629_v0 }
 0x46e   :  { %21872 = vmatpush1.bf16.msra.mxu1 %v21615_v57 }
 0x46f   :  { %21874 = vmatprep.subr.bf16.mxu1 %v21617_v55  ;;  %21632 = vmatpush1.bf16.msra.mxu0 %v21631_v59  ;;  %v21651_v55 = vpack.c.bf16 %v17066_v32, %v17064_v25 }
 0x470   :  { %21634 = vmatprep.subr.bf16.mxu0 %v21633_v53 }
 0x472   :  { %21876 = vmatpush1.bf16.msra.mxu1 %v21619_v10  ;;  %v17073_v10 = vld [vmem:[#allocation5 + $0x448] sm:$0xff] }
 0x473   :  { %21878 = vmatprep.subr.bf16.mxu1 %v21621_v38  ;;  %21636 = vmatpush1.bf16.msra.mxu0 %v21635_v47  ;;  %v17075_v38 = vld [vmem:[#allocation5 + $0x458] sm:$0xff] }
 0x474   :  { %21638 = vmatprep.subr.bf16.mxu0 %v21637_v27 }
 0x476   :  { %21880 = vmatpush1.bf16.msra.mxu1 %v21623_v50  ;;  %v21657_v50 = vpack.c.bf16 %v17075_v38, %v17073_v10  ;;  %v21689_v10 = vpack.c.bf16 %v17107_v58, %v17105_v62  ;;  %v17104_v38 = vld [vmem:[#allocation5 + $0x540] sm:$0xff]  ;;  %v17145_v58 = vld [vmem:[#allocation5 + $0x688] sm:$0xff] }
 0x477   :  { %21882 = vmatprep.subr.bf16.mxu1 %v21625_v30  ;;  %21640 = vmatpush1.bf16.msra.mxu0 %v21639_v36  ;;  %v17072_v30 = vld [vmem:[#allocation5 + $0x440] sm:$0xff] }
 0x478   :  { %21642 = vmatprep.subr.bf16.mxu0 %v21641_v63  ;;  %v17140_v62 = vld [vmem:[#allocation5 + $0x660] sm:$0xff] }
 0x479   :  { %v16828_v24 = vpop.f32.mrb[2].mxu0 }
 0x47a   :  { %v26023_v34 = vadd.f32 %v16828_v24, %v26002_v16  ;;  %v16830_v43 = vpop.f32.mrb[3].mxu0  ;;  %21884 = vmatpush1.bf16.msra.mxu1 %v21627_v8  ;;  %v17095_v24 = vld [vmem:[#allocation5 + $0x4f8] sm:$0xff] }
 0x47b   :  { %v26026_v12 = vadd.f32 %v16830_v43, %v26002_v16  ;;  %21886 = vmatprep.subr.bf16.mxu1 %v21629_v0  ;;  %21644 = vmatpush1.bf16.msra.mxu0 %v21643_v48  ;;  %v21677_v40 = vpack.c.bf16 %v17095_v24, %v17093_v39  ;;  %v17092_v43 = vld [vmem:[#allocation5 + $0x4e0] sm:$0xff]  ;;  %v17130_v24 = vld [vmem:[#allocation5 + $0x610] sm:$0xff] }
 0x47c   :  { %16932 = vst [vmem:[#allocation2 + $0x60] sm:$0xff] %v26023_v34  ;;  %21646 = vmatprep.subr.bf16.mxu0 %v26020_v21  ;;  %v17128_v39 = vld [vmem:[#allocation5 + $0x600] sm:$0xff] }
 0x47d   :  { %16933 = vst [vmem:[#allocation2 + $0x68] sm:$0xff] %v26026_v12 }
 0x47e   :  { %21888 = vmatpush1.bf16.msra.mxu1 %v21631_v59 }
 0x47f   :  { %21890 = vmatprep.subr.bf16.mxu1 %v21633_v53  ;;  %21648 = vmatpush1.bf16.msra.mxu0 %v26028_v11  ;;  %v17081_v53 = vld [vmem:[#allocation5 + $0x488] sm:$0xff] }
 0x480   :  { %21650 = vmatprep.subr.bf16.mxu0 %v26032_v1 }
 0x481   :  { %v16473_v5 = vpop.f32.mrb[2].mxu1 }
 0x482   :  { %v22125_v20 = vadd.f32 %v16473_v5, %v26002_v16  ;;  %v16475_v42 = vpop.f32.mrb[3].mxu1  ;;  %21892 = vmatpush1.bf16.msra.mxu1 %v21635_v47  ;;  %v21663_v47 = vpack.c.bf16 %v17078_v52, %v17076_v44  ;;  %v17096_v5 = vld [vmem:[#allocation5 + $0x500] sm:$0xff]  ;;  %v17117_v44 = vld [vmem:[#allocation5 + $0x5a8] sm:$0xff]  ;;  %v17119_v52 = vld [vmem:[#allocation5 + $0x5b8] sm:$0xff] }
 0x483   :  { %v22126_v57 = vadd.f32 %v16475_v42, %v26002_v16  ;;  %21894 = vmatprep.subr.bf16.mxu1 %v21637_v27  ;;  %v21665_v27 = vpack.c.bf16 %v17083_v9, %v17081_v53  ;;  %v21683_v42 = vpack.c.bf16 %v17098_v18, %v17096_v5  ;;  %v21701_v53 = vpack.c.bf16 %v17119_v52, %v17117_v44  ;;  %v17116_v9 = vld [vmem:[#allocation5 + $0x5a0] sm:$0xff]  ;;  %v17159_v44 = vld [vmem:[#allocation5 + $0x6f8] sm:$0xff] }
 0x484   :  { %16922 = vst [vmem:[#allocation2 + $0x10] sm:$0xff] %v22125_v20 }
 0x485   :  { %16923 = vst [vmem:[#allocation2 + $0x18] sm:$0xff] %v22126_v57  ;;  %v16615_v17 = vpop.f32.mrb[6].mxu1  ;;  %17335 = vmatprep.mubr.f32.mxu0 %v22126_v57 }
 0x486   :  { %v26040_v3 = vadd.f32 %v16615_v17, %v26002_v16  ;;  %v16617_v33 = vpop.f32.mrb[7].mxu1  ;;  %17336 = vmatmul.mubr.f32.vlgmr.msra.gmra.mrb[8].mxu0 %v22125_v20  ;;  %21896 = vmatpush1.bf16.msra.mxu1 %v21639_v36  ;;  %v21669_v36 = vpack.c.bf16 %v17087_v46, %v17085_v35  ;;  %v17103_v20 = vld [vmem:[#allocation5 + $0x538] sm:$0xff]  ;;  %v17120_v35 = vld [vmem:[#allocation5 + $0x5c0] sm:$0xff]  ;;  %v17122_v46 = vld [vmem:[#allocation5 + $0x5d0] sm:$0xff] }
 0x487   :  { %v26043_v28 = vadd.f32 %v16617_v33, %v26002_v16  ;;  %21652 = vmatpush1.bf16.msra.mxu0 %v21651_v55  ;;  %17406 = vmatprep.mubr.f32.mxu0 %v26014_v4  ;;  %v21659_v4 = vpack.c.bf16 %v17074_v15, %v17072_v30  ;;  %v21685_v57 = vpack.c.bf16 %v17103_v20, %v17101_v26  ;;  %v17106_v33 = vld [vmem:[#allocation5 + $0x550] sm:$0xff]  ;;  %v17136_v26 = vld [vmem:[#allocation5 + $0x640] sm:$0xff] }
 0x488   :  { %16926 = vst [vmem:[#allocation2 + $0x30] sm:$0xff] %v26040_v3  ;;  %21654 = vmatprep.subr.bf16.mxu0 %v21653_v23  ;;  %21898 = vmatprep.subr.bf16.mxu1 %v21641_v63  ;;  %v17084_v63 = vld [vmem:[#allocation5 + $0x4a0] sm:$0xff]  ;;  %v21691_v30 = vpack.c.bf16 %v17106_v33, %v17104_v38  ;;  %v17138_v20 = vld [vmem:[#allocation5 + $0x650] sm:$0xff] }
 0x489   :  { %16927 = vst [vmem:[#allocation2 + $0x38] sm:$0xff] %v26043_v28  ;;  %v16757_v56 = vpop.f32.mrb[8].mxu1  ;;  %v21671_v54 = vpack.c.bf16 %v17086_v41, %v17084_v63  ;;  %v21707_v63 = vpack.c.bf16 %v17122_v46, %v17120_v35  ;;  %v17144_v38 = vld [vmem:[#allocation5 + $0x680] sm:$0xff]  ;;  %v17146_v33 = vld [vmem:[#allocation5 + $0x690] sm:$0xff]  ;;  %v17165_v35 = vld [vmem:[#allocation5 + $0x728] sm:$0xff] }
 0x48a   :  { %v22135_v8 = vadd.f32 %v16757_v56, %v26002_v16  ;;  %v16759_v0 = vpop.f32.mrb[9].mxu1  ;;  %21900 = vmatpush1.bf16.msra.mxu1 %v21643_v48  ;;  %v21673_v48 = vpack.c.bf16 %v17091_v31, %v17089_v22  ;;  %v17108_v56 = vld [vmem:[#allocation5 + $0x560] sm:$0xff]  ;;  %v17126_v31 = vld [vmem:[#allocation5 + $0x5f0] sm:$0xff]  ;;  %v17167_v46 = vld [vmem:[#allocation5 + $0x738] sm:$0xff] }
 0x48b   :  { %v22136_v60 = vadd.f32 %v16759_v0, %v26002_v16  ;;  %21656 = vmatpush1.bf16.msra.mxu0 %v21655_v49  ;;  %21902 = vmatprep.subr.bf16.mxu1 %v26020_v21  ;;  %v17088_v21 = vld [vmem:[#allocation5 + $0x4c0] sm:$0xff]  ;;  %v21695_v0 = vpack.c.bf16 %v17110_v13, %v17108_v56  ;;  %v17150_v13 = vld [vmem:[#allocation5 + $0x6b0] sm:$0xff] }
 0x48c   :  { %16930 = vst [vmem:[#allocation2 + $0x50] sm:$0xff] %v22135_v8  ;;  %21658 = vmatprep.subr.bf16.mxu0 %v21657_v50  ;;  %v21675_v37 = vpack.c.bf16 %v17090_v61, %v17088_v21  ;;  %v17124_v22 = vld [vmem:[#allocation5 + $0x5e0] sm:$0xff] }
 0x48d   :  { %16931 = vst [vmem:[#allocation2 + $0x58] sm:$0xff] %v22136_v60  ;;  %v16899_v59 = vpop.f32.mrb[10].mxu1  ;;  %17630 = vmatprep.mubr.f32.mxu1 %v22136_v60  ;;  %v21711_v21 = vpack.c.bf16 %v17126_v31, %v17124_v22  ;;  %v17148_v56 = vld [vmem:[#allocation5 + $0x6a0] sm:$0xff]  ;;  %v17169_v22 = vld [vmem:[#allocation5 + $0x748] sm:$0xff]  ;;  %v17171_v31 = vld [vmem:[#allocation5 + $0x758] sm:$0xff] }
 0x48e   :  { %v26052_v19 = vadd.f32 %v16899_v59, %v26002_v16  ;;  %v16901_v2 = vpop.f32.mrb[11].mxu1  ;;  %21904 = vmatpush1.bf16.msra.mxu1 %v26028_v11  ;;  %v17097_v11 = vld [vmem:[#allocation5 + $0x508] sm:$0xff] }
 0x48f   :  { %v26056_v7 = vadd.f32 %v16901_v2, %v26002_v16  ;;  %21660 = vmatpush1.bf16.msra.mxu0 %v21659_v4  ;;  %21906 = vmatprep.subr.bf16.mxu1 %v26032_v1  ;;  %v21667_v16 = vpack.c.bf16 %v17082_v14, %v17080_v51  ;;  %v17099_v1 = vld [vmem:[#allocation5 + $0x518] sm:$0xff]  ;;  %v17118_v2 = vld [vmem:[#allocation5 + $0x5b0] sm:$0xff] }
 0x490   :  { %16934 = vst [vmem:[#allocation2 + $0x70] sm:$0xff] %v26052_v19  ;;  %21662 = vmatprep.subr.bf16.mxu0 %v21661_v29  ;;  %v21681_v32 = vpack.c.bf16 %v17099_v1, %v17097_v11  ;;  %v21703_v51 = vpack.c.bf16 %v17118_v2, %v17116_v9  ;;  %v17132_v11 = vld [vmem:[#allocation5 + $0x620] sm:$0xff]  ;;  %v17134_v1 = vld [vmem:[#allocation5 + $0x630] sm:$0xff]  ;;  %v17161_v9 = vld [vmem:[#allocation5 + $0x708] sm:$0xff] }
 0x491   :  { %16935 = vst [vmem:[#allocation2 + $0x78] sm:$0xff] %v26056_v7  ;;  %17631 = vmatmul.mubr.f32.vlgmr.msra.gmra.mrb[12].mxu1 %v22135_v8  ;;  %v17115_v8 = vld [vmem:[#allocation5 + $0x598] sm:$0xff]  ;;  %v21719_v5 = vpack.c.bf16 %v17134_v1, %v17132_v11  ;;  %v17177_v11 = vld [vmem:[#allocation5 + $0x788] sm:$0xff] }
 0x492   :  { %21908 = vmatpush1.bf16.msra.mxu1 %v21651_v55  ;;  %17701 = vmatprep.mubr.f32.mxu1 %v26026_v12  ;;  %v17094_v12 = vld [vmem:[#allocation5 + $0x4f0] sm:$0xff]  ;;  %v17100_v55 = vld [vmem:[#allocation5 + $0x520] sm:$0xff]  ;;  %v21697_v60 = vpack.c.bf16 %v17115_v8, %v17113_v6  ;;  %v17153_v6 = vld [vmem:[#allocation5 + $0x6c8] sm:$0xff] }
 0x493   :  { %21664 = vmatpush1.bf16.msra.mxu0 %v21663_v47  ;;  %21910 = vmatprep.subr.bf16.mxu1 %v21653_v23  ;;  %v21679_v25 = vpack.c.bf16 %v17094_v12, %v17092_v43  ;;  %v17102_v23 = vld [vmem:[#allocation5 + $0x530] sm:$0xff]  ;;  %v21715_v43 = vpack.c.bf16 %v17130_v24, %v17128_v39  ;;  %v17155_v8 = vld [vmem:[#allocation5 + $0x6d8] sm:$0xff]  ;;  %v17173_v39 = vld [vmem:[#allocation5 + $0x768] sm:$0xff] }
 0x494   :  { %21666 = vmatprep.subr.bf16.mxu0 %v21665_v27  ;;  %v21687_v17 = vpack.c.bf16 %v17102_v23, %v17100_v55  ;;  %v21723_v55 = vpack.c.bf16 %v17138_v20, %v17136_v26  ;;  %v17163_v2 = vld [vmem:[#allocation5 + $0x718] sm:$0xff]  ;;  %v17181_v26 = vld [vmem:[#allocation5 + $0x7a8] sm:$0xff] }
 0x495   :  { %v17175_v24 = vld [vmem:[#allocation5 + $0x778] sm:$0xff] }
 0x496   :  { %21912 = vmatpush1.bf16.msra.mxu1 %v21655_v49  ;;  %v17109_v49 = vld [vmem:[#allocation5 + $0x568] sm:$0xff]  ;;  %v17179_v1 = vld [vmem:[#allocation5 + $0x798] sm:$0xff] }
 0x497   :  { %21668 = vmatpush1.bf16.msra.mxu0 %v21667_v16  ;;  %21914 = vmatprep.subr.bf16.mxu1 %v21657_v50  ;;  %v17111_v50 = vld [vmem:[#allocation5 + $0x578] sm:$0xff] }
 0x498   :  { %21670 = vmatprep.subr.bf16.mxu0 %v21669_v36  ;;  %v21693_v15 = vpack.c.bf16 %v17111_v50, %v17109_v49  ;;  %v17149_v49 = vld [vmem:[#allocation5 + $0x6a8] sm:$0xff]  ;;  %v17151_v50 = vld [vmem:[#allocation5 + $0x6b8] sm:$0xff] }
 0x499   :  { %v17183_v20 = vld [vmem:[#allocation5 + $0x7b8] sm:$0xff] }
 0x49a   :  { %21916 = vmatpush1.bf16.msra.mxu1 %v21659_v4  ;;  %v17112_v4 = vld [vmem:[#allocation5 + $0x580] sm:$0xff] }
 0x49b   :  { %21672 = vmatpush1.bf16.msra.mxu0 %v21671_v54  ;;  %21918 = vmatprep.subr.bf16.mxu1 %v21661_v29  ;;  %v17114_v29 = vld [vmem:[#allocation5 + $0x590] sm:$0xff] }
 0x49c   :  { %21674 = vmatprep.subr.bf16.mxu0 %v21673_v48  ;;  %v21699_v59 = vpack.c.bf16 %v17114_v29, %v17112_v4  ;;  %v17154_v4 = vld [vmem:[#allocation5 + $0x6d0] sm:$0xff]  ;;  %v17157_v29 = vld [vmem:[#allocation5 + $0x6e8] sm:$0xff] }
 0x49d   :  { %v21741_v52 = vpack.c.bf16 %v17159_v44, %v17157_v29 }
 0x49e   :  { %21920 = vmatpush1.bf16.msra.mxu1 %v21663_v47  ;;  %v17121_v47 = vld [vmem:[#allocation5 + $0x5c8] sm:$0xff] }
 0x49f   :  { %21676 = vmatpush1.bf16.msra.mxu0 %v21675_v37  ;;  %21922 = vmatprep.subr.bf16.mxu1 %v21665_v27  ;;  %v17123_v27 = vld [vmem:[#allocation5 + $0x5d8] sm:$0xff] }
 0x4a0   :  { %21678 = vmatprep.subr.bf16.mxu0 %v21677_v40  ;;  %v21705_v14 = vpack.c.bf16 %v17123_v27, %v17121_v47  ;;  %v21745_v27 = vpack.c.bf16 %v17163_v2, %v17161_v9 }
 0x4a2   :  { %21924 = vmatpush1.bf16.msra.mxu1 %v21667_v16  ;;  %v17125_v16 = vld [vmem:[#allocation5 + $0x5e8] sm:$0xff] }
 0x4a3   :  { %21680 = vmatpush1.bf16.msra.mxu0 %v21679_v25  ;;  %21926 = vmatprep.subr.bf16.mxu1 %v21669_v36  ;;  %v17127_v36 = vld [vmem:[#allocation5 + $0x5f8] sm:$0xff] }
 0x4a4   :  { %21682 = vmatprep.subr.bf16.mxu0 %v21681_v32  ;;  %v21709_v41 = vpack.c.bf16 %v17127_v36, %v17125_v16  ;;  %v21749_v36 = vpack.c.bf16 %v17167_v46, %v17165_v35 }
 0x4a6   :  { %21928 = vmatpush1.bf16.msra.mxu1 %v21671_v54  ;;  %v17129_v54 = vld [vmem:[#allocation5 + $0x608] sm:$0xff] }
 0x4a7   :  { %21684 = vmatpush1.bf16.msra.mxu0 %v21683_v42  ;;  %21930 = vmatprep.subr.bf16.mxu1 %v21673_v48  ;;  %v17131_v48 = vld [vmem:[#allocation5 + $0x618] sm:$0xff] }
 0x4a8   :  { %21686 = vmatprep.subr.bf16.mxu0 %v21685_v57  ;;  %v21713_v61 = vpack.c.bf16 %v17131_v48, %v17129_v54  ;;  %v21753_v48 = vpack.c.bf16 %v17171_v31, %v17169_v22 }
 0x4aa   :  { %21932 = vmatpush1.bf16.msra.mxu1 %v21675_v37  ;;  %v17133_v37 = vld [vmem:[#allocation5 + $0x628] sm:$0xff] }
 0x4ab   :  { %21688 = vmatpush1.bf16.msra.mxu0 %v21687_v17  ;;  %21934 = vmatprep.subr.bf16.mxu1 %v21677_v40  ;;  %v17135_v40 = vld [vmem:[#allocation5 + $0x638] sm:$0xff] }
 0x4ac   :  { %21690 = vmatprep.subr.bf16.mxu0 %v21689_v10  ;;  %v21717_v12 = vpack.c.bf16 %v17135_v40, %v17133_v37  ;;  %v21757_v40 = vpack.c.bf16 %v17175_v24, %v17173_v39 }
 0x4ae   :  { %21936 = vmatpush1.bf16.msra.mxu1 %v21679_v25  ;;  %v17137_v25 = vld [vmem:[#allocation5 + $0x648] sm:$0xff] }
 0x4af   :  { %21692 = vmatpush1.bf16.msra.mxu0 %v21691_v30  ;;  %21938 = vmatprep.subr.bf16.mxu1 %v21681_v32  ;;  %v17139_v32 = vld [vmem:[#allocation5 + $0x658] sm:$0xff] }
 0x4b0   :  { %21694 = vmatprep.subr.bf16.mxu0 %v21693_v15  ;;  %v21721_v18 = vpack.c.bf16 %v17139_v32, %v17137_v25  ;;  %v21761_v32 = vpack.c.bf16 %v17179_v1, %v17177_v11 }
 0x4b2   :  { %21940 = vmatpush1.bf16.msra.mxu1 %v21683_v42  ;;  %v17141_v42 = vld [vmem:[#allocation5 + $0x668] sm:$0xff] }
 0x4b3   :  { %21696 = vmatpush1.bf16.msra.mxu0 %v21695_v0  ;;  %21942 = vmatprep.subr.bf16.mxu1 %v21685_v57  ;;  %v17143_v57 = vld [vmem:[#allocation5 + $0x678] sm:$0xff] }
 0x4b4   :  { %21698 = vmatprep.subr.bf16.mxu0 %v21697_v60  ;;  %v21725_v23 = vpack.c.bf16 %v17143_v57, %v17141_v42  ;;  %v21765_v57 = vpack.c.bf16 %v17183_v20, %v17181_v26 }
 0x4b6   :  { %21944 = vmatpush1.bf16.msra.mxu1 %v21687_v17  ;;  %v17147_v17 = vld [vmem:[#allocation5 + $0x698] sm:$0xff] }
 0x4b7   :  { %21700 = vmatpush1.bf16.msra.mxu0 %v21699_v59  ;;  %21946 = vmatprep.subr.bf16.mxu1 %v21689_v10  ;;  %v21729_v10 = vpack.c.bf16 %v17147_v17, %v17145_v58 }
 0x4b8   :  { %21702 = vmatprep.subr.bf16.mxu0 %v21701_v53 }
 0x4ba   :  { %21948 = vmatpush1.bf16.msra.mxu1 %v21691_v30  ;;  %v21731_v30 = vpack.c.bf16 %v17146_v33, %v17144_v38  ;;  %v17189_v38 = vld [vmem:[#allocation5 + $0x7e8] sm:$0xff]  ;;  %v17191_v33 = vld [vmem:[#allocation5 + $0x7f8] sm:$0xff] }
 0x4bb   :  { %21704 = vmatpush1.bf16.msra.mxu0 %v21703_v51  ;;  %21950 = vmatprep.subr.bf16.mxu1 %v21693_v15  ;;  %v21733_v15 = vpack.c.bf16 %v17151_v50, %v17149_v49  ;;  %v21773_v50 = vpack.c.bf16 %v17191_v33, %v17189_v38 }
 0x4bc   :  { %21706 = vmatprep.subr.bf16.mxu0 %v21705_v14 }
 0x4be   :  { %21952 = vmatpush1.bf16.msra.mxu1 %v21695_v0  ;;  %v21735_v0 = vpack.c.bf16 %v17150_v13, %v17148_v56  ;;  %v26067_v13 = vld [vmem:[#allocation2 + $0x80] sm:$0xff] }
 0x4bf   :  { %21708 = vmatpush1.bf16.msra.mxu0 %v21707_v63  ;;  %21954 = vmatprep.subr.bf16.mxu1 %v21697_v60  ;;  %v17152_v60 = vld [vmem:[#allocation5 + $0x6c0] sm:$0xff] }
 0x4c0   :  { %21710 = vmatprep.subr.bf16.mxu0 %v21709_v41 }
 0x4c2   :  { %21956 = vmatpush1.bf16.msra.mxu1 %v21699_v59  ;;  %v17156_v59 = vld [vmem:[#allocation5 + $0x6e0] sm:$0xff] }
 0x4c3   :  { %21712 = vmatpush1.bf16.msra.mxu0 %v21711_v21  ;;  %21958 = vmatprep.subr.bf16.mxu1 %v21701_v53  ;;  %v17158_v53 = vld [vmem:[#allocation5 + $0x6f0] sm:$0xff] }
 0x4c4   :  { %21714 = vmatprep.subr.bf16.mxu0 %v21713_v61  ;;  %v21743_v47 = vpack.c.bf16 %v17158_v53, %v17156_v59  ;;  %v17829_v53 = vld [vmem:[%s26450_s3] sm:$0xff] }
 0x4c6   :  { %17407 = vmatmul.mubr.f32.vlgmr.msra.gmra.mrb[8].mxu0 %v26012_v45  ;;  %21960 = vmatpush1.bf16.msra.mxu1 %v21703_v51  ;;  %v17142_v45 = vld [vmem:[#allocation5 + $0x670] sm:$0xff]  ;;  %v17160_v51 = vld [vmem:[#allocation5 + $0x700] sm:$0xff] }
 0x4c7   :  { %21716 = vmatpush1.bf16.msra.mxu0 %v21715_v43  ;;  %17477 = vmatprep.mubr.f32.mxu0 %v26043_v28  ;;  %v21727_v28 = vpack.c.bf16 %v17142_v45, %v17140_v62  ;;  %v17185_v62 = vld [vmem:[#allocation5 + $0x7c8] sm:$0xff]  ;;  %v17187_v45 = vld [vmem:[#allocation5 + $0x7d8] sm:$0xff] }
 0x4c8   :  { %21718 = vmatprep.subr.bf16.mxu0 %v21717_v12  ;;  %21962 = vmatprep.subr.bf16.mxu1 %v21705_v14  ;;  %v17162_v14 = vld [vmem:[#allocation5 + $0x710] sm:$0xff]  ;;  %v21769_v17 = vpack.c.bf16 %v17187_v45, %v17185_v62 }
 0x4c9   :  { %v21747_v16 = vpack.c.bf16 %v17162_v14, %v17160_v51 }
 0x4ca   :  { %21964 = vmatpush1.bf16.msra.mxu1 %v21707_v63  ;;  %v17164_v63 = vld [vmem:[#allocation5 + $0x720] sm:$0xff] }
 0x4cb   :  { %21720 = vmatpush1.bf16.msra.mxu0 %v21719_v5  ;;  %21966 = vmatprep.subr.bf16.mxu1 %v21709_v41  ;;  %v17166_v41 = vld [vmem:[#allocation5 + $0x730] sm:$0xff] }
 0x4cc   :  { %21722 = vmatprep.subr.bf16.mxu0 %v21721_v18  ;;  %v21751_v54 = vpack.c.bf16 %v17166_v41, %v17164_v63 }
 0x4ce   :  { %21968 = vmatpush1.bf16.msra.mxu1 %v21711_v21  ;;  %v17168_v21 = vld [vmem:[#allocation5 + $0x740] sm:$0xff] }
 0x4cf   :  { %21724 = vmatpush1.bf16.msra.mxu0 %v21723_v55  ;;  %21970 = vmatprep.subr.bf16.mxu1 %v21713_v61  ;;  %v17170_v61 = vld [vmem:[#allocation5 + $0x750] sm:$0xff] }
 0x4d0   :  { %21726 = vmatprep.subr.bf16.mxu0 %v21725_v23  ;;  %v21755_v37 = vpack.c.bf16 %v17170_v61, %v17168_v21 }
 0x4d1   :  { %17702 = vmatmul.mubr.f32.vlgmr.msra.gmra.mrb[12].mxu1 %v26023_v34  ;;  %v21737_v34 = vpack.c.bf16 %v17155_v8, %v17153_v6 }
 0x4d2   :  { %21972 = vmatpush1.bf16.msra.mxu1 %v21715_v43  ;;  %17772 = vmatprep.mubr.f32.mxu1 %v26056_v7  ;;  %v21739_v7 = vpack.c.bf16 %v17154_v4, %v17152_v60  ;;  %v17172_v43 = vld [vmem:[#allocation5 + $0x760] sm:$0xff] }
 0x4d3   :  { %21728 = vmatpush1.bf16.msra.mxu0 %v21727_v28  ;;  %21974 = vmatprep.subr.bf16.mxu1 %v21717_v12  ;;  %v17174_v12 = vld [vmem:[#allocation5 + $0x770] sm:$0xff] }
 0x4d4   :  { %21730 = vmatprep.subr.bf16.mxu0 %v21729_v10  ;;  %v21759_v25 = vpack.c.bf16 %v17174_v12, %v17172_v43 }
 0x4d6   :  { %21976 = vmatpush1.bf16.msra.mxu1 %v21719_v5  ;;  %v17176_v5 = vld [vmem:[#allocation5 + $0x780] sm:$0xff] }
 0x4d7   :  { %21732 = vmatpush1.bf16.msra.mxu0 %v21731_v30  ;;  %21978 = vmatprep.subr.bf16.mxu1 %v21721_v18  ;;  %v17178_v18 = vld [vmem:[#allocation5 + $0x790] sm:$0xff] }
 0x4d8   :  { %21734 = vmatprep.subr.bf16.mxu0 %v21733_v15  ;;  %v21763_v42 = vpack.c.bf16 %v17178_v18, %v17176_v5 }
 0x4da   :  { %21980 = vmatpush1.bf16.msra.mxu1 %v21723_v55  ;;  %v17180_v55 = vld [vmem:[#allocation5 + $0x7a0] sm:$0xff] }
 0x4db   :  { %21736 = vmatpush1.bf16.msra.mxu0 %v21735_v0  ;;  %21982 = vmatprep.subr.bf16.mxu1 %v21725_v23  ;;  %v17182_v23 = vld [vmem:[#allocation5 + $0x7b0] sm:$0xff] }
 0x4dc   :  { %21738 = vmatprep.subr.bf16.mxu0 %v21737_v34  ;;  %v21767_v58 = vpack.c.bf16 %v17182_v23, %v17180_v55 }
 0x4de   :  { %21984 = vmatpush1.bf16.msra.mxu1 %v21727_v28  ;;  %v17184_v28 = vld [vmem:[#allocation5 + $0x7c0] sm:$0xff] }
 0x4df   :  { %21740 = vmatpush1.bf16.msra.mxu0 %v21739_v7  ;;  %21986 = vmatprep.subr.bf16.mxu1 %v21729_v10  ;;  %v17186_v10 = vld [vmem:[#allocation5 + $0x7d0] sm:$0xff] }
 0x4e0   :  { %21742 = vmatprep.subr.bf16.mxu0 %v21741_v52  ;;  %v21771_v49 = vpack.c.bf16 %v17186_v10, %v17184_v28 }
 0x4e2   :  { %21988 = vmatpush1.bf16.msra.mxu1 %v21731_v30  ;;  %v17188_v30 = vld [vmem:[#allocation5 + $0x7e0] sm:$0xff] }
 0x4e3   :  { %21744 = vmatpush1.bf16.msra.mxu0 %v21743_v47  ;;  %21990 = vmatprep.subr.bf16.mxu1 %v21733_v15  ;;  %v17190_v15 = vld [vmem:[#allocation5 + $0x7f0] sm:$0xff] }
 0x4e4   :  { %21746 = vmatprep.subr.bf16.mxu0 %v21745_v27  ;;  %v21775_v56 = vpack.c.bf16 %v17190_v15, %v17188_v30 }
 0x4e6   :  { %21992 = vmatpush1.bf16.msra.mxu1 %v21735_v0 }
 0x4e7   :  { %21748 = vmatpush1.bf16.msra.mxu0 %v21747_v16  ;;  %21994 = vmatprep.subr.bf16.mxu1 %v21737_v34 }
 0x4e8   :  { %21750 = vmatprep.subr.bf16.mxu0 %v21749_v36 }
 0x4ea   :  { %21996 = vmatpush1.bf16.msra.mxu1 %v21739_v7 }
 0x4eb   :  { %21752 = vmatpush1.bf16.msra.mxu0 %v21751_v54  ;;  %21998 = vmatprep.subr.bf16.mxu1 %v21741_v52 }
 0x4ec   :  { %21754 = vmatprep.subr.bf16.mxu0 %v21753_v48 }
 0x4ee   :  { %22000 = vmatpush1.bf16.msra.mxu1 %v21743_v47 }
 0x4ef   :  { %21756 = vmatpush1.bf16.msra.mxu0 %v21755_v37  ;;  %22002 = vmatprep.subr.bf16.mxu1 %v21745_v27 }
 0x4f0   :  { %21758 = vmatprep.subr.bf16.mxu0 %v21757_v40 }
 0x4f2   :  { %22004 = vmatpush1.bf16.msra.mxu1 %v21747_v16 }
 0x4f3   :  { %21760 = vmatpush1.bf16.msra.mxu0 %v21759_v25  ;;  %22006 = vmatprep.subr.bf16.mxu1 %v21749_v36 }
 0x4f4   :  { %21762 = vmatprep.subr.bf16.mxu0 %v21761_v32 }
 0x4f6   :  { %22008 = vmatpush1.bf16.msra.mxu1 %v21751_v54  ;;  %v17839_v54 = vld [vmem:[%s26451_s4] sm:$0xff] }
 0x4f7   :  { %21764 = vmatpush1.bf16.msra.mxu0 %v21763_v42  ;;  %22010 = vmatprep.subr.bf16.mxu1 %v21753_v48 }
 0x4f8   :  { %21766 = vmatprep.subr.bf16.mxu0 %v21765_v57 }
 0x4fa   :  { %22012 = vmatpush1.bf16.msra.mxu1 %v21755_v37 }
 0x4fb   :  { %21768 = vmatpush1.bf16.msra.mxu0 %v21767_v58  ;;  %22014 = vmatprep.subr.bf16.mxu1 %v21757_v40 }
 0x4fc   :  { %21770 = vmatprep.subr.bf16.mxu0 %v21769_v17 }
 0x4fe   :  { %22016 = vmatpush1.bf16.msra.mxu1 %v21759_v25 }
 0x4ff   :  { %21772 = vmatpush1.bf16.msra.mxu0 %v21771_v49  ;;  %22018 = vmatprep.subr.bf16.mxu1 %v21761_v32 }
 0x500   :  { %21774 = vmatprep.subr.bf16.mxu0 %v21773_v50 }
 0x502   :  { %22020 = vmatpush1.bf16.msra.mxu1 %v21763_v42 }
 0x503   :  { %21776 = vmatpush1.bf16.msra.mxu0 %v21775_v56  ;;  %22022 = vmatprep.subr.bf16.mxu1 %v21765_v57 }
 0x506   :  { %17478 = vmatmul.mubr.f32.vlgmr.msra.gmra.mrb[8].mxu0 %v26040_v3  ;;  %22024 = vmatpush1.bf16.msra.mxu1 %v21767_v58 }
 0x507   :  { %22026 = vmatprep.subr.bf16.mxu1 %v21769_v17  ;;  %17956 = vmatprep.mubr.f32.mxu0 %v26067_v13 }
 0x50a   :  { %22028 = vmatpush1.bf16.msra.mxu1 %v21771_v49 }
 0x50b   :  { %22030 = vmatprep.subr.bf16.mxu1 %v21773_v50 }
 0x50e   :  { %22032 = vmatpush1.bf16.msra.mxu1 %v21775_v56 }
 0x511   :  { %17773 = vmatmul.mubr.f32.vlgmr.msra.gmra.mrb[12].mxu1 %v26052_v19 }
 0x512   :  { %18027 = vmatprep.mubr.f32.mxu1 %v26067_v13 }
 0x5d9   :  { %v17479_v6 = vpop.f32.mrb[8].mxu0 }
 0x5da   :  { %v17481_v8 = vpop.f32.mrb[9].mxu0 }
 0x5db   :  { %17486 = vst.msk [vmem:[#allocation3 + $0x8] sm:$0xff] %vm17485_vm0, %v17481_v8 }
 0x5e4   :  { %v17774_v0 = vpop.f32.mrb[12].mxu1 }
 0x5e5   :  { %17781 = vrot.lane.b32.xlu0 %v17774_v0, %s22751_s1  ;;  %v17776_v3 = vpop.f32.mrb[13].mxu1 }
 0x5e6   :  { %17783 = vrot.lane.b32.xlu1 %v17776_v3, %s22751_s1  ;;  %v17884_v3 = vld [vmem:[%s26453_s6] sm:$0xff] }
 0x657   :  { %v17782_v34 = vpop.permute.xlu0 %17781 }
 0x658   :  { %17790 = vst.msk [vmem:[#allocation3 + $0x8] sm:$0xff] %vm17789_vm1, %v17782_v34  ;;  %v17784_v60 = vpop.permute.xlu1 %17783  ;;  %vm19410_vm1 = vcmask 1043456  }
 0x659   :  { %17793 = vst.msk [vmem:[#allocation3 + $0x18] sm:$0xff] %vm17792_vm4, %v17784_v60  ;;  %v17785_v29 = vsel %vm17485_vm0, %v17782_v34, %v17784_v60 }
 0x65a   :  { %17795 = vst.msk [vmem:[#allocation3 + $0x18] sm:$0xff] %vm17794_vm5, %v26067_v13  ;;  %vm19579_vm5 = vcmask 704064  }
 0x65b   :  { %19581 = vst.msk [vmem:[#allocation4 + $0x8] sm:$0xff] %vm19579_vm5, %v26067_v13 }
 0x65f   :  { %v17797_v19 = vld [vmem:[#allocation3 + $0x8] sm:$0xff] }
 0x660   :  { %v17800_v4 = vadd.f32 %v17797_v19, %v17479_v6 }
 0x661   :  { %v17799_v44 = vld [vmem:[#allocation3 + $0x18] sm:$0xff] }
 0x662   :  { %v17801_v7 = vadd.f32 %v17800_v4, %v17785_v29  ;;  %v17802_v52 = vsel %vm17792_vm4, %v17799_v44, 0.0 }
 0x664   :  { %v17803_v59 = vadd.f32 %v17802_v52, %v17801_v7 }
 0x666   :  { %17804 = vadd.xlane.f32.xlu0 %v17803_v59  ;;  %v21340_v59 = vld [vmem:[%s26453_s6 + $0x8] sm:$0xff] }
 0x67c   :  { %17832 = vperm.xlu0 %22626, %v17829_v53  }
 0x6f3   :  { %v17805_v9 = vpop.xlane.xlu0 %17804 }
 0x6f4   :  { %v17807_v2 = vmul.f32 0.0025510204, %v17805_v9 }
 0x6f6   :  { %v17808_v47 = vsub.f32 %v17479_v6, %v17807_v2  ;;  %v17809_v27 = vsub.f32 %v17797_v19, %v17807_v2  ;;  %v17810_v51 = vsub.f32 %v17785_v29, %v17807_v2  ;;  %v17811_v14 = vsub.f32 %v17799_v44, %v17807_v2  ;;  %v17877_v19 = vld [vmem:[%s26454_s7] sm:$0xff] }
 0x6f8   :  { %v17812_v35 = vmul.f32 %v17808_v47, %v17808_v47  ;;  %v17813_v46 = vmul.f32 %v17809_v27, %v17809_v27  ;;  %v17815_v16 = vmul.f32 %v17811_v14, %v17811_v14  ;;  %v17814_v36 = vmul.f32 %v17810_v51, %v17810_v51 }
 0x6fa   :  { %v17816_v63 = vadd.f32 %v17813_v46, %v17812_v35  ;;  %v17818_v22 = vsel %vm17792_vm4, %v17815_v16, 0.0  ;;  %v21343_v46 = vld [vmem:[%s26453_s6 + $0x10] sm:$0xff] }
 0x6fb   :  { %v17833_v24 = vpop.permute.xlu0 %17832 }
 0x6fc   :  { %v17817_v41 = vadd.f32 %v17816_v63, %v17814_v36 }
 0x6fe   :  { %v17819_v31 = vadd.f32 %v17818_v22, %v17817_v41 }
 0x700   :  { %17820 = vadd.xlane.f32.xlu1 %v17819_v31 }
 0x711   :  { %17842 = vperm.xlu1 %22625, %v17839_v54  }
 0x78d   :  { %v17821_v48 = vpop.xlane.xlu1 %17820 }
 0x78e   :  { %v17822_v21 = vmul.f32 0.0025510204, %v17821_v48  ;;  %v21346_v48 = vld [vmem:[%s26453_s6 + $0x18] sm:$0xff] }
 0x790   :  { %v17823_v61 = vadd.f32 1e-05, %v17822_v21 }
 0x791   :  { %v17843_v5 = vpop.permute.xlu1 %17842 }
 0x792   :  { %22635 = vrsqrt.f32 %v17823_v61 }
 0x79c   :  { %v22636_v39 = vpop.eup %22635 }
 0x79d   :  { %v17825_v37 = vmul.f32 %v22636_v39, %v17808_v47  ;;  %v17826_v40 = vmul.f32 %v22636_v39, %v17809_v27  ;;  %v17827_v43 = vmul.f32 %v22636_v39, %v17810_v51  ;;  %v17828_v12 = vmul.f32 %v22636_v39, %v17811_v14 }
 0x79f   :  { %v17835_v11 = vmul.f32 %v17833_v24, %v17825_v37  ;;  %v17836_v1 = vmul.f32 %v17833_v24, %v17826_v40  ;;  %v17837_v25 = vmul.f32 %v17833_v24, %v17827_v43  ;;  %v17838_v32 = vmul.f32 %v17833_v24, %v17828_v12  ;;  %v21349_v12 = vld [vmem:[%s26453_s6 + $0x20] sm:$0xff] }
 0x7a1   :  { %v17845_v18 = vadd.f32 %v17843_v5, %v17835_v11  ;;  %v17846_v26 = vadd.f32 %v17843_v5, %v17836_v1  ;;  %v17847_v20 = vadd.f32 %v17843_v5, %v17837_v25  ;;  %v17848_v42 = vadd.f32 %v17843_v5, %v17838_v32 }
 0x7a3   :  { %v17853_v57 = vmin.f32 %v17845_v18, 0.0  ;;  %v17854_v55 = vmin.f32 %v17846_v26, 0.0  ;;  %v17855_v23 = vmin.f32 %v17847_v20, 0.0  ;;  %v17856_v62 = vmin.f32 %v17848_v42, 0.0 }
 0x7a4   :  { %vm17849_vm12 = vcmp.gt.f32.partialorder %v17845_v18, 0.0  ;;  %vm17850_vm13 = vcmp.gt.f32.partialorder %v17846_v26, 0.0  ;;  %vm17852_vm14 = vcmp.gt.f32.partialorder %v17848_v42, 0.0  ;;  %vm17851_vm7 = vcmp.gt.f32.partialorder %v17847_v20, 0.0 }
 0x7a5   :  { %v17857_v45 = vmul.f32 1.442695, %v17853_v57  ;;  %v17859_v58 = vmul.f32 1.442695, %v17854_v55  ;;  %v17861_v17 = vmul.f32 1.442695, %v17855_v23 }
 0x7a6   :  { %v17863_v28 = vmul.f32 1.442695, %v17856_v62 }
 0x7a7   :  { %22637 = vpow2.f32 %v17857_v45 }
 0x7a8   :  { %22639 = vpow2.f32 %v17859_v58  ;;  %v21355_v58 = vld [vmem:[%s26453_s6 + $0x30] sm:$0xff] }
 0x7a9   :  { %22641 = vpow2.f32 %v17861_v17 }
 0x7aa   :  { %22643 = vpow2.f32 %v17863_v28 }
 0x7b1   :  { %v22638_v10 = vpop.eup %22637 }
 0x7b2   :  { %v22640_v38 = vpop.eup %22639  ;;  %v21334_v33 = vadd.f32 -1.0, %v22638_v10 }
 0x7b3   :  { %v22642_v49 = vpop.eup %22641  ;;  %v21335_v50 = vadd.f32 -1.0, %v22640_v38 }
 0x7b4   :  { %v22644_v30 = vpop.eup %22643  ;;  %v17869_v15 = vsel %vm17849_vm12, %v17845_v18, %v21334_v33  ;;  %v21336_v56 = vadd.f32 -1.0, %v22642_v49  ;;  %vm19484_vm12 = vcmask 293888  }
 0x7b5   :  { %v21337_v6 = vadd.f32 -1.0, %v22644_v30  ;;  %v17870_v8 = vsel %vm17850_vm13, %v17846_v26, %v21335_v50  ;;  %v21358_v50 = vld [vmem:[%s26453_s6 + $0x38] sm:$0xff]  ;;  %vm19577_vm13 = vcmask 589088  }
 0x7b6   :  { %18046 = vrot.lane.b32.xlu1 %v17870_v8, %s22731_s24  ;;  %17892 = vmatprep.subr.mxu0 %v17870_v8  ;;  %v17871_v34 = vsel %vm17851_vm7, %v17847_v20, %v21336_v56  ;;  %v21352_v20 = vld [vmem:[%s26453_s6 + $0x28] sm:$0xff] }
 0x7b7   :  { %v17872_v0 = vsel %vm17852_vm14, %v17848_v42, %v21337_v6  ;;  %17893 = vmatpush1.msra.mxu0 %v17869_v15  ;;  %vm20623_vm14 = vcmask 261248  }
 0x7b8   :  { %17876 = vst.msk [vmem:[#allocation3 + $0x18] sm:$0xff] %vm17792_vm4, %v17872_v0  ;;  %21338 = vmatmul.mubr.msk.f32.vlgmr.msra.gmra.mrb[10].mxu0 %vm17792_vm4, %v17884_v3  ;;  %v19380_v0 = vld [vmem:[%s26457_s10] sm:$0xff] }
 0x7b9   :  { %18126 = vmatprep.mubr.f32.mxu0 %v26067_v13 }
 0x7ba   :  { %18048 = vrot.lane.b32.xlu1 %v17871_v34, %s22731_s24 }
 0x7bf   :  { %v17888_v60 = vld [vmem:[#allocation3 + $0x18] sm:$0xff] }
 0x7c0   :  { %18216 = vrot.lane.b32.xlu0 %v17888_v60, %s22732_s26  ;;  %17963 = vmatprep.subr.mxu1 %v17888_v60 }
 0x7c1   :  { %17964 = vmatpush1.msra.mxu1 %v17871_v34  ;;  %18050 = vrot.lane.b32.xlu1 %v17888_v60, %s22731_s24 }
 0x7c2   :  { %21339 = vmatmul.mubr.msk.f32.vlgmr.msra.gmra.mrb[14].mxu1 %vm17792_vm4, %v17884_v3  ;;  %v19381_v3 = vld [vmem:[%s26457_s10 + $0x8] sm:$0xff] }
 0x7c3   :  { %18197 = vmatprep.mubr.f32.mxu1 %v26067_v13 }
 0x7c4   :  { %18378 = vrot.lane.b32.xlu0 %v17870_v8, %s22752_s30 }
 0x7c5   :  { %18044 = vrot.lane.b32.xlu1 %v17869_v15, %s22731_s24 }
 0x7c8   :  { %18382 = vrot.lane.b32.xlu0 %v17888_v60, %s22752_s30 }
 0x7c9   :  { %18212 = vrot.lane.b32.xlu1 %v17870_v8, %s22732_s26 }
 0x7cc   :  { %18545 = vrot.lane.b32.xlu0 %v17870_v8, %s22753_s19 }
 0x7cd   :  { %18214 = vrot.lane.b32.xlu1 %v17871_v34, %s22732_s26 }
 0x7d0   :  { %18549 = vrot.lane.b32.xlu0 %v17888_v60, %s22753_s19 }
 0x7d1   :  { %18210 = vrot.lane.b32.xlu1 %v17869_v15, %s22732_s26 }
 0x7d4   :  { %18712 = vrot.lane.b32.xlu0 %v17870_v8, %s22754_s27 }
 0x7d5   :  { %18380 = vrot.lane.b32.xlu1 %v17871_v34, %s22752_s30 }
 0x7d8   :  { %18716 = vrot.lane.b32.xlu0 %v17888_v60, %s22754_s27 }
 0x7d9   :  { %18376 = vrot.lane.b32.xlu1 %v17869_v15, %s22752_s30 }
 0x7dc   :  { %18879 = vrot.lane.b32.xlu0 %v17870_v8, %s22755_s23 }
 0x7dd   :  { %18547 = vrot.lane.b32.xlu1 %v17871_v34, %s22753_s19 }
 0x7e0   :  { %18883 = vrot.lane.b32.xlu0 %v17888_v60, %s22755_s23 }
 0x7e1   :  { %18543 = vrot.lane.b32.xlu1 %v17869_v15, %s22753_s19 }
 0x7e4   :  { %19046 = vrot.lane.b32.xlu0 %v17870_v8, %s22756_s2 }
 0x7e5   :  { %18714 = vrot.lane.b32.xlu1 %v17871_v34, %s22754_s27 }
 0x7e8   :  { %19050 = vrot.lane.b32.xlu0 %v17888_v60, %s22756_s2 }
 0x7e9   :  { %18710 = vrot.lane.b32.xlu1 %v17869_v15, %s22754_s27  ;;  %s22760_s27 = smov 121  }
 0x7ec   :  { %19213 = vrot.lane.b32.xlu0 %v17870_v8, %s22757_s5 }
 0x7ed   :  { %18881 = vrot.lane.b32.xlu1 %v17871_v34, %s22755_s23 }
 0x7f0   :  { %19217 = vrot.lane.b32.xlu0 %v17888_v60, %s22757_s5  ;;  %v21361_v60 = vld [vmem:[%s26453_s6 + $0x40] sm:$0xff] }
 0x7f1   :  { %18877 = vrot.lane.b32.xlu1 %v17869_v15, %s22755_s23  ;;  %s22761_s23 = smov 122  }
 0x7f4   :  { %17880 = vperm.xlu0 %22626, %v17877_v19  }
 0x7f5   :  { %19048 = vrot.lane.b32.xlu1 %v17871_v34, %s22756_s2 }
 0x7f9   :  { %19044 = vrot.lane.b32.xlu1 %v17869_v15, %s22756_s2  ;;  %s22764_s2 = smov 115  }
 0x7fd   :  { %19215 = vrot.lane.b32.xlu1 %v17871_v34, %s22757_s5 }
 0x801   :  { %19211 = vrot.lane.b32.xlu1 %v17869_v15, %s22757_s5 }
 0x828   :  { %v18047_v4 = vpop.permute.xlu1 %18046 }
 0x82c   :  { %v18049_v29 = vpop.permute.xlu1 %18048 }
 0x82d   :  { %v18053_v44 = vsel %vm849_vm2, %v18047_v4, %v18049_v29 }
 0x82e   :  { %18062 = vmatprep.subr.mxu0 %v18053_v44  ;;  %v19382_v44 = vld [vmem:[%s26457_s10 + $0x10] sm:$0xff] }
 0x832   :  { %v18217_v7 = vpop.permute.xlu0 %18216 }
 0x833   :  { %v18051_v52 = vpop.permute.xlu1 %18050 }
 0x834   :  { %v18054_v53 = vsel %vm849_vm2, %v18049_v29, %v18051_v52  ;;  %18133 = vmatprep.subr.mxu1 %v18051_v52  ;;  %v22034_v29 = vpack.c.bf16 %v19381_v3, %v19380_v0  ;;  %v22758_v52 = vmov 0.0|0.0  }
 0x835   :  { %18134 = vmatpush1.msra.mxu1 %v18054_v53 }
 0x836   :  { %v18379_v9 = vpop.permute.xlu0 %18378  ;;  %18299 = vmatprep.subr.mxu1 %v18217_v7  ;;  %21342 = vmatmul.mubr.msk.f32.vlgmr.msra.gmra.mrb[14].mxu1 %vm17792_vm4, %v21340_v59 }
 0x837   :  { %v18045_v2 = vpop.permute.xlu1 %18044  ;;  %18363 = vmatprep.mubr.f32.mxu1 %v26067_v13 }
 0x838   :  { %v18052_v47 = vsel %vm849_vm2, %v18045_v2, %v18047_v4  ;;  %vm18384_vm2 = vcmask 932864   ;;  %v19384_v2 = vld [vmem:[%s26457_s10 + $0x20] sm:$0xff] }
 0x839   :  { %18063 = vmatpush1.msra.mxu0 %v18052_v47  ;;  %v19385_v47 = vld [vmem:[%s26457_s10 + $0x28] sm:$0xff] }
 0x83a   :  { %v18383_v27 = vpop.permute.xlu0 %18382  ;;  %21341 = vmatmul.mubr.msk.f32.vlgmr.msra.gmra.mrb[10].mxu0 %vm17792_vm4, %v21340_v59 }
 0x83b   :  { %v18213_v51 = vpop.permute.xlu1 %18212  ;;  %18292 = vmatprep.mubr.f32.mxu0 %v26067_v13 }
 0x83e   :  { %v18546_v14 = vpop.permute.xlu0 %18545 }
 0x83f   :  { %v18215_v35 = vpop.permute.xlu1 %18214 }
 0x840   :  { %v18220_v16 = vsel %vm1521_vm3, %v18215_v35, %v18217_v7  ;;  %v18219_v36 = vsel %vm1521_vm3, %v18213_v51, %v18215_v35  ;;  %v19383_v7 = vld [vmem:[%s26457_s10 + $0x18] sm:$0xff] }
 0x841   :  { %18228 = vmatprep.subr.mxu0 %v18219_v36  ;;  %18300 = vmatpush1.msra.mxu1 %v18220_v16  ;;  %v19389_v16 = vld [vmem:[%s26457_s10 + $0x48] sm:$0xff] }
 0x842   :  { %v18550_v63 = vpop.permute.xlu0 %18549  ;;  %21345 = vmatmul.mubr.msk.f32.vlgmr.msra.gmra.mrb[14].mxu1 %vm17792_vm4, %v21343_v46  ;;  %18466 = vmatprep.subr.mxu1 %v18383_v27 }
 0x843   :  { %v18211_v41 = vpop.permute.xlu1 %18210  ;;  %18530 = vmatprep.mubr.f32.mxu1 %v26067_v13 }
 0x844   :  { %v18218_v22 = vsel %vm1521_vm3, %v18211_v41, %v18213_v51  ;;  %vm18551_vm3 = vcmask 924672   ;;  %v19386_v51 = vld [vmem:[%s26457_s10 + $0x30] sm:$0xff]  ;;  %v19391_v41 = vld [vmem:[%s26457_s10 + $0x58] sm:$0xff] }
 0x845   :  { %18229 = vmatpush1.msra.mxu0 %v18218_v22 }
 0x846   :  { %v18713_v31 = vpop.permute.xlu0 %18712  ;;  %21344 = vmatmul.mubr.msk.f32.vlgmr.msra.gmra.mrb[10].mxu0 %vm17792_vm4, %v21343_v46  ;;  %v19388_v46 = vld [vmem:[%s26457_s10 + $0x40] sm:$0xff] }
 0x847   :  { %v18381_v54 = vpop.permute.xlu1 %18380  ;;  %18459 = vmatprep.mubr.f32.mxu0 %v26067_v13  ;;  %v22046_v36 = vpack.c.bf16 %v19389_v16, %v19388_v46 }
 0x848   :  { %v18387_v21 = vsel %vm18384_vm2, %v18381_v54, %v18383_v27  ;;  %v18386_v61 = vsel %vm18384_vm2, %v18379_v9, %v18381_v54  ;;  %v22040_v27 = vpack.c.bf16 %v19385_v47, %v19384_v2  ;;  %v19393_v54 = vld [vmem:[%s26457_s10 + $0x68] sm:$0xff] }
 0x849   :  { %18395 = vmatprep.subr.mxu0 %v18386_v61  ;;  %18467 = vmatpush1.msra.mxu1 %v18387_v21  ;;  %v19394_v21 = vld [vmem:[%s26457_s10 + $0x70] sm:$0xff]  ;;  %v19395_v61 = vld [vmem:[%s26457_s10 + $0x78] sm:$0xff] }
 0x84a   :  { %v18717_v39 = vpop.permute.xlu0 %18716  ;;  %21348 = vmatmul.mubr.msk.f32.vlgmr.msra.gmra.mrb[14].mxu1 %vm17792_vm4, %v21346_v48  ;;  %18633 = vmatprep.subr.mxu1 %v18550_v63 }
 0x84b   :  { %v18377_v24 = vpop.permute.xlu1 %18376  ;;  %18697 = vmatprep.mubr.f32.mxu1 %v26067_v13 }
 0x84c   :  { %v18385_v37 = vsel %vm18384_vm2, %v18377_v24, %v18379_v9  ;;  %v22037_v9 = vpack.c.bf16 %v19383_v7, %v19382_v44  ;;  %v19396_v24 = vld [vmem:[%s26457_s10 + $0x80] sm:$0xff] }
 0x84d   :  { %18396 = vmatpush1.msra.mxu0 %v18385_v37  ;;  %v19397_v37 = vld [vmem:[%s26457_s10 + $0x88] sm:$0xff] }
 0x84e   :  { %v18880_v40 = vpop.permute.xlu0 %18879  ;;  %21347 = vmatmul.mubr.msk.f32.vlgmr.msra.gmra.mrb[10].mxu0 %vm17792_vm4, %v21346_v48 }
 0x84f   :  { %v18548_v43 = vpop.permute.xlu1 %18547  ;;  %18626 = vmatprep.mubr.f32.mxu0 %v26067_v13 }
 0x850   :  { %v18554_v11 = vsel %vm18551_vm3, %v18548_v43, %v18550_v63  ;;  %v18553_v1 = vsel %vm18551_vm3, %v18546_v14, %v18548_v43  ;;  %v19390_v63 = vld [vmem:[%s26457_s10 + $0x50] sm:$0xff] }
 0x851   :  { %18562 = vmatprep.subr.mxu0 %v18553_v1  ;;  %18634 = vmatpush1.msra.mxu1 %v18554_v11  ;;  %v22049_v22 = vpack.c.bf16 %v19391_v41, %v19390_v63  ;;  %v19398_v43 = vld [vmem:[%s26457_s10 + $0x90] sm:$0xff]  ;;  %v19400_v1 = vld [vmem:[%s26457_s10 + $0xa0] sm:$0xff] }
 0x852   :  { %v18884_v25 = vpop.permute.xlu0 %18883  ;;  %21351 = vmatmul.mubr.msk.f32.vlgmr.msra.gmra.mrb[14].mxu1 %vm17792_vm4, %v21349_v12  ;;  %18800 = vmatprep.subr.mxu1 %v18717_v39 }
 0x853   :  { %v18544_v32 = vpop.permute.xlu1 %18543  ;;  %18864 = vmatprep.mubr.f32.mxu1 %v26067_v13 }
 0x854   :  { %v18552_v5 = vsel %vm18551_vm3, %v18544_v32, %v18546_v14  ;;  %v19387_v14 = vld [vmem:[%s26457_s10 + $0x38] sm:$0xff] }
 0x855   :  { %18563 = vmatpush1.msra.mxu0 %v18552_v5  ;;  %v22043_v35 = vpack.c.bf16 %v19387_v14, %v19386_v51  ;;  %v19402_v5 = vld [vmem:[%s26457_s10 + $0xb0] sm:$0xff] }
 0x856   :  { %21350 = vmatmul.mubr.msk.f32.vlgmr.msra.gmra.mrb[10].mxu0 %vm17792_vm4, %v21349_v12  ;;  %v19047_v18 = vpop.permute.xlu0 %19046  ;;  %v19399_v12 = vld [vmem:[%s26457_s10 + $0x98] sm:$0xff] }
 0x857   :  { %v18715_v26 = vpop.permute.xlu1 %18714  ;;  %18793 = vmatprep.mubr.f32.mxu0 %v26067_v13  ;;  %v22061_v11 = vpack.c.bf16 %v19399_v12, %v19398_v43  ;;  %v21376_v43 = vld [vmem:[%s26458_s11 + $0x28] sm:$0xff]  ;;  %v21379_v12 = vld [vmem:[%s26458_s11 + $0x30] sm:$0xff] }
 0x858   :  { %v18721_v42 = vsel %vm18718_vm8, %v18715_v26, %v18717_v39  ;;  %v18720_v57 = vsel %vm18718_vm8, %v18713_v31, %v18715_v26  ;;  %v22055_v39 = vpack.c.bf16 %v19395_v61, %v19394_v21  ;;  %v19619_v21 = vld [vmem:[%s26459_s12] sm:$0xff] }
 0x859   :  { %18729 = vmatprep.subr.mxu0 %v18720_v57  ;;  %18801 = vmatpush1.msra.mxu1 %v18721_v42 }
 0x85a   :  { %21354 = vmatmul.mubr.msk.f32.vlgmr.msra.gmra.mrb[14].mxu1 %vm17792_vm4, %v21352_v20  ;;  %18967 = vmatprep.subr.mxu1 %v18884_v25  ;;  %v19051_v62 = vpop.permute.xlu0 %19050 }
 0x85b   :  { %v18711_v55 = vpop.permute.xlu1 %18710  ;;  %19031 = vmatprep.mubr.f32.mxu1 %v26067_v13 }
 0x85c   :  { %v18719_v23 = vsel %vm18718_vm8, %v18711_v55, %v18713_v31  ;;  %v19392_v31 = vld [vmem:[%s26457_s10 + $0x60] sm:$0xff] }
 0x85d   :  { %18730 = vmatpush1.msra.mxu0 %v18719_v23  ;;  %v22052_v48 = vpack.c.bf16 %v19393_v54, %v19392_v31  ;;  %v19634_v31 = vld [vmem:[%s26458_s11 + $0x8] sm:$0xff]  ;;  %v21371_v54 = vld [vmem:[%s26458_s11 + $0x10] sm:$0xff] }
 0x85e   :  { %21353 = vmatmul.mubr.msk.f32.vlgmr.msra.gmra.mrb[10].mxu0 %vm17792_vm4, %v21352_v20  ;;  %v19214_v10 = vpop.permute.xlu0 %19213  ;;  %v19404_v20 = vld [vmem:[%s26457_s10 + $0xc0] sm:$0xf] }
 0x85f   :  { %v18882_v45 = vpop.permute.xlu1 %18881  ;;  %18960 = vmatprep.mubr.f32.mxu0 %v26067_v13 }
 0x860   :  { %v18888_v17 = vsel %vm18885_vm9, %v18882_v45, %v18884_v25  ;;  %v18887_v28 = vsel %vm18885_vm9, %v18880_v40, %v18882_v45  ;;  %v19401_v25 = vld [vmem:[%s26457_s10 + $0xa8] sm:$0xff] }
 0x861   :  { %18896 = vmatprep.subr.mxu0 %v18887_v28  ;;  %18968 = vmatpush1.msra.mxu1 %v18888_v17  ;;  %v22064_v32 = vpack.c.bf16 %v19401_v25, %v19400_v1  ;;  %v21380_v1 = vld [vmem:[%s26458_s11 + $0x38] sm:$0xff]  ;;  %v21383_v25 = vld [vmem:[%s26458_s11 + $0x40] sm:$0xff] }
 0x862   :  { %21357 = vmatmul.mubr.msk.f32.vlgmr.msra.gmra.mrb[14].mxu1 %vm17792_vm4, %v21355_v58  ;;  %19134 = vmatprep.subr.mxu1 %v19051_v62  ;;  %v19218_v56 = vpop.permute.xlu0 %19217 }
 0x863   :  { %v18878_v38 = vpop.permute.xlu1 %18877  ;;  %19198 = vmatprep.mubr.f32.mxu1 %v26067_v13 }
 0x864   :  { %v18886_v33 = vsel %vm18885_vm9, %v18878_v38, %v18880_v40  ;;  %v22058_v40 = vpack.c.bf16 %v19397_v37, %v19396_v24  ;;  %v21375_v24 = vld [vmem:[%s26458_s11 + $0x20] sm:$0xff] }
 0x865   :  { %18897 = vmatpush1.msra.mxu0 %v18886_v33 }
 0x866   :  { %21356 = vmatmul.mubr.msk.f32.vlgmr.msra.gmra.mrb[10].mxu0 %vm17792_vm4, %v21355_v58 }
 0x867   :  { %v19049_v49 = vpop.permute.xlu1 %19048  ;;  %19127 = vmatprep.mubr.f32.mxu0 %v26067_v13 }
 0x868   :  { %v19055_v30 = vsel %vm19052_vm10, %v19049_v49, %v19051_v62  ;;  %v19054_v15 = vsel %vm19052_vm10, %v19047_v18, %v19049_v49 }
 0x869   :  { %19063 = vmatprep.subr.mxu0 %v19054_v15  ;;  %19135 = vmatpush1.msra.mxu1 %v19055_v30 }
 0x86a   :  { %21360 = vmatmul.mubr.msk.f32.vlgmr.msra.gmra.mrb[14].mxu1 %vm17792_vm4, %v21358_v50  ;;  %19301 = vmatprep.subr.mxu1 %v19218_v56 }
 0x86b   :  { %v19045_v6 = vpop.permute.xlu1 %19044  ;;  %19365 = vmatprep.mubr.f32.mxu1 %v26067_v13 }
 0x86c   :  { %v19053_v8 = vsel %vm19052_vm10, %v19045_v6, %v19047_v18  ;;  %v19403_v18 = vld [vmem:[%s26457_s10 + $0xb8] sm:$0xff]  ;;  %s22759_s10 = smov 36  }
 0x86d   :  { %19064 = vmatpush1.msra.mxu0 %v19053_v8  ;;  %v22067_v26 = vpack.c.bf16 %v19403_v18, %v19402_v5  ;;  %v21384_v5 = vld [vmem:[%s26458_s11 + $0x48] sm:$0xff]  ;;  %v21387_v18 = vld [vmem:[%s26458_s11 + $0x50] sm:$0xff] }
 0x86e   :  { %21359 = vmatmul.mubr.msk.f32.vlgmr.msra.gmra.mrb[10].mxu0 %vm17792_vm4, %v21358_v50 }
 0x86f   :  { %v19216_v34 = vpop.permute.xlu1 %19215  ;;  %19294 = vmatprep.mubr.f32.mxu0 %v26067_v13 }
 0x870   :  { %v19222_v19 = vsel %vm19219_vm11, %v19216_v34, %v19218_v56  ;;  %v19221_v4 = vsel %vm19219_vm11, %v19214_v10, %v19216_v34 }
 0x871   :  { %19230 = vmatprep.subr.mxu0 %v19221_v4  ;;  %19302 = vmatpush1.msra.mxu1 %v19222_v19 }
 0x872   :  { %21363 = vmatmul.mubr.msk.f32.vlgmr.msra.gmra.mrb[14].mxu1 %vm17792_vm4, %v21361_v60  ;;  %22069 = vmatprep.subr.bf16.mxu1 %v22758_v52 }
 0x873   :  { %v19212_v59 = vpop.permute.xlu1 %19211  ;;  %22071 = vmatpush1.bf16.msra.mxu1 %v22034_v29  ;;  %v17881_v42 = vpop.permute.xlu0 %17880 }
 0x874   :  { %v19220_v53 = vsel %vm19219_vm11, %v19212_v59, %v19214_v10  ;;  %22072 = vmatprep.subr.bf16.mxu1 %v22758_v52 }
 0x875   :  { %19231 = vmatpush1.msra.mxu0 %v19220_v53 }
 0x876   :  { %21362 = vmatmul.mubr.msk.f32.vlgmr.msra.gmra.mrb[10].mxu0 %vm17792_vm4, %v21361_v60  ;;  %22033 = vmatprep.subr.bf16.mxu0 %v22758_v52  ;;  %v19605_v60 = vld [vmem:[%s26456_s9] sm:$0xff] }
 0x877   :  { %22035 = vmatpush1.bf16.msra.mxu0 %v22034_v29  ;;  %22074 = vmatpush1.bf16.msra.mxu1 %v22037_v9 }
 0x878   :  { %22036 = vmatprep.subr.bf16.mxu0 %v22758_v52  ;;  %22075 = vmatprep.subr.bf16.mxu1 %v22758_v52 }
 0x87b   :  { %22038 = vmatpush1.bf16.msra.mxu0 %v22037_v9  ;;  %22077 = vmatpush1.bf16.msra.mxu1 %v22040_v27 }
 0x87c   :  { %22039 = vmatprep.subr.bf16.mxu0 %v22758_v52  ;;  %22078 = vmatprep.subr.bf16.mxu1 %v22758_v52 }
 0x87f   :  { %22041 = vmatpush1.bf16.msra.mxu0 %v22040_v27  ;;  %22080 = vmatpush1.bf16.msra.mxu1 %v22043_v35 }
 0x880   :  { %22042 = vmatprep.subr.bf16.mxu0 %v22758_v52  ;;  %22081 = vmatprep.subr.bf16.mxu1 %v22758_v52 }
 0x883   :  { %22044 = vmatpush1.bf16.msra.mxu0 %v22043_v35  ;;  %22083 = vmatpush1.bf16.msra.mxu1 %v22046_v36 }
 0x884   :  { %22045 = vmatprep.subr.bf16.mxu0 %v22758_v52  ;;  %22084 = vmatprep.subr.bf16.mxu1 %v22758_v52 }
 0x887   :  { %22047 = vmatpush1.bf16.msra.mxu0 %v22046_v36  ;;  %22086 = vmatpush1.bf16.msra.mxu1 %v22049_v22 }
 0x888   :  { %22048 = vmatprep.subr.bf16.mxu0 %v22758_v52  ;;  %22087 = vmatprep.subr.bf16.mxu1 %v22758_v52 }
 0x88b   :  { %22050 = vmatpush1.bf16.msra.mxu0 %v22049_v22  ;;  %22089 = vmatpush1.bf16.msra.mxu1 %v22052_v48 }
 0x88c   :  { %22051 = vmatprep.subr.bf16.mxu0 %v22758_v52  ;;  %22090 = vmatprep.subr.bf16.mxu1 %v22758_v52 }
 0x88f   :  { %22053 = vmatpush1.bf16.msra.mxu0 %v22052_v48  ;;  %22092 = vmatpush1.bf16.msra.mxu1 %v22055_v39  ;;  %v19620_v48 = vld [vmem:[%s26459_s12 + $0x8] sm:$0xff] }
 0x890   :  { %22054 = vmatprep.subr.bf16.mxu0 %v22758_v52  ;;  %22093 = vmatprep.subr.bf16.mxu1 %v22758_v52 }
 0x893   :  { %22056 = vmatpush1.bf16.msra.mxu0 %v22055_v39  ;;  %22095 = vmatpush1.bf16.msra.mxu1 %v22058_v40  ;;  %v21372_v39 = vld [vmem:[%s26458_s11 + $0x18] sm:$0xff] }
 0x894   :  { %22057 = vmatprep.subr.bf16.mxu0 %v22758_v52  ;;  %22096 = vmatprep.subr.bf16.mxu1 %v22758_v52 }
 0x897   :  { %22059 = vmatpush1.bf16.msra.mxu0 %v22058_v40  ;;  %22098 = vmatpush1.bf16.msra.mxu1 %v22061_v11 }
 0x898   :  { %22060 = vmatprep.subr.bf16.mxu0 %v22758_v52  ;;  %22099 = vmatprep.subr.bf16.mxu1 %v22758_v52 }
 0x89b   :  { %22062 = vmatpush1.bf16.msra.mxu0 %v22061_v11  ;;  %22101 = vmatpush1.bf16.msra.mxu1 %v22064_v32 }
 0x89c   :  { %22063 = vmatprep.subr.bf16.mxu0 %v22758_v52  ;;  %22102 = vmatprep.subr.bf16.mxu1 %v22758_v52 }
 0x89f   :  { %22065 = vmatpush1.bf16.msra.mxu0 %v22064_v32  ;;  %22104 = vmatpush1.bf16.msra.mxu1 %v22067_v26 }
 0x8a0   :  { %22066 = vmatprep.subr.bf16.mxu0 %v22758_v52  ;;  %19551 = vmatprep.subr.mxu1 %v26067_v13  ;;  %v19633_v52 = vld [vmem:[%s26458_s11] sm:$0xff] }
 0x8a3   :  { %22068 = vmatpush1.bf16.msra.mxu0 %v22067_v26  ;;  %21366 = vmatpush1.msk.msra.mxu1 %vm19410_vm1, %v19404_v20 }
 0x8a4   :  { %19462 = vmatprep.subr.mxu0 %v26067_v13 }
 0x8a7   :  { %21364 = vmatpush1.msk.msra.mxu0 %vm19410_vm1, %v19404_v20  ;;  %v21388_v20 = vld [vmem:[%s26458_s11 + $0x58] sm:$0xff] }
 0x945   :  { %v19367_v57 = vpop.f32.mrb[14].mxu1 }
 0x946   :  { %v22143_v55 = vadd.f32 %v19367_v57, %v17881_v42  ;;  %v19369_v23 = vpop.f32.mrb[15].mxu1 }
 0x947   :  { %v22144_v62 = vadd.f32 %v19369_v23, %v17881_v42  ;;  %v21395_v23 = vld [vmem:[%s26458_s11 + $0x70] sm:$0xff] }
 0x948   :  { %19494 = vrot.lane.b32.xlu1 %v22143_v55, %s22744_s29  ;;  %v21392_v55 = vld [vmem:[%s26458_s11 + $0x68] sm:$0xff] }
 0x949   :  { %19379 = vst.msk [vmem:[#allocation3 + $0x18] sm:$0xff] %vm17792_vm4, %v22144_v62  ;;  %v19296_v45 = vpop.f32.mrb[10].mxu0 }
 0x94a   :  { %v22141_v58 = vadd.f32 %v19296_v45, %v17881_v42  ;;  %v19298_v17 = vpop.f32.mrb[11].mxu0  ;;  %v21396_v45 = vld [vmem:[%s26458_s11 + $0x78] sm:$0xff] }
 0x94b   :  { %v22142_v28 = vadd.f32 %v19298_v17, %v17881_v42  ;;  %v21391_v42 = vld [vmem:[%s26458_s11 + $0x60] sm:$0xff]  ;;  %v21400_v17 = vld [vmem:[%s26458_s11 + $0x88] sm:$0xff] }
 0x94d   :  { %19377 = vst [vmem:[#allocation3 + $0x8] sm:$0xff] %v22142_v28  ;;  %19492 = vrot.lane.b32.xlu1 %v22142_v28, %s22744_s29  ;;  %21365 = vmatprep.mubr.msk.f32.mxu0 %vm17485_vm0, %v22142_v28  ;;  %v20434_v28 = vld [vmem:[%s26462_s15] sm:$0xff] }
 0x94e   :  { %19479 = vmatmul.mubr.f32.vlgmr.msra.gmra.mrb[12].mxu0 %v22141_v58  ;;  %v21399_v58 = vld [vmem:[%s26458_s11 + $0x80] sm:$0xff] }
 0x94f   :  { %21452 = vmatprep.mubr.msk.f32.mxu0 %vm17792_vm4, %v19633_v52 }
 0x950   :  { %v19488_v10 = vld [vmem:[#allocation3 + $0x18] sm:$0xff] }
 0x951   :  { %19496 = vrot.lane.b32.xlu0 %v19488_v10, %s22744_s29  ;;  %v20435_v10 = vld [vmem:[%s26462_s15 + $0x8] sm:$0xff] }
 0x9ba   :  { %v19495_v38 = vpop.permute.xlu1 %19494 }
 0x9bf   :  { %v19493_v33 = vpop.permute.xlu1 %19492 }
 0x9c0   :  { %v19498_v30 = vsel %vm9585_vm15, %v19493_v33, %v19495_v38  ;;  %v20436_v33 = vld [vmem:[%s26462_s15 + $0x10] sm:$0xff] }
 0x9c3   :  { %v19497_v49 = vpop.permute.xlu0 %19496 }
 0x9c4   :  { %v19499_v50 = vsel %vm9585_vm15, %v19495_v38, %v19497_v49  ;;  %v22105_v38 = vpack.c.bf16 %v20435_v10, %v20434_v28  ;;  %v20437_v49 = vld [vmem:[%s26462_s15 + $0x18] sm:$0xff] }
 0x9c5   :  { %21367 = vmatprep.mubr.msk.f32.mxu1 %vm17485_vm0, %v19499_v50  ;;  %vm19583_vm0 = vcmask 588800   ;;  %v22109_v50 = vpack.c.bf16 %v20437_v49, %v20436_v33 }
 0x9c6   :  { %19568 = vmatmul.mubr.f32.vlgmr.msra.gmra.mrb[16].mxu1 %v19498_v30  ;;  %22106 = vmatprep.subr.bf16.mxu1 %v22105_v38  ;;  %v20438_v30 = vld [vmem:[%s26462_s15 + $0x20] sm:$0xf] }
 0x9c7   :  { %22108 = vmatpush3.bf16.msra.mxu1 %v22105_v38 }
 0x9c8   :  { %22110 = vmatprep.subr.bf16.mxu1 %v22109_v50 }
 0x9cb   :  { %22112 = vmatpush3.bf16.msra.mxu1 %v22109_v50 }
 0x9cc   :  { %21503 = vmatprep.subr.msk.mxu1 %vm19410_vm1, %v20438_v30 }
 0x9cf   :  { %21504 = vmatpush3.msk.msra.mxu1 %vm19410_vm1, %v20438_v30 }
 0x9d0   :  { %22114 = vmatprep.subr.bf16.mxu1 %v22105_v38 }
 0xa21   :  { %v19480_v15 = vpop.f32.mrb[12].mxu0 }
 0xa22   :  { %19485 = vst.msk [vmem:[#allocation4] sm:$0xff] %vm19484_vm12, %v19480_v15  ;;  %v19482_v56 = vpop.f32.mrb[13].mxu0 }
 0xa99   :  { %v19569_v6 = vpop.f32.mrb[16].mxu1 }
 0xa9a   :  { %19574 = vrot.lane.b32.xlu0 %v19569_v6, %s22759_s10  ;;  %v19571_v8 = vpop.f32.mrb[17].mxu1 }
 0xb0c   :  { %v19575_v0 = vpop.permute.xlu0 %19574 }
 0xb0d   :  { %19578 = vst.msk [vmem:[#allocation4] sm:$0xff] %vm19577_vm13, %v19575_v0 }
 0xb0e   :  { %19580 = vst.msk [vmem:[#allocation4] sm:$0xff] %vm19579_vm5, %v26067_v13  ;;  %v19598_v13 = vld [vmem:[%s26455_s8] sm:$0xff] }
 0xb15   :  { %v19582_v3 = vld [vmem:[#allocation4] sm:$0xff] }
 0xb16   :  { %v19584_v34 = vsel %vm19583_vm0, %v19582_v3, 0.0 }
 0xb17   :  { %19585 = vadd.xlane.f32.xlu1 %v19584_v34 }
 0xb28   :  { %19608 = vperm.xlu1 %22625, %v19605_v60  }
 0xba4   :  { %v19586_v19 = vpop.xlane.xlu1 %19585 }
 0xba5   :  { %v19588_v4 = vmul.f32 0.013888889, %v19586_v19 }
 0xba7   :  { %v19589_v29 = vsub.f32 %v19582_v3, %v19588_v4 }
 0xba8   :  { %v19609_v14 = vpop.permute.xlu1 %19608 }
 0xba9   :  { %v19590_v44 = vmul.f32 %v19589_v29, %v19589_v29 }
 0xbab   :  { %v19591_v7 = vsel %vm19583_vm0, %v19590_v44, 0.0 }
 0xbac   :  { %19592 = vadd.xlane.f32.xlu0 %v19591_v7 }
 0xbc2   :  { %19601 = vperm.xlu0 %22626, %v19598_v13  }
 0xc39   :  { %v19593_v59 = vpop.xlane.xlu0 %19592 }
 0xc3a   :  { %v19594_v53 = vmul.f32 0.013888889, %v19593_v59 }
 0xc3c   :  { %v19595_v9 = vadd.f32 1e-05, %v19594_v53 }
 0xc3e   :  { %22645 = vrsqrt.f32 %v19595_v9 }
 0xc41   :  { %v19602_v27 = vpop.permute.xlu0 %19601 }
 0xc48   :  { %v22646_v2 = vpop.eup %22645 }
 0xc49   :  { %v19597_v47 = vmul.f32 %v22646_v2, %v19589_v29 }
 0xc4b   :  { %v19604_v51 = vmul.f32 %v19602_v27, %v19597_v47  ;;  %v20656_v27 = vld [vmem:[%s26460_s13 + $0x8] sm:$0xff] }
 0xc4d   :  { %v19611_v35 = vadd.f32 %v19609_v14, %v19604_v51  ;;  %v20655_v51 = vld [vmem:[%s26460_s13] sm:$0xff] }
 0xc4f   :  { %v19613_v46 = vmin.f32 %v19611_v35, 0.0  ;;  %vm19612_vm15 = vcmp.gt.f32.partialorder %v19611_v35, 0.0 }
 0xc51   :  { %v19614_v16 = vmul.f32 1.442695, %v19613_v46 }
 0xc53   :  { %22647 = vpow2.f32 %v19614_v16 }
 0xc5d   :  { %v22648_v36 = vpop.eup %22647 }
 0xc5e   :  { %v21368_v63 = vadd.f32 -1.0, %v22648_v36 }
 0xc60   :  { %v19617_v41 = vsel %vm19612_vm15, %v19611_v35, %v21368_v63 }
 0xc61   :  { %19618 = vst.msk [vmem:[#allocation4] sm:$0xff] %vm19583_vm0, %v19617_v41 }
 0xc68   :  { %v19635_v22 = vld [vmem:[#allocation4] sm:$0xff] }
 0xc69   :  { %19812 = vrot.lane.b32.xlu0 %v19635_v22, %s22732_s26  ;;  %19723 = vrot.lane.b32.xlu1 %v19635_v22, %s22731_s24  ;;  %s22762_s26 = smov 116   ;;  %s22763_s24 = smov 120  }
 0xc6a   :  { %21450 = vmatprep.subr.mxu0 %v19635_v22 }
 0xc6b   :  { %21451 = vmatpush3.msra.mxu0 %v19635_v22 }
 0xc6c   :  { %21453 = vmatmul.mubr.msk.f32.vlgmr.msra.gmra.mrb[14].mxu0 %vm17792_vm4, %v19634_v31 }
 0xc6d   :  { %19990 = vrot.lane.b32.xlu0 %v19635_v22, %s22760_s27  ;;  %19901 = vrot.lane.b32.xlu1 %v19635_v22, %s22761_s23 }
 0xc6e   :  { %21457 = vmatprep.mubr.msk.f32.mxu0 %vm17792_vm4, %v21371_v54 }
 0xc71   :  { %20168 = vrot.lane.b32.xlu0 %v19635_v22, %s22762_s26  ;;  %20079 = vrot.lane.b32.xlu1 %v19635_v22, %s22763_s24 }
 0xc75   :  { %20346 = vrot.lane.b32.xlu0 %v19635_v22, %s22752_s30  ;;  %20257 = vrot.lane.b32.xlu1 %v19635_v22, %s22764_s2 }
 0xc79   :  { %19628 = vperm.xlu0 %22626, %v19620_v48   ;;  %19623 = vperm.xlu1 %22625, %v19619_v21   ;;  %v20669_v48 = vld [vmem:[%s26461_s14] sm:$0xff]  ;;  %v20670_v21 = vld [vmem:[%s26461_s14 + $0x8] sm:$0xff] }
 0xcdb   :  { %v19724_v61 = vpop.permute.xlu1 %19723  ;;  %v19813_v37 = vpop.permute.xlu0 %19812 }
 0xcdc   :  { %21455 = vmatprep.subr.mxu0 %v19724_v61 }
 0xcdd   :  { %21456 = vmatpush3.msra.mxu0 %v19724_v61 }
 0xcde   :  { %21458 = vmatmul.mubr.msk.f32.vlgmr.msra.gmra.mrb[14].mxu0 %vm17792_vm4, %v21372_v39  ;;  %21460 = vmatprep.subr.mxu0 %v19813_v37 }
 0xcdf   :  { %v19902_v40 = vpop.permute.xlu1 %19901  ;;  %21461 = vmatpush3.msra.mxu0 %v19813_v37  ;;  %21462 = vmatprep.mubr.msk.f32.mxu0 %vm17792_vm4, %v21375_v24  ;;  %v19991_v11 = vpop.permute.xlu0 %19990 }
 0xce0   :  { %21465 = vmatprep.subr.mxu0 %v19902_v40 }
 0xce3   :  { %v20080_v32 = vpop.permute.xlu1 %20079  ;;  %v20169_v26 = vpop.permute.xlu0 %20168 }
 0xce6   :  { %21463 = vmatmul.mubr.msk.f32.vlgmr.msra.gmra.mrb[14].mxu0 %vm17792_vm4, %v21376_v43 }
 0xce7   :  { %21466 = vmatpush3.msra.mxu0 %v19902_v40  ;;  %21467 = vmatprep.mubr.msk.f32.mxu0 %vm17792_vm4, %v21379_v12  ;;  %v20258_v57 = vpop.permute.xlu1 %20257  ;;  %v20347_v62 = vpop.permute.xlu0 %20346 }
 0xce8   :  { %21470 = vmatprep.subr.mxu0 %v19991_v11 }
 0xcee   :  { %21468 = vmatmul.mubr.msk.f32.vlgmr.msra.gmra.mrb[14].mxu0 %vm17792_vm4, %v21380_v1 }
 0xcef   :  { %21471 = vmatpush3.msra.mxu0 %v19991_v11  ;;  %21472 = vmatprep.mubr.msk.f32.mxu0 %vm17792_vm4, %v21383_v25 }
 0xcf0   :  { %21475 = vmatprep.subr.mxu0 %v20080_v32 }
 0xcf6   :  { %21473 = vmatmul.mubr.msk.f32.vlgmr.msra.gmra.mrb[14].mxu0 %vm17792_vm4, %v21384_v5 }
 0xcf7   :  { %21476 = vmatpush3.msra.mxu0 %v20080_v32  ;;  %21477 = vmatprep.mubr.msk.f32.mxu0 %vm17792_vm4, %v21387_v18 }
 0xcf8   :  { %21480 = vmatprep.subr.mxu0 %v20169_v26  ;;  %v19629_v15 = vpop.permute.xlu0 %19628  ;;  %v19624_v6 = vpop.permute.xlu1 %19623 }
 0xcfe   :  { %21478 = vmatmul.mubr.msk.f32.vlgmr.msra.gmra.mrb[14].mxu0 %vm17792_vm4, %v21388_v20 }
 0xcff   :  { %21481 = vmatpush3.msra.mxu0 %v20169_v26  ;;  %21482 = vmatprep.mubr.msk.f32.mxu0 %vm17792_vm4, %v21391_v42 }
 0xd00   :  { %21485 = vmatprep.subr.mxu0 %v20258_v57 }
 0xd06   :  { %21483 = vmatmul.mubr.msk.f32.vlgmr.msra.gmra.mrb[14].mxu0 %vm17792_vm4, %v21392_v55 }
 0xd07   :  { %21486 = vmatpush3.msra.mxu0 %v20258_v57  ;;  %21487 = vmatprep.mubr.msk.f32.mxu0 %vm17792_vm4, %v21395_v23 }
 0xd08   :  { %21490 = vmatprep.subr.mxu0 %v20347_v62 }
 0xd0e   :  { %21488 = vmatmul.mubr.msk.f32.vlgmr.msra.gmra.mrb[14].mxu0 %vm17792_vm4, %v21396_v45 }
 0xd0f   :  { %21491 = vmatpush3.msra.mxu0 %v20347_v62  ;;  %21492 = vmatprep.mubr.msk.f32.mxu0 %vm17792_vm4, %v21399_v58 }
 0xd16   :  { %21493 = vmatmul.mubr.msk.f32.vlgmr.msra.gmra.mrb[14].mxu0 %vm17792_vm4, %v21400_v17  ;;  %vm20525_vm4 = vcmask 130048  }
 0xde9   :  { %v21494_v56 = vpop.f32.mrb[14].mxu0 }
 0xdea   :  { %v22145_v8 = vadd.f32 %v21494_v56, %v19629_v15  ;;  %v20421_v0 = vpop.f32.mrb[15].mxu0 }
 0xdeb   :  { %v22146_v3 = vadd.f32 %v20421_v0, %v19624_v6 }
 0xdec   :  { %20433 = vst.msk [vmem:[#allocation4 + $0x8] sm:$0xff] %vm19583_vm0, %v22145_v8 }
 0xded   :  { %20432 = vst.msk [vmem:[#allocation4] sm:$0xff] %vm19583_vm0, %v22146_v3 }
 0xdf3   :  { %v20529_v34 = vld [vmem:[#allocation4 + $0x8] sm:$0xff] }
 0xdf4   :  { %20534 = vrot.lane.b32.xlu0 %v20529_v34, %s22739_s18  ;;  %v20528_v60 = vld [vmem:[#allocation4] sm:$0xff] }
 0xdf5   :  { %20532 = vrot.lane.b32.xlu1 %v20528_v60, %s22739_s18  ;;  %21505 = vmatprep.mubr.msk.f32.mxu1 %vm19484_vm12, %v20528_v60 }
 0xdf6   :  { %21506 = vmatmul.mubr.msk.f32.vlgmr.msra.gmra.mrb[18].mxu1 %vm19484_vm12, %v20529_v34 }
 0xdf7   :  { %22116 = vmatpush3.bf16.msra.mxu1 %v22105_v38 }
 0xdf8   :  { %22118 = vmatprep.subr.bf16.mxu1 %v22109_v50 }
 0xdfb   :  { %22120 = vmatpush3.bf16.msra.mxu1 %v22109_v50 }
 0xdfc   :  { %21516 = vmatprep.subr.msk.mxu1 %vm19410_vm1, %v20438_v30 }
 0xdff   :  { %21517 = vmatpush3.msk.msra.mxu1 %vm19410_vm1, %v20438_v30 }
 0xe66   :  { %v20535_v4 = vpop.permute.xlu0 %20534 }
 0xe67   :  { %v20533_v19 = vpop.permute.xlu1 %20532 }
 0xe68   :  { %21518 = vmatprep.mubr.msk.f32.mxu1 %vm19484_vm12, %v20533_v19 }
 0xe69   :  { %21519 = vmatmul.mubr.msk.f32.vlgmr.msra.gmra.mrb[20].mxu1 %vm19484_vm12, %v20535_v4 }
 0xec9   :  { %v21507_v29 = vpop.f32.mrb[18].mxu1 }
 0xeca   :  { %20527 = vst.msk [vmem:[%s26463_s16 + $0x8] sm:$0xff] %vm20525_vm4, %v21507_v29  ;;  %v20516_v44 = vpop.f32.mrb[19].mxu1 }
 0xecb   :  { %20526 = vst.msk [vmem:[%s26463_s16] sm:$0xff] %vm20525_vm4, %v20516_v44 }
 0xf3c   :  { %v21520_v7 = vpop.f32.mrb[20].mxu1 }
 0xf3d   :  { %20619 = vrot.lane.b32.xlu0 %v21520_v7, %s22729_s17  ;;  %v20606_v13 = vpop.f32.mrb[21].mxu1 }
 0xf3e   :  { %20617 = vrot.lane.b32.xlu1 %v20606_v13, %s22729_s17 }
 0xfaf   :  { %v20620_v52 = vpop.permute.xlu0 %20619 }
 0xfb0   :  { %20625 = vst.msk [vmem:[%s26463_s16 + $0x8] sm:$0xff] %vm20623_vm14, %v20620_v52  ;;  %v20618_v59 = vpop.permute.xlu1 %20617 }
 0xfb1   :  { %20624 = vst.msk [vmem:[%s26463_s16] sm:$0xff] %vm20623_vm14, %v20618_v59 }
 0xfb7   :  { %v20627_v53 = vld [vmem:[%s26463_s16 + $0x8] sm:$0xff] }
 0xfb8   :  { %v20631_v9 = vsel %vm10257_vm6, %v20627_v53, 0.0  ;;  %v20626_v2 = vld [vmem:[%s26463_s16] sm:$0xff] }
 0xfb9   :  { %20632 = vadd.xlane.f32.xlu0 %v20631_v9  ;;  %v20628_v47 = vsel %vm10257_vm6, %v20626_v2, 0.0 }
 0xfba   :  { %20629 = vadd.xlane.f32.xlu1 %v20628_v47 }
 0xfcb   :  { %20664 = vperm.xlu1 %22625, %v20656_v27  }
 0xfcf   :  { %20659 = vperm.xlu0 %22626, %v20655_v51  }
0x1046   :  { %v20633_v14 = vpop.xlane.xlu0 %20632 }
0x1047   :  { %v20636_v35 = vmul.f32 0.03125, %v20633_v14  ;;  %v20630_v46 = vpop.xlane.xlu1 %20629 }
0x1048   :  { %v20635_v16 = vmul.f32 0.03125, %v20630_v46 }
0x1049   :  { %v20638_v36 = vsub.f32 %v20627_v53, %v20636_v35 }
0x104a   :  { %v20637_v63 = vsub.f32 %v20626_v2, %v20635_v16 }
0x104b   :  { %v20640_v41 = vmul.f32 %v20638_v36, %v20638_v36  ;;  %v20665_v61 = vpop.permute.xlu1 %20664 }
0x104c   :  { %v20639_v22 = vmul.f32 %v20637_v63, %v20637_v63 }
0x104d   :  { %v20644_v31 = vsel %vm10257_vm6, %v20640_v41, 0.0 }
0x104e   :  { %20645 = vadd.xlane.f32.xlu1 %v20644_v31  ;;  %v20641_v54 = vsel %vm10257_vm6, %v20639_v22, 0.0  ;;  %v20660_v39 = vpop.permute.xlu0 %20659 }
0x104f   :  { %20642 = vadd.xlane.f32.xlu0 %v20641_v54 }
0x105f   :  { %20673 = vperm.xlu1 %22625, %v20669_v48  }
0x1065   :  { %20678 = vperm.xlu0 %22626, %v20670_v21  }
0x10db   :  { %v20646_v24 = vpop.xlane.xlu1 %20645 }
0x10dc   :  { %v20648_v37 = vmul.f32 0.03125, %v20646_v24  ;;  %v20643_v40 = vpop.xlane.xlu0 %20642 }
0x10dd   :  { %v20647_v43 = vmul.f32 0.03125, %v20643_v40 }
0x10de   :  { %v20650_v12 = vadd.f32 1e-05, %v20648_v37 }
0x10df   :  { %v20649_v11 = vadd.f32 1e-05, %v20647_v43  ;;  %v20674_v42 = vpop.permute.xlu1 %20673 }
0x10e0   :  { %22649 = vrsqrt.f32 %v20650_v12 }
0x10e1   :  { %22651 = vrsqrt.f32 %v20649_v11 }
0x10e4   :  { %v20679_v20 = vpop.permute.xlu0 %20678 }
0x10ea   :  { %v22650_v1 = vpop.eup %22649 }
0x10eb   :  { %v22652_v25 = vpop.eup %22651  ;;  %v20654_v32 = vmul.f32 %v22650_v1, %v20638_v36 }
0x10ec   :  { %v20653_v5 = vmul.f32 %v22652_v25, %v20637_v63 }
0x10ed   :  { %v20668_v18 = vmul.f32 %v20665_v61, %v20654_v32 }
0x10ee   :  { %v20667_v26 = vmul.f32 %v20660_v39, %v20653_v5 }
0x10ef   :  { %v20682_v57 = vadd.f32 %v20679_v20, %v20668_v18 }
0x10f0   :  { %v20681_v55 = vadd.f32 %v20674_v42, %v20667_v26 }
0x10f1   :  { %v20684_v23 = vmul.f32 %v20682_v57, %v20682_v57 }
0x10f2   :  { %v20683_v62 = vmul.f32 %v20681_v55, %v20681_v55 }
0x10f3   :  { %v20688_v45 = vsel %vm10257_vm6, %v20684_v23, 0.0 }
0x10f4   :  { %20689 = vadd.xlane.f32.xlu0 %v20688_v45  ;;  %v20685_v58 = vsel %vm10257_vm6, %v20683_v62, 0.0 }
0x10f5   :  { %20686 = vadd.xlane.f32.xlu1 %v20685_v58 }
0x1181   :  { %v20690_v17 = vpop.xlane.xlu0 %20689 }
0x1182   :  { %v20687_v28 = vpop.xlane.xlu1 %20686 }
0x1183   :  { %v20691_v10 = vadd.f32 %v20690_v17, %v20687_v28 }
0x1185   :  { %v20692_v38 = vrot.slane %v20691_v10, 4 }
0x1187   :  { %v20693_v33 = vadd.f32 %v20692_v38, %v20691_v10 }
0x1189   :  { %v20694_v49 = vrot.slane %v20693_v33, 2 }
0x118b   :  { %v20695_v50 = vadd.f32 %v20694_v49, %v20693_v33 }
0x118d   :  { %v20696_v30 = vrot.slane %v20695_v50, 1 }
0x118f   :  { %v20697_v15 = vadd.f32 %v20696_v30, %v20695_v50 }
0x1191   :  { %v20699_v56 = vmul.f32 0.5, %v20697_v15 }
0x1193   :  { %22653 = vrsqrt.f32 %v20699_v56 }
0x119d   :  { %v22654_v6 = vpop.eup %22653 }
0x119e   :  { %v20701_v8 = vmul.f32 %v22654_v6, %v20681_v55  ;;  %v20702_v0 = vmul.f32 %v22654_v6, %v20682_v57 }
0x11a0   :  { %20703 = vst.msk [vmem:[%s26463_s16] sm:$0xff] %vm10257_vm6, %v20701_v8  ;;  %20704 = vst.msk [vmem:[%s26463_s16 + $0x8] sm:$0xff] %vm10257_vm6, %v20702_v0 }
0x11a1   :  { %20709 = vsyncpa [#allocation6], 1 }

</bundles_post_ra>
